<compile_context>
chip_gen: v5e
topology: v5e:2x2
jax: 0.10.0
libtpu: 0.0.40
codegen_flags: <defaults>
</compile_context>

<pallas_src>
import functools

import numpy as np
import jax
import jax.numpy as jnp
from jax.experimental import pallas as pl
from jax.experimental.pallas import tpu as pltpu


H = 16                   # image height handled per grid step (whole image)
W = 16                   # image width
W_OFF = 8                # sublane-aligned left zero border of the W-padded scratch
W_PAD = W + 2 * W_OFF    # 32 cols: [0,8) zero | [8,24) image | [24,32) zero


# ----------------------------------------------------------------------------
# Fused kernel
# ----------------------------------------------------------------------------
def _zero_border(a_ref):
    """Zero only the border strips of an (H+2, W_PAD, C) activation scratch.

    The 16x16 interior at rows [1, 1+H), cols [W_OFF, W_OFF+W) is fully
    rewritten every grid step, so only the pad rows and the two 8-wide
    (sublane-aligned) W bands need re-zeroing.
    """
    hp, wp, c = a_ref.shape
    zrow = jnp.zeros((1, wp, c), jnp.float32)
    a_ref[0:1, :, :] = zrow                    # top pad row
    a_ref[hp - 1:hp, :, :] = zrow              # bottom pad row
    zband = jnp.zeros((hp - 2, W_OFF, c), jnp.float32)
    a_ref[1:hp - 1, 0:W_OFF, :] = zband        # left band (aligned 8-wide)
    a_ref[1:hp - 1, W_OFF + W:wp, :] = zband   # right band (aligned 8-wide)


def _conv3x3_im2col(act_ref, w_ref, b_ref, *, relu):
    """One 3x3 conv layer as a single MXU matmul.

    act_ref : (H + 2, W_PAD, Cin) f32 VMEM scratch; image interior at rows
              [1, 1+H), cols [W_OFF, W_OFF+W); zero border elsewhere.
    w_ref   : (9*Cin, Cout) bf16      b_ref : (1, Cout) f32
    returns : (H*W, Cout) f32
    """
    hp, _, cin = act_ref.shape
    h_out = hp - 2                                  # == H

    # Taps cast to bf16 at read time (scratch stays f32; see header note).
    taps = []
    for kh in range(3):                             # kh slice: free (un-tiled axis)
        for kw in range(3):                         # kw slice: shifted sublane window
            c0 = W_OFF + kw - 1
            taps.append(act_ref[kh:kh + h_out, c0:c0 + W, :].astype(jnp.bfloat16))

    # Group taps into 128-lane units (pairs for Cin=64, quads for Cin=32) so
    # every placement in the assembled patch is vreg-aligned on the lane axis.
    group = max(1, 128 // cin)
    units = []
    for i in range(0, len(taps), group):
        chunk = taps[i:i + group]
        units.append(chunk[0] if len(chunk) == 1
                     else jnp.concatenate(chunk, axis=-1))
    patch = units[0] if len(units) == 1 else jnp.concatenate(units, axis=-1)
    patch = patch.reshape(h_out * W, 9 * cin)       # free merge (16 % 8 == 0)

    y = jnp.dot(patch, w_ref[...],
                preferred_element_type=jnp.float32)  # single MXU matmul
    y = y + b_ref[...]
    if relu:
        y = jnp.maximum(y, 0.0)
    return y


def _fused_kernel(p1_ref, w1_ref, b1_ref, w2_ref, b2_ref, w3_ref, b3_ref,
                  w4_ref, b4_ref, o_ref, a2, a3, a4):
    # Re-zero only the border strips each step (interior is always rewritten,
    # border is never written).  Correct regardless of how the "parallel"
    # batch axis is split across cores, with ~45% fewer zero stores than a
    # full-buffer fill.
    _zero_border(a2)
    _zero_border(a3)
    _zero_border(a4)

    # conv1 (Cin=1): the (H*W, 25) bf16 im2col patch was built by XLA in the
    # wrapper; the old lane-width-1 in-kernel scratch is gone.
    y = jnp.dot(p1_ref[0], w1_ref[...], preferred_element_type=jnp.float32)
    y = jnp.maximum(y + b1_ref[...], 0.0)                         # (H*W, 64)
    a2[1:1 + H, W_OFF:W_OFF + W, :] = y.reshape(H, W, -1)

    y = _conv3x3_im2col(a2, w2_ref, b2_ref, relu=True)            # (H*W, 64)
    a3[1:1 + H, W_OFF:W_OFF + W, :] = y.reshape(H, W, -1)

    y = _conv3x3_im2col(a3, w3_ref, b3_ref, relu=True)            # (H*W, 32)
    a4[1:1 + H, W_OFF:W_OFF + W, :] = y.reshape(H, W, -1)

    y = _conv3x3_im2col(a4, w4_ref, b4_ref, relu=False)           # (H*W, r*r)
    o_ref[0] = y.reshape(H, W, -1)


# ----------------------------------------------------------------------------
# Wrapper
# ----------------------------------------------------------------------------
def _pixel_shuffle_nhwc(x, r):
    """(N, H, W, r*r) -> (N, 1, H*r, W*r); matches torch.nn.PixelShuffle."""
    n, h, w, _ = x.shape
    x = x.reshape(n, h, w, r, r)
    x = jnp.transpose(x, (0, 1, 3, 2, 4))            # (N, H, r, W, r)
    return x.reshape(n, 1, h * r, w * r)


def _prep_weight(w_khwio):
    kh, kw, ci, co = w_khwio.shape
    return w_khwio.reshape(kh * kw * ci, co).astype(jnp.bfloat16)


def _im2col_conv1(x_nchw):
    """(N, 1, H, W) -> (N, H*W, 25) bf16 im2col patch for the 5x5 conv (pad 2).

    Cheap XLA-side prep (6.4 K elements/image); keeps the lane-1 work out of
    the kernel entirely.
    """
    n = x_nchw.shape[0]
    xp = jnp.pad(x_nchw[:, 0, :, :], ((0, 0), (2, 2), (2, 2)))    # (N, H+4, W+4)
    taps = [xp[:, i:i + H, j:j + W] for i in range(5) for j in range(5)]
    p = jnp.stack(taps, axis=-1)                                  # (N, H, W, 25)
    return p.reshape(n, H * W, 25).astype(jnp.bfloat16)


@functools.partial(jax.jit, static_argnames=("upscale_factor",))
def super_resolution_forward(x_nchw, params, upscale_factor):
    r = upscale_factor
    n, cin, h, w = x_nchw.shape
    assert (cin, h, w) == (1, H, W), (cin, h, w)

    p1 = _im2col_conv1(x_nchw)                       # (N, H*W, 25) bf16

    w1 = _prep_weight(params["w1"]); b1 = params["b1"].reshape(1, -1)
    w2 = _prep_weight(params["w2"]); b2 = params["b2"].reshape(1, -1)
    w3 = _prep_weight(params["w3"]); b3 = params["b3"].reshape(1, -1)
    w4 = _prep_weight(params["w4"]); b4 = params["b4"].reshape(1, -1)

    def full_block(a):
        return pl.BlockSpec(a.shape, lambda *_: (0,) * a.ndim)

    conv_out = pl.pallas_call(
        _fused_kernel,
        out_shape=jax.ShapeDtypeStruct((n, H, W, r * r), jnp.float32),
        grid_spec=pltpu.PrefetchScalarGridSpec(
            num_scalar_prefetch=0,
            grid=(n,),
            in_specs=[
                pl.BlockSpec((1, H * W, 25), lambda i: (i, 0, 0)),
                full_block(w1), full_block(b1),
                full_block(w2), full_block(b2),
                full_block(w3), full_block(b3),
                full_block(w4), full_block(b4),
            ],
            out_specs=pl.BlockSpec((1, H, W, r * r), lambda i: (i, 0, 0, 0)),
            scratch_shapes=[
                pltpu.VMEM((H + 2, W_PAD, 64), jnp.float32),   # conv1 out / conv2 in
                pltpu.VMEM((H + 2, W_PAD, 64), jnp.float32),   # conv2 out / conv3 in
                pltpu.VMEM((H + 2, W_PAD, 32), jnp.float32),   # conv3 out / conv4 in
            ],
        ),
        compiler_params=pltpu.CompilerParams(
            dimension_semantics=("parallel",)),                # v7x: one image per core
    )(p1, w1, b1, w2, b2, w3, b3, w4, b4)

    return _pixel_shuffle_nhwc(conv_out, r)                    # (N, 1, H*r, W*r) f32


# ----------------------------------------------------------------------------
# Pure-JAX f32 reference (for the in-script correctness check)
# ----------------------------------------------------------------------------
def _conv2d_ref(x_nhwc, w_khwio, b, pad):
    kh, kw, _, _ = w_khwio.shape
    n, h, w, _ = x_nhwc.shape
    xp = jnp.pad(x_nhwc, ((0, 0), (pad, pad), (pad, pad), (0, 0)))
    acc = None
    for i in range(kh):
        for j in range(kw):
            t = jnp.einsum("nhwc,cd->nhwd",
                           xp[:, i:i + h, j:j + w, :], w_khwio[i, j])
            acc = t if acc is None else acc + t
    return acc + b


def _forward_ref(x_nchw, params, r):
    x = jnp.transpose(x_nchw, (0, 2, 3, 1))
    x = jax.nn.relu(_conv2d_ref(x, params["w1"], params["b1"], 2))
    x = jax.nn.relu(_conv2d_ref(x, params["w2"], params["b2"], 1))
    x = jax.nn.relu(_conv2d_ref(x, params["w3"], params["b3"], 1))
    x = _conv2d_ref(x, params["w4"], params["b4"], 1)
    return _pixel_shuffle_nhwc(x, r)


# ----------------------------------------------------------------------------
# Deterministic parameter init (mimics torch orthogonal_ + default bias init)
# ----------------------------------------------------------------------------
def orthogonal_conv_weight(key, cout, cin, kh, kw, gain=1.0):
    rows, cols = cout, cin * kh * kw
    a = jax.random.normal(key, (max(rows, cols), min(rows, cols)), jnp.float32)
    q, r = jnp.linalg.qr(a)
    q = q * jnp.sign(jnp.diagonal(r))          # make decomposition unique
    if rows < cols:
        q = q.T
    q = q[:rows, :cols]
    w_oihw = (gain * q).reshape(cout, cin, kh, kw)
    # kernel layout (KH, KW, Cin, Cout)
    return jnp.transpose(w_oihw, (2, 3, 1, 0)).astype(jnp.float32)


def conv_bias(key, cout, cin, kh, kw):
    bound = 1.0 / float(np.sqrt(cin * kh * kw))
    return jax.random.uniform(key, (cout,), jnp.float32, -bound, bound)


if __name__ == "__main__":
    upscale = 3
    relu_gain = float(np.sqrt(2.0))            # init.calculate_gain('relu')

    key = jax.random.PRNGKey(0)
    keys = jax.random.split(key, 9)

    params = {
        "w1": orthogonal_conv_weight(keys[0], 64, 1, 5, 5, relu_gain),
        "b1": conv_bias(keys[1], 64, 1, 5, 5),
        "w2": orthogonal_conv_weight(keys[2], 64, 64, 3, 3, relu_gain),
        "b2": conv_bias(keys[3], 64, 64, 3, 3),
        "w3": orthogonal_conv_weight(keys[4], 32, 64, 3, 3, relu_gain),
        "b3": conv_bias(keys[5], 32, 64, 3, 3),
        "w4": orthogonal_conv_weight(keys[6], upscale ** 2, 32, 3, 3, 1.0),
        "b4": conv_bias(keys[7], upscale ** 2, 32, 3, 3),
    }

    # PyTorch-style NCHW input: batch=2, channels=1, 16x16 spatial
    x = jax.random.normal(keys[8], (2, 1, H, W), jnp.float32)

    out = super_resolution_forward(x, params, upscale_factor=upscale)
    out = jax.block_until_ready(out)
    assert out.shape == (2, 1, H * upscale, W * upscale), out.shape

    # Correctness check vs. pure-JAX f32 reference (tolerance covers the
    # bf16 matmul operands; indexing / layout bugs would blow way past it).
    ref = jax.block_until_ready(_forward_ref(x, params, upscale))
    np.testing.assert_allclose(np.asarray(out), np.asarray(ref),
                               rtol=5e-2, atol=5e-2)

    print("KERNEL_OK")
</pallas_src>

<mosaic_0001>
module attributes {stable_mosaic.version = 11 : i64} {
  func.func @_fused_kernel(%arg0: i32, %arg1: memref<1x256x25xbf16, #tpu.memory_space<vmem>>, %arg2: memref<25x64xbf16, #tpu.memory_space<vmem>>, %arg3: memref<1x64xf32, #tpu.memory_space<vmem>>, %arg4: memref<576x64xbf16, #tpu.memory_space<vmem>>, %arg5: memref<1x64xf32, #tpu.memory_space<vmem>>, %arg6: memref<576x32xbf16, #tpu.memory_space<vmem>>, %arg7: memref<1x32xf32, #tpu.memory_space<vmem>>, %arg8: memref<288x9xbf16, #tpu.memory_space<vmem>>, %arg9: memref<1x9xf32, #tpu.memory_space<vmem>>, %arg10: memref<1x16x16x9xf32, #tpu.memory_space<vmem>>, %arg11: memref<18x32x64xf32, #tpu.memory_space<vmem>>, %arg12: memref<18x32x64xf32, #tpu.memory_space<vmem>>, %arg13: memref<18x32x32xf32, #tpu.memory_space<vmem>>) attributes {dimension_semantics = [#tpu.dimension_semantics<parallel>], iteration_bounds = array<i64: 2>, scalar_prefetch = 0 : i64, scratch_operands = 3 : i64, tpu.core_type = #tpu.core_type<tc>, window_params = [{transform_indices = @transform_0, window_bounds = array<i64: 1, 256, 25>}, {pipeline_mode = #tpu.pipeline_mode<synchronous>, transform_indices = @transform_1, window_bounds = array<i64: 25, 64>}, {pipeline_mode = #tpu.pipeline_mode<synchronous>, transform_indices = @transform_2, window_bounds = array<i64: 1, 64>}, {pipeline_mode = #tpu.pipeline_mode<synchronous>, transform_indices = @transform_3, window_bounds = array<i64: 576, 64>}, {pipeline_mode = #tpu.pipeline_mode<synchronous>, transform_indices = @transform_4, window_bounds = array<i64: 1, 64>}, {pipeline_mode = #tpu.pipeline_mode<synchronous>, transform_indices = @transform_5, window_bounds = array<i64: 576, 32>}, {pipeline_mode = #tpu.pipeline_mode<synchronous>, transform_indices = @transform_6, window_bounds = array<i64: 1, 32>}, {pipeline_mode = #tpu.pipeline_mode<synchronous>, transform_indices = @transform_7, window_bounds = array<i64: 288, 9>}, {pipeline_mode = #tpu.pipeline_mode<synchronous>, transform_indices = @transform_8, window_bounds = array<i64: 1, 9>}, {transform_indices = @transform_9, window_bounds = array<i64: 1, 16, 16, 9>}]} {
    %cst = arith.constant 0.000000e+00 : f32
    %0 = vector.broadcast %cst : f32 to vector<1x32x64xf32>
    %c0 = arith.constant 0 : index
    %c0_0 = arith.constant 0 : index
    %c0_1 = arith.constant 0 : index
    %1 = vector.load %arg11[%c0, %c0_0, %c0_1] : memref<18x32x64xf32, #tpu.memory_space<vmem>>, vector<1x32x64xf32>
    tpu.vector_store %arg11[%c0, %c0_0, %c0_1], %0 {strides = array<i32>} : memref<18x32x64xf32, #tpu.memory_space<vmem>>, vector<1x32x64xf32>,
    %c17 = arith.constant 17 : index
    %c0_2 = arith.constant 0 : index
    %c0_3 = arith.constant 0 : index
    %2 = vector.load %arg11[%c17, %c0_2, %c0_3] : memref<18x32x64xf32, #tpu.memory_space<vmem>>, vector<1x32x64xf32>
    tpu.vector_store %arg11[%c17, %c0_2, %c0_3], %0 {strides = array<i32>} : memref<18x32x64xf32, #tpu.memory_space<vmem>>, vector<1x32x64xf32>,
    %cst_4 = arith.constant 0.000000e+00 : f32
    %3 = vector.broadcast %cst_4 : f32 to vector<16x8x64xf32>
    %c1 = arith.constant 1 : index
    %c0_5 = arith.constant 0 : index
    %c0_6 = arith.constant 0 : index
    %4 = vector.load %arg11[%c1, %c0_5, %c0_6] : memref<18x32x64xf32, #tpu.memory_space<vmem>>, vector<16x8x64xf32>
    tpu.vector_store %arg11[%c1, %c0_5, %c0_6], %3 {strides = array<i32>} : memref<18x32x64xf32, #tpu.memory_space<vmem>>, vector<16x8x64xf32>,
    %c1_7 = arith.constant 1 : index
    %c24 = arith.constant 24 : index
    %c0_8 = arith.constant 0 : index
    %5 = vector.load %arg11[%c1_7, %c24, %c0_8] : memref<18x32x64xf32, #tpu.memory_space<vmem>>, vector<16x8x64xf32>
    tpu.vector_store %arg11[%c1_7, %c24, %c0_8], %3 {strides = array<i32>} : memref<18x32x64xf32, #tpu.memory_space<vmem>>, vector<16x8x64xf32>,
    %cst_9 = arith.constant 0.000000e+00 : f32
    %6 = vector.broadcast %cst_9 : f32 to vector<1x32x64xf32>
    %c0_10 = arith.constant 0 : index
    %c0_11 = arith.constant 0 : index
    %c0_12 = arith.constant 0 : index
    %7 = vector.load %arg12[%c0_10, %c0_11, %c0_12] : memref<18x32x64xf32, #tpu.memory_space<vmem>>, vector<1x32x64xf32>
    tpu.vector_store %arg12[%c0_10, %c0_11, %c0_12], %6 {strides = array<i32>} : memref<18x32x64xf32, #tpu.memory_space<vmem>>, vector<1x32x64xf32>,
    %c17_13 = arith.constant 17 : index
    %c0_14 = arith.constant 0 : index
    %c0_15 = arith.constant 0 : index
    %8 = vector.load %arg12[%c17_13, %c0_14, %c0_15] : memref<18x32x64xf32, #tpu.memory_space<vmem>>, vector<1x32x64xf32>
    tpu.vector_store %arg12[%c17_13, %c0_14, %c0_15], %6 {strides = array<i32>} : memref<18x32x64xf32, #tpu.memory_space<vmem>>, vector<1x32x64xf32>,
    %cst_16 = arith.constant 0.000000e+00 : f32
    %9 = vector.broadcast %cst_16 : f32 to vector<16x8x64xf32>
    %c1_17 = arith.constant 1 : index
    %c0_18 = arith.constant 0 : index
    %c0_19 = arith.constant 0 : index
    %10 = vector.load %arg12[%c1_17, %c0_18, %c0_19] : memref<18x32x64xf32, #tpu.memory_space<vmem>>, vector<16x8x64xf32>
    tpu.vector_store %arg12[%c1_17, %c0_18, %c0_19], %9 {strides = array<i32>} : memref<18x32x64xf32, #tpu.memory_space<vmem>>, vector<16x8x64xf32>,
    %c1_20 = arith.constant 1 : index
    %c24_21 = arith.constant 24 : index
    %c0_22 = arith.constant 0 : index
    %11 = vector.load %arg12[%c1_20, %c24_21, %c0_22] : memref<18x32x64xf32, #tpu.memory_space<vmem>>, vector<16x8x64xf32>
    tpu.vector_store %arg12[%c1_20, %c24_21, %c0_22], %9 {strides = array<i32>} : memref<18x32x64xf32, #tpu.memory_space<vmem>>, vector<16x8x64xf32>,
    %cst_23 = arith.constant 0.000000e+00 : f32
    %12 = vector.broadcast %cst_23 : f32 to vector<1x32x32xf32>
    %c0_24 = arith.constant 0 : index
    %c0_25 = arith.constant 0 : index
    %c0_26 = arith.constant 0 : index
    %13 = vector.load %arg13[%c0_24, %c0_25, %c0_26] : memref<18x32x32xf32, #tpu.memory_space<vmem>>, vector<1x32x32xf32>
    tpu.vector_store %arg13[%c0_24, %c0_25, %c0_26], %12 {strides = array<i32>} : memref<18x32x32xf32, #tpu.memory_space<vmem>>, vector<1x32x32xf32>,
    %c17_27 = arith.constant 17 : index
    %c0_28 = arith.constant 0 : index
    %c0_29 = arith.constant 0 : index
    %14 = vector.load %arg13[%c17_27, %c0_28, %c0_29] : memref<18x32x32xf32, #tpu.memory_space<vmem>>, vector<1x32x32xf32>
    tpu.vector_store %arg13[%c17_27, %c0_28, %c0_29], %12 {strides = array<i32>} : memref<18x32x32xf32, #tpu.memory_space<vmem>>, vector<1x32x32xf32>,
    %cst_30 = arith.constant 0.000000e+00 : f32
    %15 = vector.broadcast %cst_30 : f32 to vector<16x8x32xf32>
    %c1_31 = arith.constant 1 : index
    %c0_32 = arith.constant 0 : index
    %c0_33 = arith.constant 0 : index
    %16 = vector.load %arg13[%c1_31, %c0_32, %c0_33] : memref<18x32x32xf32, #tpu.memory_space<vmem>>, vector<16x8x32xf32>
    tpu.vector_store %arg13[%c1_31, %c0_32, %c0_33], %15 {strides = array<i32>} : memref<18x32x32xf32, #tpu.memory_space<vmem>>, vector<16x8x32xf32>,
    %c1_34 = arith.constant 1 : index
    %c24_35 = arith.constant 24 : index
    %c0_36 = arith.constant 0 : index
    %17 = vector.load %arg13[%c1_34, %c24_35, %c0_36] : memref<18x32x32xf32, #tpu.memory_space<vmem>>, vector<16x8x32xf32>
    tpu.vector_store %arg13[%c1_34, %c24_35, %c0_36], %15 {strides = array<i32>} : memref<18x32x32xf32, #tpu.memory_space<vmem>>, vector<16x8x32xf32>,
    %c0_37 = arith.constant 0 : index
    %c0_38 = arith.constant 0 : index
    %c0_39 = arith.constant 0 : index
    %18 = vector.load %arg1[%c0_37, %c0_38, %c0_39] : memref<1x256x25xbf16, #tpu.memory_space<vmem>>, vector<1x256x25xbf16>
    %19 = vector.shape_cast %18 : vector<1x256x25xbf16> to vector<256x25xbf16>
    %c0_40 = arith.constant 0 : index
    %c0_41 = arith.constant 0 : index
    %20 = vector.load %arg2[%c0_40, %c0_41] : memref<25x64xbf16, #tpu.memory_space<vmem>>, vector<25x64xbf16>
    %cst_42 = arith.constant dense<0.000000e+00> : vector<256x64xf32>
    %21 = tpu.matmul %19, %20, %cst_42 {dimension_numbers = #tpu.dot_dimension_numbers<[1], [0], [0], [1], [0, 0, 1, 1], [], []>} : vector<256x25xbf16>, vector<25x64xbf16>, vector<256x64xf32> -> vector<256x64xf32>
    %c0_43 = arith.constant 0 : index
    %c0_44 = arith.constant 0 : index
    %22 = vector.load %arg3[%c0_43, %c0_44] : memref<1x64xf32, #tpu.memory_space<vmem>>, vector<1x64xf32>
    %23 = vector.broadcast %22 : vector<1x64xf32> to vector<256x64xf32>
    %24 = arith.addf %21, %23 : vector<256x64xf32>
    %cst_45 = arith.constant 0.000000e+00 : f32
    %25 = vector.broadcast %cst_45 : f32 to vector<256x64xf32>
    %26 = arith.maximumf %24, %25 : vector<256x64xf32>
    %27 = vector.shape_cast %26 : vector<256x64xf32> to vector<16x16x64xf32>
    %c1_46 = arith.constant 1 : index
    %c8 = arith.constant 8 : index
    %c0_47 = arith.constant 0 : index
    %28 = vector.load %arg11[%c1_46, %c8, %c0_47] : memref<18x32x64xf32, #tpu.memory_space<vmem>>, vector<16x16x64xf32>
    tpu.vector_store %arg11[%c1_46, %c8, %c0_47], %27 {strides = array<i32>} : memref<18x32x64xf32, #tpu.memory_space<vmem>>, vector<16x16x64xf32>,
    %c0_48 = arith.constant 0 : index
    %c7 = arith.constant 7 : index
    %c0_49 = arith.constant 0 : index
    %29 = vector.load %arg11[%c0_48, %c7, %c0_49] : memref<18x32x64xf32, #tpu.memory_space<vmem>>, vector<16x16x64xf32>
    %30 = arith.truncf %29 : vector<16x16x64xf32> to vector<16x16x64xbf16>
    %c0_50 = arith.constant 0 : index
    %c8_51 = arith.constant 8 : index
    %c0_52 = arith.constant 0 : index
    %31 = vector.load %arg11[%c0_50, %c8_51, %c0_52] : memref<18x32x64xf32, #tpu.memory_space<vmem>>, vector<16x16x64xf32>
    %32 = arith.truncf %31 : vector<16x16x64xf32> to vector<16x16x64xbf16>
    %c0_53 = arith.constant 0 : index
    %c9 = arith.constant 9 : index
    %c0_54 = arith.constant 0 : index
    %33 = vector.load %arg11[%c0_53, %c9, %c0_54] : memref<18x32x64xf32, #tpu.memory_space<vmem>>, vector<16x16x64xf32>
    %34 = arith.truncf %33 : vector<16x16x64xf32> to vector<16x16x64xbf16>
    %c1_55 = arith.constant 1 : index
    %c7_56 = arith.constant 7 : index
    %c0_57 = arith.constant 0 : index
    %35 = vector.load %arg11[%c1_55, %c7_56, %c0_57] : memref<18x32x64xf32, #tpu.memory_space<vmem>>, vector<16x16x64xf32>
    %36 = arith.truncf %35 : vector<16x16x64xf32> to vector<16x16x64xbf16>
    %c1_58 = arith.constant 1 : index
    %c8_59 = arith.constant 8 : index
    %c0_60 = arith.constant 0 : index
    %37 = vector.load %arg11[%c1_58, %c8_59, %c0_60] : memref<18x32x64xf32, #tpu.memory_space<vmem>>, vector<16x16x64xf32>
    %38 = arith.truncf %37 : vector<16x16x64xf32> to vector<16x16x64xbf16>
    %c1_61 = arith.constant 1 : index
    %c9_62 = arith.constant 9 : index
    %c0_63 = arith.constant 0 : index
    %39 = vector.load %arg11[%c1_61, %c9_62, %c0_63] : memref<18x32x64xf32, #tpu.memory_space<vmem>>, vector<16x16x64xf32>
    %40 = arith.truncf %39 : vector<16x16x64xf32> to vector<16x16x64xbf16>
    %c2 = arith.constant 2 : index
    %c7_64 = arith.constant 7 : index
    %c0_65 = arith.constant 0 : index
    %41 = vector.load %arg11[%c2, %c7_64, %c0_65] : memref<18x32x64xf32, #tpu.memory_space<vmem>>, vector<16x16x64xf32>
    %42 = arith.truncf %41 : vector<16x16x64xf32> to vector<16x16x64xbf16>
    %c2_66 = arith.constant 2 : index
    %c8_67 = arith.constant 8 : index
    %c0_68 = arith.constant 0 : index
    %43 = vector.load %arg11[%c2_66, %c8_67, %c0_68] : memref<18x32x64xf32, #tpu.memory_space<vmem>>, vector<16x16x64xf32>
    %44 = arith.truncf %43 : vector<16x16x64xf32> to vector<16x16x64xbf16>
    %c2_69 = arith.constant 2 : index
    %c9_70 = arith.constant 9 : index
    %c0_71 = arith.constant 0 : index
    %45 = vector.load %arg11[%c2_69, %c9_70, %c0_71] : memref<18x32x64xf32, #tpu.memory_space<vmem>>, vector<16x16x64xf32>
    %46 = arith.truncf %45 : vector<16x16x64xf32> to vector<16x16x64xbf16>
    %47 = tpu.concatenate %30, %32 in 2 : vector<16x16x64xbf16>, vector<16x16x64xbf16> -> vector<16x16x128xbf16>
    %48 = tpu.concatenate %34, %36 in 2 : vector<16x16x64xbf16>, vector<16x16x64xbf16> -> vector<16x16x128xbf16>
    %49 = tpu.concatenate %38, %40 in 2 : vector<16x16x64xbf16>, vector<16x16x64xbf16> -> vector<16x16x128xbf16>
    %50 = tpu.concatenate %42, %44 in 2 : vector<16x16x64xbf16>, vector<16x16x64xbf16> -> vector<16x16x128xbf16>
    %51 = tpu.concatenate %47, %48, %49, %50, %46 in 2 : vector<16x16x128xbf16>, vector<16x16x128xbf16>, vector<16x16x128xbf16>, vector<16x16x128xbf16>, vector<16x16x64xbf16> -> vector<16x16x576xbf16>
    %52 = vector.shape_cast %51 : vector<16x16x576xbf16> to vector<256x576xbf16>
    %c0_72 = arith.constant 0 : index
    %c0_73 = arith.constant 0 : index
    %53 = vector.load %arg4[%c0_72, %c0_73] : memref<576x64xbf16, #tpu.memory_space<vmem>>, vector<576x64xbf16>
    %cst_74 = arith.constant dense<0.000000e+00> : vector<256x64xf32>
    %54 = tpu.matmul %52, %53, %cst_74 {dimension_numbers = #tpu.dot_dimension_numbers<[1], [0], [0], [1], [0, 0, 1, 1], [], []>} : vector<256x576xbf16>, vector<576x64xbf16>, vector<256x64xf32> -> vector<256x64xf32>
    %c0_75 = arith.constant 0 : index
    %c0_76 = arith.constant 0 : index
    %55 = vector.load %arg5[%c0_75, %c0_76] : memref<1x64xf32, #tpu.memory_space<vmem>>, vector<1x64xf32>
    %56 = vector.broadcast %55 : vector<1x64xf32> to vector<256x64xf32>
    %57 = arith.addf %54, %56 : vector<256x64xf32>
    %cst_77 = arith.constant 0.000000e+00 : f32
    %58 = vector.broadcast %cst_77 : f32 to vector<256x64xf32>
    %59 = arith.maximumf %57, %58 : vector<256x64xf32>
    %60 = vector.shape_cast %59 : vector<256x64xf32> to vector<16x16x64xf32>
    %c1_78 = arith.constant 1 : index
    %c8_79 = arith.constant 8 : index
    %c0_80 = arith.constant 0 : index
    %61 = vector.load %arg12[%c1_78, %c8_79, %c0_80] : memref<18x32x64xf32, #tpu.memory_space<vmem>>, vector<16x16x64xf32>
    tpu.vector_store %arg12[%c1_78, %c8_79, %c0_80], %60 {strides = array<i32>} : memref<18x32x64xf32, #tpu.memory_space<vmem>>, vector<16x16x64xf32>,
    %c0_81 = arith.constant 0 : index
    %c7_82 = arith.constant 7 : index
    %c0_83 = arith.constant 0 : index
    %62 = vector.load %arg12[%c0_81, %c7_82, %c0_83] : memref<18x32x64xf32, #tpu.memory_space<vmem>>, vector<16x16x64xf32>
    %63 = arith.truncf %62 : vector<16x16x64xf32> to vector<16x16x64xbf16>
    %c0_84 = arith.constant 0 : index
    %c8_85 = arith.constant 8 : index
    %c0_86 = arith.constant 0 : index
    %64 = vector.load %arg12[%c0_84, %c8_85, %c0_86] : memref<18x32x64xf32, #tpu.memory_space<vmem>>, vector<16x16x64xf32>
    %65 = arith.truncf %64 : vector<16x16x64xf32> to vector<16x16x64xbf16>
    %c0_87 = arith.constant 0 : index
    %c9_88 = arith.constant 9 : index
    %c0_89 = arith.constant 0 : index
    %66 = vector.load %arg12[%c0_87, %c9_88, %c0_89] : memref<18x32x64xf32, #tpu.memory_space<vmem>>, vector<16x16x64xf32>
    %67 = arith.truncf %66 : vector<16x16x64xf32> to vector<16x16x64xbf16>
    %c1_90 = arith.constant 1 : index
    %c7_91 = arith.constant 7 : index
    %c0_92 = arith.constant 0 : index
    %68 = vector.load %arg12[%c1_90, %c7_91, %c0_92] : memref<18x32x64xf32, #tpu.memory_space<vmem>>, vector<16x16x64xf32>
    %69 = arith.truncf %68 : vector<16x16x64xf32> to vector<16x16x64xbf16>
    %c1_93 = arith.constant 1 : index
    %c8_94 = arith.constant 8 : index
    %c0_95 = arith.constant 0 : index
    %70 = vector.load %arg12[%c1_93, %c8_94, %c0_95] : memref<18x32x64xf32, #tpu.memory_space<vmem>>, vector<16x16x64xf32>
    %71 = arith.truncf %70 : vector<16x16x64xf32> to vector<16x16x64xbf16>
    %c1_96 = arith.constant 1 : index
    %c9_97 = arith.constant 9 : index
    %c0_98 = arith.constant 0 : index
    %72 = vector.load %arg12[%c1_96, %c9_97, %c0_98] : memref<18x32x64xf32, #tpu.memory_space<vmem>>, vector<16x16x64xf32>
    %73 = arith.truncf %72 : vector<16x16x64xf32> to vector<16x16x64xbf16>
    %c2_99 = arith.constant 2 : index
    %c7_100 = arith.constant 7 : index
    %c0_101 = arith.constant 0 : index
    %74 = vector.load %arg12[%c2_99, %c7_100, %c0_101] : memref<18x32x64xf32, #tpu.memory_space<vmem>>, vector<16x16x64xf32>
    %75 = arith.truncf %74 : vector<16x16x64xf32> to vector<16x16x64xbf16>
    %c2_102 = arith.constant 2 : index
    %c8_103 = arith.constant 8 : index
    %c0_104 = arith.constant 0 : index
    %76 = vector.load %arg12[%c2_102, %c8_103, %c0_104] : memref<18x32x64xf32, #tpu.memory_space<vmem>>, vector<16x16x64xf32>
    %77 = arith.truncf %76 : vector<16x16x64xf32> to vector<16x16x64xbf16>
    %c2_105 = arith.constant 2 : index
    %c9_106 = arith.constant 9 : index
    %c0_107 = arith.constant 0 : index
    %78 = vector.load %arg12[%c2_105, %c9_106, %c0_107] : memref<18x32x64xf32, #tpu.memory_space<vmem>>, vector<16x16x64xf32>
    %79 = arith.truncf %78 : vector<16x16x64xf32> to vector<16x16x64xbf16>
    %80 = tpu.concatenate %63, %65 in 2 : vector<16x16x64xbf16>, vector<16x16x64xbf16> -> vector<16x16x128xbf16>
    %81 = tpu.concatenate %67, %69 in 2 : vector<16x16x64xbf16>, vector<16x16x64xbf16> -> vector<16x16x128xbf16>
    %82 = tpu.concatenate %71, %73 in 2 : vector<16x16x64xbf16>, vector<16x16x64xbf16> -> vector<16x16x128xbf16>
    %83 = tpu.concatenate %75, %77 in 2 : vector<16x16x64xbf16>, vector<16x16x64xbf16> -> vector<16x16x128xbf16>
    %84 = tpu.concatenate %80, %81, %82, %83, %79 in 2 : vector<16x16x128xbf16>, vector<16x16x128xbf16>, vector<16x16x128xbf16>, vector<16x16x128xbf16>, vector<16x16x64xbf16> -> vector<16x16x576xbf16>
    %85 = vector.shape_cast %84 : vector<16x16x576xbf16> to vector<256x576xbf16>
    %c0_108 = arith.constant 0 : index
    %c0_109 = arith.constant 0 : index
    %86 = vector.load %arg6[%c0_108, %c0_109] : memref<576x32xbf16, #tpu.memory_space<vmem>>, vector<576x32xbf16>
    %cst_110 = arith.constant dense<0.000000e+00> : vector<256x32xf32>
    %87 = tpu.matmul %85, %86, %cst_110 {dimension_numbers = #tpu.dot_dimension_numbers<[1], [0], [0], [1], [0, 0, 1, 1], [], []>} : vector<256x576xbf16>, vector<576x32xbf16>, vector<256x32xf32> -> vector<256x32xf32>
    %c0_111 = arith.constant 0 : index
    %c0_112 = arith.constant 0 : index
    %88 = vector.load %arg7[%c0_111, %c0_112] : memref<1x32xf32, #tpu.memory_space<vmem>>, vector<1x32xf32>
    %89 = vector.broadcast %88 : vector<1x32xf32> to vector<256x32xf32>
    %90 = arith.addf %87, %89 : vector<256x32xf32>
    %cst_113 = arith.constant 0.000000e+00 : f32
    %91 = vector.broadcast %cst_113 : f32 to vector<256x32xf32>
    %92 = arith.maximumf %90, %91 : vector<256x32xf32>
    %93 = vector.shape_cast %92 : vector<256x32xf32> to vector<16x16x32xf32>
    %c1_114 = arith.constant 1 : index
    %c8_115 = arith.constant 8 : index
    %c0_116 = arith.constant 0 : index
    %94 = vector.load %arg13[%c1_114, %c8_115, %c0_116] : memref<18x32x32xf32, #tpu.memory_space<vmem>>, vector<16x16x32xf32>
    tpu.vector_store %arg13[%c1_114, %c8_115, %c0_116], %93 {strides = array<i32>} : memref<18x32x32xf32, #tpu.memory_space<vmem>>, vector<16x16x32xf32>,
    %c0_117 = arith.constant 0 : index
    %c7_118 = arith.constant 7 : index
    %c0_119 = arith.constant 0 : index
    %95 = vector.load %arg13[%c0_117, %c7_118, %c0_119] : memref<18x32x32xf32, #tpu.memory_space<vmem>>, vector<16x16x32xf32>
    %96 = arith.truncf %95 : vector<16x16x32xf32> to vector<16x16x32xbf16>
    %c0_120 = arith.constant 0 : index
    %c8_121 = arith.constant 8 : index
    %c0_122 = arith.constant 0 : index
    %97 = vector.load %arg13[%c0_120, %c8_121, %c0_122] : memref<18x32x32xf32, #tpu.memory_space<vmem>>, vector<16x16x32xf32>
    %98 = arith.truncf %97 : vector<16x16x32xf32> to vector<16x16x32xbf16>
    %c0_123 = arith.constant 0 : index
    %c9_124 = arith.constant 9 : index
    %c0_125 = arith.constant 0 : index
    %99 = vector.load %arg13[%c0_123, %c9_124, %c0_125] : memref<18x32x32xf32, #tpu.memory_space<vmem>>, vector<16x16x32xf32>
    %100 = arith.truncf %99 : vector<16x16x32xf32> to vector<16x16x32xbf16>
    %c1_126 = arith.constant 1 : index
    %c7_127 = arith.constant 7 : index
    %c0_128 = arith.constant 0 : index
    %101 = vector.load %arg13[%c1_126, %c7_127, %c0_128] : memref<18x32x32xf32, #tpu.memory_space<vmem>>, vector<16x16x32xf32>
    %102 = arith.truncf %101 : vector<16x16x32xf32> to vector<16x16x32xbf16>
    %c1_129 = arith.constant 1 : index
    %c8_130 = arith.constant 8 : index
    %c0_131 = arith.constant 0 : index
    %103 = vector.load %arg13[%c1_129, %c8_130, %c0_131] : memref<18x32x32xf32, #tpu.memory_space<vmem>>, vector<16x16x32xf32>
    %104 = arith.truncf %103 : vector<16x16x32xf32> to vector<16x16x32xbf16>
    %c1_132 = arith.constant 1 : index
    %c9_133 = arith.constant 9 : index
    %c0_134 = arith.constant 0 : index
    %105 = vector.load %arg13[%c1_132, %c9_133, %c0_134] : memref<18x32x32xf32, #tpu.memory_space<vmem>>, vector<16x16x32xf32>
    %106 = arith.truncf %105 : vector<16x16x32xf32> to vector<16x16x32xbf16>
    %c2_135 = arith.constant 2 : index
    %c7_136 = arith.constant 7 : index
    %c0_137 = arith.constant 0 : index
    %107 = vector.load %arg13[%c2_135, %c7_136, %c0_137] : memref<18x32x32xf32, #tpu.memory_space<vmem>>, vector<16x16x32xf32>
    %108 = arith.truncf %107 : vector<16x16x32xf32> to vector<16x16x32xbf16>
    %c2_138 = arith.constant 2 : index
    %c8_139 = arith.constant 8 : index
    %c0_140 = arith.constant 0 : index
    %109 = vector.load %arg13[%c2_138, %c8_139, %c0_140] : memref<18x32x32xf32, #tpu.memory_space<vmem>>, vector<16x16x32xf32>
    %110 = arith.truncf %109 : vector<16x16x32xf32> to vector<16x16x32xbf16>
    %c2_141 = arith.constant 2 : index
    %c9_142 = arith.constant 9 : index
    %c0_143 = arith.constant 0 : index
    %111 = vector.load %arg13[%c2_141, %c9_142, %c0_143] : memref<18x32x32xf32, #tpu.memory_space<vmem>>, vector<16x16x32xf32>
    %112 = arith.truncf %111 : vector<16x16x32xf32> to vector<16x16x32xbf16>
    %113 = tpu.concatenate %96, %98, %100, %102 in 2 : vector<16x16x32xbf16>, vector<16x16x32xbf16>, vector<16x16x32xbf16>, vector<16x16x32xbf16> -> vector<16x16x128xbf16>
    %114 = tpu.concatenate %104, %106, %108, %110 in 2 : vector<16x16x32xbf16>, vector<16x16x32xbf16>, vector<16x16x32xbf16>, vector<16x16x32xbf16> -> vector<16x16x128xbf16>
    %115 = tpu.concatenate %113, %114, %112 in 2 : vector<16x16x128xbf16>, vector<16x16x128xbf16>, vector<16x16x32xbf16> -> vector<16x16x288xbf16>
    %116 = vector.shape_cast %115 : vector<16x16x288xbf16> to vector<256x288xbf16>
    %c0_144 = arith.constant 0 : index
    %c0_145 = arith.constant 0 : index
    %117 = vector.load %arg8[%c0_144, %c0_145] : memref<288x9xbf16, #tpu.memory_space<vmem>>, vector<288x9xbf16>
    %cst_146 = arith.constant dense<0.000000e+00> : vector<256x9xf32>
    %118 = tpu.matmul %116, %117, %cst_146 {dimension_numbers = #tpu.dot_dimension_numbers<[1], [0], [0], [1], [0, 0, 1, 1], [], []>} : vector<256x288xbf16>, vector<288x9xbf16>, vector<256x9xf32> -> vector<256x9xf32>
    %c0_147 = arith.constant 0 : index
    %c0_148 = arith.constant 0 : index
    %119 = vector.load %arg9[%c0_147, %c0_148] : memref<1x9xf32, #tpu.memory_space<vmem>>, vector<1x9xf32>
    %120 = vector.broadcast %119 : vector<1x9xf32> to vector<256x9xf32>
    %121 = arith.addf %118, %120 : vector<256x9xf32>
    %122 = vector.shape_cast %121 : vector<256x9xf32> to vector<16x16x9xf32>
    %c0_149 = arith.constant 0 : index
    %c0_150 = arith.constant 0 : index
    %c0_151 = arith.constant 0 : index
    %c0_152 = arith.constant 0 : index
    %123 = vector.load %arg10[%c0_149, %c0_150, %c0_151, %c0_152] : memref<1x16x16x9xf32, #tpu.memory_space<vmem>>, vector<1x16x16x9xf32>
    %124 = vector.shape_cast %123 : vector<1x16x16x9xf32> to vector<16x16x9xf32>
    %125 = vector.shape_cast %122 : vector<16x16x9xf32> to vector<1x16x16x9xf32>
    tpu.vector_store %arg10[%c0_149, %c0_150, %c0_151, %c0_152], %125 {strides = array<i32>} : memref<1x16x16x9xf32, #tpu.memory_space<vmem>>, vector<1x16x16x9xf32>,
    return
  }
  func.func @transform_0(%arg0: i32) -> (i32, i32, i32) {
    %c0_i32 = arith.constant 0 : i32
    %c0_i32_0 = arith.constant 0 : i32
    %c0_i32_1 = arith.constant 0 : i32
    return %arg0, %c0_i32, %c0_i32_0 : i32, i32, i32
  }
  func.func @transform_1(%arg0: i32) -> (i32, i32) {
    %c0_i32 = arith.constant 0 : i32
    %c0_i32_0 = arith.constant 0 : i32
    %c0_i32_1 = arith.constant 0 : i32
    return %c0_i32, %c0_i32_0 : i32, i32
  }
  func.func @transform_2(%arg0: i32) -> (i32, i32) {
    %c0_i32 = arith.constant 0 : i32
    %c0_i32_0 = arith.constant 0 : i32
    %c0_i32_1 = arith.constant 0 : i32
    return %c0_i32, %c0_i32_0 : i32, i32
  }
  func.func @transform_3(%arg0: i32) -> (i32, i32) {
    %c0_i32 = arith.constant 0 : i32
    %c0_i32_0 = arith.constant 0 : i32
    %c0_i32_1 = arith.constant 0 : i32
    return %c0_i32, %c0_i32_0 : i32, i32
  }
  func.func @transform_4(%arg0: i32) -> (i32, i32) {
    %c0_i32 = arith.constant 0 : i32
    %c0_i32_0 = arith.constant 0 : i32
    %c0_i32_1 = arith.constant 0 : i32
    return %c0_i32, %c0_i32_0 : i32, i32
  }
  func.func @transform_5(%arg0: i32) -> (i32, i32) {
    %c0_i32 = arith.constant 0 : i32
    %c0_i32_0 = arith.constant 0 : i32
    %c0_i32_1 = arith.constant 0 : i32
    return %c0_i32, %c0_i32_0 : i32, i32
  }
  func.func @transform_6(%arg0: i32) -> (i32, i32) {
    %c0_i32 = arith.constant 0 : i32
    %c0_i32_0 = arith.constant 0 : i32
    %c0_i32_1 = arith.constant 0 : i32
    return %c0_i32, %c0_i32_0 : i32, i32
  }
  func.func @transform_7(%arg0: i32) -> (i32, i32) {
    %c0_i32 = arith.constant 0 : i32
    %c0_i32_0 = arith.constant 0 : i32
    %c0_i32_1 = arith.constant 0 : i32
    return %c0_i32, %c0_i32_0 : i32, i32
  }
  func.func @transform_8(%arg0: i32) -> (i32, i32) {
    %c0_i32 = arith.constant 0 : i32
    %c0_i32_0 = arith.constant 0 : i32
    %c0_i32_1 = arith.constant 0 : i32
    return %c0_i32, %c0_i32_0 : i32, i32
  }
  func.func @transform_9(%arg0: i32) -> (i32, i32, i32, i32) {
    %c0_i32 = arith.constant 0 : i32
    %c0_i32_0 = arith.constant 0 : i32
    %c0_i32_1 = arith.constant 0 : i32
    %c0_i32_2 = arith.constant 0 : i32
    return %arg0, %c0_i32, %c0_i32_0, %c0_i32_1 : i32, i32, i32, i32
  }
}

</mosaic_0001>

<bundles_post_ra>
// kernel: super_resolution_forward.1
= control target key start
LH: loop header
LB: loop body
LE: loop exit
PB: predicated region body
PF: predicated region fallthrough
CT: control target
= control target key end

     0   :  { %s8869_s30 = smov 0   ;;  %s11332_s0 = inlined_call_operand.vmem [shape: bf16[2,256,25], index: 0, kind: input, shape index: {}]   ;;  %s11333_s1 = inlined_call_operand.vmem [shape: bf16[25,64], index: 1, kind: input, shape index: {}]   ;;  %s11334_s2 = inlined_call_operand.vmem [shape: f32[1,64], index: 2, kind: input, shape index: {}]   ;;  %s11335_s3 = inlined_call_operand.vmem [shape: bf16[576,64], index: 3, kind: input, shape index: {}]   ;;  %s11336_s4 = inlined_call_operand.vmem [shape: f32[1,64], index: 4, kind: input, shape index: {}]   ;;  %s11337_s5 = inlined_call_operand.vmem [shape: bf16[576,32], index: 5, kind: input, shape index: {}]   ;;  %s11338_s6 = inlined_call_operand.vmem [shape: f32[1,32], index: 6, kind: input, shape index: {}]   ;;  %s11339_s7 = inlined_call_operand.vmem [shape: bf16[288,9], index: 7, kind: input, shape index: {}]   ;;  %s11340_s8 = inlined_call_operand.vmem [shape: f32[1,9], index: 8, kind: input, shape index: {}]   ;;  %s11341_s9 = inlined_call_operand.vmem [shape: f32[2,16,16,9], index: 9, kind: output, shape index: {}]  }
   0x1 LB: > { %s8159_s10 = sadd.s32 4294967295, %s8812_s30   ;;  %p8163_p0 = scmp.ge.s32.totalorder %s8812_s30, 1  ;;  %s8812_s30 = sphi %s8869_s30, %s19_s30  }
   0x2   : > { %p287_p1 = scmp.lt.s32.totalorder %s8812_s30, 3 }
   0x4   : > { %p288_p2 = pnand %p8163_p0, %p287_p1 }
   0x6   : > { %291 = sbr.rel (%p288_p2) target bundleno = 1723 (0x6bb), region = 56 }
   0xb   : > { %v8238_v0 = vld [vmem:[%s11333_s1 + $0x8] sm:$0xf]  ;;  %v8685_v1 = vld [vmem:[%s11333_s1 + $0x8] sm:$0x10]  ;;  %vm642_vm0 = vcmask 1043456   ;;  %vm643_vm1 = vcmask 1044480  }
   0xc   : > { %v8239_v2 = vor.u32 %v8685_v1, %v8238_v0  ;;  %p323_p3 = scmp.lt.s32.totalorder %s8159_s10, 1  ;;  %v8814_v3 = vmov 65535   ;;  %v8684_v7 = vld [vmem:[%s11333_s1] sm:$0xff]  ;;  %vm593_vm2 = vcmask 203776   ;;  %vm334_vm3 = vcmask 523264   ;;  %s8816_s23 = smov 64  }
   0xd   : > { %v644_v4 = vsel %vm642_vm0, 4294967295, %v8814_v3  ;;  %v11342_v21 = vmov 0.0   ;;  %v8973_v23 = vld [vmem:[%s11334_s2] ss:$0 sm:$0xff]  ;;  %vm419_vm4 = vcmask 261120   ;;  %s8817_s11 = smov 32  }
   0xe   : > { %v645_v5 = vsel %vm643_vm1, %v644_v4, 0  ;;  %s11388_s10 = smov (!%p323_p3, %s8159_s10), 1  ;;  %336 = vst.msk [vmem:[#allocation2 + $0x8] sm:$0xff] %vm334_vm3, %v11342_v21  ;;  %s8818_s18 = smov 96   ;;  %vm6935_vm5 = vcmask 785408   ;;  %vm8071_vm6 = vcmask 72704  }
   0xf   : > { %v647_v6 = vand.u32 %v8239_v2, %v645_v5  ;;  %s8666_s15 = sshll.u32 %s11388_s10, 7  ;;  %337 = vst.msk [vmem:[#allocation2 + $0x10] sm:$0xff] %vm334_vm3, %v11342_v21 }
  0x10   : > { %s8892_s20 = scalar_lea.vmem %s11332_s0, %s8666_s15  ;;  %335 = vst.msk [vmem:[#allocation2] sm:$0xff] %vm334_vm3, %v11342_v21 }
  0x11   : > { %655 = vmatpush.bf16.msra.mxu0 %v647_v6  ;;  %8776 = vmatpush.bf16.msra.mxu3 %v647_v6  ;;  %v8668_v8 = vld [vmem:[%s8892_s20] sm:$0xff]  ;;  %v8677_v9 = vld [vmem:[%s8892_s20 + $0x48] sm:$0xff]  ;;  %v8678_v11 = vld [vmem:[%s8892_s20 + $0x50] sm:$0xff]  ;;  %338 = vst.msk [vmem:[#allocation2 + $0x18] sm:$0xff] %vm334_vm3, %v11342_v21 }
  0x12   : > { %v8669_v10 = vld [vmem:[%s8892_s20 + $0x8] sm:$0xff]  ;;  %v8670_v12 = vld [vmem:[%s8892_s20 + $0x10] sm:$0xff]  ;;  %v8679_v13 = vld [vmem:[%s8892_s20 + $0x58] sm:$0xff]  ;;  %340 = vst.msk [vmem:[#allocation2 + $0x220] sm:$0xff] %vm334_vm3, %v11342_v21 }
  0x13   : > { %v8671_v14 = vld [vmem:[%s8892_s20 + $0x18] sm:$0xff]  ;;  %v8680_v15 = vld [vmem:[%s8892_s20 + $0x60] sm:$0xff]  ;;  %v8681_v17 = vld [vmem:[%s8892_s20 + $0x68] sm:$0xff]  ;;  %341 = vst.msk [vmem:[#allocation2 + $0x228] sm:$0xff] %vm334_vm3, %v11342_v21 }
  0x14   : > { %v8672_v16 = vld [vmem:[%s8892_s20 + $0x20] sm:$0xff]  ;;  %v8673_v18 = vld [vmem:[%s8892_s20 + $0x28] sm:$0xff]  ;;  %v8682_v19 = vld [vmem:[%s8892_s20 + $0x70] sm:$0xff]  ;;  %342 = vst.msk [vmem:[#allocation2 + $0x230] sm:$0xff] %vm334_vm3, %v11342_v21 }
  0x15   : > { %656 = vmatpush.bf16.msra.mxu0 %v8684_v7  ;;  %8777 = vmatpush.bf16.msra.mxu3 %v8684_v7  ;;  %v8674_v20 = vld [vmem:[%s8892_s20 + $0x30] sm:$0xff]  ;;  %343 = vst.msk [vmem:[#allocation2 + $0x238] sm:$0xff] %vm334_vm3, %v11342_v21  ;;  %v8675_v22 = vld [vmem:[%s8892_s20 + $0x38] sm:$0xff]  ;;  %v8676_v24 = vld [vmem:[%s8892_s20 + $0x40] sm:$0xff] }
  0x16   : > { %345 = vst.msk [vmem:[#allocation2 + $0x20] sm:$0xff] %vm334_vm3, %v11342_v21  ;;  %v8683_v47 = vld [vmem:[%s8892_s20 + $0x78] sm:$0xff]  ;;  %s8667_s20 = sshll.u32 %s11388_s10, 8 }
  0x17   : > { %346 = vst.msk [vmem:[#allocation2 + $0x40] sm:$0xff] %vm334_vm3, %v11342_v21  ;;  %s11140_s24 = scalar_lea.vmem %s11341_s9, %s8667_s20 }
  0x18   : > { %8240 = vmatmul.msk.bf16.vlgmr.msra.gmra.mxu0 %vm593_vm2, %v8668_v8  ;;  %8249 = vmatmul.msk.bf16.vlgmr.msra.gmra.mxu3 %vm593_vm2, %v8677_v9  ;;  %347 = vst.msk [vmem:[#allocation2 + $0x60] sm:$0xff] %vm334_vm3, %v11342_v21 }
  0x19   : > { %348 = vst.msk [vmem:[#allocation2 + $0x80] sm:$0xff] %vm334_vm3, %v11342_v21 }
  0x1a   : > { %349 = vst.msk [vmem:[#allocation2 + $0xa0] sm:$0xff] %vm334_vm3, %v11342_v21 }
  0x1b   : > { %350 = vst.msk [vmem:[#allocation2 + $0xc0] sm:$0xff] %vm334_vm3, %v11342_v21 }
  0x1c   : > { %351 = vst.msk [vmem:[#allocation2 + $0xe0] sm:$0xff] %vm334_vm3, %v11342_v21 }
  0x1d   : > { %352 = vst.msk [vmem:[#allocation2 + $0x100] sm:$0xff] %vm334_vm3, %v11342_v21 }
  0x1e   : > { %353 = vst.msk [vmem:[#allocation2 + $0x120] sm:$0xff] %vm334_vm3, %v11342_v21 }
  0x1f   : > { %354 = vst.msk [vmem:[#allocation2 + $0x140] sm:$0xff] %vm334_vm3, %v11342_v21 }
  0x20   : > { %355 = vst.msk [vmem:[#allocation2 + $0x160] sm:$0xff] %vm334_vm3, %v11342_v21 }
  0x21   : > { %356 = vst.msk [vmem:[#allocation2 + $0x180] sm:$0xff] %vm334_vm3, %v11342_v21 }
  0x22   : > { %357 = vst.msk [vmem:[#allocation2 + $0x1a0] sm:$0xff] %vm334_vm3, %v11342_v21 }
  0x23   : > { %358 = vst.msk [vmem:[#allocation2 + $0x1c0] sm:$0xff] %vm334_vm3, %v11342_v21 }
  0x24   : > { %359 = vst.msk [vmem:[#allocation2 + $0x1e0] sm:$0xff] %vm334_vm3, %v11342_v21 }
  0x25   : > { %360 = vst.msk [vmem:[#allocation2 + $0x200] sm:$0xff] %vm334_vm3, %v11342_v21 }
  0x26   : > { %361 = vst.msk [vmem:[#allocation2 + $0x38] sm:$0xff] %vm334_vm3, %v11342_v21 }
  0x27   : > { %362 = vst.msk [vmem:[#allocation2 + $0x58] sm:$0xff] %vm334_vm3, %v11342_v21 }
  0x28   : > { %8241 = vmatmul.msk.bf16.gmra.mxu0 %vm593_vm2, %v8669_v10  ;;  %8250 = vmatmul.msk.bf16.gmra.mxu3 %vm593_vm2, %v8678_v11  ;;  %363 = vst.msk [vmem:[#allocation2 + $0x78] sm:$0xff] %vm334_vm3, %v11342_v21 }
  0x29   : > { %364 = vst.msk [vmem:[#allocation2 + $0x98] sm:$0xff] %vm334_vm3, %v11342_v21 }
  0x2a   : > { %365 = vst.msk [vmem:[#allocation2 + $0xb8] sm:$0xff] %vm334_vm3, %v11342_v21 }
  0x2b   : > { %366 = vst.msk [vmem:[#allocation2 + $0xd8] sm:$0xff] %vm334_vm3, %v11342_v21 }
  0x2c   : > { %367 = vst.msk [vmem:[#allocation2 + $0xf8] sm:$0xff] %vm334_vm3, %v11342_v21 }
  0x2d   : > { %368 = vst.msk [vmem:[#allocation2 + $0x118] sm:$0xff] %vm334_vm3, %v11342_v21 }
  0x2e   : > { %369 = vst.msk [vmem:[#allocation2 + $0x138] sm:$0xff] %vm334_vm3, %v11342_v21 }
  0x2f   : > { %370 = vst.msk [vmem:[#allocation2 + $0x158] sm:$0xff] %vm334_vm3, %v11342_v21 }
  0x30   : > { %371 = vst.msk [vmem:[#allocation2 + $0x178] sm:$0xff] %vm334_vm3, %v11342_v21 }
  0x31   : > { %372 = vst.msk [vmem:[#allocation2 + $0x198] sm:$0xff] %vm334_vm3, %v11342_v21 }
  0x32   : > { %373 = vst.msk [vmem:[#allocation2 + $0x1b8] sm:$0xff] %vm334_vm3, %v11342_v21 }
  0x33   : > { %374 = vst.msk [vmem:[#allocation2 + $0x1d8] sm:$0xff] %vm334_vm3, %v11342_v21 }
  0x34   : > { %375 = vst.msk [vmem:[#allocation2 + $0x1f8] sm:$0xff] %vm334_vm3, %v11342_v21 }
  0x35   : > { %376 = vst.msk [vmem:[#allocation2 + $0x218] sm:$0xff] %vm334_vm3, %v11342_v21 }
  0x36   : > { %377 = vst.msk [vmem:[#allocation3] sm:$0xff] %vm334_vm3, %v11342_v21 }
  0x37   : > { %378 = vst.msk [vmem:[#allocation3 + $0x8] sm:$0xff] %vm334_vm3, %v11342_v21 }
  0x38   : > { %8242 = vmatmul.msk.bf16.gmra.mxu0 %vm593_vm2, %v8670_v12  ;;  %8251 = vmatmul.msk.bf16.gmra.mxu3 %vm593_vm2, %v8679_v13  ;;  %379 = vst.msk [vmem:[#allocation3 + $0x10] sm:$0xff] %vm334_vm3, %v11342_v21 }
  0x39   : > { %380 = vst.msk [vmem:[#allocation3 + $0x18] sm:$0xff] %vm334_vm3, %v11342_v21 }
  0x3a   : > { %382 = vst.msk [vmem:[#allocation3 + $0x220] sm:$0xff] %vm334_vm3, %v11342_v21 }
  0x3b   : > { %383 = vst.msk [vmem:[#allocation3 + $0x228] sm:$0xff] %vm334_vm3, %v11342_v21 }
  0x3c   : > { %384 = vst.msk [vmem:[#allocation3 + $0x230] sm:$0xff] %vm334_vm3, %v11342_v21 }
  0x3d   : > { %385 = vst.msk [vmem:[#allocation3 + $0x238] sm:$0xff] %vm334_vm3, %v11342_v21 }
  0x3e   : > { %387 = vst.msk [vmem:[#allocation3 + $0x20] sm:$0xff] %vm334_vm3, %v11342_v21 }
  0x3f   : > { %388 = vst.msk [vmem:[#allocation3 + $0x40] sm:$0xff] %vm334_vm3, %v11342_v21 }
  0x40   : > { %389 = vst.msk [vmem:[#allocation3 + $0x60] sm:$0xff] %vm334_vm3, %v11342_v21 }
  0x41   : > { %390 = vst.msk [vmem:[#allocation3 + $0x80] sm:$0xff] %vm334_vm3, %v11342_v21 }
  0x42   : > { %391 = vst.msk [vmem:[#allocation3 + $0xa0] sm:$0xff] %vm334_vm3, %v11342_v21 }
  0x43   : > { %392 = vst.msk [vmem:[#allocation3 + $0xc0] sm:$0xff] %vm334_vm3, %v11342_v21 }
  0x44   : > { %393 = vst.msk [vmem:[#allocation3 + $0xe0] sm:$0xff] %vm334_vm3, %v11342_v21 }
  0x45   : > { %394 = vst.msk [vmem:[#allocation3 + $0x100] sm:$0xff] %vm334_vm3, %v11342_v21 }
  0x46   : > { %395 = vst.msk [vmem:[#allocation3 + $0x120] sm:$0xff] %vm334_vm3, %v11342_v21 }
  0x47   : > { %396 = vst.msk [vmem:[#allocation3 + $0x140] sm:$0xff] %vm334_vm3, %v11342_v21 }
  0x48   : > { %8243 = vmatmul.msk.bf16.gmra.mxu0 %vm593_vm2, %v8671_v14  ;;  %8252 = vmatmul.msk.bf16.gmra.mxu3 %vm593_vm2, %v8680_v15  ;;  %397 = vst.msk [vmem:[#allocation3 + $0x160] sm:$0xff] %vm334_vm3, %v11342_v21 }
  0x49   : > { %398 = vst.msk [vmem:[#allocation3 + $0x180] sm:$0xff] %vm334_vm3, %v11342_v21 }
  0x4a   : > { %399 = vst.msk [vmem:[#allocation3 + $0x1a0] sm:$0xff] %vm334_vm3, %v11342_v21 }
  0x4b   : > { %400 = vst.msk [vmem:[#allocation3 + $0x1c0] sm:$0xff] %vm334_vm3, %v11342_v21 }
  0x4c   : > { %401 = vst.msk [vmem:[#allocation3 + $0x1e0] sm:$0xff] %vm334_vm3, %v11342_v21 }
  0x4d   : > { %402 = vst.msk [vmem:[#allocation3 + $0x200] sm:$0xff] %vm334_vm3, %v11342_v21 }
  0x4e   : > { %403 = vst.msk [vmem:[#allocation3 + $0x38] sm:$0xff] %vm334_vm3, %v11342_v21 }
  0x4f   : > { %404 = vst.msk [vmem:[#allocation3 + $0x58] sm:$0xff] %vm334_vm3, %v11342_v21 }
  0x50   : > { %405 = vst.msk [vmem:[#allocation3 + $0x78] sm:$0xff] %vm334_vm3, %v11342_v21 }
  0x51   : > { %406 = vst.msk [vmem:[#allocation3 + $0x98] sm:$0xff] %vm334_vm3, %v11342_v21 }
  0x52   : > { %407 = vst.msk [vmem:[#allocation3 + $0xb8] sm:$0xff] %vm334_vm3, %v11342_v21 }
  0x53   : > { %408 = vst.msk [vmem:[#allocation3 + $0xd8] sm:$0xff] %vm334_vm3, %v11342_v21 }
  0x54   : > { %409 = vst.msk [vmem:[#allocation3 + $0xf8] sm:$0xff] %vm334_vm3, %v11342_v21 }
  0x55   : > { %410 = vst.msk [vmem:[#allocation3 + $0x118] sm:$0xff] %vm334_vm3, %v11342_v21 }
  0x56   : > { %411 = vst.msk [vmem:[#allocation3 + $0x138] sm:$0xff] %vm334_vm3, %v11342_v21 }
  0x57   : > { %412 = vst.msk [vmem:[#allocation3 + $0x158] sm:$0xff] %vm334_vm3, %v11342_v21 }
  0x58   : > { %8244 = vmatmul.msk.bf16.gmra.mxu0 %vm593_vm2, %v8672_v16  ;;  %8253 = vmatmul.msk.bf16.gmra.mxu3 %vm593_vm2, %v8681_v17  ;;  %413 = vst.msk [vmem:[#allocation3 + $0x178] sm:$0xff] %vm334_vm3, %v11342_v21 }
  0x59   : > { %414 = vst.msk [vmem:[#allocation3 + $0x198] sm:$0xff] %vm334_vm3, %v11342_v21 }
  0x5a   : > { %415 = vst.msk [vmem:[#allocation3 + $0x1b8] sm:$0xff] %vm334_vm3, %v11342_v21 }
  0x5b   : > { %416 = vst.msk [vmem:[#allocation3 + $0x1d8] sm:$0xff] %vm334_vm3, %v11342_v21 }
  0x5c   : > { %417 = vst.msk [vmem:[#allocation3 + $0x1f8] sm:$0xff] %vm334_vm3, %v11342_v21 }
  0x5d   : > { %418 = vst.msk [vmem:[#allocation3 + $0x218] sm:$0xff] %vm334_vm3, %v11342_v21  ;;  %v3397_v21 = vld [vmem:[#allocation3 + $0x10] sm:$0xff] }
  0x68   : > { %8245 = vmatmul.msk.bf16.gmra.mxu0 %vm593_vm2, %v8673_v18  ;;  %8254 = vmatmul.msk.bf16.gmra.mxu3 %vm593_vm2, %v8682_v19 }
  0x78   : > { %8246 = vmatmul.msk.bf16.gmra.mxu0 %vm593_vm2, %v8674_v20  ;;  %8255 = vmatmul.msk.bf16.gmra.mxu3 %vm593_vm2, %v8683_v47 }
  0x88   : > { %8247 = vmatmul.msk.bf16.gmra.mxu0 %vm593_vm2, %v8675_v22 }
  0x95   : > { %v658_v25 = vpop.f32.mrf.mxu0 }
  0x96   : > { %v659_v26 = vadd.f32 %v8973_v23, %v658_v25 }
  0x98   : > { %v738_v27 = vmax.f32 %v659_v26, 0.0  ;;  %8248 = vmatmul.msk.bf16.gmra.mxu0 %vm593_vm2, %v8676_v24 }
  0x9a   : > { %770 = vst.msk [vmem:[#allocation2 + $0x28] sm:$0xff] %vm334_vm3, %v738_v27 }
  0x9b   : > { %v703_v28 = vpop.f32.mrf.mxu3 }
  0x9c   : > { %v704_v29 = vadd.f32 %v8973_v23, %v703_v28 }
  0x9d   : > { %v660_v30 = vpop.f32.mrf.mxu0 }
  0x9e   : > { %v756_v31 = vmax.f32 %v704_v29, 0.0  ;;  %v661_v32 = vadd.f32 %v8973_v23, %v660_v30 }
  0xa0   : > { %788 = vst.msk [vmem:[#allocation2 + $0x148] sm:$0xff] %vm334_vm3, %v756_v31  ;;  %v739_v33 = vmax.f32 %v661_v32, 0.0  ;;  %v866_v32 = vld [vmem:[#allocation2 + $0x8] sm:$0xff] }
  0xa1   : > { %v868_v10 = vld [vmem:[#allocation2 + $0x28] sm:$0xff] }
  0xa2   : > { %771 = vst.msk [vmem:[#allocation2 + $0x30] sm:$0xff] %vm334_vm3, %v739_v33  ;;  %v900_v17 = vpack.c.bf16 %v868_v10, %v868_v10  ;;  %v867_v33 = vld [vmem:[#allocation2 + $0x10] sm:$0xff] }
  0xa3   : > { %v705_v34 = vpop.f32.mrf.mxu3 }
  0xa4   : > { %v706_v35 = vadd.f32 %v8973_v23, %v705_v34  ;;  %v1493_v22 = vunpack.c.l.b16 %v900_v17 }
  0xa5   : > { %v663_v36 = vpop.f32.mrf.mxu0 }
  0xa6   : > { %v757_v37 = vmax.f32 %v706_v35, 0.0  ;;  %v664_v38 = vadd.f32 %v8973_v23, %v663_v36 }
  0xa7   : > { %v886_v40 = vld [vmem:[#allocation2 + $0x148] sm:$0xff] }
  0xa8   : > { %789 = vst.msk [vmem:[#allocation2 + $0x150] sm:$0xff] %vm334_vm3, %v757_v37  ;;  %v740_v39 = vmax.f32 %v664_v38, 0.0  ;;  %v918_v43 = vpack.c.bf16 %v886_v40, %v886_v40  ;;  %v898_v38 = vpack.c.bf16 %v866_v32, %v866_v32 }
  0xa9   : > { %v869_v7 = vld [vmem:[#allocation2 + $0x30] sm:$0xff] }
  0xaa   : > { %772 = vst.msk [vmem:[#allocation2 + $0x48] sm:$0xff] %vm334_vm3, %v740_v39  ;;  %v1511_v51 = vunpack.c.l.b16 %v918_v43  ;;  %v901_v13 = vpack.c.bf16 %v869_v7, %v869_v7  ;;  %v899_v39 = vpack.c.bf16 %v867_v33, %v867_v33  ;;  %v8692_v33 = vld [vmem:[%s11335_s3 + $0x30] sm:$0xff] }
  0xab   : > { %v708_v41 = vpop.f32.mrf.mxu3 }
  0xac   : > { %v709_v42 = vadd.f32 %v8973_v23, %v708_v41  ;;  %v1494_v19 = vunpack.c.l.b16 %v901_v13  ;;  %v1492_v47 = vunpack.c.l.b16 %v899_v39 }
  0xad   : > { %v665_v44 = vpop.f32.mrf.mxu0 }
  0xae   : > { %v758_v45 = vmax.f32 %v709_v42, 0.0  ;;  %v666_v46 = vadd.f32 %v8973_v23, %v665_v44  ;;  %v1524_v26 = vpack.c.b16 %v1494_v19, %v1493_v22 }
  0xaf   : > { %v887_v48 = vld [vmem:[#allocation2 + $0x150] sm:$0xff] }
  0xb0   : > { %790 = vst.msk [vmem:[#allocation2 + $0x168] sm:$0xff] %vm334_vm3, %v758_v45  ;;  %v741_v49 = vmax.f32 %v666_v46, 0.0  ;;  %v919_v50 = vpack.c.bf16 %v887_v48, %v887_v48  ;;  %v1491_v46 = vunpack.c.l.b16 %v898_v38 }
  0xb2   : > { %773 = vst.msk [vmem:[#allocation2 + $0x50] sm:$0xff] %vm334_vm3, %v741_v49  ;;  %v1512_v52 = vunpack.c.l.b16 %v919_v50  ;;  %v1523_v49 = vpack.c.b16 %v1492_v47, %v1491_v46 }
  0xb3   : > { %v710_v53 = vpop.f32.mrf.mxu3 }
  0xb4   : > { %v711_v54 = vadd.f32 %v8973_v23, %v710_v53  ;;  %v1533_v55 = vpack.c.b16 %v1512_v52, %v1511_v51 }
  0xb5   : > { %v668_v56 = vpop.f32.mrf.mxu0 }
  0xb6   : > { %v759_v57 = vmax.f32 %v711_v54, 0.0  ;;  %v669_v58 = vadd.f32 %v8973_v23, %v668_v56  ;;  %1559 = vrot.lane.b32.xlu1 %v1533_v55, %s8816_s23 }
  0xb7   : > { %v888_v60 = vld [vmem:[#allocation2 + $0x168] sm:$0xff] }
  0xb8   : > { %791 = vst.msk [vmem:[#allocation2 + $0x170] sm:$0xff] %vm334_vm3, %v759_v57  ;;  %v742_v59 = vmax.f32 %v669_v58, 0.0  ;;  %v920_v63 = vpack.c.bf16 %v888_v60, %v888_v60 }
  0xba   : > { %774 = vst.msk [vmem:[#allocation2 + $0x68] sm:$0xff] %vm334_vm3, %v742_v59  ;;  %v1513_v6 = vunpack.c.l.b16 %v920_v63 }
  0xbb   : > { %v713_v61 = vpop.f32.mrf.mxu3 }
  0xbc   : > { %v714_v62 = vadd.f32 %v8973_v23, %v713_v61 }
  0xbd   : > { %v670_v0 = vpop.f32.mrf.mxu0 }
  0xbe   : > { %v760_v1 = vmax.f32 %v714_v62, 0.0  ;;  %v671_v2 = vadd.f32 %v8973_v23, %v670_v0 }
  0xbf   : > { %v889_v3 = vld [vmem:[#allocation2 + $0x170] sm:$0xff] }
  0xc0   : > { %792 = vst.msk [vmem:[#allocation2 + $0x188] sm:$0xff] %vm334_vm3, %v760_v1  ;;  %v743_v4 = vmax.f32 %v671_v2, 0.0  ;;  %v921_v5 = vpack.c.bf16 %v889_v3, %v889_v3 }
  0xc2   : > { %775 = vst.msk [vmem:[#allocation2 + $0x70] sm:$0xff] %vm334_vm3, %v743_v4  ;;  %v1514_v8 = vunpack.c.l.b16 %v921_v5 }
  0xc3   : > { %v715_v9 = vpop.f32.mrf.mxu3 }
  0xc4   : > { %v716_v11 = vadd.f32 %v8973_v23, %v715_v9  ;;  %v1534_v12 = vpack.c.b16 %v1514_v8, %v1513_v6 }
  0xc5   : > { %v673_v14 = vpop.f32.mrf.mxu0 }
  0xc6   : > { %v761_v15 = vmax.f32 %v716_v11, 0.0  ;;  %v674_v16 = vadd.f32 %v8973_v23, %v673_v14  ;;  %1561 = vrot.lane.b32.xlu1 %v1534_v12, %s8816_s23  ;;  %v872_v12 = vld [vmem:[#allocation2 + $0x68] sm:$0xff] }
  0xc7   : > { %v890_v20 = vld [vmem:[#allocation2 + $0x188] sm:$0xff]  ;;  %v904_v19 = vpack.c.bf16 %v872_v12, %v872_v12 }
  0xc8   : > { %793 = vst.msk [vmem:[#allocation2 + $0x190] sm:$0xff] %vm334_vm3, %v761_v15  ;;  %v744_v18 = vmax.f32 %v674_v16, 0.0  ;;  %v922_v27 = vpack.c.bf16 %v890_v20, %v890_v20 }
  0xc9   : > { %v873_v9 = vld [vmem:[#allocation2 + $0x70] sm:$0xff] }
  0xca   : > { %776 = vst.msk [vmem:[#allocation2 + $0x88] sm:$0xff] %vm334_vm3, %v744_v18  ;;  %v1515_v36 = vunpack.c.l.b16 %v922_v27  ;;  %v905_v15 = vpack.c.bf16 %v873_v9, %v873_v9  ;;  %v1497_v27 = vunpack.c.l.b16 %v904_v19 }
  0xcb   : > { %v718_v24 = vpop.f32.mrf.mxu3 }
  0xcc   : > { %v719_v25 = vadd.f32 %v8973_v23, %v718_v24  ;;  %v1498_v22 = vunpack.c.l.b16 %v905_v15  ;;  %v997_v24 = vld [vmem:[#allocation2 + $0x4f] sm:$0xff] }
  0xcd   : > { %v675_v28 = vpop.f32.mrf.mxu0 }
  0xce   : > { %v762_v29 = vmax.f32 %v719_v25, 0.0  ;;  %v676_v30 = vadd.f32 %v8973_v23, %v675_v28  ;;  %1541 = vrot.lane.b32.xlu1 %v1524_v26, %s8816_s23  ;;  %v8693_v26 = vld [vmem:[%s11335_s3 + $0x38] sm:$0xff]  ;;  %v996_v28 = vld [vmem:[#allocation2 + $0x47] sm:$0xff] }
  0xcf   : > { %v891_v31 = vld [vmem:[#allocation2 + $0x190] sm:$0xff]  ;;  %2823 = vmatpush.bf16.msra.mxu1 %v8693_v26  ;;  %8778 = vmatpush.bf16.msra.mxu2 %v8693_v26 }
  0xd0   : > { %794 = vst.msk [vmem:[#allocation2 + $0x1a8] sm:$0xff] %vm334_vm3, %v762_v29  ;;  %v745_v34 = vmax.f32 %v676_v30, 0.0  ;;  %v923_v35 = vpack.c.bf16 %v891_v31, %v891_v31  ;;  %v9153_v29 = vpack.c.b16 %v1498_v22, %v1497_v27  ;;  %v1029_v30 = vpack.c.bf16 %v997_v24, %v997_v24 }
  0xd1   : > { %v874_v47 = vld [vmem:[#allocation2 + $0x88] sm:$0xff] }
  0xd2   : > { %777 = vst.msk [vmem:[#allocation2 + $0x90] sm:$0xff] %vm334_vm3, %v745_v34  ;;  %v1516_v37 = vunpack.c.l.b16 %v923_v35  ;;  %v1028_v35 = vpack.c.bf16 %v996_v28, %v996_v28  ;;  %v1750_v38 = vunpack.c.l.b16 %v1029_v30 }
  0xd3   : > { %v720_v40 = vpop.f32.mrf.mxu3  ;;  %2824 = vmatpush.bf16.msra.mxu1 %v8692_v33  ;;  %8779 = vmatpush.bf16.msra.mxu2 %v8692_v33 }
  0xd4   : > { %v721_v41 = vadd.f32 %v8973_v23, %v720_v40  ;;  %v1535_v42 = vpack.c.b16 %v1516_v37, %v1515_v36 }
  0xd5   : > { %v678_v43 = vpop.f32.mrf.mxu0 }
  0xd6   : > { %v763_v44 = vmax.f32 %v721_v41, 0.0  ;;  %v679_v45 = vadd.f32 %v8973_v23, %v678_v43  ;;  %1563 = vrot.lane.b32.xlu2 %v1535_v42, %s8816_s23  ;;  %v8691_v43 = vld [vmem:[%s11335_s3 + $0x28] sm:$0xff] }
  0xd7   : > { %2825 = vmatpush.bf16.msra.mxu1 %v8691_v43  ;;  %8780 = vmatpush.bf16.msra.mxu2 %v8691_v43 }
  0xd8   : > { %795 = vst.msk [vmem:[#allocation2 + $0x1b0] sm:$0xff] %vm334_vm3, %v763_v44  ;;  %v746_v48 = vmax.f32 %v679_v45, 0.0  ;;  %v1749_v44 = vunpack.c.l.b16 %v1028_v35  ;;  %v8686_v35 = vld [vmem:[%s11335_s3] sm:$0xff] }
  0xd9   : > { %v875_v42 = vld [vmem:[#allocation2 + $0x90] sm:$0xff] }
  0xda   : > { %778 = vst.msk [vmem:[#allocation2 + $0xa8] sm:$0xff] %vm334_vm3, %v746_v48  ;;  %v1780_v48 = vpack.c.b16 %v1750_v38, %v1749_v44 }
  0xdb   : > { %v723_v50 = vpop.f32.mrf.mxu3 }
  0xdc   : > { %v724_v51 = vadd.f32 %v8973_v23, %v723_v50 }
  0xdd   : > { %v680_v52 = vpop.f32.mrf.mxu0 }
  0xde   : > { %v764_v53 = vmax.f32 %v724_v51, 0.0  ;;  %v681_v54 = vadd.f32 %v8973_v23, %v680_v52  ;;  %1539 = vrot.lane.b32.xlu2 %v1523_v49, %s8816_s23  ;;  %v907_v51 = vpack.c.bf16 %v875_v42, %v875_v42 }
  0xe0   : > { %796 = vst.msk [vmem:[#allocation2 + $0x1c8] sm:$0xff] %vm334_vm3, %v764_v53  ;;  %v747_v55 = vmax.f32 %v681_v54, 0.0 }
  0xe2   : > { %779 = vst.msk [vmem:[#allocation2 + $0xb0] sm:$0xff] %vm334_vm3, %v747_v55  ;;  %v906_v55 = vpack.c.bf16 %v874_v47, %v874_v47 }
  0xe3   : > { %v725_v56 = vpop.f32.mrf.mxu3 }
  0xe4   : > { %v726_v57 = vadd.f32 %v8973_v23, %v725_v56  ;;  %v8690_v56 = vld [vmem:[%s11335_s3 + $0x20] sm:$0xff] }
  0xe5   : > { %v683_v58 = vpop.f32.mrf.mxu0  ;;  %2826 = vmatpush.bf16.msra.mxu1 %v8690_v56  ;;  %8781 = vmatpush.bf16.msra.mxu2 %v8690_v56 }
  0xe6   : > { %v765_v59 = vmax.f32 %v726_v57, 0.0  ;;  %v684_v60 = vadd.f32 %v8973_v23, %v683_v58 }
  0xe7   : > { %v894_v62 = vld [vmem:[#allocation2 + $0x1c8] sm:$0xff] }
  0xe8   : > { %797 = vst.msk [vmem:[#allocation2 + $0x1d0] sm:$0xff] %vm334_vm3, %v765_v59  ;;  %v748_v61 = vmax.f32 %v684_v60, 0.0  ;;  %v926_v1 = vpack.c.bf16 %v894_v62, %v894_v62  ;;  %v1500_v59 = vunpack.c.l.b16 %v907_v51  ;;  %v999_v60 = vld [vmem:[#allocation2 + $0x6f] sm:$0xff] }
  0xe9   : > { %v1003_v62 = vld [vmem:[#allocation2 + $0xaf] sm:$0xff] }
  0xea   : > { %780 = vst.msk [vmem:[#allocation2 + $0xc8] sm:$0xff] %vm334_vm3, %v748_v61  ;;  %v1519_v8 = vunpack.c.l.b16 %v926_v1  ;;  %v8689_v61 = vld [vmem:[%s11335_s3 + $0x18] sm:$0xff]  ;;  %v1002_v1 = vld [vmem:[#allocation2 + $0xa7] sm:$0xff] }
  0xeb   : > { %v728_v63 = vpop.f32.mrf.mxu3  ;;  %2827 = vmatpush.bf16.msra.mxu1 %v8689_v61  ;;  %8782 = vmatpush.bf16.msra.mxu2 %v8689_v61  ;;  %v1034_v9 = vpack.c.bf16 %v1002_v1, %v1002_v1 }
  0xec   : > { %v729_v0 = vadd.f32 %v8973_v23, %v728_v63 }
  0xed   : > { %v685_v2 = vpop.f32.mrf.mxu0  ;;  %v1755_v19 = vunpack.c.l.b16 %v1034_v9 }
  0xee   : > { %v766_v3 = vmax.f32 %v729_v0, 0.0  ;;  %v686_v4 = vadd.f32 %v8973_v23, %v685_v2  ;;  %v1499_v0 = vunpack.c.l.b16 %v906_v55  ;;  %v998_v2 = vld [vmem:[#allocation2 + $0x67] sm:$0xff] }
  0xef   : > { %v895_v5 = vld [vmem:[#allocation2 + $0x1d0] sm:$0xff] }
  0xf0   : > { %798 = vst.msk [vmem:[#allocation2 + $0x1e8] sm:$0xff] %vm334_vm3, %v766_v3  ;;  %v749_v6 = vmax.f32 %v686_v4, 0.0  ;;  %v927_v7 = vpack.c.bf16 %v895_v5, %v895_v5  ;;  %v1031_v3 = vpack.c.bf16 %v999_v60, %v999_v60  ;;  %v9180_v5 = vpack.c.b16 %v1500_v59, %v1499_v0 }
  0xf1   : > { %v878_v46 = vld [vmem:[#allocation2 + $0xc8] sm:$0xff] }
  0xf2   : > { %781 = vst.msk [vmem:[#allocation2 + $0xd0] sm:$0xff] %vm334_vm3, %v749_v6  ;;  %v1520_v10 = vunpack.c.l.b16 %v927_v7  ;;  %v910_v54 = vpack.c.bf16 %v878_v46, %v878_v46  ;;  %v1035_v6 = vpack.c.bf16 %v1003_v62, %v1003_v62  ;;  %v1752_v15 = vunpack.c.l.b16 %v1031_v3  ;;  %v1004_v22 = vld [vmem:[#allocation2 + $0xc7] sm:$0xff] }
  0xf3   : > { %v730_v11 = vpop.f32.mrf.mxu3  ;;  %v1251_v46 = vld [vmem:[#allocation2 + $0x48] sm:$0xff] }
  0xf4   : > { %v731_v13 = vadd.f32 %v8973_v23, %v730_v11  ;;  %v9143_v14 = vpack.c.b16 %v1520_v10, %v1519_v8  ;;  %v1503_v63 = vunpack.c.l.b16 %v910_v54  ;;  %v1030_v10 = vpack.c.bf16 %v998_v2, %v998_v2  ;;  %v8688_v11 = vld [vmem:[%s11335_s3 + $0x10] sm:$0xff] }
  0xf5   : > { %v688_v16 = vpop.f32.mrf.mxu0  ;;  %2828 = vmatpush.bf16.msra.mxu1 %v8688_v11  ;;  %8783 = vmatpush.bf16.msra.mxu2 %v8688_v11  ;;  %v1283_v56 = vpack.c.bf16 %v1251_v46, %v1251_v46 }
  0xf6   : > { %v767_v17 = vmax.f32 %v731_v13, 0.0  ;;  %v689_v18 = vadd.f32 %v8973_v23, %v688_v16  ;;  %1567 = vrot.lane.b32.xlu2 %v9143_v14, %s8816_s23  ;;  %v1756_v13 = vunpack.c.l.b16 %v1035_v6 }
  0xf7   : > { %v896_v25 = vld [vmem:[#allocation2 + $0x1e8] sm:$0xff]  ;;  %v2259_v1 = vunpack.c.l.b16 %v1283_v56 }
  0xf8   : > { %799 = vst.msk [vmem:[#allocation2 + $0x1f0] sm:$0xff] %vm334_vm3, %v767_v17  ;;  %v750_v20 = vmax.f32 %v689_v18, 0.0  ;;  %v928_v31 = vpack.c.bf16 %v896_v25, %v896_v25  ;;  %v8687_v17 = vld [vmem:[%s11335_s3 + $0x8] sm:$0xff]  ;;  %v1783_v26 = vpack.c.b16 %v1756_v13, %v1755_v19  ;;  %v893_v13 = vld [vmem:[#allocation2 + $0x1b0] sm:$0xff] }
  0xf9   : > { %v879_v41 = vld [vmem:[#allocation2 + $0xd0] sm:$0xff]  ;;  %2829 = vmatpush.bf16.msra.mxu1 %v8687_v17  ;;  %8784 = vmatpush.bf16.msra.mxu2 %v8687_v17  ;;  %v802_v19 = vld [vmem:[#allocation2 + $0x7] sm:$0xff] }
  0xfa   : > { %782 = vst.msk [vmem:[#allocation2 + $0xe8] sm:$0xff] %vm334_vm3, %v750_v20  ;;  %v1521_v40 = vunpack.c.l.b16 %v928_v31  ;;  %v911_v50 = vpack.c.bf16 %v879_v41, %v879_v41  ;;  %v1005_v16 = vld [vmem:[#allocation2 + $0xcf] sm:$0xff]  ;;  %v1751_v20 = vunpack.c.l.b16 %v1030_v10  ;;  %v1036_v31 = vpack.c.bf16 %v1004_v22, %v1004_v22 }
  0xfb   : > { %v1037_v24 = vpack.c.bf16 %v1005_v16, %v1005_v16 }
  0xfc   : > { %v1504_v58 = vunpack.c.l.b16 %v911_v50  ;;  %v1781_v27 = vpack.c.b16 %v1752_v15, %v1751_v20  ;;  %v1757_v41 = vunpack.c.l.b16 %v1036_v31  ;;  %v803_v20 = vld [vmem:[#allocation2 + $0xf] sm:$0xff]  ;;  %v834_v31 = vpack.c.bf16 %v802_v19, %v802_v19 }
  0xfd   : > { %v690_v32 = vpop.f32.mrf.mxu0  ;;  %2830 = vmatpush.bf16.msra.mxu1 %v8686_v35  ;;  %8785 = vmatpush.bf16.msra.mxu2 %v8686_v35 }
  0xfe   : > { %v691_v34 = vadd.f32 %v8973_v23, %v690_v32  ;;  %1545 = vrot.lane.b32.xlu2 %v9153_v29, %s8816_s23  ;;  %v9178_v4 = vpack.c.b16 %v1504_v58, %v1503_v63 }
  0xff   : > { %v897_v36 = vld [vmem:[#allocation2 + $0x1f0] sm:$0xff] }
 0x100   : > { %v751_v37 = vmax.f32 %v691_v34, 0.0  ;;  %v929_v39 = vpack.c.bf16 %v897_v36, %v897_v36  ;;  %v1758_v36 = vunpack.c.l.b16 %v1037_v24 }
 0x101   : > { %v880_v25 = vld [vmem:[#allocation2 + $0xe8] sm:$0xff] }
 0x102   : > { %783 = vst.msk [vmem:[#allocation2 + $0xf0] sm:$0xff] %vm334_vm3, %v751_v37  ;;  %v1522_v45 = vunpack.c.l.b16 %v929_v39  ;;  %v912_v34 = vpack.c.bf16 %v880_v25, %v880_v25  ;;  %v1784_v47 = vpack.c.b16 %v1758_v36, %v1757_v41  ;;  %v925_v25 = vpack.c.bf16 %v893_v13, %v893_v13  ;;  %v994_v13 = vld [vmem:[#allocation2 + $0x27] sm:$0xff] }
 0x103   : > { %v1411_v41 = vunpack.c.l.b16 %v834_v31  ;;  %v1026_v19 = vpack.c.bf16 %v994_v13, %v994_v13 }
 0x104   : > { %v9165_v49 = vpack.c.b16 %v1522_v45, %v1521_v40  ;;  %v1252_v40 = vld [vmem:[#allocation2 + $0x50] sm:$0xff]  ;;  %v1505_v44 = vunpack.c.l.b16 %v912_v34 }
 0x105   : > { %v693_v52 = vpop.f32.mrf.mxu0  ;;  %v1284_v50 = vpack.c.bf16 %v1252_v40, %v1252_v40  ;;  %v1013_v40 = vld [vmem:[#allocation2 + $0x14f] sm:$0xff] }
 0x106   : > { %v694_v53 = vadd.f32 %v8973_v23, %v693_v52  ;;  %1797 = vrot.lane.b32.xlu2 %v1780_v48, %s8816_s23  ;;  %1569 = vrot.lane.b32.xlu1 %v9165_v49, %s8816_s23  ;;  %v1006_v48 = vld [vmem:[#allocation2 + $0xe7] sm:$0xff]  ;;  %v1045_v46 = vpack.c.bf16 %v1013_v40, %v1013_v40 }
 0x107   : > { %v1038_v59 = vpack.c.bf16 %v1006_v48, %v1006_v48  ;;  %v2260_v62 = vunpack.c.l.b16 %v1284_v50 }
 0x108   : > { %v752_v57 = vmax.f32 %v694_v53, 0.0 }
 0x109   : > { %v881_v18 = vld [vmem:[#allocation2 + $0xf0] sm:$0xff]  ;;  %v1759_v0 = vunpack.c.l.b16 %v1038_v59  ;;  %v9212_v6 = vpack.c.b16 %v2260_v62, %v2259_v1 }
 0x10a   : > { %784 = vst.msk [vmem:[#allocation2 + $0x108] sm:$0xff] %vm334_vm3, %v752_v57  ;;  %v913_v28 = vpack.c.bf16 %v881_v18, %v881_v18  ;;  %v1007_v43 = vld [vmem:[#allocation2 + $0xef] sm:$0xff] }
 0x10b   : > { %v1039_v54 = vpack.c.bf16 %v1007_v43, %v1007_v43  ;;  %v1258_v43 = vld [vmem:[#allocation2 + $0xb0] sm:$0xff] }
 0x10c   : > { %v1506_v38 = vunpack.c.l.b16 %v913_v28  ;;  %v1015_v1 = vld [vmem:[#allocation2 + $0x16f] sm:$0xff] }
 0x10d   : > { %v695_v7 = vpop.f32.mrf.mxu0  ;;  %v1760_v61 = vunpack.c.l.b16 %v1039_v54 }
 0x10e   : > { %v696_v8 = vadd.f32 %v8973_v23, %v695_v7  ;;  %1551 = vrot.lane.b32.xlu2 %v9178_v4, %s8816_s23  ;;  %1547 = vrot.lane.b32.xlu1 %v9180_v5, %s8816_s23  ;;  %v9201_v51 = vpack.c.b16 %v1506_v38, %v1505_v44  ;;  %v1518_v38 = vunpack.c.l.b16 %v925_v25  ;;  %v1747_v25 = vunpack.c.l.b16 %v1026_v19 }
 0x10f   : > { %v1785_v3 = vpack.c.b16 %v1760_v61, %v1759_v0  ;;  %v1014_v0 = vld [vmem:[#allocation2 + $0x167] sm:$0xff] }
 0x110   : > { %v753_v12 = vmax.f32 %v696_v8, 0.0 }
 0x111   : > { %v882_v32 = vld [vmem:[#allocation2 + $0x108] sm:$0xff] }
 0x112   : > { %785 = vst.msk [vmem:[#allocation2 + $0x110] sm:$0xff] %vm334_vm3, %v753_v12  ;;  %v914_v39 = vpack.c.bf16 %v882_v32, %v882_v32  ;;  %v1008_v2 = vld [vmem:[#allocation2 + $0x107] sm:$0xff]  ;;  %v835_v32 = vpack.c.bf16 %v803_v20, %v803_v20 }
 0x113   : > { %v1040_v9 = vpack.c.bf16 %v1008_v2, %v1008_v2  ;;  %v892_v12 = vld [vmem:[#allocation2 + $0x1a8] sm:$0xff] }
 0x114   : > { %v1507_v52 = vunpack.c.l.b16 %v914_v39  ;;  %v924_v24 = vpack.c.bf16 %v892_v12, %v892_v12  ;;  %v1012_v39 = vld [vmem:[#allocation2 + $0x147] sm:$0xff] }
 0x115   : > { %v698_v30 = vpop.f32.mrf.mxu0  ;;  %v1761_v17 = vunpack.c.l.b16 %v1040_v9  ;;  %v1016_v20 = vld [vmem:[#allocation2 + $0x187] sm:$0xff] }
 0x116   : > { %v699_v33 = vadd.f32 %v8973_v23, %v698_v30  ;;  %1803 = vrot.lane.b32.xlu2 %v1783_v26, %s8816_s23  ;;  %1799 = vrot.lane.b32.xlu1 %v1781_v27, %s8816_s23 }
 0x118   : > { %v754_v37 = vmax.f32 %v699_v33, 0.0 }
 0x119   : > { %v883_v42 = vld [vmem:[#allocation2 + $0x110] sm:$0xff] }
 0x11a   : > { %786 = vst.msk [vmem:[#allocation2 + $0x128] sm:$0xff] %vm334_vm3, %v754_v37  ;;  %v915_v45 = vpack.c.bf16 %v883_v42, %v883_v42  ;;  %v1009_v63 = vld [vmem:[#allocation2 + $0x10f] sm:$0xff]  ;;  %v1517_v37 = vunpack.c.l.b16 %v924_v24  ;;  %v1412_v42 = vunpack.c.l.b16 %v835_v32 }
 0x11b   : > { %v1041_v7 = vpack.c.bf16 %v1009_v63, %v1009_v63 }
 0x11c   : > { %v1508_v53 = vunpack.c.l.b16 %v915_v45  ;;  %v1044_v45 = vpack.c.bf16 %v1012_v39, %v1012_v39 }
 0x11d   : > { %v700_v55 = vpop.f32.mrf.mxu0  ;;  %v1762_v10 = vunpack.c.l.b16 %v1041_v7 }
 0x11e   : > { %v701_v57 = vadd.f32 %v8973_v23, %v700_v55  ;;  %1805 = vrot.lane.b32.xlu2 %v1784_v47, %s8816_s23  ;;  %1553 = vrot.lane.b32.xlu1 %v9201_v51, %s8816_s23  ;;  %v9207_v58 = vpack.c.b16 %v1508_v53, %v1507_v52  ;;  %v733_v47 = vpop.f32.mrf.mxu3  ;;  %v9233_v52 = vpack.c.b16 %v1518_v38, %v1517_v37  ;;  %v1765_v59 = vunpack.c.l.b16 %v1044_v45  ;;  %v1019_v37 = vld [vmem:[#allocation2 + $0x1af] sm:$0xff] }
 0x11f   : > { %v9217_v26 = vpack.c.b16 %v1762_v10, %v1761_v17  ;;  %v1290_v53 = vpack.c.bf16 %v1258_v43, %v1258_v43  ;;  %v734_v54 = vadd.f32 %v8973_v23, %v733_v47  ;;  %v1443_v55 = vpack.c.b16 %v1412_v42, %v1411_v41  ;;  %v1001_v38 = vld [vmem:[#allocation2 + $0x8f] sm:$0xff]  ;;  %v1000_v42 = vld [vmem:[#allocation2 + $0x87] sm:$0xff] }
 0x120   : > { %v755_v60 = vmax.f32 %v701_v57, 0.0  ;;  %1555 = vrot.lane.b32.xlu0 %v9207_v58, %s8816_s23  ;;  %v1046_v10 = vpack.c.bf16 %v1014_v0, %v1014_v0  ;;  %v1051_v41 = vpack.c.bf16 %v1019_v37, %v1019_v37  ;;  %v1032_v45 = vpack.c.bf16 %v1000_v42, %v1000_v42  ;;  %v1267_v0 = vld [vmem:[#allocation2 + $0x148] sm:$0xff] }
 0x121   : > { %v884_v8 = vld [vmem:[#allocation2 + $0x128] sm:$0xff]  ;;  %v768_v57 = vmax.f32 %v734_v54, 0.0  ;;  %v2266_v62 = vunpack.c.l.b16 %v1290_v53  ;;  %v1123_v54 = vld [vmem:[#allocation2 + $0x31] sm:$0xff] }
 0x122   : > { %787 = vst.msk [vmem:[#allocation2 + $0x130] sm:$0xff] %vm334_vm3, %v755_v60  ;;  %v916_v11 = vpack.c.bf16 %v884_v8, %v884_v8  ;;  %v1010_v22 = vld [vmem:[#allocation2 + $0x127] sm:$0xff]  ;;  %v1766_v60 = vunpack.c.l.b16 %v1045_v46  ;;  %v1767_v17 = vunpack.c.l.b16 %v1046_v10 }
 0x123   : > { %v1042_v34 = vpack.c.bf16 %v1010_v22, %v1010_v22  ;;  %800 = vst.msk [vmem:[#allocation2 + $0x208] sm:$0xff] %vm334_vm3, %v768_v57  ;;  %v1017_v22 = vld [vmem:[#allocation2 + $0x18f] sm:$0xff]  ;;  %v1020_v46 = vld [vmem:[#allocation2 + $0x1c7] sm:$0xff] }
 0x124   : > { %v1509_v27 = vunpack.c.l.b16 %v916_v11  ;;  %v1047_v11 = vpack.c.bf16 %v1015_v1, %v1015_v1  ;;  %v1122_v53 = vld [vmem:[#allocation2 + $0x29] sm:$0xff]  ;;  %v1052_v57 = vpack.c.bf16 %v1020_v46, %v1020_v46  ;;  %v8717_v1 = vld [vmem:[%s11335_s3 + $0xf8] sm:$0xff] }
 0x125   : > { %v1763_v44 = vunpack.c.l.b16 %v1042_v34  ;;  %3090 = vmatpush.bf16.msrb.mxu0 %v8717_v1  ;;  %v1129_v1 = vld [vmem:[#allocation2 + $0x91] sm:$0xff] }
 0x126   : > { %1807 = vrot.lane.b32.xlu2 %v1785_v3, %s8816_s23  ;;  %2307 = vrot.lane.b32.xlu1 %v9212_v6, %s8816_s23  ;;  %v9244_v3 = vpack.c.b16 %v1766_v60, %v1765_v59  ;;  %v735_v7 = vpop.f32.mrf.mxu3  ;;  %v1154_v60 = vpack.c.bf16 %v1122_v53, %v1122_v53 }
 0x127   : > { %v736_v12 = vadd.f32 %v8973_v23, %v735_v7  ;;  %v1268_v7 = vld [vmem:[#allocation2 + $0x150] sm:$0xff] }
 0x128   : > { %v9229_v48 = vpop.permute.xlu1 %1559 }
 0x129   : > { %v885_v15 = vld [vmem:[#allocation2 + $0x130] sm:$0xff] }
 0x12a   : > { %v1011_v16 = vld [vmem:[#allocation2 + $0x12f] sm:$0xff]  ;;  %v917_v18 = vpack.c.bf16 %v885_v15, %v885_v15 }
 0x12b   : > { %v1043_v30 = vpack.c.bf16 %v1011_v16, %v1011_v16  ;;  %v769_v16 = vmax.f32 %v736_v12, 0.0  ;;  %v1299_v12 = vpack.c.bf16 %v1267_v0, %v1267_v0  ;;  %v1128_v0 = vld [vmem:[#allocation2 + $0x89] sm:$0xff] }
 0x12c   : > { %v1510_v28 = vunpack.c.l.b16 %v917_v18  ;;  %v1768_v18 = vunpack.c.l.b16 %v1047_v11  ;;  %v1125_v11 = vld [vmem:[#allocation2 + $0x51] sm:$0xff] }
 0x12d   : > { %v1764_v36 = vunpack.c.l.b16 %v1043_v30  ;;  %801 = vst.msk [vmem:[#allocation2 + $0x210] sm:$0xff] %vm334_vm3, %v769_v16  ;;  %v1157_v19 = vpack.c.bf16 %v1125_v11, %v1125_v11  ;;  %v8712_v11 = vld [vmem:[%s11335_s3 + $0xd0] sm:$0xff] }
 0x12e   : > { %1809 = vrot.lane.b32.xlu2 %v9217_v26, %s8816_s23  ;;  %2309 = vrot.lane.b32.xlu1 %v9153_v29, %s8816_s23  ;;  %v9223_v33 = vpack.c.b16 %v1510_v28, %v1509_v27  ;;  %v1257_v29 = vld [vmem:[#allocation2 + $0xa8] sm:$0xff]  ;;  %v9255_v23 = vpack.c.b16 %v1768_v18, %v1767_v17  ;;  %v1048_v27 = vpack.c.bf16 %v1016_v20, %v1016_v20 }
 0x12f   : > { %v9231_v50 = vpack.c.b16 %v1764_v36, %v1763_v44  ;;  %v1289_v56 = vpack.c.bf16 %v1257_v29, %v1257_v29  ;;  %v1049_v28 = vpack.c.bf16 %v1017_v22, %v1017_v22  ;;  %v1018_v36 = vld [vmem:[#allocation2 + $0x1a7] sm:$0xff]  ;;  %v1772_v44 = vunpack.c.l.b16 %v1051_v41  ;;  %v1021_v29 = vld [vmem:[#allocation2 + $0x1cf] sm:$0xff] }
 0x130   : > { %v9225_v35 = vpop.permute.xlu2 %1563  ;;  %1557 = vrot.lane.b32.xlu0 %v9223_v33, %s8816_s23  ;;  %v1769_v31 = vunpack.c.l.b16 %v1048_v27  ;;  %v1050_v40 = vpack.c.bf16 %v1018_v36, %v1018_v36  ;;  %v1053_v59 = vpack.c.bf16 %v1021_v29, %v1021_v29  ;;  %v1300_v17 = vpack.c.bf16 %v1268_v7, %v1268_v7  ;;  %v8716_v22 = vld [vmem:[%s11335_s3 + $0xf0] sm:$0xff] }
 0x131   : > { %v2265_v2 = vunpack.c.l.b16 %v1289_v56  ;;  %v1770_v32 = vunpack.c.l.b16 %v1049_v28  ;;  %v1753_v56 = vunpack.c.l.b16 %v1032_v45  ;;  %3091 = vmatpush.bf16.msrb.mxu0 %v8716_v22  ;;  %v1270_v36 = vld [vmem:[#allocation2 + $0x170] sm:$0xff]  ;;  %v8701_v22 = vld [vmem:[%s11335_s3 + $0x78] sm:$0xff] }
 0x132   : > { %v1771_v43 = vunpack.c.l.b16 %v1050_v40  ;;  %v1126_v40 = vld [vmem:[#allocation2 + $0x69] sm:$0xff]  ;;  %v1127_v41 = vld [vmem:[#allocation2 + $0x71] sm:$0xff]  ;;  %2912 = vmatpush.bf16.msrb.mxu2 %v8701_v22 }
 0x133   : > { %v2294_v9 = vpack.c.b16 %v2266_v62, %v2265_v2  ;;  %v9263_v39 = vpack.c.b16 %v1770_v32, %v1769_v31  ;;  %v1773_v62 = vunpack.c.l.b16 %v1052_v57  ;;  %v1022_v2 = vld [vmem:[#allocation2 + $0x1e7] sm:$0xff]  ;;  %v1159_v53 = vpack.c.bf16 %v1127_v41, %v1127_v41  ;;  %v8713_v57 = vld [vmem:[%s11335_s3 + $0xd8] sm:$0xff] }
 0x134   : > { %v8715_v31 = vld [vmem:[%s11335_s3 + $0xe8] sm:$0xff] }
 0x135   : > { %3092 = vmatpush.bf16.msrb.mxu0 %v8715_v31  ;;  %v8707_v22 = vld [vmem:[%s11335_s3 + $0xa8] sm:$0xff] }
 0x136   : > { %1811 = vrot.lane.b32.xlu2 %v9231_v50, %s8816_s23  ;;  %2311 = vrot.lane.b32.xlu1 %v9180_v5, %s8816_s23  ;;  %v995_v5 = vld [vmem:[#allocation2 + $0x2f] sm:$0xff] }
 0x137   : > { %v1027_v15 = vpack.c.bf16 %v995_v5, %v995_v5  ;;  %v1023_v5 = vld [vmem:[#allocation2 + $0x1ef] sm:$0xff] }
 0x138   : > { %v1540_v61 = vpop.permute.xlu2 %1539  ;;  %1565 = vrot.lane.b32.xlu0 %v9233_v52, %s8816_s23  ;;  %v9246_v8 = vpop.permute.xlu1 %1561  ;;  %v1055_v16 = vpack.c.bf16 %v1023_v5, %v1023_v5 }
 0x139   : > { %v1573_v63 = vsel %vm334_vm3, %v1443_v55, %v1540_v61  ;;  %v1748_v24 = vunpack.c.l.b16 %v1027_v15  ;;  %v1791_v55 = vpack.c.b16 %v1772_v44, %v1771_v43  ;;  %v1155_v61 = vpack.c.bf16 %v1123_v54, %v1123_v54  ;;  %v8714_v54 = vld [vmem:[%s11335_s3 + $0xe0] sm:$0xff] }
 0x13a   : > { %2831 = vmatmul.bf16.vlgmr.msra.gmra.mxu1 %v1573_v63  ;;  %v1774_v63 = vunpack.c.l.b16 %v1053_v59  ;;  %v1054_v15 = vpack.c.bf16 %v1022_v2, %v1022_v2  ;;  %v1776_v28 = vunpack.c.l.b16 %v1055_v16  ;;  %v1302_v44 = vpack.c.bf16 %v1270_v36, %v1270_v36  ;;  %3093 = vmatpush.bf16.msrb.mxu0 %v8714_v54  ;;  %v1271_v59 = vld [vmem:[#allocation2 + $0x188] sm:$0xff] }
 0x13b   : > { %v2004_v10 = vunpack.c.l.b16 %v1155_v61  ;;  %v1303_v5 = vpack.c.bf16 %v1271_v59, %v1271_v59 }
 0x13c   : > { %v1792_v13 = vpack.c.b16 %v1774_v63, %v1773_v62  ;;  %v1775_v27 = vunpack.c.l.b16 %v1054_v15  ;;  %v2008_v63 = vunpack.c.l.b16 %v1159_v53 }
 0x13e   : > { %1813 = vrot.lane.b32.xlu2 %v9244_v3, %s8816_s23  ;;  %2313 = vrot.lane.b32.xlu1 %v2294_v9, %s8816_s23  ;;  %v1793_v42 = vpack.c.b16 %v1776_v28, %v1775_v27 }
 0x13f   : > { %3094 = vmatpush.bf16.msrb.mxu0 %v8713_v57  ;;  %v1188_v57 = vld [vmem:[#allocation2 + $0x4f] sm:$0xff] }
 0x140   : > { %1543 = vrot.lane.b32.xlu0 %v9212_v6, %s8816_s23  ;;  %v1542_v30 = vpop.permute.xlu1 %1541  ;;  %v1779_v6 = vpack.c.b16 %v1748_v24, %v1747_v25  ;;  %v1024_v24 = vld [vmem:[#allocation2 + $0x207] sm:$0xff]  ;;  %v1025_v25 = vld [vmem:[#allocation2 + $0x20f] sm:$0xff] }
 0x141   : > { %v1056_v37 = vpack.c.bf16 %v1024_v24, %v1024_v24  ;;  %v8710_v24 = vld [vmem:[%s11335_s3 + $0xc0] sm:$0xff] }
 0x142   : > { %v1577_v34 = vsel %vm334_vm3, %v1779_v6, %v1542_v30  ;;  %v2275_v30 = vunpack.c.l.b16 %v1299_v12  ;;  %v2279_v12 = vunpack.c.l.b16 %v1303_v5 }
 0x143   : > { %v1777_v46 = vunpack.c.l.b16 %v1056_v37  ;;  %3095 = vmatpush.bf16.msrb.mxu0 %v8712_v11  ;;  %v8708_v11 = vld [vmem:[%s11335_s3 + $0xb0] sm:$0xff] }
 0x146   : > { %1815 = vrot.lane.b32.xlu2 %v9255_v23, %s8816_s23  ;;  %2315 = vrot.lane.b32.xlu1 %v9178_v4, %s8816_s23  ;;  %v1033_v4 = vpack.c.bf16 %v1001_v38, %v1001_v38  ;;  %v1057_v38 = vpack.c.bf16 %v1025_v25, %v1025_v25 }
 0x148   : > { %1795 = vrot.lane.b32.xlu0 %v1779_v6, %s8816_s23  ;;  %v1754_v47 = vunpack.c.l.b16 %v1033_v4  ;;  %v2276_v6 = vunpack.c.l.b16 %v1300_v17  ;;  %v1778_v29 = vunpack.c.l.b16 %v1057_v38  ;;  %v8711_v17 = vld [vmem:[%s11335_s3 + $0xc8] sm:$0xff] }
 0x149   : > { %3096 = vmatpush.bf16.msrb.mxu0 %v8711_v17 }
 0x14a   : > { %2836 = vmatmul.bf16.gmra.mxu1 %v1577_v34  ;;  %v1269_v34 = vld [vmem:[#allocation2 + $0x168] sm:$0xff]  ;;  %v2299_v4 = vpack.c.b16 %v2276_v6, %v2275_v30  ;;  %v1794_v61 = vpack.c.b16 %v1778_v29, %v1777_v46 }
 0x14b   : > { %v1301_v43 = vpack.c.bf16 %v1269_v34, %v1269_v34  ;;  %v1133_v34 = vld [vmem:[#allocation2 + $0xd1] sm:$0xff] }
 0x14c   : > { %v1165_v38 = vpack.c.bf16 %v1133_v34, %v1133_v34  ;;  %v8720_v34 = vld [vmem:[%s11335_s3 + $0x110] sm:$0xff] }
 0x14d   : > { %3097 = vmatpush.bf16.msrb.mxu0 %v8710_v24  ;;  %v1140_v24 = vld [vmem:[#allocation2 + $0x149] sm:$0xff] }
 0x14e   : > { %1817 = vrot.lane.b32.xlu2 %v9263_v39, %s8816_s23  ;;  %2317 = vrot.lane.b32.xlu1 %v9201_v51, %s8816_s23  ;;  %v9273_v51 = vpack.c.b16 %v1754_v47, %v1753_v56  ;;  %v1158_v47 = vpack.c.bf16 %v1126_v40, %v1126_v40  ;;  %v2278_v56 = vunpack.c.l.b16 %v1302_v44  ;;  %v8700_v44 = vld [vmem:[%s11335_s3 + $0x70] sm:$0xff] }
 0x14f   : > { %2913 = vmatpush.bf16.msrb.mxu2 %v8700_v44  ;;  %v1142_v44 = vld [vmem:[#allocation2 + $0x169] sm:$0xff] }
 0x150   : > { %1549 = vrot.lane.b32.xlu0 %v2294_v9, %s8816_s23  ;;  %v2003_v9 = vunpack.c.l.b16 %v1154_v60  ;;  %v1272_v60 = vld [vmem:[#allocation2 + $0x190] sm:$0xff]  ;;  %v2007_v62 = vunpack.c.l.b16 %v1158_v47 }
 0x151   : > { %v1304_v7 = vpack.c.bf16 %v1272_v60, %v1272_v60 }
 0x152   : > { %v2035_v20 = vpack.c.b16 %v2004_v10, %v2003_v9  ;;  %v2037_v9 = vpack.c.b16 %v2008_v63, %v2007_v62  ;;  %v1160_v10 = vpack.c.bf16 %v1128_v0, %v1128_v0  ;;  %v1220_v62 = vpack.c.bf16 %v1188_v57, %v1188_v57  ;;  %v8704_v57 = vld [vmem:[%s11335_s3 + $0x90] sm:$0xff] }
 0x154   : > { %v2009_v15 = vunpack.c.l.b16 %v1160_v10  ;;  %v1138_v10 = vld [vmem:[#allocation2 + $0x129] sm:$0xff] }
 0x156   : > { %1819 = vrot.lane.b32.xlu2 %v1791_v55, %s8816_s23  ;;  %2319 = vrot.lane.b32.xlu1 %v9207_v58, %s8816_s23  ;;  %v1124_v58 = vld [vmem:[#allocation2 + $0x49] sm:$0xff]  ;;  %v2277_v55 = vunpack.c.l.b16 %v1301_v43  ;;  %v1135_v43 = vld [vmem:[#allocation2 + $0xf1] sm:$0xff] }
 0x157   : > { %v1156_v18 = vpack.c.bf16 %v1124_v58, %v1124_v58  ;;  %v1161_v58 = vpack.c.bf16 %v1129_v1, %v1129_v1  ;;  %v1167_v29 = vpack.c.bf16 %v1135_v43, %v1135_v43 }
 0x158   : > { %1801 = vrot.lane.b32.xlu0 %v9273_v51, %s8816_s23  ;;  %v2300_v2 = vpack.c.b16 %v2278_v56, %v2277_v55  ;;  %v1136_v55 = vld [vmem:[#allocation2 + $0x109] sm:$0xff]  ;;  %v1137_v56 = vld [vmem:[#allocation2 + $0x111] sm:$0xff] }
 0x159   : > { %v2005_v32 = vunpack.c.l.b16 %v1156_v18  ;;  %v2010_v16 = vunpack.c.l.b16 %v1161_v58  ;;  %v1130_v18 = vld [vmem:[#allocation2 + $0xa9] sm:$0xff]  ;;  %v2016_v54 = vunpack.c.l.b16 %v1167_v29  ;;  %v1168_v60 = vpack.c.bf16 %v1136_v55, %v1136_v55  ;;  %v1139_v58 = vld [vmem:[#allocation2 + $0x131] sm:$0xff] }
 0x15a   : > { %v1162_v27 = vpack.c.bf16 %v1130_v18, %v1130_v18  ;;  %v1174_v55 = vpack.c.bf16 %v1142_v44, %v1142_v44  ;;  %v1617_v44 = vsel %vm334_vm3, %v9255_v23, %v9246_v8  ;;  %v1058_v8 = vld [vmem:[#allocation2 + $0x28] sm:$0xff] }
 0x15b   : > { %v2038_v25 = vpack.c.b16 %v2010_v16, %v2009_v15  ;;  %v1170_v15 = vpack.c.bf16 %v1138_v10, %v1138_v10  ;;  %v1171_v16 = vpack.c.bf16 %v1139_v58, %v1139_v58 }
 0x15c   : > { %v2011_v6 = vunpack.c.l.b16 %v1162_v27  ;;  %v1190_v27 = vld [vmem:[#allocation2 + $0x6f] sm:$0xff] }
 0x15e   : > { %1821 = vrot.lane.b32.xlu2 %v1792_v13, %s8816_s23  ;;  %2321 = vrot.lane.b32.xlu1 %v9223_v33, %s8816_s23  ;;  %v2006_v33 = vunpack.c.l.b16 %v1157_v19  ;;  %v2280_v13 = vunpack.c.l.b16 %v1304_v7  ;;  %v1131_v19 = vld [vmem:[#allocation2 + $0xb1] sm:$0xff] }
 0x15f   : > { %v1163_v28 = vpack.c.bf16 %v1131_v19, %v1131_v19  ;;  %v2019_v19 = vunpack.c.l.b16 %v1170_v15  ;;  %v1147_v15 = vld [vmem:[#allocation2 + $0x1b1] sm:$0xff] }
 0x160   : > { %2051 = vrot.lane.b32.xlu0 %v2035_v20, %s8816_s23  ;;  %v2036_v45 = vpack.c.b16 %v2006_v33, %v2005_v32  ;;  %v2301_v20 = vpack.c.b16 %v2280_v13, %v2279_v12  ;;  %v8721_v32 = vld [vmem:[%s11335_s3 + $0x118] sm:$0xff]  ;;  %v1132_v33 = vld [vmem:[#allocation2 + $0xc9] sm:$0xff] }
 0x161   : > { %v2012_v31 = vunpack.c.l.b16 %v1163_v28  ;;  %3183 = vmatpush.bf16.msrb.mxu1 %v8721_v32  ;;  %v1164_v37 = vpack.c.bf16 %v1132_v33, %v1132_v33  ;;  %v1189_v32 = vld [vmem:[#allocation2 + $0x67] sm:$0xff]  ;;  %v1222_v33 = vpack.c.bf16 %v1190_v27, %v1190_v27 }
 0x162   : > { %v1148_v27 = vld [vmem:[#allocation2 + $0x1c9] sm:$0xff] }
 0x163   : > { %v2039_v36 = vpack.c.b16 %v2012_v31, %v2011_v6  ;;  %v2013_v41 = vunpack.c.l.b16 %v1164_v37  ;;  %v1172_v6 = vpack.c.bf16 %v1140_v24, %v1140_v24  ;;  %v1221_v37 = vpack.c.bf16 %v1189_v32, %v1189_v32 }
 0x164   : > { %v2182_v43 = vunpack.c.l.b16 %v1222_v33  ;;  %v1180_v32 = vpack.c.bf16 %v1148_v27, %v1148_v27 }
 0x165   : > { %3184 = vmatpush.bf16.msrb.mxu1 %v8720_v34  ;;  %v2181_v29 = vunpack.c.l.b16 %v1221_v37  ;;  %v1193_v34 = vld [vmem:[#allocation2 + $0xa7] sm:$0xff] }
 0x166   : > { %1823 = vrot.lane.b32.xlu2 %v1793_v42, %s8816_s23  ;;  %2323 = vrot.lane.b32.xlu1 %v2299_v4, %s8816_s23  ;;  %v2014_v42 = vunpack.c.l.b16 %v1165_v38  ;;  %v1134_v4 = vld [vmem:[#allocation2 + $0xe9] sm:$0xff] }
 0x167   : > { %v1166_v46 = vpack.c.bf16 %v1134_v4, %v1134_v4 }
 0x168   : > { %2053 = vrot.lane.b32.xlu0 %v2036_v45, %s8816_s23  ;;  %v8709_v45 = vld [vmem:[%s11335_s3 + $0xb8] sm:$0xff] }
 0x169   : > { %3001 = vmatpush.bf16.msrb.mxu3 %v8709_v45  ;;  %v2015_v53 = vunpack.c.l.b16 %v1166_v46  ;;  %v1143_v45 = vld [vmem:[#allocation2 + $0x171] sm:$0xff] }
 0x16a   : > { %v8705_v46 = vld [vmem:[%s11335_s3 + $0x98] sm:$0xff] }
 0x16b   : > { %v2041_v59 = vpack.c.b16 %v2016_v54, %v2015_v53 }
 0x16d   : > { %3002 = vmatpush.bf16.msrb.mxu3 %v8708_v11 }
 0x16e   : > { %1825 = vrot.lane.b32.xlu2 %v1794_v61, %s8816_s23  ;;  %2325 = vrot.lane.b32.xlu1 %v2300_v2, %s8816_s23  ;;  %v1187_v61 = vld [vmem:[#allocation2 + $0x47] sm:$0xff]  ;;  %v2017_v2 = vunpack.c.l.b16 %v1168_v60 }
 0x16f   : > { %v1219_v0 = vpack.c.bf16 %v1187_v61, %v1187_v61 }
 0x170   : > { %2055 = vrot.lane.b32.xlu0 %v2037_v9, %s8816_s23  ;;  %v2180_v9 = vunpack.c.l.b16 %v1220_v62  ;;  %v8703_v62 = vld [vmem:[%s11335_s3 + $0x88] sm:$0xff] }
 0x171   : > { %v2179_v12 = vunpack.c.l.b16 %v1219_v0  ;;  %3003 = vmatpush.bf16.msrb.mxu3 %v8707_v22  ;;  %v1144_v0 = vld [vmem:[#allocation2 + $0x189] sm:$0xff]  ;;  %v1179_v22 = vpack.c.bf16 %v1147_v15, %v1147_v15  ;;  %v1621_v15 = vsel %vm334_vm3, %v9263_v39, %v9225_v35 }
 0x173   : > { %v9350_v17 = vpack.c.b16 %v2180_v9, %v2179_v12  ;;  %v8702_v9 = vld [vmem:[%s11335_s3 + $0x80] sm:$0xff]  ;;  %v1613_v12 = vsel %vm334_vm3, %v9244_v3, %v9229_v48  ;;  %v2028_v24 = vunpack.c.l.b16 %v1179_v22 }
 0x176   : > { %2327 = vrot.lane.b32.xlu1 %v2301_v20, %s8816_s23  ;;  %v2020_v20 = vunpack.c.l.b16 %v1171_v16  ;;  %v8697_v16 = vld [vmem:[%s11335_s3 + $0x58] sm:$0xff] }
 0x178   : > { %2057 = vrot.lane.b32.xlu0 %v2038_v25, %s8816_s23  ;;  %v9316_v30 = vpop.permute.xlu1 %1569  ;;  %v1141_v25 = vld [vmem:[#allocation2 + $0x151] sm:$0xff]  ;;  %v2043_v28 = vpack.c.b16 %v2020_v20, %v2019_v19 }
 0x179   : > { %v1173_v31 = vpack.c.bf16 %v1141_v25, %v1141_v25  ;;  %v8719_v25 = vld [vmem:[%s11335_s3 + $0x108] sm:$0xff] }
 0x17a   : > { %3185 = vmatpush.bf16.msrb.mxu1 %v8719_v25  ;;  %v1060_v25 = vld [vmem:[#allocation2 + $0x48] sm:$0xff] }
 0x17e   : > { %2329 = vrot.lane.b32.xlu1 %v9233_v52, %s8816_s23  ;;  %v2040_v52 = vpack.c.b16 %v2014_v42, %v2013_v41  ;;  %v2021_v41 = vunpack.c.l.b16 %v1172_v6  ;;  %v2022_v42 = vunpack.c.l.b16 %v1173_v31  ;;  %v1194_v6 = vld [vmem:[#allocation2 + $0xaf] sm:$0xff] }
 0x180   : > { %2059 = vrot.lane.b32.xlu0 %v2039_v36, %s8816_s23  ;;  %v9324_v40 = vpop.permute.xlu1 %1547  ;;  %v8706_v36 = vld [vmem:[%s11335_s3 + $0xa0] sm:$0xff]  ;;  %v2044_v54 = vpack.c.b16 %v2022_v42, %v2021_v41  ;;  %v2029_v42 = vunpack.c.l.b16 %v1180_v32 }
 0x181   : > { %3004 = vmatpush.bf16.msrb.mxu3 %v8706_v36  ;;  %v1226_v36 = vpack.c.bf16 %v1194_v6, %v1194_v6  ;;  %v1092_v6 = vpack.c.bf16 %v1060_v25, %v1060_v25 }
 0x185   : > { %3005 = vmatpush.bf16.msrb.mxu3 %v8705_v46  ;;  %v1151_v46 = vld [vmem:[#allocation2 + $0x1f1] sm:$0xff] }
 0x186   : > { %2331 = vrot.lane.b32.xlu1 %v9143_v14, %s8816_s23  ;;  %v1169_v14 = vpack.c.bf16 %v1137_v56, %v1137_v56  ;;  %v1175_v56 = vpack.c.bf16 %v1143_v45, %v1143_v45  ;;  %v2186_v45 = vunpack.c.l.b16 %v1226_v36  ;;  %v1197_v36 = vld [vmem:[#allocation2 + $0xe7] sm:$0xff] }
 0x188   : > { %2061 = vrot.lane.b32.xlu0 %v2040_v52, %s8816_s23  ;;  %v9335_v47 = vpop.permute.xlu1 %1799  ;;  %v2018_v5 = vunpack.c.l.b16 %v1169_v14  ;;  %v8698_v52 = vld [vmem:[%s11335_s3 + $0x60] sm:$0xff]  ;;  %v2023_v14 = vunpack.c.l.b16 %v1174_v55  ;;  %v2024_v61 = vunpack.c.l.b16 %v1175_v56 }
 0x189   : > { %3006 = vmatpush.bf16.msrb.mxu3 %v8704_v57  ;;  %v1183_v57 = vpack.c.bf16 %v1151_v46, %v1151_v46 }
 0x18a   : > { %v2042_v13 = vpack.c.b16 %v2018_v5, %v2017_v2  ;;  %v2045_v2 = vpack.c.b16 %v2024_v61, %v2023_v14  ;;  %v1176_v5 = vpack.c.bf16 %v1144_v0, %v1144_v0 }
 0x18b   : > { %v2032_v0 = vunpack.c.l.b16 %v1183_v57  ;;  %v830_v57 = vld [vmem:[#allocation2 + $0x1c7] sm:$0xff] }
 0x18c   : > { %v2025_v58 = vunpack.c.l.b16 %v1176_v5 }
 0x18d   : > { %3007 = vmatpush.bf16.msrb.mxu3 %v8703_v62 }
 0x18e   : > { %2333 = vrot.lane.b32.xlu1 %v9165_v49, %s8816_s23  ;;  %v8699_v49 = vld [vmem:[%s11335_s3 + $0x68] sm:$0xff] }
 0x18f   : > { %2914 = vmatpush.bf16.msrb.mxu2 %v8699_v49 }
 0x190   : > { %2063 = vrot.lane.b32.xlu0 %v2041_v59, %s8816_s23  ;;  %v9340_v63 = vpop.permute.xlu1 %1553 }
 0x191   : > { %3008 = vmatpush.bf16.msrb.mxu3 %v8702_v9  ;;  %v1195_v9 = vld [vmem:[#allocation2 + $0xc7] sm:$0xff] }
 0x192   : > { %v1556_v1 = vpop.permute.xlu0 %1555 }
 0x193   : > { %v1605_v7 = vsel %vm334_vm3, %v9217_v26, %v1556_v1  ;;  %2915 = vmatpush.bf16.msrb.mxu2 %v8698_v52  ;;  %v1145_v1 = vld [vmem:[#allocation2 + $0x191] sm:$0xff]  ;;  %v1150_v52 = vld [vmem:[#allocation2 + $0x1e9] sm:$0xff] }
 0x194   : > { %2871 = vmatmul.bf16.vlgmr.msra.gmra.mxu2 %v1605_v7  ;;  %v1177_v7 = vpack.c.bf16 %v1145_v1, %v1145_v1  ;;  %v1182_v56 = vpack.c.bf16 %v1150_v52, %v1150_v52  ;;  %v1090_v1 = vpack.c.bf16 %v1058_v8, %v1058_v8  ;;  %v862_v8 = vpack.c.bf16 %v830_v57, %v830_v57 }
 0x196   : > { %v2026_v49 = vunpack.c.l.b16 %v1177_v7  ;;  %v2031_v62 = vunpack.c.l.b16 %v1182_v56 }
 0x197   : > { %2916 = vmatpush.bf16.msrb.mxu2 %v8697_v16 }
 0x198   : > { %2065 = vrot.lane.b32.xlu0 %v2042_v13, %s8816_s23  ;;  %v2308_v26 = vpop.permute.xlu1 %2307  ;;  %v1146_v13 = vld [vmem:[#allocation2 + $0x1a9] sm:$0xff]  ;;  %v2046_v19 = vpack.c.b16 %v2026_v49, %v2025_v58  ;;  %v2049_v7 = vpack.c.b16 %v2032_v0, %v2031_v62 }
 0x199   : > { %v2341_v18 = vsel %vm334_vm3, %v9350_v17, %v2308_v26  ;;  %v9395_v26 = vpop.permute.xlu2 %1567  ;;  %v1178_v20 = vpack.c.bf16 %v1146_v13, %v1146_v13  ;;  %v1589_v13 = vsel %vm334_vm3, %v9273_v51, %v9324_v40  ;;  %v1061_v40 = vld [vmem:[#allocation2 + $0x50] sm:$0xff] }
 0x19a   : > { %3098 = vmatmul.bf16.vlgmr.msrb.gmra.mxu0 %v2341_v18  ;;  %v1093_v27 = vpack.c.bf16 %v1061_v40, %v1061_v40  ;;  %v833_v40 = vld [vmem:[#allocation2 + $0x1ef] sm:$0xff] }
 0x1a0   : > { %2067 = vrot.lane.b32.xlu0 %v2043_v28, %s8816_s23  ;;  %v2310_v53 = vpop.permute.xlu1 %2309  ;;  %v1149_v28 = vld [vmem:[#allocation2 + $0x1d1] sm:$0xff] }
 0x1a1   : > { %v1181_v33 = vpack.c.bf16 %v1149_v28, %v1149_v28  ;;  %v1546_v37 = vpop.permute.xlu2 %1545  ;;  %v8718_v28 = vld [vmem:[%s11335_s3 + $0x100] sm:$0xff] }
 0x1a2   : > { %v1558_v38 = vpop.permute.xlu0 %1557  ;;  %3186 = vmatpush.bf16.msrb.mxu1 %v8718_v28 }
 0x1a3   : > { %v1609_v4 = vsel %vm334_vm3, %v9231_v50, %v1558_v38  ;;  %v2212_v50 = vpack.c.b16 %v2182_v43, %v2181_v29  ;;  %v1225_v38 = vpack.c.bf16 %v1193_v34, %v1193_v34  ;;  %v8696_v29 = vld [vmem:[%s11335_s3 + $0x50] sm:$0xff]  ;;  %v1926_v34 = vunpack.c.l.b16 %v1093_v27  ;;  %v1064_v27 = vld [vmem:[#allocation2 + $0x88] sm:$0xff] }
 0x1a4   : > { %2876 = vmatmul.bf16.gmra.mxu2 %v1609_v4  ;;  %v2030_v4 = vunpack.c.l.b16 %v1181_v33 }
 0x1a5   : > { %v2345_v59 = vsel %vm334_vm3, %v2212_v50, %v2310_v53  ;;  %v1585_v43 = vsel %vm334_vm3, %v2212_v50, %v1546_v37  ;;  %v2185_v53 = vunpack.c.l.b16 %v1225_v38  ;;  %2917 = vmatpush.bf16.msrb.mxu2 %v8696_v29  ;;  %v1925_v38 = vunpack.c.l.b16 %v1092_v6 }
 0x1a6   : > { %v2048_v55 = vpack.c.b16 %v2030_v4, %v2029_v42  ;;  %v1096_v6 = vpack.c.bf16 %v1064_v27, %v1064_v27 }
 0x1a7   : > { %v2214_v50 = vpack.c.b16 %v2186_v45, %v2185_v53  ;;  %v8694_v53 = vld [vmem:[%s11335_s3 + $0x40] sm:$0xff] }
 0x1a8   : > { %2069 = vrot.lane.b32.xlu0 %v2044_v54, %s8816_s23  ;;  %v2312_v18 = vpop.permute.xlu1 %2311 }
 0x1a9   : > { %v2349_v48 = vsel %vm334_vm3, %v9273_v51, %v2312_v18 }
 0x1aa   : > { %v9378_v60 = vpop.permute.xlu0 %1565  ;;  %3103 = vmatmul.bf16.gmra.mxu0 %v2345_v59  ;;  %v1059_v59 = vld [vmem:[#allocation2 + $0x30] sm:$0xff] }
 0x1ab   : > { %v1091_v14 = vpack.c.bf16 %v1059_v59, %v1059_v59 }
 0x1ad   : > { %v1924_v5 = vunpack.c.l.b16 %v1091_v14  ;;  %v1062_v14 = vld [vmem:[#allocation2 + $0x68] sm:$0xff] }
 0x1ae   : > { %v1094_v0 = vpack.c.bf16 %v1062_v14, %v1062_v14 }
 0x1b0   : > { %2071 = vrot.lane.b32.xlu0 %v2045_v2, %s8816_s23  ;;  %v2314_v54 = vpop.permute.xlu1 %2313  ;;  %v1196_v2 = vld [vmem:[#allocation2 + $0xcf] sm:$0xff] }
 0x1b1   : > { %v2353_v23 = vsel %vm334_vm3, %v2214_v50, %v2314_v54  ;;  %v1228_v58 = vpack.c.bf16 %v1196_v2, %v1196_v2  ;;  %v1439_v2 = vunpack.c.l.b16 %v862_v8  ;;  %v930_v8 = vld [vmem:[#allocation2 + $0x9] sm:$0xff] }
 0x1b2   : > { %v1544_v10 = vpop.permute.xlu0 %1543 }
 0x1b3   : > { %v1581_v11 = vsel %vm334_vm3, %v9350_v17, %v1544_v10  ;;  %v2027_v17 = vunpack.c.l.b16 %v1178_v20  ;;  %v1923_v10 = vunpack.c.l.b16 %v1090_v1  ;;  %v2188_v18 = vunpack.c.l.b16 %v1228_v58  ;;  %v1200_v1 = vld [vmem:[#allocation2 + $0x10f] sm:$0xff] }
 0x1b4   : > { %2841 = vmatmul.bf16.gmra.mxu1 %v1581_v11  ;;  %2881 = vmatmul.bf16.gmra.mxu2 %v1613_v12  ;;  %v1227_v11 = vpack.c.bf16 %v1195_v9, %v1195_v9  ;;  %v1199_v9 = vld [vmem:[#allocation2 + $0x107] sm:$0xff] }
 0x1b5   : > { %v2047_v31 = vpack.c.b16 %v2028_v24, %v2027_v17  ;;  %v1955_v49 = vpack.c.b16 %v1924_v5, %v1923_v10  ;;  %v829_v17 = vld [vmem:[#allocation2 + $0x1af] sm:$0xff]  ;;  %v1232_v10 = vpack.c.bf16 %v1200_v1, %v1200_v1 }
 0x1b6   : > { %v2187_v20 = vunpack.c.l.b16 %v1227_v11  ;;  %v861_v39 = vpack.c.bf16 %v829_v17, %v829_v17  ;;  %v832_v17 = vld [vmem:[#allocation2 + $0x1e7] sm:$0xff] }
 0x1b7   : > { %v864_v25 = vpack.c.bf16 %v832_v17, %v832_v17 }
 0x1b8   : > { %2073 = vrot.lane.b32.xlu0 %v2046_v19, %s8816_s23  ;;  %v8695_v19 = vld [vmem:[%s11335_s3 + $0x48] sm:$0xff]  ;;  %v2316_v22 = vpop.permute.xlu1 %2315  ;;  %v2215_v51 = vpack.c.b16 %v2188_v18, %v2187_v20  ;;  %v1438_v33 = vunpack.c.l.b16 %v861_v39 }
 0x1b9   : > { %2918 = vmatpush.bf16.msrb.mxu2 %v8695_v19  ;;  %v2192_v19 = vunpack.c.l.b16 %v1232_v10 }
 0x1ba   : > { %v9400_v3 = vpop.permute.xlu0 %1795  ;;  %3108 = vmatmul.bf16.gmra.mxu0 %v2349_v48  ;;  %v828_v48 = vld [vmem:[#allocation2 + $0x1a7] sm:$0xff]  ;;  %v2357_v24 = vsel %vm334_vm3, %v2215_v51, %v2316_v22 }
 0x1bb   : > { %v860_v35 = vpack.c.bf16 %v828_v48, %v828_v48 }
 0x1bd   : > { %v1437_v32 = vunpack.c.l.b16 %v860_v35  ;;  %2919 = vmatpush.bf16.msrb.mxu2 %v8694_v53  ;;  %v1065_v35 = vld [vmem:[#allocation2 + $0x90] sm:$0xff] }
 0x1be   : > { %v1097_v28 = vpack.c.bf16 %v1065_v35, %v1065_v35 }
 0x1bf   : > { %v9434_v4 = vpack.c.b16 %v1438_v33, %v1437_v32  ;;  %v1441_v32 = vunpack.c.l.b16 %v864_v25 }
 0x1c0   : > { %2075 = vrot.lane.b32.xlu0 %v2047_v31, %s8816_s23  ;;  %v1198_v31 = vld [vmem:[#allocation2 + $0xef] sm:$0xff]  ;;  %v2318_v56 = vpop.permute.xlu1 %2317 }
 0x1c1   : > { %v1230_v37 = vpack.c.bf16 %v1198_v31, %v1198_v31  ;;  %v1625_v52 = vsel %vm334_vm3, %v9434_v4, %v9378_v60  ;;  %v1202_v31 = vld [vmem:[#allocation2 + $0x12f] sm:$0xff] }
 0x1c2   : > { %v9406_v41 = vpop.permute.xlu0 %1549 }
 0x1c3   : > { %v1593_v45 = vsel %vm334_vm3, %v2214_v50, %v9406_v41  ;;  %v2190_v46 = vunpack.c.l.b16 %v1230_v37  ;;  %v831_v41 = vld [vmem:[#allocation2 + $0x1cf] sm:$0xff]  ;;  %v1234_v37 = vpack.c.bf16 %v1202_v31, %v1202_v31 }
 0x1c4   : > { %2846 = vmatmul.bf16.gmra.mxu1 %v1585_v43  ;;  %2886 = vmatmul.bf16.gmra.mxu2 %v1617_v44  ;;  %v1229_v43 = vpack.c.bf16 %v1197_v36, %v1197_v36  ;;  %v1956_v44 = vpack.c.b16 %v1926_v34, %v1925_v38  ;;  %v1063_v50 = vld [vmem:[#allocation2 + $0x70] sm:$0xff]  ;;  %v1930_v34 = vunpack.c.l.b16 %v1097_v28  ;;  %v1201_v36 = vld [vmem:[#allocation2 + $0x127] sm:$0xff] }
 0x1c5   : > { %v1095_v62 = vpack.c.bf16 %v1063_v50, %v1063_v50  ;;  %v1279_v38 = vld [vmem:[#allocation2 + $0x208] sm:$0xff]  ;;  %v2194_v50 = vunpack.c.l.b16 %v1234_v37 }
 0x1c6   : > { %v2189_v54 = vunpack.c.l.b16 %v1229_v43  ;;  %v1929_v43 = vunpack.c.l.b16 %v1096_v6 }
 0x1c8   : > { %2077 = vrot.lane.b32.xlu0 %v2048_v55, %s8816_s23  ;;  %v9445_v55 = vpop.permute.xlu2 %1797  ;;  %v2216_v59 = vpack.c.b16 %v2190_v46, %v2189_v54  ;;  %v2320_v48 = vpop.permute.xlu1 %2319  ;;  %v1958_v53 = vpack.c.b16 %v1930_v34, %v1929_v43  ;;  %v933_v34 = vld [vmem:[#allocation2 + $0x31] sm:$0xff] }
 0x1ca   : > { %v9417_v61 = vpop.permute.xlu0 %1801  ;;  %3113 = vmatmul.bf16.gmra.mxu0 %v2353_v23  ;;  %v2361_v60 = vsel %vm334_vm3, %v2216_v59, %v2318_v56  ;;  %v863_v23 = vpack.c.bf16 %v831_v41, %v831_v41  ;;  %v1601_v57 = vsel %vm334_vm3, %v2216_v59, %v9340_v63  ;;  %v1067_v59 = vld [vmem:[#allocation2 + $0xb0] sm:$0xff] }
 0x1cb   : > { %v1099_v10 = vpack.c.bf16 %v1067_v59, %v1067_v59 }
 0x1cc   : > { %v1440_v5 = vunpack.c.l.b16 %v863_v23  ;;  %v931_v23 = vld [vmem:[#allocation2 + $0x11] sm:$0xff] }
 0x1cd   : > { %v963_v63 = vpack.c.bf16 %v931_v23, %v931_v23 }
 0x1d0   : > { %2079 = vrot.lane.b32.xlu0 %v2049_v7, %s8816_s23  ;;  %v1928_v7 = vunpack.c.l.b16 %v1095_v62  ;;  %v1552_v58 = vpop.permute.xlu2 %1551 }
 0x1d2   : > { %v2052_v12 = vpop.permute.xlu0 %2051 }
 0x1d3   : > { %v2085_v16 = vsel %vm334_vm3, %v1955_v49, %v2052_v12  ;;  %v1927_v49 = vunpack.c.l.b16 %v1094_v0  ;;  %v9448_v12 = vpack.c.b16 %v1440_v5, %v1439_v2  ;;  %v2322_v0 = vpop.permute.xlu1 %2321  ;;  %v962_v2 = vpack.c.bf16 %v930_v8, %v930_v8  ;;  %v1315_v5 = vld [vmem:[#allocation2 + $0x49] sm:$0xff] }
 0x1d4   : > { %2851 = vmatmul.bf16.gmra.mxu1 %v1589_v13  ;;  %2891 = vmatmul.bf16.gmra.mxu2 %v1621_v15  ;;  %v1231_v13 = vpack.c.bf16 %v1199_v9, %v1199_v9  ;;  %v1066_v9 = vld [vmem:[#allocation2 + $0xa8] sm:$0xff] }
 0x1d5   : > { %3009 = vmatmul.bf16.vlgmr.msrb.gmra.mxu3 %v2085_v16  ;;  %v1957_v15 = vpack.c.b16 %v1928_v7, %v1927_v49  ;;  %v1597_v16 = vsel %vm334_vm3, %v2215_v51, %v1552_v58  ;;  %v1629_v18 = vsel %vm334_vm3, %v9448_v12, %v9395_v26  ;;  %v865_v51 = vpack.c.bf16 %v833_v40, %v833_v40  ;;  %v8729_v26 = vld [vmem:[%s11337_s5 + $0x38] sm:$0xff] }
 0x1d6   : > { %v2191_v22 = vunpack.c.l.b16 %v1231_v13  ;;  %5353 = vmatpush.bf16.msra.mxu2 %v8729_v26  ;;  %v1316_v7 = vld [vmem:[#allocation2 + $0x51] sm:$0xff]  ;;  %v1347_v58 = vpack.c.bf16 %v1315_v5, %v1315_v5  ;;  %v1667_v13 = vunpack.c.l.b16 %v962_v2 }
 0x1d7   : > { %v1442_v33 = vunpack.c.l.b16 %v865_v51  ;;  %v1348_v49 = vpack.c.bf16 %v1316_v7, %v1316_v7 }
 0x1d9   : > { %v9459_v46 = vpack.c.b16 %v1442_v33, %v1441_v32  ;;  %v932_v33 = vld [vmem:[#allocation2 + $0x29] sm:$0xff] }
 0x1da   : > { %3118 = vmatmul.bf16.gmra.mxu0 %v2357_v24  ;;  %v2054_v42 = vpop.permute.xlu0 %2053  ;;  %v2217_v24 = vpack.c.b16 %v2192_v19, %v2191_v22  ;;  %v1204_v19 = vld [vmem:[#allocation2 + $0x14f] sm:$0xff]  ;;  %v2435_v22 = vunpack.c.l.b16 %v1347_v58 }
 0x1db   : > { %v2089_v29 = vsel %vm334_vm3, %v1956_v44, %v2054_v42  ;;  %v1280_v42 = vld [vmem:[#allocation2 + $0x210] sm:$0xff]  ;;  %v1311_v44 = vpack.c.bf16 %v1279_v38, %v1279_v38  ;;  %v1633_v41 = vsel %vm334_vm3, %v9459_v46, %v9316_v30  ;;  %v2324_v32 = vpop.permute.xlu1 %2323 }
 0x1dc   : > { %v2365_v39 = vsel %vm334_vm3, %v2217_v24, %v2320_v48  ;;  %v2436_v48 = vunpack.c.l.b16 %v1348_v49  ;;  %v1236_v24 = vpack.c.bf16 %v1204_v19, %v1204_v19  ;;  %v1069_v38 = vld [vmem:[#allocation2 + $0xd0] sm:$0xff] }
 0x1dd   : > { %v2287_v54 = vunpack.c.l.b16 %v1311_v44  ;;  %v964_v44 = vpack.c.bf16 %v932_v33, %v932_v33  ;;  %v1071_v19 = vld [vmem:[#allocation2 + $0xf0] sm:$0xff] }
 0x1de   : > { %v9471_v51 = vpack.c.b16 %v2436_v48, %v2435_v22  ;;  %v2196_v26 = vunpack.c.l.b16 %v1236_v24  ;;  %v1320_v22 = vld [vmem:[#allocation2 + $0x91] sm:$0xff] }
 0x1e2   : > { %v2056_v11 = vpop.permute.xlu0 %2055 }
 0x1e3   : > { %v2093_v20 = vsel %vm334_vm3, %v1957_v15, %v2056_v11  ;;  %v9469_v11 = vpop.f32.mrf.mxu1  ;;  %v1668_v15 = vunpack.c.l.b16 %v963_v63 }
 0x1e4   : > { %2856 = vmatmul.bf16.gmra.mxu1 %v1593_v45  ;;  %2896 = vmatmul.bf16.gmra.mxu2 %v1625_v52  ;;  %v1312_v45 = vpack.c.bf16 %v1280_v42, %v1280_v42  ;;  %v1317_v42 = vld [vmem:[#allocation2 + $0x69] sm:$0xff] }
 0x1e5   : > { %3014 = vmatmul.bf16.gmra.mxu3 %v2089_v29  ;;  %v1233_v29 = vpack.c.bf16 %v1201_v36, %v1201_v36  ;;  %v1699_v17 = vpack.c.b16 %v1668_v15, %v1667_v13  ;;  %v2326_v15 = vpop.permute.xlu1 %2325 }
 0x1e6   : > { %v2288_v56 = vunpack.c.l.b16 %v1312_v45  ;;  %v965_v45 = vpack.c.bf16 %v933_v34, %v933_v34 }
 0x1e7   : > { %v2193_v62 = vunpack.c.l.b16 %v1233_v29  ;;  %v1829_v27 = vsel %vm334_vm3, %v1699_v17, %v9400_v3  ;;  %v1318_v3 = vld [vmem:[#allocation2 + $0x71] sm:$0xff]  ;;  %v1101_v29 = vpack.c.bf16 %v1069_v38, %v1069_v38  ;;  %v1070_v17 = vld [vmem:[#allocation2 + $0xe8] sm:$0xff] }
 0x1e8   : > { %v2305_v14 = vpack.c.b16 %v2288_v56, %v2287_v54  ;;  %v1350_v54 = vpack.c.bf16 %v1318_v3, %v1318_v3  ;;  %v8728_v56 = vld [vmem:[%s11337_s5 + $0x30] sm:$0xff]  ;;  %v1670_v8 = vunpack.c.l.b16 %v965_v45 }
 0x1e9   : > { %v2218_v1 = vpack.c.b16 %v2194_v50, %v2193_v62  ;;  %v1206_v50 = vld [vmem:[#allocation2 + $0x16f] sm:$0xff]  ;;  %5354 = vmatpush.bf16.msra.mxu2 %v8728_v56  ;;  %v1934_v23 = vunpack.c.l.b16 %v1101_v29 }
 0x1ea   : > { %3123 = vmatmul.bf16.gmra.mxu0 %v2361_v60  ;;  %v2058_v52 = vpop.permute.xlu0 %2057  ;;  %2335 = vrot.lane.b32.xlu1 %v2305_v14, %s8816_s23  ;;  %v2438_v62 = vunpack.c.l.b16 %v1350_v54  ;;  %v1238_v63 = vpack.c.bf16 %v1206_v50, %v1206_v50  ;;  %v1322_v50 = vld [vmem:[#allocation2 + $0xb1] sm:$0xff] }
 0x1eb   : > { %v2097_v60 = vsel %vm334_vm3, %v1958_v53, %v2058_v52  ;;  %v2369_v30 = vsel %vm334_vm3, %v2218_v1, %v2322_v0  ;;  %v9478_v31 = vpop.f32.mrf.mxu1  ;;  %v1068_v52 = vld [vmem:[#allocation2 + $0xc8] sm:$0xff]  ;;  %v1349_v53 = vpack.c.bf16 %v1317_v42, %v1317_v42 }
 0x1ec   : > { %v2198_v49 = vunpack.c.l.b16 %v1238_v63 }
 0x1ed   : > { %v2437_v14 = vunpack.c.l.b16 %v1349_v53  ;;  %v2328_v53 = vpop.permute.xlu1 %2327 }
 0x1f3   : > { %v9486_v0 = vpop.f32.mrf.mxu1 }
 0x1f4   : > { %2861 = vmatmul.bf16.gmra.mxu1 %v1597_v16  ;;  %2901 = vmatmul.bf16.gmra.mxu2 %v1629_v18  ;;  %v1098_v16 = vpack.c.bf16 %v1066_v9, %v1066_v9  ;;  %v1203_v18 = vld [vmem:[#allocation2 + $0x147] sm:$0xff]  ;;  %v9490_v9 = vpack.c.b16 %v2438_v62, %v2437_v14  ;;  %v1354_v14 = vpack.c.bf16 %v1322_v50, %v1322_v50 }
 0x1f5   : > { %3019 = vmatmul.bf16.gmra.mxu3 %v2093_v20  ;;  %v1932_v20 = vunpack.c.l.b16 %v1099_v10  ;;  %v1235_v40 = vpack.c.bf16 %v1203_v18, %v1203_v18  ;;  %v8727_v62 = vld [vmem:[%s11337_s5 + $0x28] sm:$0xff] }
 0x1f6   : > { %v1931_v35 = vunpack.c.l.b16 %v1098_v16  ;;  %5355 = vmatpush.bf16.msra.mxu2 %v8727_v62  ;;  %v1325_v50 = vld [vmem:[#allocation2 + $0xe9] sm:$0xff] }
 0x1f7   : > { %v2195_v28 = vunpack.c.l.b16 %v1235_v40  ;;  %v1103_v40 = vpack.c.bf16 %v1071_v19, %v1071_v19  ;;  %v2330_v19 = vpop.permute.xlu1 %2329 }
 0x1f8   : > { %v1959_v25 = vpack.c.b16 %v1932_v20, %v1931_v35  ;;  %v1319_v20 = vld [vmem:[#allocation2 + $0x89] sm:$0xff]  ;;  %v1352_v35 = vpack.c.bf16 %v1320_v22, %v1320_v22 }
 0x1f9   : > { %v2219_v37 = vpack.c.b16 %v2196_v26, %v2195_v28  ;;  %v1351_v24 = vpack.c.bf16 %v1319_v20, %v1319_v20  ;;  %v1936_v28 = vunpack.c.l.b16 %v1103_v40  ;;  %v1075_v22 = vld [vmem:[#allocation2 + $0x130] sm:$0xff] }
 0x1fa   : > { %3128 = vmatmul.bf16.gmra.mxu0 %v2365_v39  ;;  %v2060_v39 = vpop.permute.xlu0 %2059 }
 0x1fb   : > { %v2101_v6 = vsel %vm334_vm3, %v1959_v25, %v2060_v39  ;;  %v2373_v43 = vsel %vm334_vm3, %v2219_v37, %v2324_v32  ;;  %v9499_v48 = vpop.f32.mrf.mxu1  ;;  %v1102_v39 = vpack.c.bf16 %v1070_v17, %v1070_v17  ;;  %v1207_v25 = vld [vmem:[#allocation2 + $0x187] sm:$0xff]  ;;  %v2439_v26 = vunpack.c.l.b16 %v1351_v24  ;;  %v1324_v17 = vld [vmem:[#allocation2 + $0xd1] sm:$0xff] }
 0x1fc   : > { %v1239_v33 = vpack.c.bf16 %v1207_v25, %v1207_v25  ;;  %v1356_v25 = vpack.c.bf16 %v1324_v17, %v1324_v17 }
 0x1fd   : > { %v1935_v37 = vunpack.c.l.b16 %v1102_v39 }
 0x1fe   : > { %v2199_v45 = vunpack.c.l.b16 %v1239_v33 }
 0x1ff   : > { %v1961_v3 = vpack.c.b16 %v1936_v28, %v1935_v37 }
 0x202   : > { %v2062_v5 = vpop.permute.xlu0 %2061 }
 0x204   : > { %2866 = vmatmul.bf16.gmra.mxu1 %v1601_v57  ;;  %2906 = vmatmul.bf16.gmra.mxu2 %v1633_v41  ;;  %v1100_v57 = vpack.c.bf16 %v1068_v52, %v1068_v52  ;;  %v1205_v41 = vld [vmem:[#allocation2 + $0x167] sm:$0xff] }
 0x205   : > { %3024 = vmatmul.bf16.gmra.mxu3 %v2097_v60  ;;  %v1669_v60 = vunpack.c.l.b16 %v964_v44  ;;  %v1237_v2 = vpack.c.bf16 %v1205_v41, %v1205_v41  ;;  %v1837_v44 = vsel %vm334_vm3, %v9471_v51, %v9335_v47  ;;  %v1321_v41 = vld [vmem:[#allocation2 + $0xa9] sm:$0xff] }
 0x206   : > { %v1933_v59 = vunpack.c.l.b16 %v1100_v57  ;;  %v1073_v57 = vld [vmem:[#allocation2 + $0x110] sm:$0xff] }
 0x207   : > { %v1700_v7 = vpack.c.b16 %v1670_v8, %v1669_v60  ;;  %v2197_v58 = vunpack.c.l.b16 %v1237_v2  ;;  %v1105_v8 = vpack.c.bf16 %v1073_v57, %v1073_v57 }
 0x209   : > { %v1833_v10 = vsel %vm334_vm3, %v1700_v7, %v9445_v55  ;;  %v2220_v18 = vpack.c.b16 %v2198_v49, %v2197_v58  ;;  %v1938_v63 = vunpack.c.l.b16 %v1105_v8 }
 0x20a   : > { %3133 = vmatmul.bf16.gmra.mxu0 %v2369_v30  ;;  %v1960_v30 = vpack.c.b16 %v1934_v23, %v1933_v59  ;;  %v2064_v38 = vpop.permute.xlu0 %2063  ;;  %v1353_v23 = vpack.c.bf16 %v1321_v41, %v1321_v41  ;;  %v1077_v41 = vld [vmem:[#allocation2 + $0x150] sm:$0xff] }
 0x20b   : > { %v2377_v55 = vsel %vm334_vm3, %v2220_v18, %v2326_v15  ;;  %v2109_v29 = vsel %vm334_vm3, %v1961_v3, %v2064_v38  ;;  %v1841_v15 = vsel %vm334_vm3, %v9490_v9, %v9417_v61  ;;  %v2385_v61 = vsel %vm334_vm3, %v9434_v4, %v2330_v19 }
 0x20c   : > { %v2105_v13 = vsel %vm334_vm3, %v1960_v30, %v2062_v5  ;;  %v2441_v59 = vunpack.c.l.b16 %v1353_v23  ;;  %v2442_v5 = vunpack.c.l.b16 %v1354_v14  ;;  %v1109_v23 = vpack.c.bf16 %v1077_v41, %v1077_v41 }
 0x20d   : > { %v1357_v14 = vpack.c.bf16 %v1325_v50, %v1325_v50 }
 0x214   : > { %2920 = vmatmul.bf16.vlgmr.msrb.gmra.mxu2 %v1829_v27  ;;  %8400 = vmatmul.msk.bf16.vlgmr.msrb.gmra.mxu1 %vm334_vm3, %v9471_v51  ;;  %v1208_v27 = vld [vmem:[#allocation2 + $0x18f] sm:$0xff] }
 0x215   : > { %3029 = vmatmul.bf16.gmra.mxu3 %v2101_v6  ;;  %v2440_v6 = vunpack.c.l.b16 %v1352_v35  ;;  %v1240_v34 = vpack.c.bf16 %v1208_v27, %v1208_v27  ;;  %v1072_v51 = vld [vmem:[#allocation2 + $0x108] sm:$0xff]  ;;  %v1107_v35 = vpack.c.bf16 %v1075_v22, %v1075_v22 }
 0x216   : > { %v1104_v2 = vpack.c.bf16 %v1072_v51, %v1072_v51 }
 0x217   : > { %v9480_v36 = vpop.f32.mrf.mxu2  ;;  %v2200_v52 = vunpack.c.l.b16 %v1240_v34  ;;  %v9536_v40 = vpop.f32.mrf.mxu0  ;;  %v1940_v28 = vunpack.c.l.b16 %v1107_v35 }
 0x218   : > { %v1937_v30 = vunpack.c.l.b16 %v1104_v2  ;;  %v1804_v34 = vpop.permute.xlu2 %1803  ;;  %v8726_v2 = vld [vmem:[%s11337_s5 + $0x20] sm:$0xff] }
 0x219   : > { %v2221_v56 = vpack.c.b16 %v2200_v52, %v2199_v45  ;;  %5356 = vmatpush.bf16.msra.mxu2 %v8726_v2 }
 0x21a   : > { %3138 = vmatmul.bf16.gmra.mxu0 %v2373_v43  ;;  %v9506_v43 = vpack.c.b16 %v2440_v6, %v2439_v26  ;;  %v1962_v49 = vpack.c.b16 %v1938_v63, %v1937_v30  ;;  %v2444_v6 = vunpack.c.l.b16 %v1356_v25  ;;  %v2445_v30 = vunpack.c.l.b16 %v1357_v14  ;;  %v1215_v14 = vld [vmem:[#allocation2 + $0x207] sm:$0xff] }
 0x21b   : > { %v2381_v47 = vsel %vm334_vm3, %v2221_v56, %v2328_v53  ;;  %v2332_v53 = vpop.permute.xlu1 %2331  ;;  %v1076_v56 = vld [vmem:[#allocation2 + $0x148] sm:$0xff] }
 0x21c   : > { %v1845_v52 = vsel %vm334_vm3, %v9506_v43, %v1804_v34  ;;  %v2389_v8 = vsel %vm334_vm3, %v9448_v12, %v2332_v53 }
 0x21f   : > { %v9488_v1 = vpop.f32.mrf.mxu2 }
 0x220   : > { %v1806_v12 = vpop.permute.xlu2 %1805 }
 0x224   : > { %2925 = vmatmul.bf16.gmra.mxu2 %v1833_v10  ;;  %8401 = vmatmul.msk.bf16.gmra.mxu1 %vm334_vm3, %v9490_v9  ;;  %v2066_v10 = vpop.permute.xlu0 %2065  ;;  %v1074_v9 = vld [vmem:[#allocation2 + $0x128] sm:$0xff] }
 0x225   : > { %3034 = vmatmul.bf16.gmra.mxu3 %v2105_v13  ;;  %v9526_v13 = vpack.c.b16 %v2442_v5, %v2441_v59  ;;  %v2113_v18 = vsel %vm334_vm3, %v1962_v49, %v2066_v10  ;;  %v1106_v27 = vpack.c.bf16 %v1074_v9, %v1074_v9  ;;  %v1942_v5 = vunpack.c.l.b16 %v1109_v23  ;;  %v2334_v9 = vpop.permute.xlu1 %2333 }
 0x227   : > { %v9497_v16 = vpop.f32.mrf.mxu2  ;;  %v1939_v37 = vunpack.c.l.b16 %v1106_v27  ;;  %v1849_v17 = vsel %vm334_vm3, %v9526_v13, %v1806_v12  ;;  %v1079_v27 = vld [vmem:[#allocation2 + $0x170] sm:$0xff] }
 0x229   : > { %v1963_v45 = vpack.c.b16 %v1940_v28, %v1939_v37  ;;  %v1327_v28 = vld [vmem:[#allocation2 + $0x109] sm:$0xff] }
 0x22a   : > { %3143 = vmatmul.bf16.gmra.mxu0 %v2377_v55  ;;  %v1323_v55 = vld [vmem:[#allocation2 + $0xc9] sm:$0xff] }
 0x22b   : > { %v1355_v39 = vpack.c.bf16 %v1323_v55, %v1323_v55 }
 0x22c   : > { %v2068_v38 = vpop.permute.xlu0 %2067 }
 0x22d   : > { %v2443_v26 = vunpack.c.l.b16 %v1355_v39  ;;  %v1078_v39 = vld [vmem:[#allocation2 + $0x168] sm:$0xff] }
 0x22e   : > { %v1110_v37 = vpack.c.bf16 %v1078_v39, %v1078_v39  ;;  %v1081_v39 = vld [vmem:[#allocation2 + $0x190] sm:$0xff] }
 0x22f   : > { %v9502_v32 = vpop.f32.mrf.mxu2  ;;  %v9548_v4 = vpack.c.b16 %v2444_v6, %v2443_v26  ;;  %v1328_v26 = vld [vmem:[#allocation2 + $0x111] sm:$0xff] }
 0x231   : > { %v9504_v42 = vpop.f32.mrf.mxu1 }
 0x234   : > { %2930 = vmatmul.bf16.gmra.mxu2 %v1837_v44  ;;  %8402 = vmatmul.msk.bf16.gmra.mxu1 %vm334_vm3, %v9506_v43  ;;  %v9546_v44 = vpop.f32.mrf.mxu0  ;;  %v1108_v43 = vpack.c.bf16 %v1076_v56, %v1076_v56 }
 0x235   : > { %3039 = vmatmul.bf16.gmra.mxu3 %v2109_v29  ;;  %v2117_v29 = vsel %vm334_vm3, %v1963_v45, %v2068_v38  ;;  %v1111_v38 = vpack.c.bf16 %v1079_v27, %v1079_v27  ;;  %v1359_v45 = vpack.c.bf16 %v1327_v28, %v1327_v28  ;;  %v1329_v27 = vld [vmem:[#allocation2 + $0x129] sm:$0xff]  ;;  %v1330_v28 = vld [vmem:[#allocation2 + $0x131] sm:$0xff] }
 0x236   : > { %v1941_v59 = vunpack.c.l.b16 %v1108_v43 }
 0x237   : > { %v9514_v54 = vpop.f32.mrf.mxu2  ;;  %v1944_v53 = vunpack.c.l.b16 %v1111_v38  ;;  %v2447_v56 = vunpack.c.l.b16 %v1359_v45  ;;  %v1113_v45 = vpack.c.bf16 %v1081_v39, %v1081_v39 }
 0x238   : > { %v1964_v22 = vpack.c.b16 %v1942_v5, %v1941_v59  ;;  %v1247_v59 = vpack.c.bf16 %v1215_v14, %v1215_v14 }
 0x239   : > { %v9516_v60 = vpop.f32.mrf.mxu1 }
 0x23a   : > { %3148 = vmatmul.bf16.gmra.mxu0 %v2381_v47  ;;  %v1326_v47 = vld [vmem:[#allocation2 + $0xf1] sm:$0xff] }
 0x23b   : > { %v1358_v62 = vpack.c.bf16 %v1326_v47, %v1326_v47  ;;  %v1808_v47 = vpop.permute.xlu2 %1807 }
 0x23c   : > { %v9564_v63 = vpop.f32.mrf.mxu0 }
 0x23d   : > { %v2446_v10 = vunpack.c.l.b16 %v1358_v62  ;;  %v1216_v62 = vld [vmem:[#allocation2 + $0x20f] sm:$0xff] }
 0x23e   : > { %v1248_v5 = vpack.c.bf16 %v1216_v62, %v1216_v62 }
 0x23f   : > { %v9522_v7 = vpop.f32.mrf.mxu2  ;;  %v9572_v55 = vpack.c.b16 %v2446_v10, %v2445_v30  ;;  %v1853_v10 = vsel %vm334_vm3, %v9548_v4, %v1808_v47 }
 0x241   : > { %v9524_v58 = vpop.f32.mrf.mxu1 }
 0x243   : > { %v1810_v62 = vpop.permute.xlu2 %1809 }
 0x244   : > { %2935 = vmatmul.bf16.gmra.mxu2 %v1841_v15  ;;  %8403 = vmatmul.msk.bf16.gmra.mxu1 %vm334_vm3, %v9526_v13  ;;  %v9579_v35 = vpop.f32.mrf.mxu0  ;;  %v2393_v13 = vsel %vm334_vm3, %v9459_v46, %v2334_v9 }
 0x245   : > { %3044 = vmatmul.bf16.gmra.mxu3 %v2113_v18  ;;  %v2070_v18 = vpop.permute.xlu0 %2069 }
 0x247   : > { %v9534_v20 = vpop.f32.mrf.mxu2 }
 0x249   : > { %v9538_v24 = vpop.f32.mrf.mxu1 }
 0x24a   : > { %3153 = vmatmul.bf16.gmra.mxu0 %v2385_v61  ;;  %v2121_v61 = vsel %vm334_vm3, %v1964_v22, %v2070_v18  ;;  %v2207_v18 = vunpack.c.l.b16 %v1247_v59  ;;  %v2208_v22 = vunpack.c.l.b16 %v1248_v5 }
 0x24d   : > { %v2072_v43 = vpop.permute.xlu0 %2071 }
 0x24f   : > { %v9542_v33 = vpop.f32.mrf.mxu2 }
 0x251   : > { %v9544_v3 = vpop.f32.mrf.mxu1 }
 0x254   : > { %2940 = vmatmul.bf16.gmra.mxu2 %v1845_v52  ;;  %8404 = vmatmul.msk.bf16.gmra.mxu1 %vm334_vm3, %v9548_v4  ;;  %v1360_v52 = vpack.c.bf16 %v1328_v26, %v1328_v26 }
 0x255   : > { %3049 = vmatmul.bf16.gmra.mxu3 %v2117_v29  ;;  %v1943_v29 = vunpack.c.l.b16 %v1110_v37 }
 0x256   : > { %v2448_v41 = vunpack.c.l.b16 %v1360_v52  ;;  %v1361_v52 = vpack.c.bf16 %v1329_v27, %v1329_v27  ;;  %v1082_v27 = vld [vmem:[#allocation2 + $0x1a8] sm:$0xff] }
 0x257   : > { %v9555_v57 = vpop.f32.mrf.mxu2  ;;  %v1965_v46 = vpack.c.b16 %v1944_v53, %v1943_v29  ;;  %v1362_v29 = vpack.c.bf16 %v1330_v28, %v1330_v28  ;;  %v1083_v28 = vld [vmem:[#allocation2 + $0x1b0] sm:$0xff] }
 0x258   : > { %11344 = vst [vmem:[#allocation5_spill] sm:$0xff] %v9555_v57  ;;  %v9566_v49 = vpop.f32.mrf.mxu3  ;;  %v9595_v2 = vpack.c.b16 %v2448_v41, %v2447_v56  ;;  %v1946_v41 = vunpack.c.l.b16 %v1113_v45  ;;  %v2449_v47 = vunpack.c.l.b16 %v1361_v52 }
 0x259   : > { %v9557_v51 = vpop.f32.mrf.mxu1  ;;  %v2125_v12 = vsel %vm334_vm3, %v1965_v46, %v2072_v43  ;;  %v2450_v43 = vunpack.c.l.b16 %v1362_v29  ;;  %v2074_v46 = vpop.permute.xlu0 %2073 }
 0x25a   : > { %3158 = vmatmul.bf16.gmra.mxu0 %v2389_v8  ;;  %v9591_v8 = vpop.f32.mrf.mxu0 }
 0x25c   : > { %v2336_v26 = vpop.permute.xlu1 %2335 }
 0x25f   : > { %v9568_v15 = vpop.f32.mrf.mxu2 }
 0x260   : > { %11345 = vst [vmem:[#allocation6_spill] sm:$0xff] %v9568_v15  ;;  %v9583_v6 = vpop.f32.mrf.mxu3 }
 0x261   : > { %v9570_v19 = vpop.f32.mrf.mxu1 }
 0x262   : > { %v9609_v37 = vpop.f32.mrf.mxu0 }
 0x264   : > { %2945 = vmatmul.bf16.gmra.mxu2 %v1849_v17  ;;  %8405 = vmatmul.msk.bf16.gmra.mxu1 %vm334_vm3, %v9572_v55  ;;  %v1080_v17 = vld [vmem:[#allocation2 + $0x188] sm:$0xff] }
 0x265   : > { %3054 = vmatmul.bf16.gmra.mxu3 %v2121_v61  ;;  %v2225_v61 = vpack.c.b16 %v2208_v22, %v2207_v18  ;;  %v1112_v38 = vpack.c.bf16 %v1080_v17, %v1080_v17  ;;  %v1857_v18 = vsel %vm334_vm3, %v9572_v55, %v1810_v62  ;;  %v1331_v17 = vld [vmem:[#allocation2 + $0x149] sm:$0xff]  ;;  %v1115_v55 = vpack.c.bf16 %v1083_v28, %v1083_v28  ;;  %v1812_v62 = vpop.permute.xlu2 %1811 }
 0x266   : > { %v1363_v45 = vpack.c.bf16 %v1331_v17, %v1331_v17  ;;  %v9644_v17 = vld [vmem:[%s11336_s4] ss:$0 sm:$0xff] }
 0x267   : > { %v9581_v25 = vpop.f32.mrf.mxu2  ;;  %v2397_v4 = vsel %vm334_vm3, %v2225_v61, %v2336_v26  ;;  %v1945_v56 = vunpack.c.l.b16 %v1112_v38  ;;  %v1332_v26 = vld [vmem:[#allocation2 + $0x151] sm:$0xff]  ;;  %v1114_v38 = vpack.c.bf16 %v1082_v27, %v1082_v27  ;;  %v1861_v27 = vsel %vm334_vm3, %v9595_v2, %v1812_v62 }
 0x268   : > { %11346 = vst [vmem:[#allocation7_spill] sm:$0xff] %v9581_v25  ;;  %v9597_v30 = vpop.f32.mrf.mxu3  ;;  %v1364_v52 = vpack.c.bf16 %v1332_v26, %v1332_v26  ;;  %v2833_v26 = vadd.f32 %v9644_v17, %v9469_v11 }
 0x269   : > { %v9585_v34 = vpop.f32.mrf.mxu1  ;;  %v1966_v5 = vpack.c.b16 %v1946_v41, %v1945_v56  ;;  %v1947_v29 = vunpack.c.l.b16 %v1114_v38  ;;  %v1948_v56 = vunpack.c.l.b16 %v1115_v55  ;;  %v2451_v41 = vunpack.c.l.b16 %v1363_v45  ;;  %v1333_v38 = vld [vmem:[#allocation2 + $0x169] sm:$0xff]  ;;  %v1334_v55 = vld [vmem:[#allocation2 + $0x171] sm:$0xff] }
 0x26a   : > { %3163 = vmatmul.bf16.gmra.mxu0 %v2393_v13 }
 0x26b   : > { %v2129_v22 = vsel %vm334_vm3, %v1966_v5, %v2074_v46  ;;  %v2076_v46 = vpop.permute.xlu0 %2075 }
 0x26f   : > { %v9589_v50 = vpop.f32.mrf.mxu2 }
 0x270   : > { %11347 = vst [vmem:[#allocation8_spill] sm:$0xff] %v9589_v50  ;;  %v9611_v53 = vpop.f32.mrf.mxu3 }
 0x271   : > { %v9593_v23 = vpop.f32.mrf.mxu1 }
 0x274   : > { %2950 = vmatmul.bf16.gmra.mxu2 %v1853_v10  ;;  %8406 = vmatmul.msk.bf16.gmra.mxu1 %vm334_vm3, %v9595_v2  ;;  %v9617_v10 = vpack.c.b16 %v2450_v43, %v2449_v47  ;;  %v2452_v47 = vunpack.c.l.b16 %v1364_v52  ;;  %v1084_v52 = vld [vmem:[#allocation2 + $0x1c8] sm:$0xff]  ;;  %v1085_v2 = vld [vmem:[#allocation2 + $0x1d0] sm:$0xff] }
 0x275   : > { %3059 = vmatmul.bf16.gmra.mxu3 %v2125_v12  ;;  %v8725_v12 = vld [vmem:[%s11337_s5 + $0x18] sm:$0xff] }
 0x276   : > { %5357 = vmatpush.bf16.msra.mxu2 %v8725_v12 }
 0x277   : > { %v9604_v9 = vpop.f32.mrf.mxu2 }
 0x278   : > { %11348 = vst [vmem:[#allocation9_spill] sm:$0xff] %v9604_v9  ;;  %v9627_v61 = vpop.f32.mrf.mxu3 }
 0x279   : > { %v9606_v13 = vpop.f32.mrf.mxu1 }
 0x27a   : > { %3168 = vmatmul.bf16.gmra.mxu0 %v2397_v4 }
 0x27f   : > { %v9613_v14 = vpop.f32.mrf.mxu2 }
 0x280   : > { %11349 = vst [vmem:[#allocation10_spill] sm:$0xff] %v9613_v14  ;;  %v9635_v5 = vpop.f32.mrf.mxu3 }
 0x281   : > { %v9615_v59 = vpop.f32.mrf.mxu1 }
 0x284   : > { %2955 = vmatmul.bf16.gmra.mxu2 %v1857_v18  ;;  %8407 = vmatmul.msk.bf16.gmra.mxu1 %vm334_vm3, %v9617_v10  ;;  %v1967_v18 = vpack.c.b16 %v1948_v56, %v1947_v29 }
 0x285   : > { %3064 = vmatmul.bf16.gmra.mxu3 %v2129_v22  ;;  %v9637_v22 = vpack.c.b16 %v2452_v47, %v2451_v41  ;;  %v1365_v41 = vpack.c.bf16 %v1333_v38, %v1333_v38  ;;  %v1366_v47 = vpack.c.bf16 %v1334_v55, %v1334_v55  ;;  %v9657_v38 = vpop.f32.mrf.mxu0 }
 0x286   : > { %v2133_v28 = vsel %vm334_vm3, %v1967_v18, %v2076_v46  ;;  %v1117_v46 = vpack.c.bf16 %v1085_v2, %v1085_v2  ;;  %v3396_v18 = vld [vmem:[#allocation3 + $0x8] sm:$0xff] }
 0x287   : > { %v9629_v39 = vpop.f32.mrf.mxu2  ;;  %v2453_v14 = vunpack.c.l.b16 %v1365_v41  ;;  %v2454_v9 = vunpack.c.l.b16 %v1366_v47  ;;  %v1336_v47 = vld [vmem:[#allocation2 + $0x191] sm:$0xff] }
 0x288   : > { %11350 = vst [vmem:[#allocation11_spill] sm:$0xff] %v9629_v39  ;;  %v3429_v39 = vpack.c.bf16 %v3397_v21, %v3397_v21  ;;  %v2078_v21 = vpop.permute.xlu0 %2077 }
 0x289   : > { %v9631_v4 = vpop.f32.mrf.mxu1 }
 0x28a   : > { %v4022_v25 = vunpack.c.l.b16 %v3429_v39 }
 0x28f   : > { %v9633_v43 = vpop.f32.mrf.mxu2 }
 0x290   : > { %11351 = vst [vmem:[#allocation12_spill] sm:$0xff] %v9633_v43  ;;  %v9652_v43 = vpop.f32.mrf.mxu3 }
 0x291   : > { %v3188_v12 = vpop.f32.mrf.mxu1 }
 0x294   : > { %2960 = vmatmul.bf16.gmra.mxu2 %v1861_v27  ;;  %8408 = vmatmul.msk.bf16.gmra.mxu1 %vm334_vm3, %v9637_v22  ;;  %v1116_v27 = vpack.c.bf16 %v1084_v52, %v1084_v52 }
 0x295   : > { %3069 = vmatmul.bf16.gmra.mxu3 %v2133_v28  ;;  %v3428_v28 = vpack.c.bf16 %v3396_v18, %v3396_v18 }
 0x296   : > { %v1949_v55 = vunpack.c.l.b16 %v1116_v27  ;;  %v1087_v27 = vld [vmem:[#allocation2 + $0x1f0] sm:$0xff] }
 0x297   : > { %v2921_v45 = vpop.f32.mrf.mxu2  ;;  %v4021_v50 = vunpack.c.l.b16 %v3428_v28 }
 0x298   : > { %v2922_v29 = vadd.f32 %v2921_v45, %v2833_v26  ;;  %v2835_v26 = vadd.f32 %v9644_v17, %v9478_v31  ;;  %v1950_v45 = vunpack.c.l.b16 %v1117_v46  ;;  %v9662_v31 = vpack.c.b16 %v2454_v9, %v2453_v14  ;;  %v1335_v14 = vld [vmem:[#allocation2 + $0x189] sm:$0xff] }
 0x299   : > { %v3190_v56 = vpop.f32.mrf.mxu1  ;;  %v4053_v2 = vpack.c.b16 %v4022_v25, %v4021_v50 }
 0x29a   : > { %v3011_v62 = vadd.f32 %v9566_v49, %v2922_v29  ;;  %v1814_v29 = vpop.permute.xlu2 %1813  ;;  %v1968_v39 = vpack.c.b16 %v1950_v45, %v1949_v55 }
 0x29b   : > { %4069 = vrot.lane.b32.xlu2 %v4053_v2, %s8816_s23  ;;  %v1865_v25 = vsel %vm334_vm3, %v9617_v10, %v1814_v29  ;;  %v1086_v10 = vld [vmem:[#allocation2 + $0x1e8] sm:$0xff] }
 0x29c   : > { %v3100_v11 = vadd.f32 %v9536_v40, %v3011_v62  ;;  %v2137_v41 = vsel %vm334_vm3, %v1968_v39, %v2078_v21  ;;  %v1118_v45 = vpack.c.bf16 %v1086_v10, %v1086_v10 }
 0x29e   : > { %v3189_v49 = vadd.f32 %v3188_v12, %v3100_v11  ;;  %v8724_v12 = vld [vmem:[%s11337_s5 + $0x10] sm:$0xff] }
 0x29f   : > { %v2923_v52 = vpop.f32.mrf.mxu2  ;;  %5358 = vmatpush.bf16.msra.mxu2 %v8724_v12 }
 0x2a0   : > { %v3268_v15 = vmax.f32 %v3189_v49, 0.0  ;;  %v2924_v18 = vadd.f32 %v2923_v52, %v2835_v26  ;;  %v1367_v26 = vpack.c.bf16 %v1335_v14, %v1335_v14  ;;  %v1368_v49 = vpack.c.bf16 %v1336_v47, %v1336_v47 }
 0x2a1   : > { %v3193_v57 = vpop.f32.mrf.mxu1  ;;  %v1119_v52 = vpack.c.bf16 %v1087_v27, %v1087_v27 }
 0x2a2   : > { %3300 = vst.msk [vmem:[#allocation3 + $0x28] sm:$0xff] %vm334_vm3, %v3268_v15  ;;  %v3013_v40 = vadd.f32 %v9583_v6, %v2924_v18  ;;  %v9673_v15 = vpop.f32.mrf.mxu3  ;;  %v2838_v6 = vadd.f32 %v9644_v17, %v9486_v0  ;;  %v2456_v2 = vunpack.c.l.b16 %v1368_v49  ;;  %v2840_v18 = vadd.f32 %v9644_v17, %v9499_v48 }
 0x2a3   : > { %v1952_v39 = vunpack.c.l.b16 %v1119_v52 }
 0x2a4   : > { %v3102_v50 = vadd.f32 %v9546_v44, %v3013_v40  ;;  %2965 = vmatmul.bf16.gmra.mxu2 %v1865_v25  ;;  %8409 = vmatmul.msk.bf16.gmra.mxu1 %vm334_vm3, %v9662_v31  ;;  %v9677_v44 = vpop.f32.mrf.mxu0  ;;  %v1951_v40 = vunpack.c.l.b16 %v1118_v45 }
 0x2a5   : > { %3074 = vmatmul.bf16.gmra.mxu3 %v2137_v41 }
 0x2a6   : > { %v3191_v9 = vadd.f32 %v3190_v56, %v3102_v50  ;;  %v2455_v56 = vunpack.c.l.b16 %v1367_v26  ;;  %v1816_v50 = vpop.permute.xlu2 %1815  ;;  %v1969_v48 = vpack.c.b16 %v1952_v39, %v1951_v40 }
 0x2a7   : > { %v2926_v62 = vpop.f32.mrf.mxu2  ;;  %v1869_v27 = vsel %vm334_vm3, %v9637_v22, %v1816_v50 }
 0x2a8   : > { %v3269_v46 = vmax.f32 %v3191_v9, 0.0  ;;  %v2927_v28 = vadd.f32 %v2926_v62, %v2838_v6  ;;  %v2080_v9 = vpop.permute.xlu0 %2079 }
 0x2a9   : > { %v3195_v11 = vpop.f32.mrf.mxu1  ;;  %v3398_v29 = vld [vmem:[#allocation3 + $0x28] sm:$0xff] }
 0x2aa   : > { %3301 = vst.msk [vmem:[#allocation3 + $0x30] sm:$0xff] %vm334_vm3, %v3269_v46  ;;  %v3016_v55 = vadd.f32 %v9597_v30, %v2927_v28  ;;  %v9684_v12 = vpop.f32.mrf.mxu3  ;;  %v3430_v30 = vpack.c.bf16 %v3398_v29, %v3398_v29  ;;  %v2141_v28 = vsel %vm334_vm3, %v1969_v48, %v2080_v9 }
 0x2ac   : > { %v3105_v0 = vadd.f32 %v9564_v63, %v3016_v55  ;;  %v9686_v63 = vpop.f32.mrf.mxu0  ;;  %v4023_v26 = vunpack.c.l.b16 %v3430_v30 }
 0x2ae   : > { %v3194_v21 = vadd.f32 %v3193_v57, %v3105_v0  ;;  %v9690_v57 = vpack.c.b16 %v2456_v2, %v2455_v56  ;;  %v1337_v0 = vld [vmem:[#allocation2 + $0x1a9] sm:$0xff]  ;;  %v1338_v56 = vld [vmem:[#allocation2 + $0x1b1] sm:$0xff]  ;;  %v1818_v9 = vpop.permute.xlu2 %1817 }
 0x2af   : > { %v2928_v25 = vpop.f32.mrf.mxu2  ;;  %v1370_v40 = vpack.c.bf16 %v1338_v56, %v1338_v56  ;;  %v1339_v56 = vld [vmem:[#allocation2 + $0x1c9] sm:$0xff] }
 0x2b0   : > { %v3270_v41 = vmax.f32 %v3194_v21, 0.0  ;;  %v2929_v6 = vadd.f32 %v2928_v25, %v2840_v18  ;;  %v1369_v21 = vpack.c.bf16 %v1337_v0, %v1337_v0  ;;  %v2845_v25 = vadd.f32 %v9644_v17, %v9516_v60  ;;  %v8723_v60 = vld [vmem:[%s11337_s5 + $0x8] sm:$0xff] }
 0x2b1   : > { %v3198_v14 = vpop.f32.mrf.mxu1  ;;  %v3399_v47 = vld [vmem:[#allocation3 + $0x30] sm:$0xff]  ;;  %5359 = vmatpush.bf16.msra.mxu2 %v8723_v60 }
 0x2b2   : > { %3302 = vst.msk [vmem:[#allocation3 + $0x48] sm:$0xff] %vm334_vm3, %v3270_v41  ;;  %v3018_v62 = vadd.f32 %v9611_v53, %v2929_v6  ;;  %v3431_v10 = vpack.c.bf16 %v3399_v47, %v3399_v47  ;;  %v2843_v53 = vadd.f32 %v9644_v17, %v9504_v42  ;;  %v2457_v41 = vunpack.c.l.b16 %v1369_v21 }
 0x2b3   : > { %v2458_v6 = vunpack.c.l.b16 %v1370_v40  ;;  %v1371_v21 = vpack.c.bf16 %v1339_v56, %v1339_v56 }
 0x2b4   : > { %v3107_v46 = vadd.f32 %v9579_v35, %v3018_v62  ;;  %2970 = vmatmul.bf16.gmra.mxu2 %v1869_v27  ;;  %8410 = vmatmul.msk.bf16.gmra.mxu1 %vm334_vm3, %v9690_v57  ;;  %v4024_v49 = vunpack.c.l.b16 %v3431_v10  ;;  %v9701_v35 = vpop.f32.mrf.mxu3  ;;  %v9705_v39 = vpop.f32.mrf.mxu0 }
 0x2b5   : > { %3079 = vmatmul.bf16.gmra.mxu3 %v2141_v28  ;;  %v1873_v28 = vsel %vm334_vm3, %v9662_v31, %v1818_v9  ;;  %v1340_v31 = vld [vmem:[#allocation2 + $0x1d1] sm:$0xff] }
 0x2b6   : > { %v3196_v55 = vadd.f32 %v3195_v11, %v3107_v46  ;;  %v4054_v45 = vpack.c.b16 %v4024_v49, %v4023_v26  ;;  %v9712_v46 = vpack.c.b16 %v2458_v6, %v2457_v41 }
 0x2b7   : > { %v2931_v52 = vpop.f32.mrf.mxu2 }
 0x2b8   : > { %v3271_v22 = vmax.f32 %v3196_v55, 0.0  ;;  %v2932_v2 = vadd.f32 %v2931_v52, %v2843_v53  ;;  %4071 = vrot.lane.b32.xlu2 %v4054_v45, %s8816_s23  ;;  %v2848_v53 = vadd.f32 %v9644_v17, %v9524_v58  ;;  %v1372_v58 = vpack.c.bf16 %v1340_v31, %v1340_v31 }
 0x2b9   : > { %v3200_v29 = vpop.f32.mrf.mxu1  ;;  %v3400_v11 = vld [vmem:[#allocation3 + $0x48] sm:$0xff] }
 0x2ba   : > { %3303 = vst.msk [vmem:[#allocation3 + $0x50] sm:$0xff] %vm334_vm3, %v3271_v22  ;;  %v3021_v18 = vadd.f32 %v9627_v61, %v2932_v2  ;;  %v3432_v48 = vpack.c.bf16 %v3400_v11, %v3400_v11  ;;  %v2850_v11 = vadd.f32 %v9644_v17, %v9538_v24  ;;  %v2460_v41 = vunpack.c.l.b16 %v1372_v58 }
 0x2bc   : > { %v3110_v42 = vadd.f32 %v9591_v8, %v3021_v18  ;;  %v4025_v49 = vunpack.c.l.b16 %v3432_v48  ;;  %v9726_v55 = vpop.f32.mrf.mxu0 }
 0x2be   : > { %v3199_v50 = vadd.f32 %v3198_v14, %v3110_v42  ;;  %v9717_v14 = vpop.f32.mrf.mxu3 }
 0x2bf   : > { %v2933_v30 = vpop.f32.mrf.mxu2 }
 0x2c0   : > { %v3272_v47 = vmax.f32 %v3199_v50, 0.0  ;;  %v2934_v62 = vadd.f32 %v2933_v30, %v2845_v25  ;;  %v2459_v50 = vunpack.c.l.b16 %v1371_v21  ;;  %v1820_v30 = vpop.permute.xlu2 %1819  ;;  %v2855_v21 = vadd.f32 %v9644_v17, %v9557_v51  ;;  %v8722_v51 = vld [vmem:[%s11337_s5] sm:$0xff] }
 0x2c1   : > { %v3203_v10 = vpop.f32.mrf.mxu1  ;;  %v3401_v61 = vld [vmem:[#allocation3 + $0x50] sm:$0xff]  ;;  %v1877_v24 = vsel %vm334_vm3, %v9690_v57, %v1820_v30  ;;  %5360 = vmatpush.bf16.msra.mxu2 %v8722_v51 }
 0x2c2   : > { %3304 = vst.msk [vmem:[#allocation3 + $0x68] sm:$0xff] %vm334_vm3, %v3272_v47  ;;  %v3023_v27 = vadd.f32 %v9635_v5, %v2934_v62  ;;  %v3433_v8 = vpack.c.bf16 %v3401_v61, %v3401_v61 }
 0x2c4   : > { %v3112_v26 = vadd.f32 %v9609_v37, %v3023_v27  ;;  %2975 = vmatmul.bf16.gmra.mxu2 %v1873_v28  ;;  %8411 = vmatmul.msk.bf16.gmra.mxu1 %vm334_vm3, %v9712_v46  ;;  %v4026_v5 = vunpack.c.l.b16 %v3433_v8  ;;  %v9739_v9 = vpop.f32.mrf.mxu0  ;;  %v9743_v27 = vpack.c.b16 %v2460_v41, %v2459_v50 }
 0x2c6   : > { %v3201_v45 = vadd.f32 %v3200_v29, %v3112_v26  ;;  %v9728_v52 = vpack.c.b16 %v4026_v5, %v4025_v49  ;;  %v9735_v29 = vpop.f32.mrf.mxu3  ;;  %v2853_v26 = vadd.f32 %v9644_v17, %v9544_v3 }
 0x2c7   : > { %v2936_v0 = vpop.f32.mrf.mxu2 }
 0x2c8   : > { %v3273_v22 = vmax.f32 %v3201_v45, 0.0  ;;  %v2937_v37 = vadd.f32 %v2936_v0, %v2848_v53  ;;  %4073 = vrot.lane.b32.xlu2 %v9728_v52, %s8816_s23  ;;  %v1341_v45 = vld [vmem:[#allocation2 + $0x1e9] sm:$0xff]  ;;  %v1342_v0 = vld [vmem:[#allocation2 + $0x1f1] sm:$0xff] }
 0x2c9   : > { %v3205_v2 = vpop.f32.mrf.mxu1  ;;  %v3402_v42 = vld [vmem:[#allocation3 + $0x68] sm:$0xff]  ;;  %v1374_v3 = vpack.c.bf16 %v1342_v0, %v1342_v0 }
 0x2ca   : > { %3305 = vst.msk [vmem:[#allocation3 + $0x70] sm:$0xff] %vm334_vm3, %v3273_v22  ;;  %v3026_v18 = vadd.f32 %v9652_v43, %v2937_v37  ;;  %v3434_v43 = vpack.c.bf16 %v3402_v42, %v3402_v42  ;;  %v1373_v37 = vpack.c.bf16 %v1341_v45, %v1341_v45 }
 0x2cb   : > { %v2462_v42 = vunpack.c.l.b16 %v1374_v3 }
 0x2cc   : > { %v3115_v40 = vadd.f32 %v9657_v38, %v3026_v18  ;;  %v4027_v60 = vunpack.c.l.b16 %v3434_v43  ;;  %v9755_v31 = vpop.f32.mrf.mxu0 }
 0x2ce   : > { %v3204_v25 = vadd.f32 %v3203_v10, %v3115_v40  ;;  %v2461_v40 = vunpack.c.l.b16 %v1373_v37 }
 0x2cf   : > { %v2938_v6 = vpop.f32.mrf.mxu2 }
 0x2d0   : > { %v3274_v47 = vmax.f32 %v3204_v25, 0.0  ;;  %v2939_v62 = vadd.f32 %v2938_v6, %v2850_v11  ;;  %v1822_v25 = vpop.permute.xlu2 %1821 }
 0x2d1   : > { %v3208_v48 = vpop.f32.mrf.mxu1  ;;  %v3403_v61 = vld [vmem:[#allocation3 + $0x70] sm:$0xff] }
 0x2d2   : > { %3306 = vst.msk [vmem:[#allocation3 + $0x88] sm:$0xff] %vm334_vm3, %v3274_v47  ;;  %v3028_v38 = vadd.f32 %v9673_v15, %v2939_v62  ;;  %v3435_v8 = vpack.c.bf16 %v3403_v61, %v3403_v61  ;;  %v9752_v15 = vpop.f32.mrf.mxu3  ;;  %v9766_v62 = vpack.c.b16 %v2462_v42, %v2461_v40 }
 0x2d4   : > { %v3117_v10 = vadd.f32 %v9677_v44, %v3028_v38  ;;  %2980 = vmatmul.bf16.gmra.mxu2 %v1877_v24  ;;  %8412 = vmatmul.msk.bf16.gmra.mxu1 %vm334_vm3, %v9743_v27  ;;  %v4028_v28 = vunpack.c.l.b16 %v3435_v8  ;;  %v9773_v61 = vpop.f32.mrf.mxu0  ;;  %v2858_v24 = vadd.f32 %v9644_v17, %v9570_v19 }
 0x2d6   : > { %v3206_v49 = vadd.f32 %v3205_v2, %v3117_v10  ;;  %v4056_v5 = vpack.c.b16 %v4028_v28, %v4027_v60 }
 0x2d7   : > { %v2941_v53 = vpop.f32.mrf.mxu2 }
 0x2d8   : > { %v3275_v56 = vmax.f32 %v3206_v49, 0.0  ;;  %v2942_v57 = vadd.f32 %v2941_v53, %v2853_v26  ;;  %4075 = vrot.lane.b32.xlu2 %v4056_v5, %s8816_s23  ;;  %v1343_v26 = vld [vmem:[#allocation2 + $0x209] sm:$0xff]  ;;  %v1344_v49 = vld [vmem:[#allocation2 + $0x211] sm:$0xff] }
 0x2d9   : > { %v3210_v44 = vpop.f32.mrf.mxu1  ;;  %v3404_v18 = vld [vmem:[#allocation3 + $0x88] sm:$0xff]  ;;  %v1375_v45 = vpack.c.bf16 %v1343_v26, %v1343_v26  ;;  %v1376_v0 = vpack.c.bf16 %v1344_v49, %v1344_v49 }
 0x2da   : > { %3307 = vst.msk [vmem:[#allocation3 + $0x90] sm:$0xff] %vm334_vm3, %v3275_v56  ;;  %v3031_v22 = vadd.f32 %v9684_v12, %v2942_v57  ;;  %v3436_v6 = vpack.c.bf16 %v3404_v18, %v3404_v18  ;;  %v9762_v30 = vpop.f32.mrf.mxu3 }
 0x2db   : > { %v2463_v3 = vunpack.c.l.b16 %v1375_v45  ;;  %v3332_v45 = vld [vmem:[#allocation3 + $0x7] sm:$0xff] }
 0x2dc   : > { %v3120_v2 = vadd.f32 %v9686_v63, %v3031_v22  ;;  %v4029_v8 = vunpack.c.l.b16 %v3436_v6  ;;  %v9788_v22 = vpop.f32.mrf.mxu0 }
 0x2de   : > { %v3209_v58 = vadd.f32 %v3208_v48, %v3120_v2  ;;  %v1881_v48 = vsel %vm334_vm3, %v9712_v46, %v1822_v25  ;;  %v2464_v2 = vunpack.c.l.b16 %v1376_v0 }
 0x2df   : > { %v2943_v11 = vpop.f32.mrf.mxu2 }
 0x2e0   : > { %v3276_v50 = vmax.f32 %v3209_v58, 0.0  ;;  %v2944_v41 = vadd.f32 %v2943_v11, %v2855_v21  ;;  %v1824_v21 = vpop.permute.xlu2 %1823  ;;  %v9792_v25 = vpack.c.b16 %v2464_v2, %v2463_v3 }
 0x2e1   : > { %v3213_v47 = vpop.f32.mrf.mxu1  ;;  %v3405_v12 = vld [vmem:[#allocation3 + $0x90] sm:$0xff] }
 0x2e2   : > { %3308 = vst.msk [vmem:[#allocation3 + $0xa8] sm:$0xff] %vm334_vm3, %v3276_v50  ;;  %v3033_v63 = vadd.f32 %v9701_v35, %v2944_v41  ;;  %v3437_v43 = vpack.c.bf16 %v3405_v12, %v3405_v12  ;;  %v9783_v56 = vpop.f32.mrf.mxu3 }
 0x2e4   : > { %v3122_v38 = vadd.f32 %v9705_v39, %v3033_v63  ;;  %2985 = vmatmul.bf16.gmra.mxu2 %v1881_v48  ;;  %8413 = vmatmul.msk.bf16.gmra.mxu1 %vm334_vm3, %v9766_v62  ;;  %v4030_v35 = vunpack.c.l.b16 %v3437_v43  ;;  %v2863_v63 = vadd.f32 %v9644_v17, %v9593_v23  ;;  %v9803_v48 = vpop.f32.mrf.mxu0 }
 0x2e6   : > { %v3211_v10 = vadd.f32 %v3210_v44, %v3122_v38  ;;  %v4057_v60 = vpack.c.b16 %v4030_v35, %v4029_v8  ;;  %v2860_v44 = vadd.f32 %v9644_v17, %v9585_v34  ;;  %v1885_v34 = vsel %vm334_vm3, %v9743_v27, %v1824_v21  ;;  %v8737_v35 = vld [vmem:[%s11337_s5 + $0x78] sm:$0xff] }
 0x2e7   : > { %v2946_v28 = vpop.f32.mrf.mxu2  ;;  %5442 = vmatpush.bf16.msra.mxu3 %v8737_v35 }
 0x2e8   : > { %v3277_v46 = vmax.f32 %v3211_v10, 0.0  ;;  %v2947_v5 = vadd.f32 %v2946_v28, %v2858_v24  ;;  %4077 = vrot.lane.b32.xlu0 %v4057_v60, %s8816_s23  ;;  %v2865_v10 = vadd.f32 %v9644_v17, %v9606_v13  ;;  %v1826_v49 = vpop.permute.xlu2 %1825  ;;  %v8757_v13 = vld [vmem:[%s11337_s5 + $0x118] sm:$0xff] }
 0x2e9   : > { %v3215_v39 = vpop.f32.mrf.mxu1  ;;  %v3406_v57 = vld [vmem:[#allocation3 + $0xa8] sm:$0xff]  ;;  %5713 = vmatpush.bf16.msrb.mxu2 %v8757_v13 }
 0x2ea   : > { %3309 = vst.msk [vmem:[#allocation3 + $0xb0] sm:$0xff] %vm334_vm3, %v3277_v46  ;;  %v3036_v53 = vadd.f32 %v9717_v14, %v2947_v5  ;;  %v3438_v14 = vpack.c.bf16 %v3406_v57, %v3406_v57  ;;  %v9799_v12 = vpop.f32.mrf.mxu3  ;;  %v3333_v57 = vld [vmem:[#allocation3 + $0xf] sm:$0xff] }
 0x2eb   : > { %v3365_v21 = vpack.c.bf16 %v3333_v57, %v3333_v57 }
 0x2ec   : > { %v3125_v19 = vadd.f32 %v9726_v55, %v3036_v53  ;;  %v4031_v6 = vunpack.c.l.b16 %v3438_v14  ;;  %v9816_v0 = vpop.f32.mrf.mxu0 }
 0x2ee   : > { %v3214_v37 = vadd.f32 %v3213_v47, %v3125_v19 }
 0x2ef   : > { %v2948_v18 = vpop.f32.mrf.mxu2 }
 0x2f0   : > { %v3278_v58 = vmax.f32 %v3214_v37, 0.0  ;;  %v2949_v40 = vadd.f32 %v2948_v18, %v2860_v44  ;;  %v8745_v44 = vld [vmem:[%s11337_s5 + $0xb8] sm:$0xff]  ;;  %v1889_v37 = vsel %vm334_vm3, %v9766_v62, %v1826_v49 }
 0x2f1   : > { %v3218_v42 = vpop.f32.mrf.mxu1  ;;  %v3407_v11 = vld [vmem:[#allocation3 + $0xb0] sm:$0xff]  ;;  %5531 = vmatpush.bf16.msra.mxu0 %v8745_v44 }
 0x2f2   : > { %3310 = vst.msk [vmem:[#allocation3 + $0xc8] sm:$0xff] %vm334_vm3, %v3278_v58  ;;  %v3038_v55 = vadd.f32 %v9735_v29, %v2949_v40  ;;  %v3439_v50 = vpack.c.bf16 %v3407_v11, %v3407_v11  ;;  %v9814_v28 = vpop.f32.mrf.mxu3  ;;  %v2868_v58 = vadd.f32 %v9644_v17, %v9615_v59  ;;  %v8753_v59 = vld [vmem:[%s11337_s5 + $0xf8] sm:$0xff] }
 0x2f3   : > { %5620 = vmatpush.bf16.msra.mxu1 %v8753_v59 }
 0x2f4   : > { %v3127_v41 = vadd.f32 %v9739_v9, %v3038_v55  ;;  %2990 = vmatmul.bf16.gmra.mxu2 %v1885_v34  ;;  %8414 = vmatmul.msk.bf16.gmra.mxu1 %vm334_vm3, %v9792_v25  ;;  %v4032_v47 = vunpack.c.l.b16 %v3439_v50  ;;  %v3942_v34 = vunpack.c.l.b16 %v3365_v21 }
 0x2f6   : > { %v3216_v29 = vadd.f32 %v3215_v39, %v3127_v41  ;;  %v4058_v43 = vpack.c.b16 %v4032_v47, %v4031_v6  ;;  %v3141_v6 = vpop.f32.mrf.mxu0 }
 0x2f7   : > { %v2951_v51 = vpop.f32.mrf.mxu2 }
 0x2f8   : > { %v3279_v38 = vmax.f32 %v3216_v29, 0.0  ;;  %v2952_v27 = vadd.f32 %v2951_v51, %v2863_v63  ;;  %4079 = vrot.lane.b32.xlu1 %v4058_v43, %s8816_s23  ;;  %v2870_v43 = vadd.f32 %v9644_v17, %v9631_v4 }
 0x2f9   : > { %v3220_v9 = vpop.f32.mrf.mxu1  ;;  %v3408_v24 = vld [vmem:[#allocation3 + $0xc8] sm:$0xff] }
 0x2fa   : > { %3311 = vst.msk [vmem:[#allocation3 + $0xd0] sm:$0xff] %vm334_vm3, %v3279_v38  ;;  %v3041_v8 = vadd.f32 %v9752_v15, %v2952_v27  ;;  %v3440_v39 = vpack.c.bf16 %v3408_v24, %v3408_v24  ;;  %v9832_v62 = vpop.f32.mrf.mxu3 }
 0x2fc   : > { %v3130_v23 = vadd.f32 %v9755_v31, %v3041_v8  ;;  %v4033_v2 = vunpack.c.l.b16 %v3440_v39 }
 0x2fe   : > { %v3219_v60 = vadd.f32 %v3218_v42, %v3130_v23 }
 0x2ff   : > { %v2953_v26 = vpop.f32.mrf.mxu2 }
 0x300   : > { %v3280_v46 = vmax.f32 %v3219_v60, 0.0  ;;  %v2954_v5 = vadd.f32 %v2953_v26, %v2865_v10 }
 0x301   : > { %v3223_v15 = vpop.f32.mrf.mxu1  ;;  %v3409_v53 = vld [vmem:[#allocation3 + $0xd0] sm:$0xff] }
 0x302   : > { %3312 = vst.msk [vmem:[#allocation3 + $0xe8] sm:$0xff] %vm334_vm3, %v3280_v46  ;;  %v3043_v31 = vadd.f32 %v9762_v30, %v2954_v5  ;;  %v3441_v19 = vpack.c.bf16 %v3409_v53, %v3409_v53  ;;  %v3364_v30 = vpack.c.bf16 %v3332_v45, %v3332_v45  ;;  %v3055_v60 = vpop.f32.mrf.mxu3  ;;  %v2873_v46 = vadd.f32 %v9644_v17, %v9480_v36  ;;  %v3144_v5 = vpop.f32.mrf.mxu0  ;;  %v3335_v53 = vld [vmem:[#allocation3 + $0x2f] sm:$0xff] }
 0x303   : > { %v3367_v13 = vpack.c.bf16 %v3335_v53, %v3335_v53  ;;  %v8736_v36 = vld [vmem:[%s11337_s5 + $0x70] sm:$0xff] }
 0x304   : > { %v3132_v3 = vadd.f32 %v9773_v61, %v3043_v31  ;;  %2995 = vmatmul.bf16.gmra.mxu2 %v1889_v37  ;;  %v4034_v18 = vunpack.c.l.b16 %v3441_v19  ;;  %v3941_v50 = vunpack.c.l.b16 %v3364_v30  ;;  %5443 = vmatpush.bf16.msra.mxu3 %v8736_v36  ;;  %v2875_v30 = vadd.f32 %v9644_v17, %v9488_v1  ;;  %v8744_v1 = vld [vmem:[%s11337_s5 + $0xb0] sm:$0xff] }
 0x305   : > { %5532 = vmatpush.bf16.msra.mxu0 %v8744_v1 }
 0x306   : > { %v3221_v40 = vadd.f32 %v3220_v9, %v3132_v3  ;;  %v4059_v14 = vpack.c.b16 %v4034_v18, %v4033_v2  ;;  %v3973_v63 = vpack.c.b16 %v3942_v34, %v3941_v50  ;;  %v4070_v9 = vpop.permute.xlu2 %4069  ;;  %v3944_v2 = vunpack.c.l.b16 %v3367_v13 }
 0x307   : > { %v2956_v42 = vpop.f32.mrf.mxu2 }
 0x308   : > { %v3281_v11 = vmax.f32 %v3221_v40, 0.0  ;;  %v2957_v55 = vadd.f32 %v2956_v42, %v2868_v58  ;;  %4081 = vrot.lane.b32.xlu2 %v4059_v14, %s8816_s23 }
 0x309   : > { %v3225_v61 = vpop.f32.mrf.mxu1  ;;  %v3410_v29 = vld [vmem:[#allocation3 + $0xe8] sm:$0xff] }
 0x30a   : > { %3313 = vst.msk [vmem:[#allocation3 + $0xf0] sm:$0xff] %vm334_vm3, %v3281_v11  ;;  %v3046_v41 = vadd.f32 %v9783_v56, %v2957_v55  ;;  %v3442_v35 = vpack.c.bf16 %v3410_v29, %v3410_v29  ;;  %v4103_v56 = vsel %vm334_vm3, %v3973_v63, %v4070_v9  ;;  %v3057_v3 = vpop.f32.mrf.mxu3  ;;  %v3146_v14 = vpop.f32.mrf.mxu0 }
 0x30c   : > { %v3135_v47 = vadd.f32 %v9788_v22, %v3046_v41  ;;  %v4035_v4 = vunpack.c.l.b16 %v3442_v35 }
 0x30e   : > { %v3224_v51 = vadd.f32 %v3223_v15, %v3135_v47 }
 0x30f   : > { %v2958_v38 = vpop.f32.mrf.mxu2 }
 0x310   : > { %v3282_v27 = vmax.f32 %v3224_v51, 0.0  ;;  %v2959_v8 = vadd.f32 %v2958_v38, %v2870_v43  ;;  %v2878_v43 = vadd.f32 %v9644_v17, %v9497_v16  ;;  %v8752_v16 = vld [vmem:[%s11337_s5 + $0xf0] sm:$0xff] }
 0x311   : > { %v3228_v23 = vpop.f32.mrf.mxu1  ;;  %v3411_v24 = vld [vmem:[#allocation3 + $0xf0] sm:$0xff]  ;;  %5621 = vmatpush.bf16.msra.mxu1 %v8752_v16 }
 0x312   : > { %3314 = vst.msk [vmem:[#allocation3 + $0x108] sm:$0xff] %vm334_vm3, %v3282_v27  ;;  %v3048_v22 = vadd.f32 %v9799_v12, %v2959_v8  ;;  %v3443_v10 = vpack.c.bf16 %v3411_v24, %v3411_v24  ;;  %v3334_v12 = vld [vmem:[#allocation3 + $0x27] sm:$0xff]  ;;  %v4072_v42 = vpop.permute.xlu2 %4071  ;;  %v3337_v27 = vld [vmem:[#allocation3 + $0x4f] sm:$0xff] }
 0x313   : > { %v3366_v44 = vpack.c.bf16 %v3334_v12, %v3334_v12  ;;  %v3369_v24 = vpack.c.bf16 %v3337_v27, %v3337_v27 }
 0x314   : > { %v3137_v26 = vadd.f32 %v9803_v48, %v3048_v22  ;;  %5361 = vmatmul.bf16.vlgmr.msra.gmra.mxu2 %v4103_v56  ;;  %v4036_v49 = vunpack.c.l.b16 %v3443_v10  ;;  %v3336_v56 = vld [vmem:[#allocation3 + $0x47] sm:$0xff] }
 0x315   : > { %v3943_v40 = vunpack.c.l.b16 %v3366_v44  ;;  %v3368_v10 = vpack.c.bf16 %v3336_v56, %v3336_v56 }
 0x316   : > { %v3226_v39 = vadd.f32 %v3225_v61, %v3137_v26  ;;  %v4060_v15 = vpack.c.b16 %v4036_v49, %v4035_v4  ;;  %v3946_v4 = vunpack.c.l.b16 %v3369_v24 }
 0x317   : > { %v2961_v45 = vpop.f32.mrf.mxu2  ;;  %v9857_v50 = vpack.c.b16 %v3944_v2, %v3943_v40  ;;  %v3945_v53 = vunpack.c.l.b16 %v3368_v10  ;;  %v3339_v40 = vld [vmem:[#allocation3 + $0x6f] sm:$0xff] }
 0x318   : > { %v3283_v31 = vmax.f32 %v3226_v39, 0.0  ;;  %v2962_v19 = vadd.f32 %v2961_v45, %v2873_v46  ;;  %4083 = vrot.lane.b32.xlu0 %v4060_v15, %s8816_s23  ;;  %v2880_v46 = vadd.f32 %v9644_v17, %v9502_v32 }
 0x319   : > { %v3230_v57 = vpop.f32.mrf.mxu1  ;;  %v3412_v18 = vld [vmem:[#allocation3 + $0x108] sm:$0xff]  ;;  %v4107_v59 = vsel %vm334_vm3, %v9857_v50, %v4072_v42  ;;  %v9875_v13 = vpack.c.b16 %v3946_v4, %v3945_v53  ;;  %v2888_v4 = vadd.f32 %v9644_v17, %v9534_v20 }
 0x31a   : > { %3315 = vst.msk [vmem:[#allocation3 + $0x110] sm:$0xff] %vm334_vm3, %v3283_v31  ;;  %v3051_v48 = vadd.f32 %v9814_v28, %v2962_v19  ;;  %v3444_v55 = vpack.c.bf16 %v3412_v18, %v3412_v18  ;;  %v3654_v20 = vld [vmem:[#allocation3 + $0x49] sm:$0xff] }
 0x31c   : > { %v3140_v37 = vadd.f32 %v9816_v0, %v3051_v48  ;;  %v4037_v63 = vunpack.c.l.b16 %v3444_v55 }
 0x31e   : > { %v3229_v21 = vadd.f32 %v3228_v23, %v3140_v37 }
 0x31f   : > { %v2963_v58 = vpop.f32.mrf.mxu2 }
 0x320   : > { %v3284_v28 = vmax.f32 %v3229_v21, 0.0  ;;  %v2964_v11 = vadd.f32 %v2963_v58, %v2875_v30  ;;  %v2883_v30 = vadd.f32 %v9644_v17, %v9514_v54 }
 0x321   : > { %v3233_v61 = vpop.f32.mrf.mxu1  ;;  %v3413_v34 = vld [vmem:[#allocation3 + $0x110] sm:$0xff] }
 0x322   : > { %3316 = vst.msk [vmem:[#allocation3 + $0x128] sm:$0xff] %vm334_vm3, %v3284_v28  ;;  %v3053_v0 = vadd.f32 %v9832_v62, %v2964_v11  ;;  %v3445_v41 = vpack.c.bf16 %v3413_v34, %v3413_v34  ;;  %v3060_v62 = vpop.f32.mrf.mxu3  ;;  %v4074_v45 = vpop.permute.xlu2 %4073  ;;  %v8735_v34 = vld [vmem:[%s11337_s5 + $0x68] sm:$0xff] }
 0x323   : > { %v4111_v44 = vsel %vm334_vm3, %v9875_v13, %v4074_v45  ;;  %5444 = vmatpush.bf16.msra.mxu3 %v8735_v34 }
 0x324   : > { %v3142_v47 = vadd.f32 %v3141_v6, %v3053_v0  ;;  %5366 = vmatmul.bf16.gmra.mxu2 %v4107_v59  ;;  %v4038_v29 = vunpack.c.l.b16 %v3445_v41  ;;  %v3149_v6 = vpop.f32.mrf.mxu0 }
 0x326   : > { %v3231_v51 = vadd.f32 %v3230_v57, %v3142_v47  ;;  %v4061_v38 = vpack.c.b16 %v4038_v29, %v4037_v63  ;;  %v2885_v47 = vadd.f32 %v9644_v17, %v9522_v7  ;;  %v8756_v7 = vld [vmem:[%s11337_s5 + $0x110] sm:$0xff] }
 0x327   : > { %v2966_v9 = vpop.f32.mrf.mxu2  ;;  %5714 = vmatpush.bf16.msrb.mxu2 %v8756_v7 }
 0x328   : > { %v3285_v8 = vmax.f32 %v3231_v51, 0.0  ;;  %v2967_v35 = vadd.f32 %v2966_v9, %v2878_v43  ;;  %4085 = vrot.lane.b32.xlu1 %v4061_v38, %s8816_s23 }
 0x329   : > { %v3235_v23 = vpop.f32.mrf.mxu1  ;;  %v3414_v49 = vld [vmem:[#allocation3 + $0x128] sm:$0xff] }
 0x32a   : > { %3317 = vst.msk [vmem:[#allocation3 + $0x130] sm:$0xff] %vm334_vm3, %v3285_v8  ;;  %v3056_v22 = vadd.f32 %v3055_v60, %v2967_v35  ;;  %v3446_v12 = vpack.c.bf16 %v3414_v49, %v3414_v49  ;;  %v3062_v60 = vpop.f32.mrf.mxu3 }
 0x32c   : > { %v3145_v26 = vadd.f32 %v3144_v5, %v3056_v22  ;;  %v3151_v32 = vpop.f32.mrf.mxu0  ;;  %v4039_v2 = vunpack.c.l.b16 %v3446_v12  ;;  %v8751_v12 = vld [vmem:[%s11337_s5 + $0xe8] sm:$0xff] }
 0x32d   : > { %5622 = vmatpush.bf16.msra.mxu1 %v8751_v12 }
 0x32e   : > { %v3234_v39 = vadd.f32 %v3233_v61, %v3145_v26  ;;  %v3371_v61 = vpack.c.bf16 %v3339_v40, %v3339_v40  ;;  %v1281_v40 = vld [vmem:[#allocation2 + $0x228] sm:$0xff] }
 0x32f   : > { %v2968_v15 = vpop.f32.mrf.mxu2 }
 0x330   : > { %v3286_v31 = vmax.f32 %v3234_v39, 0.0  ;;  %v2969_v19 = vadd.f32 %v2968_v15, %v2880_v46  ;;  %v3948_v1 = vunpack.c.l.b16 %v3371_v61 }
 0x331   : > { %v3238_v57 = vpop.f32.mrf.mxu1  ;;  %v3415_v48 = vld [vmem:[#allocation3 + $0x130] sm:$0xff] }
 0x332   : > { %3318 = vst.msk [vmem:[#allocation3 + $0x148] sm:$0xff] %vm334_vm3, %v3286_v31  ;;  %v3058_v5 = vadd.f32 %v3057_v3, %v2969_v19  ;;  %v3447_v36 = vpack.c.bf16 %v3415_v48, %v3415_v48  ;;  %v3338_v3 = vld [vmem:[#allocation3 + $0x67] sm:$0xff]  ;;  %v3065_v0 = vpop.f32.mrf.mxu3  ;;  %v4076_v38 = vpop.permute.xlu2 %4075 }
 0x333   : > { %v3370_v54 = vpack.c.bf16 %v3338_v3, %v3338_v3 }
 0x334   : > { %v3147_v37 = vadd.f32 %v3146_v14, %v3058_v5  ;;  %5371 = vmatmul.bf16.gmra.mxu2 %v4111_v44  ;;  %v4040_v18 = vunpack.c.l.b16 %v3447_v36  ;;  %v3154_v63 = vpop.f32.mrf.mxu0  ;;  %v2890_v5 = vadd.f32 %v9644_v17, %v9542_v33  ;;  %v3686_v44 = vpack.c.bf16 %v3654_v20, %v3654_v20  ;;  %v3343_v20 = vld [vmem:[#allocation3 + $0xaf] sm:$0xff] }
 0x335   : > { %v3947_v51 = vunpack.c.l.b16 %v3370_v54 }
 0x336   : > { %v3236_v21 = vadd.f32 %v3235_v23, %v3147_v37  ;;  %v4062_v58 = vpack.c.b16 %v4040_v18, %v4039_v2 }
 0x337   : > { %v2971_v42 = vpop.f32.mrf.mxu2  ;;  %v9891_v35 = vpack.c.b16 %v3948_v1, %v3947_v51 }
 0x338   : > { %v3287_v28 = vmax.f32 %v3236_v21, 0.0  ;;  %v2972_v11 = vadd.f32 %v2971_v42, %v2883_v30  ;;  %4087 = vrot.lane.b32.xlu2 %v4062_v58, %s8816_s23  ;;  %v3340_v58 = vld [vmem:[#allocation3 + $0x87] sm:$0xff] }
 0x339   : > { %v3240_v55 = vpop.f32.mrf.mxu1  ;;  %v3416_v59 = vld [vmem:[#allocation3 + $0x148] sm:$0xff]  ;;  %v3372_v34 = vpack.c.bf16 %v3340_v58, %v3340_v58 }
 0x33a   : > { %3319 = vst.msk [vmem:[#allocation3 + $0x150] sm:$0xff] %vm334_vm3, %v3287_v28  ;;  %v3061_v14 = vadd.f32 %v3060_v62, %v2972_v11  ;;  %v3448_v9 = vpack.c.bf16 %v3416_v59, %v3416_v59  ;;  %v3067_v26 = vpop.f32.mrf.mxu3  ;;  %v1282_v11 = vld [vmem:[#allocation2 + $0x230] sm:$0xff] }
 0x33c   : > { %v3150_v41 = vadd.f32 %v3149_v6, %v3061_v14  ;;  %v8743_v6 = vld [vmem:[%s11337_s5 + $0xa8] sm:$0xff]  ;;  %v4041_v16 = vunpack.c.l.b16 %v3448_v9  ;;  %v3156_v15 = vpop.f32.mrf.mxu0 }
 0x33d   : > { %5533 = vmatpush.bf16.msra.mxu0 %v8743_v6 }
 0x33e   : > { %v3239_v29 = vadd.f32 %v3238_v57, %v3150_v41 }
 0x33f   : > { %v2973_v43 = vpop.f32.mrf.mxu2 }
 0x340   : > { %v3288_v27 = vmax.f32 %v3239_v29, 0.0  ;;  %v2974_v62 = vadd.f32 %v2973_v43, %v2885_v47  ;;  %2081 = vrot.lane.b32.xlu2 %v9792_v25, %s8816_s23  ;;  %v4115_v25 = vsel %vm334_vm3, %v9891_v35, %v4076_v38  ;;  %v9919_v47 = vld [vmem:[%s11336_s4] ss:$0 sm:$0xff] }
 0x341   : > { %v3243_v8 = vpop.f32.mrf.mxu1  ;;  %v3417_v56 = vld [vmem:[#allocation3 + $0x150] sm:$0xff] }
 0x342   : > { %3320 = vst.msk [vmem:[#allocation3 + $0x168] sm:$0xff] %vm334_vm3, %v3288_v27  ;;  %v3063_v23 = vadd.f32 %v3062_v60, %v2974_v62  ;;  %v3449_v24 = vpack.c.bf16 %v3417_v56, %v3417_v56  ;;  %v3655_v60 = vld [vmem:[#allocation3 + $0x51] sm:$0xff]  ;;  %v3070_v37 = vpop.f32.mrf.mxu3  ;;  %v3949_v62 = vunpack.c.l.b16 %v3372_v34 }
 0x344   : > { %v3152_v22 = vadd.f32 %v3151_v32, %v3063_v23  ;;  %5376 = vmatmul.bf16.gmra.mxu2 %v4115_v25  ;;  %v4042_v10 = vunpack.c.l.b16 %v3449_v24  ;;  %v3687_v32 = vpack.c.bf16 %v3655_v60, %v3655_v60  ;;  %v3159_v3 = vpop.f32.mrf.mxu0 }
 0x346   : > { %v3241_v49 = vadd.f32 %v3240_v55, %v3152_v22  ;;  %v4063_v46 = vpack.c.b16 %v4042_v10, %v4041_v16  ;;  %v4535_v55 = vunpack.c.l.b16 %v3686_v44  ;;  %v4536_v61 = vunpack.c.l.b16 %v3687_v32  ;;  %v8734_v22 = vld [vmem:[%s11337_s5 + $0x60] sm:$0xff]  ;;  %v3652_v10 = vld [vmem:[#allocation3 + $0x29] sm:$0xff] }
 0x347   : > { %v2976_v39 = vpop.f32.mrf.mxu2  ;;  %5445 = vmatpush.bf16.msra.mxu3 %v8734_v22  ;;  %v3375_v32 = vpack.c.bf16 %v3343_v20, %v3343_v20  ;;  %v11356_v20 = vld [vmem:[#allocation9_spill] sm:$0xff] }
 0x348   : > { %v3289_v53 = vmax.f32 %v3241_v49, 0.0  ;;  %v2977_v45 = vadd.f32 %v2976_v39, %v2888_v4  ;;  %4089 = vrot.lane.b32.xlu0 %v4063_v46, %s8816_s23  ;;  %4325 = vrot.lane.b32.xlu2 %v9857_v50, %s8816_s23  ;;  %v3341_v50 = vld [vmem:[#allocation3 + $0x8f] sm:$0xff]  ;;  %v4566_v38 = vpack.c.b16 %v4536_v61, %v4535_v55 }
 0x349   : > { %v3245_v31 = vpop.f32.mrf.mxu1  ;;  %v3418_v48 = vld [vmem:[#allocation3 + $0x168] sm:$0xff]  ;;  %v3373_v28 = vpack.c.bf16 %v3341_v50, %v3341_v50 }
 0x34a   : > { %3321 = vst.msk [vmem:[#allocation3 + $0x170] sm:$0xff] %vm334_vm3, %v3289_v53  ;;  %v3066_v19 = vadd.f32 %v3065_v0, %v2977_v45  ;;  %v3450_v21 = vpack.c.bf16 %v3418_v48, %v3418_v48  ;;  %v1313_v0 = vpack.c.bf16 %v1281_v40, %v1281_v40  ;;  %v3072_v24 = vpop.f32.mrf.mxu3  ;;  %v11353_v53 = vld [vmem:[#allocation6_spill] sm:$0xff] }
 0x34b   : > { %v3950_v59 = vunpack.c.l.b16 %v3373_v28  ;;  %v2895_v45 = vadd.f32 %v9919_v47, %v11353_v53 }
 0x34c   : > { %v3155_v57 = vadd.f32 %v3154_v63, %v3066_v19  ;;  %v4043_v41 = vunpack.c.l.b16 %v3450_v21  ;;  %v11352_v63 = vld [vmem:[#allocation5_spill] sm:$0xff]  ;;  %v2289_v56 = vunpack.c.l.b16 %v1313_v0  ;;  %v3161_v4 = vpop.f32.mrf.mxu0  ;;  %v3684_v19 = vpack.c.bf16 %v3652_v10, %v3652_v10 }
 0x34d   : > { %v2893_v29 = vadd.f32 %v9919_v47, %v11352_v63  ;;  %v9928_v7 = vpack.c.b16 %v3950_v59, %v3949_v62 }
 0x34e   : > { %v3244_v36 = vadd.f32 %v3243_v8, %v3155_v57 }
 0x34f   : > { %v2978_v2 = vpop.f32.mrf.mxu2 }
 0x350   : > { %v3290_v18 = vmax.f32 %v3244_v36, 0.0  ;;  %v2979_v30 = vadd.f32 %v2978_v2, %v2890_v5  ;;  %4837 = vrot.lane.b32.xlu2 %v9728_v52, %s8816_s23  ;;  %v1314_v52 = vpack.c.bf16 %v1282_v11, %v1282_v11  ;;  %v3342_v36 = vld [vmem:[#allocation3 + $0xa7] sm:$0xff]  ;;  %v3952_v11 = vunpack.c.l.b16 %v3375_v32 }
 0x351   : > { %v3419_v42 = vld [vmem:[#allocation3 + $0x170] sm:$0xff]  ;;  %v3248_v14 = vpop.f32.mrf.mxu1  ;;  %v3374_v58 = vpack.c.bf16 %v3342_v36, %v3342_v36 }
 0x352   : > { %3322 = vst.msk [vmem:[#allocation3 + $0x188] sm:$0xff] %vm334_vm3, %v3290_v18  ;;  %v3068_v33 = vadd.f32 %v3067_v26, %v2979_v30  ;;  %v3451_v17 = vpack.c.bf16 %v3419_v42, %v3419_v42  ;;  %v2290_v23 = vunpack.c.l.b16 %v1314_v52  ;;  %v3653_v26 = vld [vmem:[#allocation3 + $0x31] sm:$0xff]  ;;  %v8742_v30 = vld [vmem:[%s11337_s5 + $0xa0] sm:$0xff]  ;;  %v3075_v21 = vpop.f32.mrf.mxu3 }
 0x353   : > { %v3685_v12 = vpack.c.bf16 %v3653_v26, %v3653_v26  ;;  %5534 = vmatpush.bf16.msra.mxu0 %v8742_v30 }
 0x354   : > { %v3157_v54 = vadd.f32 %v3156_v15, %v3068_v33  ;;  %v4044_v1 = vunpack.c.l.b16 %v3451_v17  ;;  %v2306_v46 = vpack.c.b16 %v2290_v23, %v2289_v56  ;;  %v3164_v17 = vpop.f32.mrf.mxu0  ;;  %v3345_v23 = vld [vmem:[#allocation3 + $0xcf] sm:$0xff] }
 0x355   : > { %v4534_v2 = vunpack.c.l.b16 %v3685_v12 }
 0x356   : > { %v3246_v43 = vadd.f32 %v3245_v31, %v3157_v54  ;;  %v9923_v51 = vpack.c.b16 %v4044_v1, %v4043_v41  ;;  %v3951_v54 = vunpack.c.l.b16 %v3374_v58 }
 0x357   : > { %v2981_v27 = vpop.f32.mrf.mxu2 }
 0x358   : > { %v3291_v9 = vmax.f32 %v3246_v43, 0.0  ;;  %v2982_v8 = vadd.f32 %v2981_v27, %v2893_v29  ;;  %4091 = vrot.lane.b32.xlu1 %v9923_v51, %s8816_s23  ;;  %4583 = vrot.lane.b32.xlu2 %v4566_v38, %s8816_s23  ;;  %v9950_v52 = vpack.c.b16 %v3952_v11, %v3951_v54  ;;  %v8750_v29 = vld [vmem:[%s11337_s5 + $0xe0] sm:$0xff]  ;;  %v1345_v11 = vld [vmem:[#allocation2 + $0x229] sm:$0xff] }
 0x359   : > { %v3250_v39 = vpop.f32.mrf.mxu1  ;;  %v3420_v15 = vld [vmem:[#allocation3 + $0x188] sm:$0xff]  ;;  %5623 = vmatpush.bf16.msra.mxu1 %v8750_v29 }
 0x35a   : > { %3323 = vst.msk [vmem:[#allocation3 + $0x190] sm:$0xff] %vm334_vm3, %v3291_v9  ;;  %v3071_v6 = vadd.f32 %v3070_v37, %v2982_v8  ;;  %v4078_v25 = vpop.permute.xlu0 %4077  ;;  %v3452_v5 = vpack.c.bf16 %v3420_v15, %v3420_v15  ;;  %v4533_v37 = vunpack.c.l.b16 %v3684_v19  ;;  %v3077_v27 = vpop.f32.mrf.mxu3  ;;  %v11355_v9 = vld [vmem:[#allocation8_spill] sm:$0xff]  ;;  %v11357_v54 = vld [vmem:[#allocation10_spill] sm:$0xff] }
 0x35b   : > { %v4119_v16 = vsel %vm334_vm3, %v9928_v7, %v4078_v25  ;;  %v2900_v8 = vadd.f32 %v9919_v47, %v11355_v9  ;;  %v8733_v15 = vld [vmem:[%s11337_s5 + $0x58] sm:$0xff] }
 0x35c   : > { %v3160_v49 = vadd.f32 %v3159_v3, %v3071_v6  ;;  %5381 = vmatmul.bf16.gmra.mxu2 %v4119_v16  ;;  %v4045_v42 = vunpack.c.l.b16 %v3452_v5  ;;  %v11354_v3 = vld [vmem:[#allocation7_spill] sm:$0xff]  ;;  %v4565_v61 = vpack.c.b16 %v4534_v2, %v4533_v37  ;;  %v3344_v16 = vld [vmem:[#allocation3 + $0xc7] sm:$0xff]  ;;  %v3166_v10 = vpop.f32.mrf.mxu0  ;;  %5446 = vmatpush.bf16.msra.mxu3 %v8733_v15 }
 0x35d   : > { %v2898_v33 = vadd.f32 %v9919_v47, %v11354_v3  ;;  %v3376_v53 = vpack.c.bf16 %v3344_v16, %v3344_v16  ;;  %v1346_v3 = vld [vmem:[#allocation2 + $0x231] sm:$0xff] }
 0x35e   : > { %v3249_v31 = vadd.f32 %v3248_v14, %v3160_v49  ;;  %v3377_v49 = vpack.c.bf16 %v3345_v23, %v3345_v23  ;;  %v8748_v16 = vld [vmem:[%s11337_s5 + $0xd0] sm:$0xff] }
 0x35f   : > { %v2983_v60 = vpop.f32.mrf.mxu2  ;;  %v3657_v15 = vld [vmem:[#allocation3 + $0x71] sm:$0xff] }
 0x360   : > { %v3292_v57 = vmax.f32 %v3249_v31, 0.0  ;;  %v2984_v48 = vadd.f32 %v2983_v60, %v2895_v45  ;;  %2337 = vrot.lane.b32.xlu1 %v2306_v46, %s8816_s23  ;;  %v3954_v12 = vunpack.c.l.b16 %v3377_v49  ;;  %v2903_v60 = vadd.f32 %v9919_v47, %v11356_v20  ;;  %v3656_v49 = vld [vmem:[#allocation3 + $0x69] sm:$0xff] }
 0x361   : > { %v3421_v44 = vld [vmem:[#allocation3 + $0x190] sm:$0xff]  ;;  %v3253_v34 = vpop.f32.mrf.mxu1 }
 0x362   : > { %3324 = vst.msk [vmem:[#allocation3 + $0x1a8] sm:$0xff] %vm334_vm3, %v3292_v57  ;;  %v3073_v50 = vadd.f32 %v3072_v24, %v2984_v48  ;;  %v3453_v18 = vpack.c.bf16 %v3421_v44, %v3421_v44  ;;  %v3080_v5 = vpop.f32.mrf.mxu3  ;;  %v3953_v44 = vunpack.c.l.b16 %v3376_v53  ;;  %v4082_v32 = vpop.permute.xlu2 %4081  ;;  %v8731_v53 = vld [vmem:[%s11337_s5 + $0x48] sm:$0xff]  ;;  %v11358_v20 = vld [vmem:[#allocation11_spill] sm:$0xff] }
 0x364   : > { %v3162_v40 = vadd.f32 %v3161_v4, %v3073_v50  ;;  %v4046_v28 = vunpack.c.l.b16 %v3453_v18  ;;  %v3169_v2 = vpop.f32.mrf.mxu0  ;;  %v9970_v18 = vpack.c.b16 %v3954_v12, %v3953_v44  ;;  %v8747_v44 = vld [vmem:[%s11337_s5 + $0xc8] sm:$0xff] }
 0x366   : > { %v3251_v55 = vadd.f32 %v3250_v39, %v3162_v40  ;;  %v9945_v14 = vpack.c.b16 %v4046_v28, %v4045_v42  ;;  %v4127_v58 = vsel %vm334_vm3, %v9970_v18, %v4082_v32  ;;  %v3783_v40 = vld [vmem:[#allocation3 + $0x68] sm:$0xff]  ;;  %v3784_v42 = vld [vmem:[#allocation3 + $0x70] sm:$0xff] }
 0x367   : > { %v2986_v0 = vpop.f32.mrf.mxu2 }
 0x368   : > { %v3293_v41 = vmax.f32 %v3251_v55, 0.0  ;;  %v2987_v1 = vadd.f32 %v2986_v0, %v2898_v33  ;;  %4581 = vrot.lane.b32.xlu1 %v4565_v61, %s8816_s23  ;;  %4093 = vrot.lane.b32.xlu0 %v9945_v14, %s8816_s23  ;;  %v8755_v33 = vld [vmem:[%s11337_s5 + $0x108] sm:$0xff]  ;;  %v1377_v55 = vpack.c.bf16 %v1345_v11, %v1345_v11  ;;  %v1378_v61 = vpack.c.bf16 %v1346_v3, %v1346_v3  ;;  %v8741_v0 = vld [vmem:[%s11337_s5 + $0x98] sm:$0xff] }
 0x369   : > { %v3422_v62 = vld [vmem:[#allocation3 + $0x1a8] sm:$0xff]  ;;  %v3255_v26 = vpop.f32.mrf.mxu1  ;;  %5715 = vmatpush.bf16.msrb.mxu2 %v8755_v33  ;;  %5535 = vmatpush.bf16.msra.mxu0 %v8741_v0  ;;  %v8746_v11 = vld [vmem:[%s11337_s5 + $0xc0] sm:$0xff]  ;;  %v3659_v0 = vld [vmem:[#allocation3 + $0x91] sm:$0xff] }
 0x36a   : > { %3325 = vst.msk [vmem:[#allocation3 + $0x1b0] sm:$0xff] %vm334_vm3, %v3293_v41  ;;  %v3076_v59 = vadd.f32 %v3075_v21, %v2987_v1  ;;  %v4080_v63 = vpop.permute.xlu1 %4079  ;;  %v3454_v22 = vpack.c.bf16 %v3422_v62, %v3422_v62  ;;  %v2905_v41 = vadd.f32 %v9919_v47, %v11357_v54  ;;  %v3082_v23 = vpop.f32.mrf.mxu3  ;;  %v3785_v54 = vld [vmem:[#allocation3 + $0x88] sm:$0xff] }
 0x36b   : > { %v4123_v43 = vsel %vm334_vm3, %v9950_v52, %v4080_v63  ;;  %v3347_v63 = vld [vmem:[#allocation3 + $0xef] sm:$0xff] }
 0x36c   : > { %v3165_v38 = vadd.f32 %v3164_v17, %v3076_v59  ;;  %5386 = vmatmul.bf16.gmra.mxu2 %v4123_v43  ;;  %v4047_v31 = vunpack.c.l.b16 %v3454_v22  ;;  %v3816_v59 = vpack.c.bf16 %v3784_v42, %v3784_v42  ;;  %v2465_v43 = vunpack.c.l.b16 %v1377_v55  ;;  %v8732_v22 = vld [vmem:[%s11337_s5 + $0x50] sm:$0xff] }
 0x36d   : > { %5447 = vmatpush.bf16.msra.mxu3 %v8732_v22  ;;  %v3786_v55 = vld [vmem:[#allocation3 + $0x90] sm:$0xff] }
 0x36e   : > { %v3254_v56 = vadd.f32 %v3253_v34, %v3165_v38  ;;  %v8749_v34 = vld [vmem:[%s11337_s5 + $0xd8] sm:$0xff]  ;;  %v2466_v38 = vunpack.c.l.b16 %v1378_v61 }
 0x36f   : > { %v2988_v24 = vpop.f32.mrf.mxu2  ;;  %5624 = vmatpush.bf16.msra.mxu1 %v8749_v34  ;;  %v3658_v34 = vld [vmem:[#allocation3 + $0x89] sm:$0xff] }
 0x370   : > { %v3294_v6 = vmax.f32 %v3254_v56, 0.0  ;;  %v2989_v25 = vadd.f32 %v2988_v24, %v2900_v8  ;;  %v3815_v8 = vpack.c.bf16 %v3783_v40, %v3783_v40  ;;  %v3346_v56 = vld [vmem:[#allocation3 + $0xe7] sm:$0xff] }
 0x371   : > { %v3423_v4 = vld [vmem:[#allocation3 + $0x1b0] sm:$0xff]  ;;  %v3258_v21 = vpop.f32.mrf.mxu1  ;;  %5448 = vmatpush.bf16.msra.mxu3 %v8731_v53 }
 0x372   : > { %3326 = vst.msk [vmem:[#allocation3 + $0x1c8] sm:$0xff] %vm334_vm3, %v3294_v6  ;;  %v3078_v46 = vadd.f32 %v3077_v27, %v2989_v25  ;;  %v3455_v39 = vpack.c.bf16 %v3423_v4, %v3423_v4  ;;  %v3379_v6 = vpack.c.bf16 %v3347_v63, %v3347_v63  ;;  %v2482_v25 = vpack.c.b16 %v2466_v38, %v2465_v43  ;;  %v11359_v63 = vld [vmem:[#allocation12_spill] sm:$0xff] }
 0x373   : > { %v4792_v4 = vunpack.c.l.b16 %v3816_v59  ;;  %v4791_v12 = vunpack.c.l.b16 %v3815_v8  ;;  %5625 = vmatpush.bf16.msra.mxu1 %v8748_v16  ;;  %v1088_v59 = vld [vmem:[#allocation2 + $0x208] sm:$0xff]  ;;  %v3690_v38 = vpack.c.bf16 %v3658_v34, %v3658_v34 }
 0x374   : > { %v3167_v45 = vadd.f32 %v3166_v10, %v3078_v46  ;;  %v4048_v19 = vunpack.c.l.b16 %v3455_v39  ;;  %v3171_v46 = vpop.f32.mrf.mxu0  ;;  %v3378_v39 = vpack.c.bf16 %v3346_v56, %v3346_v56  ;;  %8415 = vmatmul.msk.bf16.gmra.mxu1 %vm334_vm3, %v2482_v25  ;;  %v3817_v56 = vpack.c.bf16 %v3785_v54, %v3785_v54  ;;  %v3348_v25 = vld [vmem:[#allocation3 + $0x107] sm:$0xff] }
 0x375   : > { %v3380_v53 = vpack.c.bf16 %v3348_v25, %v3348_v25 }
 0x376   : > { %v3256_v57 = vadd.f32 %v3255_v26, %v3167_v45  ;;  %v9966_v48 = vpack.c.b16 %v4048_v19, %v4047_v31 }
 0x377   : > { %v2991_v36 = vpop.f32.mrf.mxu2  ;;  %5626 = vmatpush.bf16.msra.mxu1 %v8747_v44 }
 0x378   : > { %v3295_v50 = vmax.f32 %v3256_v57, 0.0  ;;  %v2992_v37 = vadd.f32 %v2991_v36, %v2903_v60  ;;  %4095 = vrot.lane.b32.xlu0 %v9966_v48, %s8816_s23  ;;  %v2908_v60 = vadd.f32 %v9919_v47, %v11358_v20  ;;  %v3688_v36 = vpack.c.bf16 %v3656_v49, %v3656_v49  ;;  %v3787_v20 = vld [vmem:[#allocation3 + $0xa8] sm:$0xff] }
 0x379   : > { %v3424_v17 = vld [vmem:[#allocation3 + $0x1c8] sm:$0xff]  ;;  %v3260_v57 = vpop.f32.mrf.mxu1 }
 0x37a   : > { %3327 = vst.msk [vmem:[#allocation3 + $0x1d0] sm:$0xff] %vm334_vm3, %v3295_v50  ;;  %v3081_v30 = vadd.f32 %v3080_v5, %v2992_v37  ;;  %v3456_v9 = vpack.c.bf16 %v3424_v17, %v3424_v17  ;;  %v3956_v5 = vunpack.c.l.b16 %v3379_v6  ;;  %v4822_v37 = vpack.c.b16 %v4792_v4, %v4791_v12 }
 0x37b   : > { %v4537_v33 = vunpack.c.l.b16 %v3688_v36  ;;  %5627 = vmatpush.bf16.msra.mxu1 %v8746_v11  ;;  %v1120_v6 = vpack.c.bf16 %v1088_v59, %v1088_v59  ;;  %v4539_v4 = vunpack.c.l.b16 %v3690_v38  ;;  %v3663_v59 = vld [vmem:[#allocation3 + $0xd1] sm:$0xff] }
 0x37c   : > { %v3170_v28 = vadd.f32 %v3169_v2, %v3081_v30  ;;  %5391 = vmatmul.bf16.gmra.mxu2 %v4127_v58  ;;  %v4049_v31 = vunpack.c.l.b16 %v3456_v9  ;;  %v3689_v2 = vpack.c.bf16 %v3657_v15, %v3657_v15  ;;  %v3349_v9 = vld [vmem:[#allocation3 + $0x10f] sm:$0xff]  ;;  %v4793_v15 = vunpack.c.l.b16 %v3817_v56 }
 0x37d   : > { %v1953_v12 = vunpack.c.l.b16 %v1120_v6  ;;  %v3695_v56 = vpack.c.bf16 %v3663_v59, %v3663_v59  ;;  %v3667_v59 = vld [vmem:[#allocation3 + $0x111] sm:$0xff] }
 0x37e   : > { %v3259_v1 = vadd.f32 %v3258_v21, %v3170_v28  ;;  %v3955_v21 = vunpack.c.l.b16 %v3378_v39  ;;  %v8730_v28 = vld [vmem:[%s11337_s5 + $0x40] sm:$0xff]  ;;  %v4538_v17 = vunpack.c.l.b16 %v3689_v2  ;;  %v3788_v39 = vld [vmem:[#allocation3 + $0xb0] sm:$0xff] }
 0x37f   : > { %v2993_v29 = vpop.f32.mrf.mxu2  ;;  %5449 = vmatpush.bf16.msra.mxu3 %v8730_v28  ;;  %v3820_v36 = vpack.c.bf16 %v3788_v39, %v3788_v39  ;;  %v4544_v39 = vunpack.c.l.b16 %v3695_v56 }
 0x380   : > { %v3296_v27 = vmax.f32 %v3259_v1, 0.0  ;;  %v2994_v62 = vadd.f32 %v2993_v29, %v2905_v41  ;;  %4327 = vrot.lane.b32.xlu0 %v9875_v13, %s8816_s23  ;;  %v10011_v42 = vpack.c.b16 %v3956_v5, %v3955_v21  ;;  %v3818_v41 = vpack.c.bf16 %v3786_v55, %v3786_v55 }
 0x381   : > { %v3425_v24 = vld [vmem:[#allocation3 + $0x1d0] sm:$0xff]  ;;  %v2910_v29 = vadd.f32 %v9919_v47, %v11359_v63  ;;  %v4567_v43 = vpack.c.b16 %v4538_v17, %v4537_v33  ;;  %v3957_v21 = vunpack.c.l.b16 %v3380_v53 }
 0x382   : > { %3328 = vst.msk [vmem:[#allocation3 + $0x1e8] sm:$0xff] %vm334_vm3, %v3296_v27  ;;  %v3083_v10 = vadd.f32 %v3082_v23, %v2994_v62  ;;  %v3457_v26 = vpack.c.bf16 %v3425_v24, %v3425_v24  ;;  %v3691_v27 = vpack.c.bf16 %v3659_v0, %v3659_v0  ;;  %v1089_v62 = vld [vmem:[#allocation2 + $0x210] sm:$0xff]  ;;  %v4794_v22 = vunpack.c.l.b16 %v3818_v41 }
 0x383   : > { %v1121_v47 = vpack.c.bf16 %v1089_v62, %v1089_v62  ;;  %v3790_v41 = vld [vmem:[#allocation3 + $0xd0] sm:$0xff] }
 0x384   : > { %v3172_v45 = vadd.f32 %v3171_v46, %v3083_v10  ;;  %v4050_v19 = vunpack.c.l.b16 %v3457_v26  ;;  %v3381_v10 = vpack.c.bf16 %v3349_v9, %v3349_v9  ;;  %v4540_v49 = vunpack.c.l.b16 %v3691_v27  ;;  %v3460_v63 = vld [vmem:[#allocation3 + $0x9] sm:$0xff] }
 0x385   : > { %v3789_v27 = vld [vmem:[#allocation3 + $0xc8] sm:$0xff]  ;;  %v3822_v9 = vpack.c.bf16 %v3790_v41, %v3790_v41  ;;  %v3492_v25 = vpack.c.bf16 %v3460_v63, %v3460_v63  ;;  %v3794_v41 = vld [vmem:[#allocation3 + $0x110] sm:$0xff] }
 0x386   : > { %v3261_v32 = vadd.f32 %v3260_v57, %v3172_v45  ;;  %v10004_v50 = vpack.c.b16 %v4050_v19, %v4049_v31  ;;  %v3660_v45 = vld [vmem:[#allocation3 + $0xa9] sm:$0xff]  ;;  %v3661_v31 = vld [vmem:[#allocation3 + $0xb1] sm:$0xff]  ;;  %v1954_v57 = vunpack.c.l.b16 %v1121_v47  ;;  %v3958_v5 = vunpack.c.l.b16 %v3381_v10 }
 0x387   : > { %v2996_v30 = vpop.f32.mrf.mxu2  ;;  %v4568_v44 = vpack.c.b16 %v4540_v49, %v4539_v4  ;;  %v3693_v2 = vpack.c.bf16 %v3661_v31, %v3661_v31  ;;  %v3350_v47 = vld [vmem:[#allocation3 + $0x127] sm:$0xff]  ;;  %v4798_v49 = vunpack.c.l.b16 %v3822_v9  ;;  %v4197_v53 = vunpack.c.l.b16 %v3492_v25 }
 0x388   : > { %v3297_v58 = vmax.f32 %v3261_v32, 0.0  ;;  %v10006_v40 = vadd.f32 %v2996_v30, %v2908_v60  ;;  %4097 = vrot.lane.b32.xlu1 %v10004_v50, %s8816_s23  ;;  %4839 = vrot.lane.b32.xlu0 %v4822_v37, %s8816_s23  ;;  %v4823_v60 = vpack.c.b16 %v4794_v22, %v4793_v15  ;;  %v3692_v37 = vpack.c.bf16 %v3660_v45, %v3660_v45  ;;  %v3792_v15 = vld [vmem:[#allocation3 + $0xf0] sm:$0xff]  ;;  %v3793_v63 = vld [vmem:[#allocation3 + $0x108] sm:$0xff] }
 0x389   : > { %v3426_v1 = vld [vmem:[#allocation3 + $0x1e8] sm:$0xff]  ;;  %v1970_v28 = vpack.c.b16 %v1954_v57, %v1953_v12  ;;  %v10039_v11 = vpack.c.b16 %v3958_v5, %v3957_v21  ;;  %v3382_v31 = vpack.c.bf16 %v3350_v47, %v3350_v47  ;;  %v3824_v57 = vpack.c.bf16 %v3792_v15, %v3792_v15  ;;  %v3669_v47 = vld [vmem:[#allocation3 + $0x131] sm:$0xff] }
 0x38a   : > { %3329 = vst.msk [vmem:[#allocation3 + $0x1f0] sm:$0xff] %vm334_vm3, %v3297_v58  ;;  %v4084_v3 = vpop.permute.xlu0 %4083  ;;  %v3458_v24 = vpack.c.bf16 %v3426_v1, %v3426_v1  ;;  %v3819_v58 = vpack.c.bf16 %v3787_v20, %v3787_v20  ;;  %v4541_v55 = vunpack.c.l.b16 %v3692_v37  ;;  %v3662_v1 = vld [vmem:[#allocation3 + $0xc9] sm:$0xff] }
 0x38b   : > { %v4131_v61 = vsel %vm334_vm3, %v10011_v42, %v4084_v3  ;;  %v4796_v3 = vunpack.c.l.b16 %v3820_v36  ;;  %v3791_v20 = vld [vmem:[#allocation3 + $0xe8] sm:$0xff]  ;;  %v3959_v21 = vunpack.c.l.b16 %v3382_v31 }
 0x38c   : > { %5396 = vmatmul.bf16.gmra.mxu2 %v4131_v61  ;;  %v4542_v61 = vunpack.c.l.b16 %v3693_v2  ;;  %v4795_v54 = vunpack.c.l.b16 %v3819_v58  ;;  %v3823_v58 = vpack.c.bf16 %v3791_v20, %v3791_v20 }
 0x38e   : > { %v4824_v38 = vpack.c.b16 %v4796_v3, %v4795_v54  ;;  %v4569_v62 = vpack.c.b16 %v4542_v61, %v4541_v55  ;;  %v4800_v3 = vunpack.c.l.b16 %v3824_v57  ;;  %v4799_v54 = vunpack.c.l.b16 %v3823_v58  ;;  %v8754_v58 = vld [vmem:[%s11337_s5 + $0x100] sm:$0xff] }
 0x38f   : > { %v2998_v8 = vpop.f32.mrf.mxu2  ;;  %5716 = vmatpush.bf16.msrb.mxu2 %v8754_v58 }
 0x390   : > { %v10024_v23 = vadd.f32 %v2998_v8, %v2910_v29  ;;  %4329 = vrot.lane.b32.xlu1 %v9891_v35, %s8816_s23  ;;  %4585 = vrot.lane.b32.xlu0 %v4567_v43, %s8816_s23  ;;  %v4051_v35 = vunpack.c.l.b16 %v3458_v24  ;;  %v3461_v29 = vld [vmem:[#allocation3 + $0x11] sm:$0xff]  ;;  %v3694_v8 = vpack.c.bf16 %v3662_v1, %v3662_v1  ;;  %v3666_v1 = vld [vmem:[#allocation3 + $0x109] sm:$0xff] }
 0x391   : > { %v3427_v16 = vld [vmem:[#allocation3 + $0x1f0] sm:$0xff]  ;;  %v3493_v22 = vpack.c.bf16 %v3461_v29, %v3461_v29 }
 0x392   : > { %v10029_v26 = vpop.permute.xlu2 %4087  ;;  %v3459_v46 = vpack.c.bf16 %v3427_v16, %v3427_v16  ;;  %v8740_v43 = vld [vmem:[%s11337_s5 + $0x90] sm:$0xff]  ;;  %v3821_v16 = vpack.c.bf16 %v3789_v27, %v3789_v27  ;;  %v3699_v27 = vpack.c.bf16 %v3667_v59, %v3667_v59  ;;  %v8738_v59 = vld [vmem:[%s11337_s5 + $0x80] sm:$0xff] }
 0x393   : > { %v3351_v24 = vld [vmem:[#allocation3 + $0x12f] sm:$0xff]  ;;  %5536 = vmatpush.bf16.msra.mxu0 %v8740_v43  ;;  %v4198_v45 = vunpack.c.l.b16 %v3493_v22  ;;  %v3826_v43 = vpack.c.bf16 %v3794_v41, %v3794_v41  ;;  %v3354_v41 = vld [vmem:[#allocation3 + $0x167] sm:$0xff] }
 0x394   : > { %v4052_v19 = vunpack.c.l.b16 %v3459_v46  ;;  %v3383_v10 = vpack.c.bf16 %v3351_v24, %v3351_v24  ;;  %v4543_v46 = vunpack.c.l.b16 %v3694_v8  ;;  %v4797_v12 = vunpack.c.l.b16 %v3821_v16  ;;  %v3796_v22 = vld [vmem:[#allocation3 + $0x130] sm:$0xff] }
 0x395   : > { %v4802_v56 = vunpack.c.l.b16 %v3826_v43  ;;  %v4548_v25 = vunpack.c.l.b16 %v3699_v27  ;;  %v3668_v16 = vld [vmem:[#allocation3 + $0x129] sm:$0xff] }
 0x396   : > { %v10031_v32 = vpack.c.b16 %v4052_v19, %v4051_v35  ;;  %v3664_v35 = vld [vmem:[#allocation3 + $0xe9] sm:$0xff]  ;;  %v3665_v19 = vld [vmem:[#allocation3 + $0xf1] sm:$0xff]  ;;  %v4825_v5 = vpack.c.b16 %v4798_v49, %v4797_v12  ;;  %v4570_v36 = vpack.c.b16 %v4544_v39, %v4543_v46  ;;  %v3828_v39 = vpack.c.bf16 %v3796_v22, %v3796_v22 }
 0x397   : > { %v10033_v30 = vpop.f32.mrf.mxu2  ;;  %v3697_v37 = vpack.c.bf16 %v3665_v19, %v3665_v19  ;;  %v3795_v49 = vld [vmem:[#allocation3 + $0x128] sm:$0xff]  ;;  %v3700_v15 = vpack.c.bf16 %v3668_v16, %v3668_v16 }
 0x398   : > { %4841 = vrot.lane.b32.xlu1 %v4823_v60, %s8816_s23  ;;  %4587 = vrot.lane.b32.xlu0 %v4568_v44, %s8816_s23  ;;  %v3960_v60 = vunpack.c.l.b16 %v3383_v10  ;;  %v3696_v44 = vpack.c.bf16 %v3664_v35, %v3664_v35  ;;  %v3827_v19 = vpack.c.bf16 %v3795_v49, %v3795_v49  ;;  %v4804_v20 = vunpack.c.l.b16 %v3828_v39  ;;  %v3672_v27 = vld [vmem:[#allocation3 + $0x169] sm:$0xff] }
 0x399   : > { %4099 = vrot.lane.b32.xlu2 %v10031_v32, %s8816_s23  ;;  %v4546_v55 = vunpack.c.l.b16 %v3697_v37  ;;  %v3798_v37 = vld [vmem:[#allocation3 + $0x150] sm:$0xff] }
 0x39a   : > { %v4086_v33 = vpop.permute.xlu1 %4085  ;;  %v2082_v17 = vpop.permute.xlu2 %2081 }
 0x39b   : > { %v2145_v34 = vsel %vm334_vm3, %v1970_v28, %v2082_v17  ;;  %v4135_v0 = vsel %vm334_vm3, %v10039_v11, %v4086_v33  ;;  %v10059_v28 = vpack.c.b16 %v3960_v60, %v3959_v21  ;;  %v4545_v17 = vunpack.c.l.b16 %v3696_v44  ;;  %v3671_v21 = vld [vmem:[#allocation3 + $0x151] sm:$0xff] }
 0x39c   : > { %3084 = vmatmul.bf16.gmra.mxu3 %v2145_v34  ;;  %5401 = vmatmul.bf16.gmra.mxu2 %v4135_v0  ;;  %v4549_v60 = vunpack.c.l.b16 %v3700_v15  ;;  %v4803_v44 = vunpack.c.l.b16 %v3827_v19 }
 0x39d   : > { %v4139_v0 = vsel %vm334_vm3, %v10059_v28, %v10029_v26  ;;  %v4571_v29 = vpack.c.b16 %v4546_v55, %v4545_v17  ;;  %v3352_v26 = vld [vmem:[#allocation3 + $0x147] sm:$0xff]  ;;  %v3830_v55 = vpack.c.bf16 %v3798_v37, %v3798_v37 }
 0x39e   : > { %v3384_v10 = vpack.c.bf16 %v3352_v26, %v3352_v26  ;;  %v3797_v17 = vld [vmem:[#allocation3 + $0x148] sm:$0xff] }
 0x39f   : > { %v10047_v6 = vpop.f32.mrf.mxu2  ;;  %v1217_v26 = vld [vmem:[#allocation2 + $0x227] sm:$0xff] }
 0x3a0   : > { %4843 = vrot.lane.b32.xlu1 %v4824_v38, %s8816_s23  ;;  %4589 = vrot.lane.b32.xlu0 %v4569_v62, %s8816_s23  ;;  %v3698_v38 = vpack.c.bf16 %v3666_v1, %v3666_v1  ;;  %v3353_v62 = vld [vmem:[#allocation3 + $0x14f] sm:$0xff]  ;;  %v3961_v35 = vunpack.c.l.b16 %v3384_v10 }
 0x3a1   : > { %4331 = vrot.lane.b32.xlu2 %v9928_v7, %s8816_s23  ;;  %v4229_v7 = vpack.c.b16 %v4198_v45, %v4197_v53  ;;  %v3385_v8 = vpack.c.bf16 %v3353_v62, %v3353_v62  ;;  %v3701_v53 = vpack.c.bf16 %v3669_v47, %v3669_v47  ;;  %v3673_v62 = vld [vmem:[#allocation3 + $0x171] sm:$0xff]  ;;  %v1249_v47 = vpack.c.bf16 %v1217_v26, %v1217_v26 }
 0x3a2   : > { %v4326_v4 = vpop.permute.xlu2 %4325  ;;  %v4547_v24 = vunpack.c.l.b16 %v3698_v38  ;;  %v3386_v38 = vpack.c.bf16 %v3354_v41, %v3354_v41  ;;  %v3705_v22 = vpack.c.bf16 %v3673_v62, %v3673_v62  ;;  %v3679_v62 = vld [vmem:[#allocation3 + $0x1d1] sm:$0xff] }
 0x3a3   : > { %v4359_v61 = vsel %vm334_vm3, %v4229_v7, %v4326_v4  ;;  %v3962_v46 = vunpack.c.l.b16 %v3385_v8  ;;  %v4550_v57 = vunpack.c.l.b16 %v3701_v53  ;;  %v3670_v7 = vld [vmem:[#allocation3 + $0x149] sm:$0xff]  ;;  %v2209_v53 = vunpack.c.l.b16 %v1249_v47 }
 0x3a4   : > { %v4572_v31 = vpack.c.b16 %v4548_v25, %v4547_v24  ;;  %v1218_v8 = vld [vmem:[#allocation2 + $0x22f] sm:$0xff]  ;;  %v3704_v25 = vpack.c.bf16 %v3672_v27, %v3672_v27  ;;  %v3963_v16 = vunpack.c.l.b16 %v3386_v38  ;;  %v4554_v39 = vunpack.c.l.b16 %v3705_v22 }
 0x3a5   : > { %v10079_v12 = vpack.c.b16 %v3962_v46, %v3961_v35  ;;  %v1250_v10 = vpack.c.bf16 %v1218_v8, %v1218_v8  ;;  %v3675_v35 = vld [vmem:[#allocation3 + $0x191] sm:$0xff]  ;;  %v3678_v27 = vld [vmem:[#allocation3 + $0x1c9] sm:$0xff] }
 0x3a6   : > { %v4553_v46 = vunpack.c.l.b16 %v3704_v25 }
 0x3a7   : > { %v10053_v2 = vpop.f32.mrf.mxu2 }
 0x3a8   : > { %4845 = vrot.lane.b32.xlu1 %v4825_v5, %s8816_s23  ;;  %4591 = vrot.lane.b32.xlu0 %v4570_v36, %s8816_s23 }
 0x3a9   : > { %4333 = vrot.lane.b32.xlu2 %v9950_v52, %s8816_s23  ;;  %v4826_v52 = vpack.c.b16 %v4800_v3, %v4799_v54  ;;  %v4828_v3 = vpack.c.b16 %v4804_v20, %v4803_v44  ;;  %v3829_v54 = vpack.c.bf16 %v3797_v17, %v3797_v17  ;;  %v4575_v20 = vpack.c.b16 %v4554_v39, %v4553_v46 }
 0x3aa   : > { %v4838_v33 = vpop.permute.xlu2 %4837 }
 0x3ab   : > { %v4871_v34 = vsel %vm334_vm3, %v9875_v13, %v4838_v33  ;;  %v3825_v13 = vpack.c.bf16 %v3793_v63, %v3793_v63  ;;  %v4573_v33 = vpack.c.b16 %v4550_v57, %v4549_v60  ;;  %v3707_v57 = vpack.c.bf16 %v3675_v35, %v3675_v35  ;;  %v3462_v35 = vld [vmem:[#allocation3 + $0x29] sm:$0xff] }
 0x3ac   : > { %5406 = vmatmul.bf16.gmra.mxu2 %v4139_v0  ;;  %5450 = vmatmul.bf16.vlgmr.msra.gmra.mxu3 %v4359_v61  ;;  %v3702_v61 = vpack.c.bf16 %v3670_v7, %v3670_v7  ;;  %v3355_v0 = vld [vmem:[#allocation3 + $0x16f] sm:$0xff] }
 0x3ad   : > { %5628 = vmatmul.bf16.vlgmr.msra.gmra.mxu1 %v4871_v34  ;;  %v4801_v4 = vunpack.c.l.b16 %v3825_v13  ;;  %v3703_v34 = vpack.c.bf16 %v3671_v21, %v3671_v21  ;;  %v3387_v1 = vpack.c.bf16 %v3355_v0, %v3355_v0  ;;  %v4805_v13 = vunpack.c.l.b16 %v3829_v54 }
 0x3ae   : > { %v4551_v63 = vunpack.c.l.b16 %v3702_v61  ;;  %v4556_v21 = vunpack.c.l.b16 %v3707_v57  ;;  %v3589_v61 = vld [vmem:[#allocation3 + $0x30] sm:$0xff]  ;;  %v3550_v57 = vld [vmem:[#allocation3 + $0x1c7] sm:$0xff] }
 0x3af   : > { %v10067_v9 = vpop.f32.mrf.mxu2  ;;  %v4827_v45 = vpack.c.b16 %v4802_v56, %v4801_v4  ;;  %v3964_v56 = vunpack.c.l.b16 %v3387_v1  ;;  %v3621_v41 = vpack.c.bf16 %v3589_v61, %v3589_v61 }
 0x3b0   : > { %4847 = vrot.lane.b32.xlu1 %v4826_v52, %s8816_s23  ;;  %4593 = vrot.lane.b32.xlu0 %v4571_v29, %s8816_s23  ;;  %v4806_v52 = vunpack.c.l.b16 %v3830_v55  ;;  %v4552_v29 = vunpack.c.l.b16 %v3703_v34 }
 0x3b1   : > { %4335 = vrot.lane.b32.xlu2 %v9970_v18, %s8816_s23  ;;  %v3984_v4 = vpack.c.b16 %v3964_v56, %v3963_v16  ;;  %v4454_v26 = vunpack.c.l.b16 %v3621_v41  ;;  %v3711_v56 = vpack.c.bf16 %v3679_v62, %v3679_v62 }
 0x3b2   : > { %v4829_v24 = vpack.c.b16 %v4806_v52, %v4805_v13  ;;  %v3549_v13 = vld [vmem:[#allocation3 + $0x1af] sm:$0xff] }
 0x3b3   : > { %v3581_v22 = vpack.c.bf16 %v3549_v13, %v3549_v13  ;;  %v4584_v13 = vpop.permute.xlu2 %4583 }
 0x3b5   : > { %v4302_v39 = vunpack.c.l.b16 %v3581_v22 }
 0x3b7   : > { %v10075_v18 = vpop.f32.mrf.mxu2 }
 0x3b8   : > { %4849 = vrot.lane.b32.xlu1 %v4827_v45, %s8816_s23  ;;  %4595 = vrot.lane.b32.xlu0 %v4572_v31, %s8816_s23  ;;  %v2210_v45 = vunpack.c.l.b16 %v1250_v10  ;;  %v3674_v31 = vld [vmem:[#allocation3 + $0x189] sm:$0xff] }
 0x3b9   : > { %4337 = vrot.lane.b32.xlu2 %v10011_v42, %s8816_s23  ;;  %v8739_v42 = vld [vmem:[%s11337_s5 + $0x88] sm:$0xff]  ;;  %v3706_v60 = vpack.c.bf16 %v3674_v31, %v3674_v31 }
 0x3ba   : > { %v4090_v5 = vpop.permute.xlu0 %4089  ;;  %5537 = vmatpush.bf16.msra.mxu0 %v8739_v42 }
 0x3bb   : > { %v4143_v36 = vsel %vm334_vm3, %v10079_v12, %v4090_v5  ;;  %v3357_v5 = vld [vmem:[#allocation3 + $0x18f] sm:$0xff]  ;;  %v4555_v7 = vunpack.c.l.b16 %v3706_v60 }
 0x3bc   : > { %5411 = vmatmul.bf16.gmra.mxu2 %v4143_v36  ;;  %v2226_v36 = vpack.c.b16 %v2210_v45, %v2209_v53  ;;  %v3389_v44 = vpack.c.bf16 %v3357_v5, %v3357_v5  ;;  %v3681_v53 = vld [vmem:[#allocation3 + $0x1f1] sm:$0xff] }
 0x3bd   : > { %v4576_v55 = vpack.c.b16 %v4556_v21, %v4555_v7  ;;  %v3551_v45 = vld [vmem:[#allocation3 + $0x1cf] sm:$0xff]  ;;  %v3582_v21 = vpack.c.bf16 %v3550_v57, %v3550_v57 }
 0x3be   : > { %5538 = vmatpush.bf16.msra.mxu0 %v8738_v59  ;;  %v3966_v17 = vunpack.c.l.b16 %v3389_v44  ;;  %v3463_v5 = vld [vmem:[#allocation3 + $0x31] sm:$0xff]  ;;  %v3590_v7 = vld [vmem:[#allocation3 + $0x48] sm:$0xff] }
 0x3bf   : > { %v10096_v43 = vpop.f32.mrf.mxu2 }
 0x3c0   : > { %4851 = vrot.lane.b32.xlu1 %v4828_v3, %s8816_s23  ;;  %4597 = vrot.lane.b32.xlu0 %v4573_v33, %s8816_s23  ;;  %v3676_v3 = vld [vmem:[#allocation3 + $0x1a9] sm:$0xff]  ;;  %v3677_v33 = vld [vmem:[#allocation3 + $0x1b1] sm:$0xff] }
 0x3c1   : > { %4339 = vrot.lane.b32.xlu2 %v10039_v11, %s8816_s23  ;;  %v4574_v11 = vpack.c.b16 %v4552_v29, %v4551_v63  ;;  %v3709_v34 = vpack.c.bf16 %v3677_v33, %v3677_v33 }
 0x3c3   : > { %v4558_v63 = vunpack.c.l.b16 %v3709_v34  ;;  %v3622_v34 = vpack.c.bf16 %v3590_v7, %v3590_v7 }
 0x3c7   : > { %v10103_v19 = vpop.f32.mrf.mxu2 }
 0x3c8   : > { %4853 = vrot.lane.b32.xlu1 %v4829_v24, %s8816_s23  ;;  %4599 = vrot.lane.b32.xlu0 %v4574_v11, %s8816_s23  ;;  %v3548_v24 = vld [vmem:[#allocation3 + $0x1a7] sm:$0xff] }
 0x3c9   : > { %4341 = vrot.lane.b32.xlu2 %v10059_v28, %s8816_s23  ;;  %v3356_v28 = vld [vmem:[#allocation3 + $0x187] sm:$0xff]  ;;  %v3580_v10 = vpack.c.bf16 %v3548_v24, %v3548_v24 }
 0x3ca   : > { %v4092_v49 = vpop.permute.xlu1 %4091  ;;  %v3388_v42 = vpack.c.bf16 %v3356_v28, %v3356_v28 }
 0x3cb   : > { %v4147_v15 = vsel %vm334_vm3, %v3984_v4, %v4092_v49  ;;  %v4560_v49 = vunpack.c.l.b16 %v3711_v56  ;;  %v4301_v31 = vunpack.c.l.b16 %v3580_v10 }
 0x3cc   : > { %5416 = vmatmul.bf16.gmra.mxu2 %v4147_v15  ;;  %v3965_v54 = vunpack.c.l.b16 %v3388_v42  ;;  %v3680_v15 = vld [vmem:[#allocation3 + $0x1e9] sm:$0xff]  ;;  %v3495_v42 = vpack.c.bf16 %v3463_v5, %v3463_v5 }
 0x3cd   : > { %v3712_v60 = vpack.c.bf16 %v3680_v15, %v3680_v15  ;;  %v4321_v44 = vpack.c.b16 %v4302_v39, %v4301_v31  ;;  %v3593_v39 = vld [vmem:[#allocation3 + $0x70] sm:$0xff]  ;;  %v3592_v31 = vld [vmem:[#allocation3 + $0x68] sm:$0xff] }
 0x3ce   : > { %v3985_v1 = vpack.c.b16 %v3966_v17, %v3965_v54  ;;  %v3553_v54 = vld [vmem:[#allocation3 + $0x1ef] sm:$0xff]  ;;  %v4200_v41 = vunpack.c.l.b16 %v3495_v42 }
 0x3cf   : > { %v10111_v0 = vpop.f32.mrf.mxu2  ;;  %v4561_v17 = vunpack.c.l.b16 %v3712_v60  ;;  %v3585_v62 = vpack.c.bf16 %v3553_v54, %v3553_v54  ;;  %v3722_v42 = vld [vmem:[#allocation3 + $0x8f] sm:$0xff] }
 0x3d0   : > { %4855 = vrot.lane.b32.xlu1 %v9923_v51, %s8816_s23  ;;  %4601 = vrot.lane.b32.xlu0 %v4575_v20, %s8816_s23  ;;  %v3708_v51 = vpack.c.bf16 %v3676_v3, %v3676_v3 }
 0x3d1   : > { %4343 = vrot.lane.b32.xlu2 %v10079_v12, %s8816_s23  ;;  %v3588_v12 = vld [vmem:[#allocation3 + $0x28] sm:$0xff] }
 0x3d2   : > { %v2338_v37 = vpop.permute.xlu1 %2337  ;;  %v4557_v52 = vunpack.c.l.b16 %v3708_v51  ;;  %v3620_v29 = vpack.c.bf16 %v3588_v12, %v3588_v12  ;;  %v4303_v12 = vunpack.c.l.b16 %v3582_v21 }
 0x3d3   : > { %v2401_v58 = vsel %vm334_vm3, %v2226_v36, %v2338_v37  ;;  %v3591_v36 = vld [vmem:[#allocation3 + $0x50] sm:$0xff]  ;;  %v3583_v37 = vpack.c.bf16 %v3551_v45, %v3551_v45 }
 0x3d4   : > { %3173 = vmatmul.bf16.gmra.mxu0 %v2401_v58  ;;  %v4577_v8 = vpack.c.b16 %v4558_v63, %v4557_v52  ;;  %v4453_v11 = vunpack.c.l.b16 %v3620_v29  ;;  %v3494_v58 = vpack.c.bf16 %v3462_v35, %v3462_v35  ;;  %v3623_v3 = vpack.c.bf16 %v3591_v36, %v3591_v36  ;;  %v3552_v52 = vld [vmem:[#allocation3 + $0x1e7] sm:$0xff]  ;;  %v3720_v63 = vld [vmem:[#allocation3 + $0x6f] sm:$0xff] }
 0x3d5   : > { %v4304_v51 = vunpack.c.l.b16 %v3583_v37  ;;  %v3584_v56 = vpack.c.bf16 %v3552_v52, %v3552_v52  ;;  %v3752_v24 = vpack.c.bf16 %v3720_v63, %v3720_v63  ;;  %v3624_v37 = vpack.c.bf16 %v3592_v31, %v3592_v31  ;;  %v3466_v52 = vld [vmem:[#allocation3 + $0x69] sm:$0xff]  ;;  %v3467_v63 = vld [vmem:[#allocation3 + $0x71] sm:$0xff] }
 0x3d6   : > { %v4485_v47 = vpack.c.b16 %v4454_v26, %v4453_v11  ;;  %v3719_v26 = vld [vmem:[#allocation3 + $0x67] sm:$0xff] }
 0x3d7   : > { %v3751_v10 = vpack.c.bf16 %v3719_v26, %v3719_v26  ;;  %v3723_v31 = vld [vmem:[#allocation3 + $0xa7] sm:$0xff] }
 0x3d8   : > { %4857 = vrot.lane.b32.xlu1 %v9945_v14, %s8816_s23  ;;  %4603 = vrot.lane.b32.xlu0 %v4576_v55, %s8816_s23  ;;  %v3710_v14 = vpack.c.bf16 %v3678_v27, %v3678_v27  ;;  %v4455_v27 = vunpack.c.l.b16 %v3622_v34 }
 0x3d9   : > { %4345 = vrot.lane.b32.xlu2 %v3984_v4, %s8816_s23  ;;  %v4711_v45 = vunpack.c.l.b16 %v3751_v10 }
 0x3da   : > { %v4094_v59 = vpop.permute.xlu0 %4093  ;;  %v4582_v16 = vpop.permute.xlu1 %4581  ;;  %v4559_v4 = vunpack.c.l.b16 %v3710_v14 }
 0x3db   : > { %v4151_v38 = vsel %vm334_vm3, %v3985_v1, %v4094_v59  ;;  %v4615_v46 = vsel %vm334_vm3, %v4485_v47, %v4582_v16  ;;  %v4306_v47 = vunpack.c.l.b16 %v3585_v62 }
 0x3dc   : > { %5421 = vmatmul.bf16.gmra.mxu2 %v4151_v38  ;;  %v4578_v20 = vpack.c.b16 %v4560_v49, %v4559_v4  ;;  %v4322_v38 = vpack.c.b16 %v4304_v51, %v4303_v12  ;;  %v4305_v4 = vunpack.c.l.b16 %v3584_v56  ;;  %v3464_v49 = vld [vmem:[#allocation3 + $0x49] sm:$0xff]  ;;  %v3754_v51 = vpack.c.bf16 %v3722_v42, %v3722_v42 }
 0x3dd   : > { %v3596_v42 = vld [vmem:[#allocation3 + $0xa8] sm:$0xff] }
 0x3df   : > { %v10118_v25 = vpop.f32.mrf.mxu2 }
 0x3e0   : > { %4859 = vrot.lane.b32.xlu1 %v9966_v48, %s8816_s23  ;;  %4605 = vrot.lane.b32.xlu0 %v4577_v8, %s8816_s23  ;;  %v3713_v48 = vpack.c.bf16 %v3681_v53, %v3681_v53  ;;  %v4323_v53 = vpack.c.b16 %v4306_v47, %v4305_v4 }
 0x3e1   : > { %4347 = vrot.lane.b32.xlu2 %v3985_v1, %s8816_s23  ;;  %v4456_v1 = vunpack.c.l.b16 %v3623_v3 }
 0x3e2   : > { %v4562_v55 = vunpack.c.l.b16 %v3713_v48  ;;  %v3625_v48 = vpack.c.bf16 %v3593_v39, %v3593_v39 }
 0x3e3   : > { %v4486_v14 = vpack.c.b16 %v4456_v1, %v4455_v27  ;;  %v4714_v1 = vunpack.c.l.b16 %v3754_v51 }
 0x3e4   : > { %5539 = vmatmul.bf16.vlgmr.msra.gmra.mxu0 %v4615_v46  ;;  %v4579_v59 = vpack.c.b16 %v4562_v55, %v4561_v17  ;;  %v3465_v46 = vld [vmem:[#allocation3 + $0x51] sm:$0xff]  ;;  %v3721_v17 = vld [vmem:[#allocation3 + $0x87] sm:$0xff] }
 0x3e5   : > { %v4619_v16 = vsel %vm334_vm3, %v4486_v14, %v4584_v13  ;;  %v3497_v60 = vpack.c.bf16 %v3465_v46, %v3465_v46  ;;  %v3594_v13 = vld [vmem:[#allocation3 + $0x88] sm:$0xff]  ;;  %v3499_v14 = vpack.c.bf16 %v3467_v63, %v3467_v63 }
 0x3e7   : > { %v10125_v28 = vpop.f32.mrf.mxu2  ;;  %v4202_v21 = vunpack.c.l.b16 %v3497_v60  ;;  %v4204_v10 = vunpack.c.l.b16 %v3499_v14 }
 0x3e8   : > { %4861 = vrot.lane.b32.xlu1 %v10004_v50, %s8816_s23  ;;  %4607 = vrot.lane.b32.xlu0 %v4578_v20, %s8816_s23  ;;  %v4199_v50 = vunpack.c.l.b16 %v3494_v58  ;;  %v3496_v20 = vpack.c.bf16 %v3464_v49, %v3464_v49  ;;  %v4458_v58 = vunpack.c.l.b16 %v3625_v48 }
 0x3e9   : > { %4349 = vrot.lane.b32.xlu2 %v4321_v44, %s8816_s23 }
 0x3ea   : > { %v4096_v33 = vpop.permute.xlu0 %4095  ;;  %v4230_v8 = vpack.c.b16 %v4200_v41, %v4199_v50  ;;  %v4201_v7 = vunpack.c.l.b16 %v3496_v20  ;;  %v3753_v41 = vpack.c.bf16 %v3721_v17, %v3721_v17 }
 0x3eb   : > { %v4155_v61 = vsel %vm334_vm3, %v4321_v44, %v4096_v33  ;;  %v4457_v33 = vunpack.c.l.b16 %v3624_v37  ;;  %v3597_v37 = vld [vmem:[#allocation3 + $0xb0] sm:$0xff] }
 0x3ec   : > { %5426 = vmatmul.bf16.gmra.mxu2 %v4155_v61  ;;  %v4231_v55 = vpack.c.b16 %v4202_v21, %v4201_v7  ;;  %v4713_v62 = vunpack.c.l.b16 %v3753_v41 }
 0x3ed   : > { %v4487_v61 = vpack.c.b16 %v4458_v58, %v4457_v33  ;;  %v8765_v33 = vld [vmem:[%s11339_s7 + $0x38] sm:$0xff] }
 0x3ee   : > { %v4743_v26 = vpack.c.b16 %v4714_v1, %v4713_v62  ;;  %7804 = vmatpush.bf16.msrb.mxu3 %v8765_v33 }
 0x3ef   : > { %v10132_v29 = vpop.f32.mrf.mxu2 }
 0x3f0   : > { %4863 = vrot.lane.b32.xlu1 %v10031_v32, %s8816_s23  ;;  %4609 = vrot.lane.b32.xlu0 %v4579_v59, %s8816_s23  ;;  %v4712_v32 = vunpack.c.l.b16 %v3752_v24 }
 0x3f1   : > { %4351 = vrot.lane.b32.xlu2 %v4322_v38, %s8816_s23 }
 0x3f2   : > { %v4328_v11 = vpop.permute.xlu0 %4327  ;;  %v4742_v35 = vpack.c.b16 %v4712_v32, %v4711_v45  ;;  %v3724_v32 = vld [vmem:[#allocation3 + $0xaf] sm:$0xff] }
 0x3f3   : > { %v4363_v22 = vsel %vm334_vm3, %v4230_v8, %v4328_v11  ;;  %v4100_v59 = vpop.permute.xlu2 %4099  ;;  %v3498_v8 = vpack.c.bf16 %v3466_v52, %v3466_v52  ;;  %v3756_v60 = vpack.c.bf16 %v3724_v32, %v3724_v32 }
 0x3f4   : > { %5455 = vmatmul.bf16.gmra.mxu3 %v4363_v22  ;;  %5544 = vmatmul.bf16.gmra.mxu0 %v4619_v16  ;;  %v4163_v11 = vsel %vm334_vm3, %v4323_v53, %v4100_v59  ;;  %v3626_v16 = vpack.c.bf16 %v3594_v13, %v3594_v13  ;;  %v3726_v59 = vld [vmem:[#allocation3 + $0xcf] sm:$0xff]  ;;  %v3725_v13 = vld [vmem:[#allocation3 + $0xc7] sm:$0xff] }
 0x3f5   : > { %v4203_v47 = vunpack.c.l.b16 %v3498_v8  ;;  %v8775_v8 = vld [vmem:[%s11339_s7 + $0x88] sm:$0xff] }
 0x3f6   : > { %v4459_v46 = vunpack.c.l.b16 %v3626_v16  ;;  %7988 = vmatpush.bf16.msrb.mxu1 %v8775_v8 }
 0x3f7   : > { %v10140_v15 = vpop.f32.mrf.mxu2 }
 0x3f9   : > { %4353 = vrot.lane.b32.xlu2 %v4323_v53, %s8816_s23 }
 0x3fa   : > { %v4098_v57 = vpop.permute.xlu1 %4097  ;;  %v4840_v5 = vpop.permute.xlu0 %4839 }
 0x3fb   : > { %v4159_v36 = vsel %vm334_vm3, %v4322_v38, %v4098_v57  ;;  %v4875_v44 = vsel %vm334_vm3, %v4742_v35, %v4840_v5  ;;  %v3595_v38 = vld [vmem:[#allocation3 + $0x90] sm:$0xff]  ;;  %v4332_v39 = vpop.permute.xlu2 %4331  ;;  %v4232_v35 = vpack.c.b16 %v4204_v10, %v4203_v47  ;;  %v3755_v57 = vpack.c.bf16 %v3723_v31, %v3723_v31 }
 0x3fc   : > { %5431 = vmatmul.bf16.gmra.mxu2 %v4159_v36  ;;  %5633 = vmatmul.bf16.gmra.mxu1 %v4875_v44  ;;  %v3627_v56 = vpack.c.bf16 %v3595_v38, %v3595_v38  ;;  %v4716_v5 = vunpack.c.l.b16 %v3756_v60  ;;  %v3468_v36 = vld [vmem:[#allocation3 + $0x89] sm:$0xff]  ;;  %v3469_v44 = vld [vmem:[#allocation3 + $0x91] sm:$0xff] }
 0x3fd   : > { %v4371_v53 = vsel %vm334_vm3, %v4232_v35, %v4332_v39  ;;  %v4715_v21 = vunpack.c.l.b16 %v3755_v57  ;;  %v3501_v51 = vpack.c.bf16 %v3469_v44, %v3469_v44  ;;  %v3470_v47 = vld [vmem:[#allocation3 + $0xa9] sm:$0xff]  ;;  %v3471_v10 = vld [vmem:[#allocation3 + $0xb1] sm:$0xff] }
 0x3fe   : > { %v4460_v4 = vunpack.c.l.b16 %v3627_v56  ;;  %v3758_v56 = vpack.c.bf16 %v3726_v59, %v3726_v59  ;;  %v3503_v60 = vpack.c.bf16 %v3471_v10, %v3471_v10  ;;  %v3601_v59 = vld [vmem:[#allocation3 + $0xf0] sm:$0xff] }
 0x3ff   : > { %v10145_v3 = vpop.f32.mrf.mxu2  ;;  %v4744_v17 = vpack.c.b16 %v4716_v5, %v4715_v21  ;;  %v4206_v41 = vunpack.c.l.b16 %v3501_v51 }
 0x400   : > { %v4488_v20 = vpack.c.b16 %v4460_v4, %v4459_v46  ;;  %v4718_v16 = vunpack.c.l.b16 %v3758_v56  ;;  %v3599_v4 = vld [vmem:[#allocation3 + $0xd0] sm:$0xff] }
 0x402   : > { %v4330_v34 = vpop.permute.xlu1 %4329  ;;  %v4586_v54 = vpop.permute.xlu0 %4585 }
 0x403   : > { %v4367_v12 = vsel %vm334_vm3, %v4231_v55, %v4330_v34  ;;  %v4623_v50 = vsel %vm334_vm3, %v4487_v61, %v4586_v54  ;;  %v3500_v61 = vpack.c.bf16 %v3468_v36, %v3468_v36  ;;  %v3629_v34 = vpack.c.bf16 %v3597_v37, %v3597_v37  ;;  %v4334_v38 = vpop.permute.xlu2 %4333  ;;  %v3728_v37 = vld [vmem:[#allocation3 + $0xef] sm:$0xff] }
 0x404   : > { %5460 = vmatmul.bf16.gmra.mxu3 %v4367_v12  ;;  %5549 = vmatmul.bf16.gmra.mxu0 %v4623_v50  ;;  %v3628_v12 = vpack.c.bf16 %v3596_v42, %v3596_v42  ;;  %v4208_v36 = vunpack.c.l.b16 %v3503_v60  ;;  %v8772_v60 = vld [vmem:[%s11339_s7 + $0x70] sm:$0xff] }
 0x405   : > { %v4205_v50 = vunpack.c.l.b16 %v3500_v61  ;;  %v4462_v1 = vunpack.c.l.b16 %v3629_v34  ;;  %v3760_v34 = vpack.c.bf16 %v3728_v37, %v3728_v37  ;;  %v3474_v37 = vld [vmem:[#allocation3 + $0xe9] sm:$0xff] }
 0x406   : > { %v4461_v63 = vunpack.c.l.b16 %v3628_v12 }
 0x407   : > { %v10149_v27 = vpop.f32.mrf.mxu2  ;;  %v4233_v14 = vpack.c.b16 %v4206_v41, %v4205_v50  ;;  %v3472_v41 = vld [vmem:[#allocation3 + $0xc9] sm:$0xff] }
 0x40a   : > { %v4842_v24 = vpop.permute.xlu1 %4841  ;;  %v4588_v45 = vpop.permute.xlu0 %4587 }
 0x40b   : > { %v4879_v22 = vsel %vm334_vm3, %v4743_v26, %v4842_v24  ;;  %v4627_v48 = vsel %vm334_vm3, %v4488_v20, %v4588_v45  ;;  %v8773_v26 = vld [vmem:[%s11339_s7 + $0x78] sm:$0xff]  ;;  %v4375_v24 = vsel %vm334_vm3, %v4233_v14, %v4334_v38  ;;  %v3598_v45 = vld [vmem:[#allocation3 + $0xc8] sm:$0xff]  ;;  %v3502_v20 = vpack.c.bf16 %v3470_v47, %v3470_v47  ;;  %v4336_v42 = vpop.permute.xlu2 %4335 }
 0x40c   : > { %5436 = vmatmul.bf16.gmra.mxu2 %v4163_v11  ;;  %5638 = vmatmul.bf16.gmra.mxu1 %v4879_v22  ;;  %v3757_v22 = vpack.c.bf16 %v3725_v13, %v3725_v13  ;;  %v3630_v57 = vpack.c.bf16 %v3598_v45, %v3598_v45  ;;  %v3600_v13 = vld [vmem:[#allocation3 + $0xe8] sm:$0xff] }
 0x40d   : > { %7893 = vmatpush.bf16.msrb.mxu0 %v8773_v26  ;;  %v4207_v5 = vunpack.c.l.b16 %v3502_v20  ;;  %v8764_v26 = vld [vmem:[%s11339_s7 + $0x30] sm:$0xff]  ;;  %v3729_v20 = vld [vmem:[#allocation3 + $0x107] sm:$0xff] }
 0x40e   : > { %v4717_v46 = vunpack.c.l.b16 %v3757_v22  ;;  %7805 = vmatpush.bf16.msrb.mxu3 %v8764_v26  ;;  %v3632_v22 = vpack.c.bf16 %v3600_v13, %v3600_v13  ;;  %v3732_v26 = vld [vmem:[#allocation3 + $0x12f] sm:$0xff] }
 0x40f   : > { %v10153_v49 = vpop.f32.mrf.mxu2  ;;  %v4234_v61 = vpack.c.b16 %v4208_v36, %v4207_v5  ;;  %v3761_v36 = vpack.c.bf16 %v3729_v20, %v3729_v20 }
 0x410   : > { %v4745_v31 = vpack.c.b16 %v4718_v16, %v4717_v46 }
 0x411   : > { %7894 = vmatpush.bf16.msrb.mxu0 %v8772_v60 }
 0x412   : > { %v4844_v58 = vpop.permute.xlu1 %4843  ;;  %v4590_v62 = vpop.permute.xlu0 %4589 }
 0x413   : > { %v4883_v54 = vsel %vm334_vm3, %v4744_v17, %v4844_v58  ;;  %v4463_v58 = vunpack.c.l.b16 %v3630_v57  ;;  %v3727_v17 = vld [vmem:[#allocation3 + $0xe7] sm:$0xff]  ;;  %v4338_v45 = vpop.permute.xlu2 %4337 }
 0x414   : > { %5465 = vmatmul.bf16.gmra.mxu3 %v4371_v53  ;;  %5554 = vmatmul.bf16.gmra.mxu0 %v4627_v48  ;;  %v3631_v53 = vpack.c.bf16 %v3599_v4, %v3599_v4  ;;  %v3759_v50 = vpack.c.bf16 %v3727_v17, %v3727_v17  ;;  %v3730_v4 = vld [vmem:[#allocation3 + $0x10f] sm:$0xff]  ;;  %v4721_v17 = vunpack.c.l.b16 %v3761_v36 }
 0x415   : > { %v3762_v57 = vpack.c.bf16 %v3730_v4, %v3730_v4  ;;  %v3605_v36 = vld [vmem:[#allocation3 + $0x130] sm:$0xff] }
 0x416   : > { %v4464_v44 = vunpack.c.l.b16 %v3631_v53  ;;  %v4719_v38 = vunpack.c.l.b16 %v3759_v50 }
 0x417   : > { %v10157_v7 = vpop.f32.mrf.mxu2 }
 0x418   : > { %v4490_v51 = vpack.c.b16 %v4464_v44, %v4463_v58  ;;  %v4722_v44 = vunpack.c.l.b16 %v3762_v57  ;;  %v3475_v58 = vld [vmem:[#allocation3 + $0xf1] sm:$0xff] }
 0x419   : > { %v3507_v50 = vpack.c.bf16 %v3475_v58, %v3475_v58 }
 0x41a   : > { %v4846_v39 = vpop.permute.xlu1 %4845  ;;  %v4592_v33 = vpop.permute.xlu0 %4591 }
 0x41b   : > { %v4887_v48 = vsel %vm334_vm3, %v4745_v31, %v4846_v39  ;;  %v4635_v12 = vsel %vm334_vm3, %v4490_v51, %v4592_v33  ;;  %v4465_v39 = vunpack.c.l.b16 %v3632_v22  ;;  %v3731_v22 = vld [vmem:[#allocation3 + $0x127] sm:$0xff] }
 0x41c   : > { %5643 = vmatmul.bf16.gmra.mxu1 %v4883_v54  ;;  %8560 = vmatmul.msk.bf16.vlgmr.msrb.gmra.mxu2 %vm334_vm3, %v4231_v55  ;;  %v4489_v55 = vpack.c.b16 %v4462_v1, %v4461_v63  ;;  %v4379_v54 = vsel %vm334_vm3, %v4234_v61, %v4336_v42  ;;  %v3473_v1 = vld [vmem:[#allocation3 + $0xd1] sm:$0xff]  ;;  %v3763_v20 = vpack.c.bf16 %v3731_v22, %v3731_v22 }
 0x41d   : > { %v3505_v56 = vpack.c.bf16 %v3473_v1, %v3473_v1  ;;  %v3603_v42 = vld [vmem:[#allocation3 + $0x110] sm:$0xff] }
 0x41e   : > { %v4631_v11 = vsel %vm334_vm3, %v4489_v55, %v4590_v62  ;;  %v3504_v55 = vpack.c.bf16 %v3472_v41, %v3472_v41 }
 0x41f   : > { %v10164_v52 = vpop.f32.mrf.mxu2  ;;  %v4210_v47 = vunpack.c.l.b16 %v3505_v56  ;;  %v3085_v41 = vpop.f32.mrf.mxu3 }
 0x420   : > { %v4209_v16 = vunpack.c.l.b16 %v3504_v55  ;;  %v4340_v56 = vpop.permute.xlu2 %4339 }
 0x422   : > { %v4848_v62 = vpop.permute.xlu1 %4847  ;;  %v4594_v31 = vpop.permute.xlu0 %4593  ;;  %v10194_v53 = vpack.c.b16 %v4210_v47, %v4209_v16 }
 0x423   : > { %v3263_v16 = vpop.f32.mrf.mxu1 }
 0x424   : > { %5470 = vmatmul.bf16.gmra.mxu3 %v4375_v24  ;;  %5559 = vmatmul.bf16.gmra.mxu0 %v4631_v11  ;;  %v3633_v24 = vpack.c.bf16 %v3601_v59, %v3601_v59 }
 0x426   : > { %v4466_v10 = vunpack.c.l.b16 %v3633_v24  ;;  %v3086_v24 = vadd.f32 %v3085_v41, %v10006_v40 }
 0x427   : > { %v10174_v32 = vpop.f32.mrf.mxu2 }
 0x428   : > { %v4342_v22 = vpop.permute.xlu2 %4341 }
 0x42a   : > { %v4850_v51 = vpop.permute.xlu1 %4849 }
 0x42c   : > { %5648 = vmatmul.bf16.gmra.mxu1 %v4887_v48  ;;  %8561 = vmatmul.msk.bf16.gmra.mxu2 %vm334_vm3, %v4232_v35  ;;  %v4720_v35 = vunpack.c.l.b16 %v3760_v34  ;;  %v4491_v48 = vpack.c.b16 %v4466_v10, %v4465_v39  ;;  %v3602_v34 = vld [vmem:[#allocation3 + $0x108] sm:$0xff]  ;;  %v3764_v39 = vpack.c.bf16 %v3732_v26, %v3732_v26 }
 0x42d   : > { %v3634_v59 = vpack.c.bf16 %v3602_v34, %v3602_v34 }
 0x42e   : > { %v4746_v8 = vpack.c.b16 %v4720_v35, %v4719_v38  ;;  %v4639_v5 = vsel %vm334_vm3, %v4491_v48, %v4594_v31  ;;  %v3635_v35 = vpack.c.bf16 %v3603_v42, %v3603_v42  ;;  %v3087_v48 = vpop.f32.mrf.mxu3  ;;  %v4724_v40 = vunpack.c.l.b16 %v3764_v39 }
 0x42f   : > { %v10178_v21 = vpop.f32.mrf.mxu2  ;;  %v4467_v55 = vunpack.c.l.b16 %v3634_v59  ;;  %v3088_v58 = vadd.f32 %v3087_v48, %v10024_v23 }
 0x430   : > { %v4891_v11 = vsel %vm334_vm3, %v4746_v8, %v4848_v62  ;;  %v4212_v62 = vunpack.c.l.b16 %v3507_v50  ;;  %v4468_v13 = vunpack.c.l.b16 %v3635_v35  ;;  %v3637_v35 = vpack.c.bf16 %v3605_v36, %v3605_v36 }
 0x432   : > { %v4492_v4 = vpack.c.b16 %v4468_v13, %v4467_v55  ;;  %v4852_v42 = vpop.permute.xlu1 %4851  ;;  %v4470_v26 = vunpack.c.l.b16 %v3637_v35 }
 0x434   : > { %5475 = vmatmul.bf16.gmra.mxu3 %v4379_v54  ;;  %5564 = vmatmul.bf16.gmra.mxu0 %v4635_v12  ;;  %v4747_v54 = vpack.c.b16 %v4722_v44, %v4721_v17  ;;  %v3506_v12 = vpack.c.bf16 %v3474_v37, %v3474_v37  ;;  %v4723_v37 = vunpack.c.l.b16 %v3763_v20  ;;  %v3604_v17 = vld [vmem:[#allocation3 + $0x128] sm:$0xff] }
 0x436   : > { %v4895_v1 = vsel %vm334_vm3, %v4747_v54, %v4850_v51  ;;  %v4211_v38 = vunpack.c.l.b16 %v3506_v12  ;;  %v8763_v51 = vld [vmem:[%s11339_s7 + $0x28] sm:$0xff]  ;;  %v4748_v54 = vpack.c.b16 %v4724_v40, %v4723_v37  ;;  %v3607_v37 = vld [vmem:[#allocation3 + $0x150] sm:$0xff] }
 0x437   : > { %v10182_v63 = vpop.f32.mrf.mxu2  ;;  %7806 = vmatpush.bf16.msrb.mxu3 %v8763_v51 }
 0x438   : > { %11360 = vst [vmem:[#allocation5_spill] sm:$0xff] %v10182_v63  ;;  %v10206_v10 = vpack.c.b16 %v4212_v62, %v4211_v38  ;;  %v4899_v59 = vsel %vm334_vm3, %v4748_v54, %v4852_v42  ;;  %v3636_v38 = vpack.c.bf16 %v3604_v17, %v3604_v17  ;;  %v3811_v42 = vld [vmem:[#allocation3 + $0x228] sm:$0xff]  ;;  %v3812_v17 = vld [vmem:[#allocation3 + $0x230] sm:$0xff] }
 0x43c   : > { %5653 = vmatmul.bf16.gmra.mxu1 %v4891_v11  ;;  %8562 = vmatmul.msk.bf16.gmra.mxu2 %vm334_vm3, %v4233_v14  ;;  %v4383_v14 = vsel %vm334_vm3, %v10194_v53, %v4338_v45  ;;  %v4596_v11 = vpop.permute.xlu0 %4595 }
 0x43d   : > { %v4643_v31 = vsel %vm334_vm3, %v4492_v4, %v4596_v11  ;;  %v4469_v11 = vunpack.c.l.b16 %v3636_v38  ;;  %v8771_v4 = vld [vmem:[%s11339_s7 + $0x68] sm:$0xff]  ;;  %v4854_v38 = vpop.permute.xlu1 %4853 }
 0x43e   : > { %7895 = vmatpush.bf16.msrb.mxu0 %v8771_v4  ;;  %v3844_v4 = vpack.c.bf16 %v3812_v17, %v3812_v17 }
 0x43f   : > { %v10189_v46 = vpop.f32.mrf.mxu2 }
 0x440   : > { %11361 = vst [vmem:[#allocation6_spill] sm:$0xff] %v10189_v46  ;;  %v3616_v46 = vld [vmem:[#allocation3 + $0x1e8] sm:$0xff] }
 0x444   : > { %5480 = vmatmul.bf16.gmra.mxu3 %v4383_v14  ;;  %5569 = vmatmul.bf16.gmra.mxu0 %v4639_v5  ;;  %v3476_v14 = vld [vmem:[#allocation3 + $0x109] sm:$0xff]  ;;  %v3477_v5 = vld [vmem:[#allocation3 + $0x111] sm:$0xff] }
 0x445   : > { %v3508_v12 = vpack.c.bf16 %v3476_v14, %v3476_v14  ;;  %v3509_v50 = vpack.c.bf16 %v3477_v5, %v3477_v5  ;;  %v3479_v14 = vld [vmem:[#allocation3 + $0x131] sm:$0xff]  ;;  %v10234_v5 = vpop.f32.mrf.mxu3 }
 0x447   : > { %v10199_v33 = vpop.f32.mrf.mxu2  ;;  %v4213_v62 = vunpack.c.l.b16 %v3508_v12  ;;  %v4214_v13 = vunpack.c.l.b16 %v3509_v50 }
 0x448   : > { %11362 = vst [vmem:[#allocation7_spill] sm:$0xff] %v10199_v33 }
 0x44c   : > { %5658 = vmatmul.bf16.gmra.mxu1 %v4895_v1  ;;  %8563 = vmatmul.msk.bf16.gmra.mxu2 %vm334_vm3, %v4234_v61  ;;  %v4387_v61 = vsel %vm334_vm3, %v10206_v10, %v4340_v56  ;;  %v3265_v1 = vpop.f32.mrf.mxu1  ;;  %v3734_v56 = vld [vmem:[#allocation3 + $0x14f] sm:$0xff] }
 0x44f   : > { %v10203_v8 = vpop.f32.mrf.mxu2 }
 0x450   : > { %11363 = vst [vmem:[#allocation8_spill] sm:$0xff] %v10203_v8 }
 0x451   : > { %v3174_v47 = vpop.f32.mrf.mxu0 }
 0x452   : > { %v3175_v45 = vadd.f32 %v3174_v47, %v3086_v24  ;;  %v3733_v47 = vld [vmem:[#allocation3 + $0x147] sm:$0xff] }
 0x454   : > { %v3264_v60 = vadd.f32 %v3263_v16, %v3175_v45  ;;  %5485 = vmatmul.bf16.gmra.mxu3 %v4387_v61  ;;  %5574 = vmatmul.bf16.gmra.mxu0 %v4643_v31  ;;  %v4598_v16 = vpop.permute.xlu0 %4597  ;;  %v4493_v45 = vpack.c.b16 %v4470_v26, %v4469_v11  ;;  %v3766_v61 = vpack.c.bf16 %v3734_v56, %v3734_v56  ;;  %v10236_v51 = vpop.f32.mrf.mxu1 }
 0x455   : > { %v3639_v56 = vpack.c.bf16 %v3607_v37, %v3607_v37 }
 0x456   : > { %v3298_v57 = vmax.f32 %v3264_v60, 0.0  ;;  %v4647_v20 = vsel %vm334_vm3, %v4493_v45, %v4598_v16  ;;  %v3765_v60 = vpack.c.bf16 %v3733_v47, %v3733_v47  ;;  %v4726_v36 = vunpack.c.l.b16 %v3766_v61 }
 0x457   : > { %v10211_v44 = vpop.f32.mrf.mxu2  ;;  %v3843_v47 = vpack.c.bf16 %v3811_v42, %v3811_v42  ;;  %v4472_v42 = vunpack.c.l.b16 %v3639_v56 }
 0x458   : > { %11364 = vst [vmem:[#allocation9_spill] sm:$0xff] %v10211_v44  ;;  %v4725_v54 = vunpack.c.l.b16 %v3765_v60 }
 0x459   : > { %3330 = vst.msk [vmem:[#allocation3 + $0x208] sm:$0xff] %vm334_vm3, %v3298_v57  ;;  %v3176_v34 = vpop.f32.mrf.mxu0  ;;  %v3478_v57 = vld [vmem:[#allocation3 + $0x129] sm:$0xff]  ;;  %v4819_v17 = vunpack.c.l.b16 %v3843_v47 }
 0x45a   : > { %v3177_v41 = vadd.f32 %v3176_v34, %v3088_v58 }
 0x45c   : > { %v3266_v23 = vadd.f32 %v3265_v1, %v3177_v41  ;;  %5663 = vmatmul.bf16.gmra.mxu1 %v4899_v59  ;;  %8564 = vmatmul.msk.bf16.gmra.mxu2 %vm334_vm3, %v10194_v53  ;;  %v10229_v53 = vpack.c.b16 %v4214_v13, %v4213_v62  ;;  %v3510_v1 = vpack.c.bf16 %v3478_v57, %v3478_v57 }
 0x45d   : > { %v3511_v59 = vpack.c.bf16 %v3479_v14, %v3479_v14 }
 0x45e   : > { %v3299_v55 = vmax.f32 %v3266_v23, 0.0  ;;  %v4391_v31 = vsel %vm334_vm3, %v10229_v53, %v4342_v22  ;;  %v4749_v22 = vpack.c.b16 %v4726_v36, %v4725_v54  ;;  %v4215_v36 = vunpack.c.l.b16 %v3510_v1  ;;  %v10252_v1 = vpop.f32.mrf.mxu1 }
 0x45f   : > { %v10221_v24 = vpop.f32.mrf.mxu2  ;;  %v4216_v54 = vunpack.c.l.b16 %v3511_v59 }
 0x460   : > { %11365 = vst [vmem:[#allocation10_spill] sm:$0xff] %v10221_v24  ;;  %v3809_v48 = vld [vmem:[#allocation3 + $0x208] sm:$0xff]  ;;  %v4903_v60 = vsel %vm334_vm3, %v4749_v22, %v4854_v38  ;;  %v4344_v38 = vpop.permute.xlu2 %4343 }
 0x461   : > { %3331 = vst.msk [vmem:[#allocation3 + $0x210] sm:$0xff] %vm334_vm3, %v3299_v55  ;;  %v10227_v39 = vpop.f32.mrf.mxu0  ;;  %v3554_v40 = vld [vmem:[#allocation3 + $0x207] sm:$0xff]  ;;  %v3841_v58 = vpack.c.bf16 %v3809_v48, %v3809_v48 }
 0x462   : > { %v3586_v41 = vpack.c.bf16 %v3554_v40, %v3554_v40  ;;  %v3606_v55 = vld [vmem:[#allocation3 + $0x148] sm:$0xff] }
 0x463   : > { %v4817_v45 = vunpack.c.l.b16 %v3841_v58  ;;  %v3638_v57 = vpack.c.bf16 %v3606_v55, %v3606_v55  ;;  %v3736_v58 = vld [vmem:[#allocation3 + $0x16f] sm:$0xff] }
 0x464   : > { %5490 = vmatmul.bf16.gmra.mxu3 %v4391_v31  ;;  %5579 = vmatmul.bf16.gmra.mxu0 %v4647_v20  ;;  %v4307_v48 = vunpack.c.l.b16 %v3586_v41  ;;  %v3768_v55 = vpack.c.bf16 %v3736_v58, %v3736_v58 }
 0x467   : > { %v10238_v34 = vpop.f32.mrf.mxu2 }
 0x468   : > { %11366 = vst [vmem:[#allocation11_spill] sm:$0xff] %v10238_v34  ;;  %v3810_v12 = vld [vmem:[#allocation3 + $0x210] sm:$0xff]  ;;  %v3612_v34 = vld [vmem:[#allocation3 + $0x1a8] sm:$0xff] }
 0x469   : > { %v3682_v50 = vld [vmem:[#allocation3 + $0x209] sm:$0xff]  ;;  %v3683_v35 = vld [vmem:[#allocation3 + $0x211] sm:$0xff]  ;;  %v3842_v23 = vpack.c.bf16 %v3810_v12, %v3810_v12  ;;  %v10240_v11 = vpop.f32.mrf.mxu0 }
 0x46a   : > { %v3714_v62 = vpack.c.bf16 %v3682_v50, %v3682_v50  ;;  %v3715_v13 = vpack.c.bf16 %v3683_v35, %v3683_v35  ;;  %v3555_v26 = vld [vmem:[#allocation3 + $0x20f] sm:$0xff]  ;;  %v4820_v50 = vunpack.c.l.b16 %v3844_v4  ;;  %v10247_v35 = vpop.f32.mrf.mxu3  ;;  %v4728_v4 = vunpack.c.l.b16 %v3768_v55 }
 0x46b   : > { %v3587_v16 = vpack.c.bf16 %v3555_v26, %v3555_v26  ;;  %v4818_v61 = vunpack.c.l.b16 %v3842_v23  ;;  %v4600_v23 = vpop.permute.xlu0 %4599 }
 0x46c   : > { %v4563_v31 = vunpack.c.l.b16 %v3714_v62  ;;  %v4564_v20 = vunpack.c.l.b16 %v3715_v13  ;;  %5668 = vmatmul.bf16.gmra.mxu1 %v4903_v60  ;;  %8565 = vmatmul.msk.bf16.gmra.mxu2 %vm334_vm3, %v10206_v10  ;;  %v4471_v10 = vunpack.c.l.b16 %v3638_v57  ;;  %v3735_v62 = vld [vmem:[#allocation3 + $0x167] sm:$0xff]  ;;  %v10256_v13 = vpack.c.b16 %v4216_v54, %v4215_v36 }
 0x46d   : > { %v4308_v40 = vunpack.c.l.b16 %v3587_v16  ;;  %v4835_v14 = vpack.c.b16 %v4818_v61, %v4817_v45  ;;  %v4836_v56 = vpack.c.b16 %v4820_v50, %v4819_v17  ;;  %v3767_v47 = vpack.c.bf16 %v3735_v62, %v3735_v62  ;;  %v3480_v45 = vld [vmem:[#allocation3 + $0x149] sm:$0xff]  ;;  %v3481_v61 = vld [vmem:[#allocation3 + $0x151] sm:$0xff] }
 0x46e   : > { %v4580_v37 = vpack.c.b16 %v4564_v20, %v4563_v31  ;;  %v4494_v26 = vpack.c.b16 %v4472_v42, %v4471_v10  ;;  %v4395_v22 = vsel %vm334_vm3, %v10256_v13, %v4344_v38  ;;  %v3609_v31 = vld [vmem:[#allocation3 + $0x170] sm:$0xff]  ;;  %v3608_v57 = vld [vmem:[#allocation3 + $0x168] sm:$0xff]  ;;  %v3512_v54 = vpack.c.bf16 %v3480_v45, %v3480_v45 }
 0x46f   : > { %v4324_v12 = vpack.c.b16 %v4308_v40, %v4307_v48  ;;  %4865 = vrot.lane.b32.xlu1 %v4835_v14, %s8816_s23  ;;  %v10250_v41 = vpop.f32.mrf.mxu2  ;;  %v4727_v48 = vunpack.c.l.b16 %v3767_v47  ;;  %v4856_v40 = vpop.permute.xlu1 %4855  ;;  %v8762_v14 = vld [vmem:[%s11339_s7 + $0x20] sm:$0xff]  ;;  %v3513_v42 = vpack.c.bf16 %v3481_v61, %v3481_v61  ;;  %v3641_v58 = vpack.c.bf16 %v3609_v31, %v3609_v31  ;;  %v3738_v62 = vld [vmem:[#allocation3 + $0x18f] sm:$0xff] }
 0x470   : > { %4611 = vrot.lane.b32.xlu0 %v4580_v37, %s8816_s23  ;;  %11367 = vst [vmem:[#allocation12_spill] sm:$0xff] %v10250_v41  ;;  %v4651_v16 = vsel %vm334_vm3, %v4494_v26, %v4600_v23  ;;  %7807 = vmatpush.bf16.msrb.mxu3 %v8762_v14  ;;  %v3640_v50 = vpack.c.bf16 %v3608_v57, %v3608_v57  ;;  %v4217_v10 = vunpack.c.l.b16 %v3512_v54  ;;  %v3737_v47 = vld [vmem:[#allocation3 + $0x187] sm:$0xff] }
 0x471   : > { %4355 = vrot.lane.b32.xlu2 %v4324_v12, %s8816_s23  ;;  %v10254_v59 = vpop.f32.mrf.mxu0  ;;  %v4750_v36 = vpack.c.b16 %v4728_v4, %v4727_v48  ;;  %v4218_v38 = vunpack.c.l.b16 %v3513_v42  ;;  %v4474_v23 = vunpack.c.l.b16 %v3641_v58  ;;  %v3770_v31 = vpack.c.bf16 %v3738_v62, %v3738_v62  ;;  %v3482_v54 = vld [vmem:[#allocation3 + $0x169] sm:$0xff]  ;;  %v3483_v42 = vld [vmem:[#allocation3 + $0x171] sm:$0xff] }
 0x472   : > { %v3769_v14 = vpack.c.bf16 %v3737_v47, %v3737_v47  ;;  %v3611_v58 = vld [vmem:[#allocation3 + $0x190] sm:$0xff] }
 0x473   : > { %v4907_v17 = vsel %vm334_vm3, %v4750_v36, %v4856_v40  ;;  %v10282_v45 = vpack.c.b16 %v4218_v38, %v4217_v10  ;;  %v4730_v36 = vunpack.c.l.b16 %v3770_v31  ;;  %v3643_v47 = vpack.c.bf16 %v3611_v58, %v3611_v58 }
 0x474   : > { %5495 = vmatmul.bf16.gmra.mxu3 %v4395_v22  ;;  %5584 = vmatmul.bf16.gmra.mxu0 %v4651_v16  ;;  %v4346_v22 = vpop.permute.xlu2 %4345  ;;  %v4602_v16 = vpop.permute.xlu0 %4601  ;;  %v4729_v10 = vunpack.c.l.b16 %v3769_v14 }
 0x475   : > { %v4399_v40 = vsel %vm334_vm3, %v10282_v45, %v4346_v22  ;;  %v3514_v22 = vpack.c.bf16 %v3482_v54, %v3482_v54  ;;  %v4476_v54 = vunpack.c.l.b16 %v3643_v47 }
 0x477   : > { %4867 = vrot.lane.b32.xlu1 %v4836_v56, %s8816_s23  ;;  %v10262_v20 = vpop.f32.mrf.mxu2  ;;  %v10264_v60 = vpop.f32.mrf.mxu3  ;;  %v4473_v56 = vunpack.c.l.b16 %v3640_v50  ;;  %v4219_v14 = vunpack.c.l.b16 %v3514_v22 }
 0x478   : > { %11368 = vst [vmem:[#allocation13_spill] sm:$0xff] %v10262_v20  ;;  %v4858_v38 = vpop.permute.xlu1 %4857 }
 0x479   : > { %v10269_v37 = vpop.f32.mrf.mxu0  ;;  %v10271_v12 = vpop.f32.mrf.mxu1  ;;  %v4495_v61 = vpack.c.b16 %v4474_v23, %v4473_v56  ;;  %v3610_v23 = vld [vmem:[#allocation3 + $0x188] sm:$0xff]  ;;  %v4751_v56 = vpack.c.b16 %v4730_v36, %v4729_v10 }
 0x47b   : > { %v4655_v57 = vsel %vm334_vm3, %v4495_v61, %v4602_v16  ;;  %v3515_v16 = vpack.c.bf16 %v3483_v42, %v3483_v42  ;;  %v8770_v61 = vld [vmem:[%s11339_s7 + $0x60] sm:$0xff]  ;;  %v4911_v31 = vsel %vm334_vm3, %v4751_v56, %v4858_v38  ;;  %v3740_v42 = vld [vmem:[#allocation3 + $0x1af] sm:$0xff] }
 0x47c   : > { %5673 = vmatmul.bf16.gmra.mxu1 %v4907_v17  ;;  %8566 = vmatmul.msk.bf16.gmra.mxu2 %vm334_vm3, %v10229_v53  ;;  %v11370_v53 = vmov 0.0   ;;  %v3739_v56 = vld [vmem:[#allocation3 + $0x1a7] sm:$0xff] }
 0x47d   : > { %420 = vst.msk [vmem:[#allocation4] sm:$0xff] %vm419_vm4, %v11370_v53  ;;  %7896 = vmatpush.bf16.msrb.mxu0 %v8770_v61  ;;  %v4220_v36 = vunpack.c.l.b16 %v3515_v16  ;;  %v3772_v61 = vpack.c.bf16 %v3740_v42, %v3740_v42 }
 0x47e   : > { %421 = vst.msk [vmem:[#allocation4 + $0x8] sm:$0xff] %vm419_vm4, %v11370_v53 }
 0x47f   : > { %v10276_v26 = vpop.f32.mrf.mxu2  ;;  %v10278_v55 = vpop.f32.mrf.mxu3  ;;  %422 = vst.msk [vmem:[#allocation4 + $0x10] sm:$0xff] %vm419_vm4, %v11370_v53  ;;  %v10341_v16 = vpack.c.b16 %v4220_v36, %v4219_v14  ;;  %v3771_v14 = vpack.c.bf16 %v3739_v56, %v3739_v56  ;;  %v4732_v42 = vunpack.c.l.b16 %v3772_v61 }
 0x480   : > { %11369 = vst [vmem:[#allocation14_spill] sm:$0xff] %v10276_v26 }
 0x481   : > { %v10280_v4 = vpop.f32.mrf.mxu1  ;;  %v10286_v48 = vpop.f32.mrf.mxu0  ;;  %423 = vst.msk [vmem:[#allocation4 + $0x18] sm:$0xff] %vm419_vm4, %v11370_v53  ;;  %v4731_v61 = vunpack.c.l.b16 %v3771_v14 }
 0x482   : > { %425 = vst.msk [vmem:[#allocation4 + $0x220] sm:$0xff] %vm419_vm4, %v11370_v53 }
 0x483   : > { %426 = vst.msk [vmem:[#allocation4 + $0x228] sm:$0xff] %vm419_vm4, %v11370_v53  ;;  %v4752_v44 = vpack.c.b16 %v4732_v42, %v4731_v61 }
 0x484   : > { %5500 = vmatmul.bf16.gmra.mxu3 %v4399_v40  ;;  %5589 = vmatmul.bf16.gmra.mxu0 %v4655_v57  ;;  %427 = vst.msk [vmem:[#allocation4 + $0x230] sm:$0xff] %vm419_vm4, %v11370_v53  ;;  %v3642_v40 = vpack.c.bf16 %v3610_v23, %v3610_v23  ;;  %v4604_v23 = vpop.permute.xlu0 %4603 }
 0x485   : > { %428 = vst.msk [vmem:[#allocation4 + $0x238] sm:$0xff] %vm419_vm4, %v11370_v53  ;;  %v5926_v36 = vld [vmem:[#allocation4 + $0x8] sm:$0xff] }
 0x486   : > { %430 = vst.msk [vmem:[#allocation4 + $0x20] sm:$0xff] %vm419_vm4, %v11370_v53  ;;  %v4475_v38 = vunpack.c.l.b16 %v3642_v40 }
 0x487   : > { %v10301_v17 = vpop.f32.mrf.mxu2  ;;  %v10303_v50 = vpop.f32.mrf.mxu3  ;;  %431 = vst.msk [vmem:[#allocation4 + $0x40] sm:$0xff] %vm419_vm4, %v11370_v53 }
 0x488   : > { %11371 = vst [vmem:[#allocation15_spill] sm:$0xff] %v10301_v17  ;;  %v4496_v47 = vpack.c.b16 %v4476_v54, %v4475_v38  ;;  %v5927_v54 = vld [vmem:[#allocation4 + $0x10] sm:$0xff]  ;;  %v5958_v17 = vpack.c.bf16 %v5926_v36, %v5926_v36 }
 0x489   : > { %v10309_v62 = vpop.f32.mrf.mxu1  ;;  %432 = vst.msk [vmem:[#allocation4 + $0x60] sm:$0xff] %vm419_vm4, %v11370_v53  ;;  %v10321_v57 = vpop.f32.mrf.mxu0  ;;  %v3484_v38 = vld [vmem:[#allocation3 + $0x189] sm:$0xff]  ;;  %v5991_v42 = vld [vmem:[#allocation4 + $0x11] sm:$0xff] }
 0x48a   : > { %433 = vst.msk [vmem:[#allocation4 + $0x80] sm:$0xff] %vm419_vm4, %v11370_v53  ;;  %v6551_v36 = vunpack.c.l.b16 %v5958_v17  ;;  %v3516_v41 = vpack.c.bf16 %v3484_v38, %v3484_v38  ;;  %v3644_v38 = vpack.c.bf16 %v3612_v34, %v3612_v34 }
 0x48b   : > { %434 = vst.msk [vmem:[#allocation4 + $0xa0] sm:$0xff] %vm419_vm4, %v11370_v53 }
 0x48c   : > { %5678 = vmatmul.bf16.gmra.mxu1 %v4911_v31  ;;  %8567 = vmatmul.msk.bf16.gmra.mxu2 %vm334_vm3, %v10256_v13  ;;  %435 = vst.msk [vmem:[#allocation4 + $0xc0] sm:$0xff] %vm419_vm4, %v11370_v53  ;;  %v4348_v13 = vpop.permute.xlu2 %4347  ;;  %v10348_v31 = vld [vmem:[%s11338_s6] ss:$0 sm:$0xff] }
 0x48d   : > { %436 = vst.msk [vmem:[#allocation4 + $0xe0] sm:$0xff] %vm419_vm4, %v11370_v53  ;;  %v4403_v40 = vsel %vm334_vm3, %v10341_v16, %v4348_v13  ;;  %v5959_v13 = vpack.c.bf16 %v5927_v54, %v5927_v54 }
 0x48e   : > { %437 = vst.msk [vmem:[#allocation4 + $0x100] sm:$0xff] %vm419_vm4, %v11370_v53 }
 0x48f   : > { %v10331_v58 = vpop.f32.mrf.mxu2  ;;  %v10333_v10 = vpop.f32.mrf.mxu3  ;;  %438 = vst.msk [vmem:[#allocation4 + $0x120] sm:$0xff] %vm419_vm4, %v11370_v53  ;;  %v6552_v54 = vunpack.c.l.b16 %v5959_v13 }
 0x490   : > { %11372 = vst [vmem:[#allocation16_spill] sm:$0xff] %v10331_v58  ;;  %v4659_v58 = vsel %vm334_vm3, %v4496_v47, %v4604_v23  ;;  %v5363_v23 = vadd.f32 %v10348_v31, %v10033_v30  ;;  %v3613_v47 = vld [vmem:[#allocation3 + $0x1b0] sm:$0xff]  ;;  %v4860_v30 = vpop.permute.xlu1 %4859 }
 0x491   : > { %v10339_v22 = vpop.f32.mrf.mxu1  ;;  %439 = vst.msk [vmem:[#allocation4 + $0x140] sm:$0xff] %vm419_vm4, %v11370_v53  ;;  %v10363_v56 = vpop.f32.mrf.mxu0  ;;  %v6583_v8 = vpack.c.b16 %v6552_v54, %v6551_v36 }
 0x492   : > { %440 = vst.msk [vmem:[#allocation4 + $0x160] sm:$0xff] %vm419_vm4, %v11370_v53  ;;  %v5452_v20 = vadd.f32 %v10234_v5, %v5363_v23  ;;  %v4915_v5 = vsel %vm334_vm3, %v4752_v44, %v4860_v30  ;;  %v5990_v44 = vld [vmem:[#allocation4 + $0x9] sm:$0xff]  ;;  %v6023_v23 = vpack.c.bf16 %v5991_v42, %v5991_v42 }
 0x493   : > { %441 = vst.msk [vmem:[#allocation4 + $0x180] sm:$0xff] %vm419_vm4, %v11370_v53  ;;  %6599 = vrot.lane.b32.xlu2 %v6583_v8, %s8817_s11  ;;  %v6022_v8 = vpack.c.bf16 %v5990_v44, %v5990_v44 }
 0x494   : > { %5505 = vmatmul.bf16.gmra.mxu3 %v4403_v40  ;;  %5594 = vmatmul.bf16.gmra.mxu0 %v4659_v58  ;;  %442 = vst.msk [vmem:[#allocation4 + $0x1a0] sm:$0xff] %vm419_vm4, %v11370_v53  ;;  %v3485_v58 = vld [vmem:[#allocation3 + $0x191] sm:$0xff]  ;;  %v5541_v17 = vadd.f32 %v10227_v39, %v5452_v20  ;;  %v4221_v39 = vunpack.c.l.b16 %v3516_v41  ;;  %v6664_v30 = vunpack.c.l.b16 %v6023_v23 }
 0x495   : > { %443 = vst.msk [vmem:[#allocation4 + $0x1c0] sm:$0xff] %vm419_vm4, %v11370_v53  ;;  %v3517_v14 = vpack.c.bf16 %v3485_v58, %v3485_v58  ;;  %v8761_v20 = vld [vmem:[%s11339_s7 + $0x18] sm:$0xff]  ;;  %v4350_v58 = vpop.permute.xlu2 %4349  ;;  %v3742_v41 = vld [vmem:[#allocation3 + $0x1cf] sm:$0xff]  ;;  %v6663_v54 = vunpack.c.l.b16 %v6022_v8 }
 0x496   : > { %444 = vst.msk [vmem:[#allocation4 + $0x1e0] sm:$0xff] %vm419_vm4, %v11370_v53  ;;  %7808 = vmatpush.bf16.msrb.mxu3 %v8761_v20  ;;  %v3774_v42 = vpack.c.bf16 %v3742_v41, %v3742_v41  ;;  %v3486_v41 = vld [vmem:[#allocation3 + $0x1a9] sm:$0xff] }
 0x497   : > { %v10367_v40 = vpop.f32.mrf.mxu2  ;;  %v10369_v26 = vpop.f32.mrf.mxu3  ;;  %445 = vst.msk [vmem:[#allocation4 + $0x200] sm:$0xff] %vm419_vm4, %v11370_v53  ;;  %v4222_v34 = vunpack.c.l.b16 %v3517_v14  ;;  %v6695_v8 = vpack.c.b16 %v6664_v30, %v6663_v54  ;;  %v3615_v54 = vld [vmem:[#allocation3 + $0x1d0] sm:$0xff] }
 0x498   : > { %11373 = vst [vmem:[#allocation17_spill] sm:$0xff] %v10367_v40  ;;  %v3645_v40 = vpack.c.bf16 %v3613_v47, %v3613_v47  ;;  %v5630_v47 = vadd.f32 %v10236_v51, %v5541_v17  ;;  %v3741_v17 = vld [vmem:[#allocation3 + $0x1c7] sm:$0xff] }
 0x499   : > { %v10376_v24 = vpop.f32.mrf.mxu1  ;;  %446 = vst.msk [vmem:[#allocation4 + $0x38] sm:$0xff] %vm419_vm4, %v11370_v53  ;;  %v10414_v44 = vpack.c.b16 %v4222_v34, %v4221_v39  ;;  %6711 = vrot.lane.b32.xlu0 %v6695_v8, %s8816_s23  ;;  %v5368_v39 = vadd.f32 %v10348_v31, %v10053_v2  ;;  %v8774_v34 = vld [vmem:[%s11339_s7 + $0x80] sm:$0xff] }
 0x49a   : > { %447 = vst.msk [vmem:[#allocation4 + $0x58] sm:$0xff] %vm419_vm4, %v11370_v53  ;;  %v4478_v13 = vunpack.c.l.b16 %v3645_v40  ;;  %v4477_v40 = vunpack.c.l.b16 %v3644_v38  ;;  %7989 = vmatpush.bf16.msrb.mxu1 %v8774_v34 }
 0x49b   : > { %448 = vst.msk [vmem:[#allocation4 + $0x78] sm:$0xff] %vm419_vm4, %v11370_v53 }
 0x49c   : > { %5683 = vmatmul.bf16.gmra.mxu1 %v4915_v5  ;;  %8568 = vmatmul.msk.bf16.gmra.mxu2 %vm334_vm3, %v10282_v45  ;;  %449 = vst.msk [vmem:[#allocation4 + $0x98] sm:$0xff] %vm419_vm4, %v11370_v53  ;;  %v5365_v45 = vadd.f32 %v10348_v31, %v10047_v6  ;;  %v4606_v6 = vpop.permute.xlu0 %4605  ;;  %v10406_v5 = vpop.f32.mrf.mxu0  ;;  %v4497_v38 = vpack.c.b16 %v4478_v13, %v4477_v40  ;;  %v4734_v13 = vunpack.c.l.b16 %v3774_v42  ;;  %v3487_v40 = vld [vmem:[#allocation3 + $0x1b1] sm:$0xff] }
 0x49d   : > { %450 = vst.msk [vmem:[#allocation4 + $0xb8] sm:$0xff] %vm419_vm4, %v11370_v53  ;;  %v3518_v42 = vpack.c.bf16 %v3486_v41, %v3486_v41  ;;  %v3519_v8 = vpack.c.bf16 %v3487_v40, %v3487_v40 }
 0x49e   : > { %451 = vst.msk [vmem:[#allocation4 + $0xd8] sm:$0xff] %vm419_vm4, %v11370_v53  ;;  %v5454_v14 = vadd.f32 %v10247_v35, %v5365_v45  ;;  %v4407_v45 = vsel %vm334_vm3, %v10414_v44, %v4350_v58  ;;  %v5457_v58 = vadd.f32 %v10264_v60, %v5368_v39 }
 0x49f   : > { %v10401_v61 = vpop.f32.mrf.mxu3  ;;  %v5718_v36 = vpop.f32.mrf.mxu2  ;;  %452 = vst.msk [vmem:[#allocation4 + $0xf8] sm:$0xff] %vm419_vm4, %v11370_v53  ;;  %v4224_v34 = vunpack.c.l.b16 %v3519_v8 }
 0x4a0   : > { %v5719_v51 = vadd.f32 %v5718_v36, %v5630_v47  ;;  %453 = vst.msk [vmem:[#allocation4 + $0x118] sm:$0xff] %vm419_vm4, %v11370_v53  ;;  %v5543_v35 = vadd.f32 %v10240_v11, %v5454_v14  ;;  %v4663_v47 = vsel %vm334_vm3, %v4497_v38, %v4606_v6  ;;  %v3773_v36 = vpack.c.bf16 %v3741_v17, %v3741_v17  ;;  %v8769_v11 = vld [vmem:[%s11339_s7 + $0x58] sm:$0xff]  ;;  %v3614_v17 = vld [vmem:[#allocation3 + $0x1c8] sm:$0xff] }
 0x4a1   : > { %454 = vst.msk [vmem:[#allocation4 + $0x138] sm:$0xff] %vm419_vm4, %v11370_v53  ;;  %v10412_v20 = vpop.f32.mrf.mxu1  ;;  %7897 = vmatpush.bf16.msrb.mxu0 %v8769_v11  ;;  %v3646_v39 = vpack.c.bf16 %v3614_v17, %v3614_v17  ;;  %v5370_v11 = vadd.f32 %v10348_v31, %v10067_v9 }
 0x4a2   : > { %v5798_v23 = vmax.f32 %v5719_v51, 0.0  ;;  %455 = vst.msk [vmem:[#allocation4 + $0x158] sm:$0xff] %vm419_vm4, %v11370_v53  ;;  %v5632_v2 = vadd.f32 %v10252_v1, %v5543_v35  ;;  %v4733_v6 = vunpack.c.l.b16 %v3773_v36  ;;  %v4862_v51 = vpop.permute.xlu1 %4861  ;;  %v3647_v35 = vpack.c.bf16 %v3615_v54, %v3615_v54 }
 0x4a3   : > { %456 = vst.msk [vmem:[#allocation4 + $0x178] sm:$0xff] %vm419_vm4, %v11370_v53  ;;  %v4479_v54 = vunpack.c.l.b16 %v3646_v39 }
 0x4a4   : > { %5830 = vst.msk [vmem:[#allocation4 + $0x28] sm:$0xff] %vm419_vm4, %v5798_v23  ;;  %5510 = vmatmul.bf16.gmra.mxu3 %v4407_v45  ;;  %5599 = vmatmul.bf16.gmra.mxu0 %v4663_v47  ;;  %v4753_v38 = vpack.c.b16 %v4734_v13, %v4733_v6  ;;  %v5546_v23 = vadd.f32 %v10254_v59, %v5457_v58  ;;  %v10451_v45 = vpop.f32.mrf.mxu0  ;;  %v4480_v13 = vunpack.c.l.b16 %v3647_v35  ;;  %v4608_v9 = vpop.permute.xlu0 %4607 }
 0x4a5   : > { %457 = vst.msk [vmem:[#allocation4 + $0x198] sm:$0xff] %vm419_vm4, %v11370_v53  ;;  %v5459_v58 = vadd.f32 %v10278_v55, %v5370_v11 }
 0x4a6   : > { %458 = vst.msk [vmem:[#allocation4 + $0x1b8] sm:$0xff] %vm419_vm4, %v11370_v53  ;;  %v4919_v36 = vsel %vm334_vm3, %v4753_v38, %v4862_v51  ;;  %v5635_v59 = vadd.f32 %v10271_v12, %v5546_v23  ;;  %v4498_v38 = vpack.c.b16 %v4480_v13, %v4479_v54 }
 0x4a7   : > { %459 = vst.msk [vmem:[#allocation4 + $0x1d8] sm:$0xff] %vm419_vm4, %v11370_v53  ;;  %v10442_v30 = vpop.f32.mrf.mxu3  ;;  %v5720_v14 = vpop.f32.mrf.mxu2  ;;  %v5548_v12 = vadd.f32 %v10269_v37, %v5459_v58 }
 0x4a8   : > { %460 = vst.msk [vmem:[#allocation4 + $0x1f8] sm:$0xff] %vm419_vm4, %v11370_v53  ;;  %v5721_v60 = vadd.f32 %v5720_v14, %v5632_v2  ;;  %v3744_v2 = vld [vmem:[#allocation3 + $0x1ef] sm:$0xff]  ;;  %v4352_v14 = vpop.permute.xlu2 %4351  ;;  %v4667_v35 = vsel %vm334_vm3, %v4498_v38, %v4608_v9 }
 0x4a9   : > { %461 = vst.msk [vmem:[#allocation4 + $0x218] sm:$0xff] %vm419_vm4, %v11370_v53  ;;  %v10448_v1 = vpop.f32.mrf.mxu1  ;;  %v4223_v53 = vunpack.c.l.b16 %v3518_v42  ;;  %v3776_v42 = vpack.c.bf16 %v3744_v2, %v3744_v2  ;;  %v5637_v54 = vadd.f32 %v10280_v4, %v5548_v12 }
 0x4aa   : > { %v5799_v47 = vmax.f32 %v5721_v60, 0.0  ;;  %v3743_v60 = vld [vmem:[#allocation3 + $0x1e7] sm:$0xff] }
 0x4ab   : > { %v6054_v51 = vld [vmem:[#allocation4 + $0x27] sm:$0xff]  ;;  %v3775_v11 = vpack.c.bf16 %v3743_v60, %v3743_v60  ;;  %v4736_v58 = vunpack.c.l.b16 %v3776_v42 }
 0x4ac   : > { %5831 = vst.msk [vmem:[#allocation4 + $0x30] sm:$0xff] %vm419_vm4, %v5799_v47  ;;  %5688 = vmatmul.bf16.gmra.mxu1 %v4919_v36  ;;  %8569 = vmatmul.msk.bf16.gmra.mxu2 %vm334_vm3, %v10341_v16  ;;  %v10465_v16 = vpack.c.b16 %v4224_v34, %v4223_v53  ;;  %v6086_v39 = vpack.c.bf16 %v6054_v51, %v6054_v51  ;;  %v10473_v53 = vpop.f32.mrf.mxu0  ;;  %v3489_v51 = vld [vmem:[#allocation3 + $0x1d1] sm:$0xff] }
 0x4ae   : > { %v4411_v55 = vsel %vm334_vm3, %v10465_v16, %v4352_v14  ;;  %v6775_v38 = vunpack.c.l.b16 %v6086_v39 }
 0x4af   : > { %v10461_v41 = vpop.f32.mrf.mxu3  ;;  %v5723_v40 = vpop.f32.mrf.mxu2 }
 0x4b0   : > { %v5724_v6 = vadd.f32 %v5723_v40, %v5635_v59  ;;  %v5373_v59 = vadd.f32 %v10348_v31, %v10075_v18  ;;  %v3488_v40 = vld [vmem:[#allocation3 + $0x1c9] sm:$0xff] }
 0x4b1   : > { %v10463_v17 = vpop.f32.mrf.mxu1  ;;  %v3617_v18 = vld [vmem:[#allocation3 + $0x1f0] sm:$0xff] }
 0x4b2   : > { %v5800_v8 = vmax.f32 %v5724_v6, 0.0  ;;  %v5462_v14 = vadd.f32 %v10303_v50, %v5373_v59  ;;  %v3521_v59 = vpack.c.bf16 %v3489_v51, %v3489_v51 }
 0x4b3   : > { %v6182_v23 = vld [vmem:[#allocation4 + $0x29] sm:$0xff]  ;;  %v6183_v47 = vld [vmem:[#allocation4 + $0x31] sm:$0xff] }
 0x4b4   : > { %v6055_v36 = vld [vmem:[#allocation4 + $0x2f] sm:$0xff]  ;;  %5832 = vst.msk [vmem:[#allocation4 + $0x48] sm:$0xff] %vm419_vm4, %v5800_v8  ;;  %5515 = vmatmul.bf16.gmra.mxu3 %v4411_v55  ;;  %5604 = vmatmul.bf16.gmra.mxu0 %v4667_v35  ;;  %v6214_v37 = vpack.c.bf16 %v6182_v23, %v6182_v23  ;;  %v6215_v34 = vpack.c.bf16 %v6183_v47, %v6183_v47  ;;  %v4735_v8 = vunpack.c.l.b16 %v3775_v11  ;;  %v4864_v35 = vpop.permute.xlu1 %4863 }
 0x4b5   : > { %v6087_v13 = vpack.c.bf16 %v6055_v36, %v6055_v36  ;;  %v5929_v2 = vld [vmem:[#allocation4 + $0x30] sm:$0xff]  ;;  %v5928_v55 = vld [vmem:[#allocation4 + $0x28] sm:$0xff]  ;;  %v3520_v36 = vpack.c.bf16 %v3488_v40, %v3488_v40  ;;  %v5551_v39 = vadd.f32 %v10286_v48, %v5462_v14  ;;  %v3648_v40 = vpack.c.bf16 %v3616_v46, %v3616_v46 }
 0x4b6   : > { %v7096_v9 = vunpack.c.l.b16 %v6214_v37  ;;  %v7097_v6 = vunpack.c.l.b16 %v6215_v34  ;;  %v5961_v42 = vpack.c.bf16 %v5929_v2, %v5929_v2  ;;  %v4754_v12 = vpack.c.b16 %v4736_v58, %v4735_v8  ;;  %v8760_v48 = vld [vmem:[%s11339_s7 + $0x10] sm:$0xff]  ;;  %v4610_v8 = vpop.permute.xlu0 %4609 }
 0x4b7   : > { %v5725_v60 = vpop.f32.mrf.mxu2  ;;  %v6776_v33 = vunpack.c.l.b16 %v6087_v13  ;;  %v10480_v63 = vpop.f32.mrf.mxu3  ;;  %v3649_v37 = vpack.c.bf16 %v3617_v18, %v3617_v18  ;;  %v5960_v11 = vpack.c.bf16 %v5928_v55, %v5928_v55  ;;  %v5375_v13 = vadd.f32 %v10348_v31, %v10096_v43  ;;  %7809 = vmatpush.bf16.msrb.mxu3 %v8760_v48 }
 0x4b8   : > { %v5726_v23 = vadd.f32 %v5725_v60, %v5637_v54  ;;  %v10478_v47 = vpack.c.b16 %v7097_v6, %v7096_v9  ;;  %v4923_v2 = vsel %vm334_vm3, %v4754_v12, %v4864_v35  ;;  %v4225_v43 = vunpack.c.l.b16 %v3520_v36  ;;  %v10499_v6 = vpop.f32.mrf.mxu0 }
 0x4b9   : > { %v10482_v4 = vpop.f32.mrf.mxu1  ;;  %v6807_v50 = vpack.c.b16 %v6776_v33, %v6775_v38  ;;  %v6554_v33 = vunpack.c.l.b16 %v5961_v42  ;;  %v5464_v58 = vadd.f32 %v10333_v10, %v5375_v13  ;;  %v4226_v54 = vunpack.c.l.b16 %v3521_v59  ;;  %v4354_v38 = vpop.permute.xlu2 %4353 }
 0x4ba   : > { %v5801_v34 = vmax.f32 %v5726_v23, 0.0  ;;  %7144 = vrot.lane.b32.xlu2 %v10478_v47, %s8817_s11  ;;  %v4482_v14 = vunpack.c.l.b16 %v3649_v37  ;;  %v5640_v9 = vadd.f32 %v10309_v62, %v5551_v39  ;;  %v6553_v46 = vunpack.c.l.b16 %v5960_v11 }
 0x4bb   : > { %6823 = vrot.lane.b32.xlu1 %v6807_v50, %s8818_s18  ;;  %v4481_v18 = vunpack.c.l.b16 %v3648_v40  ;;  %v6247_v60 = vld [vmem:[#allocation4 + $0x47] sm:$0xff]  ;;  %v5553_v10 = vadd.f32 %v10321_v57, %v5464_v58  ;;  %v10506_v42 = vpack.c.b16 %v4226_v54, %v4225_v43  ;;  %v5378_v59 = vadd.f32 %v10348_v31, %v10103_v19  ;;  %v8768_v19 = vld [vmem:[%s11339_s7 + $0x50] sm:$0xff] }
 0x4bc   : > { %5833 = vst.msk [vmem:[#allocation4 + $0x50] sm:$0xff] %vm419_vm4, %v5801_v34  ;;  %5693 = vmatmul.bf16.gmra.mxu1 %v4923_v2  ;;  %8570 = vmatmul.msk.bf16.gmra.mxu2 %vm334_vm3, %v10414_v44  ;;  %v6311_v44 = vld [vmem:[#allocation4 + $0x48] sm:$0xff]  ;;  %v10501_v35 = vpack.c.b16 %v6554_v33, %v6553_v46  ;;  %v6279_v50 = vpack.c.bf16 %v6247_v60, %v6247_v60  ;;  %v3491_v60 = vld [vmem:[#allocation3 + $0x1f1] sm:$0xff] }
 0x4bd   : > { %v4499_v62 = vpack.c.b16 %v4482_v14, %v4481_v18  ;;  %v6343_v12 = vpack.c.bf16 %v6311_v44, %v6311_v44  ;;  %v4415_v39 = vsel %vm334_vm3, %v10506_v42, %v4354_v38  ;;  %v5642_v48 = vadd.f32 %v10339_v22, %v5553_v10  ;;  %v3490_v18 = vld [vmem:[#allocation3 + $0x1e9] sm:$0xff]  ;;  %7898 = vmatpush.bf16.msrb.mxu0 %v8768_v19 }
 0x4be   : > { %v5467_v58 = vadd.f32 %v10369_v26, %v5378_v59  ;;  %v7208_v14 = vunpack.c.l.b16 %v6279_v50  ;;  %v3522_v26 = vpack.c.bf16 %v3490_v18, %v3490_v18  ;;  %v3523_v10 = vpack.c.bf16 %v3491_v60, %v3491_v60 }
 0x4bf   : > { %v5728_v51 = vpop.f32.mrf.mxu2  ;;  %v10512_v37 = vpop.f32.mrf.mxu3  ;;  %v4671_v57 = vsel %vm334_vm3, %v4499_v62, %v4610_v8  ;;  %v7320_v46 = vunpack.c.l.b16 %v6343_v12 }
 0x4c0   : > { %v5729_v55 = vadd.f32 %v5728_v51, %v5640_v9  ;;  %v5556_v50 = vadd.f32 %v10363_v56, %v5467_v58 }
 0x4c1   : > { %v10504_v23 = vpop.f32.mrf.mxu1 }
 0x4c2   : > { %v5802_v36 = vmax.f32 %v5729_v55, 0.0  ;;  %6601 = vrot.lane.b32.xlu2 %v10501_v35, %s8817_s11  ;;  %v10523_v55 = vpop.f32.mrf.mxu0 }
 0x4c3   : > { %v6248_v34 = vld [vmem:[#allocation4 + $0x4f] sm:$0xff] }
 0x4c4   : > { %v6312_v11 = vld [vmem:[#allocation4 + $0x50] sm:$0xff]  ;;  %5834 = vst.msk [vmem:[#allocation4 + $0x68] sm:$0xff] %vm419_vm4, %v5802_v36  ;;  %5520 = vmatmul.bf16.gmra.mxu3 %v4415_v39  ;;  %5609 = vmatmul.bf16.gmra.mxu0 %v4671_v57  ;;  %v6280_v2 = vpack.c.bf16 %v6248_v34, %v6248_v34  ;;  %v5380_v57 = vadd.f32 %v10348_v31, %v10111_v0 }
 0x4c5   : > { %v6184_v13 = vld [vmem:[#allocation4 + $0x49] sm:$0xff]  ;;  %v6344_v40 = vpack.c.bf16 %v6312_v11, %v6312_v11  ;;  %v6185_v33 = vld [vmem:[#allocation4 + $0x51] sm:$0xff]  ;;  %v4227_v11 = vunpack.c.l.b16 %v3522_v26 }
 0x4c6   : > { %v6216_v43 = vpack.c.bf16 %v6184_v13, %v6184_v13  ;;  %v6217_v54 = vpack.c.bf16 %v6185_v33, %v6185_v33  ;;  %v7209_v9 = vunpack.c.l.b16 %v6280_v2  ;;  %v5469_v56 = vadd.f32 %v10401_v61, %v5380_v57  ;;  %v3618_v57 = vld [vmem:[#allocation3 + $0x208] sm:$0xff] }
 0x4c7   : > { %v7321_v51 = vunpack.c.l.b16 %v6344_v40  ;;  %v5730_v44 = vpop.f32.mrf.mxu2  ;;  %v10540_v34 = vpop.f32.mrf.mxu3  ;;  %v4228_v13 = vunpack.c.l.b16 %v3523_v10  ;;  %v5645_v2 = vadd.f32 %v10376_v24, %v5556_v50 }
 0x4c8   : > { %v7098_v38 = vunpack.c.l.b16 %v6216_v43  ;;  %v7099_v8 = vunpack.c.l.b16 %v6217_v54  ;;  %v5731_v62 = vadd.f32 %v5730_v44, %v5642_v48  ;;  %v7240_v36 = vpack.c.b16 %v7209_v9, %v7208_v14 }
 0x4c9   : > { %v7352_v39 = vpack.c.b16 %v7321_v51, %v7320_v46  ;;  %v10528_v12 = vpop.f32.mrf.mxu1  ;;  %v5558_v58 = vadd.f32 %v10406_v5, %v5469_v56  ;;  %v10544_v43 = vpack.c.b16 %v4228_v13, %v4227_v11  ;;  %v5383_v9 = vadd.f32 %v10348_v31, %v10118_v25  ;;  %v3745_v56 = vld [vmem:[#allocation3 + $0x207] sm:$0xff] }
 0x4ca   : > { %v10525_v22 = vpack.c.b16 %v7099_v8, %v7098_v38  ;;  %v5803_v59 = vmax.f32 %v5731_v62, 0.0  ;;  %7256 = vrot.lane.b32.xlu0 %v7240_v36, %s8816_s23  ;;  %v10546_v54 = vpop.f32.mrf.mxu0  ;;  %v3746_v8 = vld [vmem:[#allocation3 + $0x20f] sm:$0xff] }
 0x4cb   : > { %7368 = vrot.lane.b32.xlu1 %v7352_v39, %s8818_s18  ;;  %v6313_v33 = vld [vmem:[#allocation4 + $0x68] sm:$0xff]  ;;  %v4356_v0 = vpop.permute.xlu2 %4355  ;;  %v5647_v62 = vadd.f32 %v10412_v20, %v5558_v58  ;;  %v5472_v25 = vadd.f32 %v10442_v30, %v5383_v9  ;;  %v3650_v30 = vpack.c.bf16 %v3618_v57, %v3618_v57 }
 0x4cc   : > { %7146 = vrot.lane.b32.xlu2 %v10525_v22, %s8817_s11  ;;  %5835 = vst.msk [vmem:[#allocation4 + $0x70] sm:$0xff] %vm419_vm4, %v5803_v59  ;;  %8571 = vmatmul.msk.bf16.gmra.mxu2 %vm334_vm3, %v10465_v16  ;;  %v6249_v19 = vld [vmem:[#allocation4 + $0x67] sm:$0xff]  ;;  %v6345_v24 = vpack.c.bf16 %v6313_v33, %v6313_v33  ;;  %v4419_v5 = vsel %vm334_vm3, %v10544_v43, %v4356_v0 }
 0x4cd   : > { %v6281_v61 = vpack.c.bf16 %v6249_v19, %v6249_v19  ;;  %v3778_v19 = vpack.c.bf16 %v3746_v8, %v3746_v8 }
 0x4ce   : > { %v7322_v26 = vunpack.c.l.b16 %v6345_v24  ;;  %v5561_v24 = vadd.f32 %v10451_v45, %v5472_v25  ;;  %v8759_v45 = vld [vmem:[%s11339_s7 + $0x8] sm:$0xff] }
 0x4cf   : > { %v5733_v40 = vpop.f32.mrf.mxu2  ;;  %v7210_v50 = vunpack.c.l.b16 %v6281_v61  ;;  %v10561_v11 = vpop.f32.mrf.mxu3  ;;  %7810 = vmatpush.bf16.msrb.mxu3 %v8759_v45 }
 0x4d0   : > { %v5734_v48 = vadd.f32 %v5733_v40, %v5645_v2 }
 0x4d1   : > { %v10548_v14 = vpop.f32.mrf.mxu1 }
 0x4d2   : > { %v5804_v16 = vmax.f32 %v5734_v48, 0.0  ;;  %6713 = vrot.lane.b32.xlu0 %v10478_v47, %s8816_s23  ;;  %v3619_v47 = vld [vmem:[#allocation3 + $0x210] sm:$0xff] }
 0x4d3   : > { %6825 = vrot.lane.b32.xlu1 %v7240_v36, %s8818_s18  ;;  %v6314_v46 = vld [vmem:[#allocation4 + $0x70] sm:$0xff]  ;;  %v3651_v33 = vpack.c.bf16 %v3619_v47, %v3619_v47 }
 0x4d4   : > { %6603 = vrot.lane.b32.xlu2 %v7352_v39, %s8817_s11  ;;  %v6250_v51 = vld [vmem:[#allocation4 + $0x6f] sm:$0xff]  ;;  %5836 = vst.msk [vmem:[#allocation4 + $0x88] sm:$0xff] %vm419_vm4, %v5804_v16  ;;  %5525 = vmatmul.bf16.gmra.mxu3 %v4419_v5  ;;  %v6346_v60 = vpack.c.bf16 %v6314_v46, %v6314_v46  ;;  %v3777_v16 = vpack.c.bf16 %v3745_v56, %v3745_v56 }
 0x4d5   : > { %v6186_v18 = vld [vmem:[#allocation4 + $0x69] sm:$0xff]  ;;  %v6282_v44 = vpack.c.bf16 %v6250_v51, %v6250_v51  ;;  %v6187_v38 = vld [vmem:[#allocation4 + $0x71] sm:$0xff]  ;;  %v5385_v5 = vadd.f32 %v10348_v31, %v10125_v28  ;;  %v4484_v46 = vunpack.c.l.b16 %v3651_v33  ;;  %v4738_v51 = vunpack.c.l.b16 %v3778_v19 }
 0x4d6   : > { %v6218_v36 = vpack.c.bf16 %v6186_v18, %v6186_v18  ;;  %v6219_v39 = vpack.c.bf16 %v6187_v38, %v6187_v38  ;;  %v7323_v10 = vunpack.c.l.b16 %v6346_v60  ;;  %v10574_v18 = vpop.f32.mrf.mxu0  ;;  %v4737_v28 = vunpack.c.l.b16 %v3777_v16 }
 0x4d7   : > { %v7211_v59 = vunpack.c.l.b16 %v6282_v44  ;;  %v5735_v13 = vpop.f32.mrf.mxu2  ;;  %v5474_v60 = vadd.f32 %v10461_v41, %v5385_v5  ;;  %v4483_v44 = vunpack.c.l.b16 %v3650_v30  ;;  %v5650_v38 = vadd.f32 %v10448_v1, %v5561_v24  ;;  %v10585_v57 = vpop.f32.mrf.mxu3 }
 0x4d8   : > { %v7100_v2 = vunpack.c.l.b16 %v6218_v36  ;;  %v7101_v40 = vunpack.c.l.b16 %v6219_v39  ;;  %v5736_v0 = vadd.f32 %v5735_v13, %v5647_v62  ;;  %v7353_v48 = vpack.c.b16 %v7323_v10, %v7322_v26 }
 0x4d9   : > { %v7241_v20 = vpack.c.b16 %v7211_v59, %v7210_v50  ;;  %v10566_v9 = vpop.f32.mrf.mxu1  ;;  %v4500_v8 = vpack.c.b16 %v4484_v46, %v4483_v44  ;;  %v4755_v62 = vpack.c.b16 %v4738_v51, %v4737_v28  ;;  %v3748_v50 = vld [vmem:[#allocation3 + $0x22f] sm:$0xff]  ;;  %v5563_v59 = vadd.f32 %v10473_v53, %v5474_v60 }
 0x4da   : > { %v10563_v58 = vpack.c.b16 %v7101_v40, %v7100_v2  ;;  %v5805_v61 = vmax.f32 %v5736_v0, 0.0  ;;  %v5388_v33 = vadd.f32 %v10348_v31, %v10132_v29  ;;  %v3780_v16 = vpack.c.bf16 %v3748_v50, %v3748_v50  ;;  %v8767_v29 = vld [vmem:[%s11339_s7 + $0x48] sm:$0xff] }
 0x4db   : > { %7370 = vrot.lane.b32.xlu1 %v7353_v48, %s8818_s18  ;;  %7258 = vrot.lane.b32.xlu0 %v7241_v20, %s8816_s23  ;;  %v6251_v25 = vld [vmem:[#allocation4 + $0x87] sm:$0xff]  ;;  %v5652_v46 = vadd.f32 %v10463_v17, %v5563_v59  ;;  %v5390_v59 = vadd.f32 %v10348_v31, %v10140_v15  ;;  %v3874_v15 = vld [vmem:[#allocation3 + $0x211] sm:$0xff] }
 0x4dc   : > { %7148 = vrot.lane.b32.xlu2 %v10563_v58, %s8817_s11  ;;  %5837 = vst.msk [vmem:[#allocation4 + $0x90] sm:$0xff] %vm419_vm4, %v5805_v61  ;;  %8572 = vmatmul.msk.bf16.gmra.mxu2 %vm334_vm3, %v10506_v42  ;;  %v6315_v36 = vld [vmem:[#allocation4 + $0x88] sm:$0xff]  ;;  %v6283_v2 = vpack.c.bf16 %v6251_v25, %v6251_v25 }
 0x4dd   : > { %v3747_v42 = vld [vmem:[#allocation3 + $0x227] sm:$0xff]  ;;  %v6347_v40 = vpack.c.bf16 %v6315_v36, %v6315_v36  ;;  %7899 = vmatpush.bf16.msrb.mxu0 %v8767_v29  ;;  %v4740_v36 = vunpack.c.l.b16 %v3780_v16 }
 0x4de   : > { %v3779_v30 = vpack.c.bf16 %v3747_v42, %v3747_v42  ;;  %v10603_v60 = vpop.f32.mrf.mxu0  ;;  %v7212_v44 = vunpack.c.l.b16 %v6283_v2  ;;  %v3873_v2 = vld [vmem:[#allocation3 + $0x209] sm:$0xff] }
 0x4df   : > { %v5738_v47 = vpop.f32.mrf.mxu2 }
 0x4e0   : > { %v5739_v39 = vadd.f32 %v5738_v47, %v5650_v38  ;;  %v7324_v38 = vunpack.c.l.b16 %v6347_v40  ;;  %v4739_v25 = vunpack.c.l.b16 %v3779_v30 }
 0x4e1   : > { %v4866_v26 = vpop.permute.xlu1 %4865  ;;  %v10589_v13 = vpop.f32.mrf.mxu1 }
 0x4e2   : > { %v4612_v10 = vpop.permute.xlu0 %4611  ;;  %v4927_v56 = vsel %vm334_vm3, %v4755_v62, %v4866_v26  ;;  %v5806_v1 = vmax.f32 %v5739_v39, 0.0 }
 0x4e3   : > { %v4675_v41 = vsel %vm334_vm3, %v4500_v8, %v4612_v10  ;;  %5698 = vmatmul.bf16.gmra.mxu1 %v4927_v56  ;;  %6715 = vrot.lane.b32.xlu0 %v10525_v22, %s8816_s23  ;;  %v6252_v53 = vld [vmem:[#allocation4 + $0x8f] sm:$0xff]  ;;  %v4756_v56 = vpack.c.b16 %v4740_v36, %v4739_v25 }
 0x4e4   : > { %5614 = vmatmul.bf16.gmra.mxu0 %v4675_v41  ;;  %6827 = vrot.lane.b32.xlu1 %v7241_v20, %s8818_s18  ;;  %v6316_v19 = vld [vmem:[#allocation4 + $0x90] sm:$0xff]  ;;  %5838 = vst.msk [vmem:[#allocation4 + $0xa8] sm:$0xff] %vm419_vm4, %v5806_v1  ;;  %v6284_v24 = vpack.c.bf16 %v6252_v53, %v6252_v53  ;;  %v5477_v20 = vadd.f32 %v10480_v63, %v5388_v33  ;;  %v10612_v41 = vpop.f32.mrf.mxu3 }
 0x4e5   : > { %v6188_v0 = vld [vmem:[#allocation4 + $0x89] sm:$0xff]  ;;  %6605 = vrot.lane.b32.xlu2 %v7353_v48, %s8817_s11  ;;  %v6348_v61 = vpack.c.bf16 %v6316_v19, %v6316_v19  ;;  %v6189_v5 = vld [vmem:[#allocation4 + $0x91] sm:$0xff]  ;;  %v5479_v1 = vadd.f32 %v10512_v37, %v5390_v59 }
 0x4e6   : > { %v6220_v51 = vpack.c.bf16 %v6188_v0, %v6188_v0  ;;  %v6221_v45 = vpack.c.bf16 %v6189_v5, %v6189_v5  ;;  %v7213_v28 = vunpack.c.l.b16 %v6284_v24  ;;  %v5566_v63 = vadd.f32 %v10499_v6, %v5477_v20  ;;  %v10624_v30 = vpop.f32.mrf.mxu0 }
 0x4e7   : > { %v7325_v47 = vunpack.c.l.b16 %v6348_v61  ;;  %v5740_v48 = vpop.f32.mrf.mxu2  ;;  %v3905_v24 = vpack.c.bf16 %v3873_v2, %v3873_v2  ;;  %v3906_v61 = vpack.c.bf16 %v3874_v15, %v3874_v15  ;;  %v5568_v5 = vadd.f32 %v10523_v55, %v5479_v1 }
 0x4e8   : > { %v7102_v8 = vunpack.c.l.b16 %v6220_v51  ;;  %v7103_v62 = vunpack.c.l.b16 %v6221_v45  ;;  %v5741_v39 = vadd.f32 %v5740_v48, %v5652_v46  ;;  %v7242_v26 = vpack.c.b16 %v7213_v28, %v7212_v44 }
 0x4e9   : > { %v7354_v10 = vpack.c.b16 %v7325_v47, %v7324_v38  ;;  %v10608_v50 = vpop.f32.mrf.mxu1  ;;  %v4868_v6 = vpop.permute.xlu1 %4867  ;;  %v5655_v40 = vadd.f32 %v10482_v4, %v5566_v63  ;;  %v5393_v46 = vadd.f32 %v10348_v31, %v10145_v3  ;;  %v4993_v38 = vunpack.c.l.b16 %v3905_v24 }
 0x4ea   : > { %v10605_v17 = vpack.c.b16 %v7103_v62, %v7102_v8  ;;  %v5807_v42 = vmax.f32 %v5741_v39, 0.0  ;;  %v4931_v53 = vsel %vm334_vm3, %v4756_v56, %v4868_v6  ;;  %v4994_v47 = vunpack.c.l.b16 %v3906_v61 }
 0x4eb   : > { %7260 = vrot.lane.b32.xlu0 %v7242_v26, %s8816_s23  ;;  %v6317_v19 = vld [vmem:[#allocation4 + $0xa8] sm:$0xff]  ;;  %v5657_v3 = vadd.f32 %v10504_v23, %v5568_v5  ;;  %v5482_v48 = vadd.f32 %v10540_v34, %v5393_v46 }
 0x4ec   : > { %7372 = vrot.lane.b32.xlu1 %v7354_v10, %s8818_s18  ;;  %5839 = vst.msk [vmem:[#allocation4 + $0xb0] sm:$0xff] %vm419_vm4, %v5807_v42  ;;  %8573 = vmatmul.msk.bf16.gmra.mxu2 %vm334_vm3, %v10544_v43  ;;  %v6253_v0 = vld [vmem:[#allocation4 + $0xa7] sm:$0xff]  ;;  %v6349_v29 = vpack.c.bf16 %v6317_v19, %v6317_v19  ;;  %v10638_v8 = vpop.f32.mrf.mxu3 }
 0x4ed   : > { %7150 = vrot.lane.b32.xlu2 %v10605_v17, %s8817_s11  ;;  %v6285_v37 = vpack.c.bf16 %v6253_v0, %v6253_v0  ;;  %v5571_v23 = vadd.f32 %v10546_v54, %v5482_v48  ;;  %v8758_v54 = vld [vmem:[%s11339_s7] sm:$0xff]  ;;  %v3876_v0 = vld [vmem:[#allocation3 + $0x231] sm:$0xff] }
 0x4ee   : > { %v7326_v36 = vunpack.c.l.b16 %v6349_v29  ;;  %v10643_v15 = vpop.f32.mrf.mxu0  ;;  %7811 = vmatpush.bf16.msrb.mxu3 %v8758_v54  ;;  %v3908_v46 = vpack.c.bf16 %v3876_v0, %v3876_v0 }
 0x4ef   : > { %v5743_v33 = vpop.f32.mrf.mxu2 }
 0x4f0   : > { %v5744_v16 = vadd.f32 %v5743_v33, %v5655_v40  ;;  %v5011_v40 = vpack.c.b16 %v4994_v47, %v4993_v38  ;;  %v5395_v33 = vadd.f32 %v10348_v31, %v10149_v27  ;;  %v3875_v27 = vld [vmem:[#allocation3 + $0x229] sm:$0xff]  ;;  %v4996_v48 = vunpack.c.l.b16 %v3908_v46 }
 0x4f1   : > { %v10629_v4 = vpop.f32.mrf.mxu1 }
 0x4f2   : > { %v5808_v43 = vmax.f32 %v5744_v16, 0.0  ;;  %v5660_v16 = vadd.f32 %v10528_v12, %v5571_v23  ;;  %v5398_v12 = vadd.f32 %v10348_v31, %v10153_v49  ;;  %v8766_v49 = vld [vmem:[%s11339_s7 + $0x40] sm:$0xff] }
 0x4f3   : > { %5703 = vmatmul.bf16.gmra.mxu1 %v4931_v53  ;;  %6717 = vrot.lane.b32.xlu0 %v10563_v58, %s8816_s23  ;;  %v6318_v20 = vld [vmem:[#allocation4 + $0xb0] sm:$0xff]  ;;  %v5484_v53 = vadd.f32 %v10561_v11, %v5395_v33 }
 0x4f4   : > { %6829 = vrot.lane.b32.xlu1 %v7242_v26, %s8818_s18  ;;  %v6254_v51 = vld [vmem:[#allocation4 + $0xaf] sm:$0xff]  ;;  %5840 = vst.msk [vmem:[#allocation4 + $0xc8] sm:$0xff] %vm419_vm4, %v5808_v43  ;;  %v6350_v55 = vpack.c.bf16 %v6318_v20, %v6318_v20  ;;  %v7214_v26 = vunpack.c.l.b16 %v6285_v37  ;;  %v10660_v24 = vpop.f32.mrf.mxu3  ;;  %v3907_v37 = vpack.c.bf16 %v3875_v27, %v3875_v27  ;;  %7900 = vmatpush.bf16.msrb.mxu0 %v8766_v49  ;;  %v10691_v27 = vld [vmem:[%s11338_s6] ss:$0 sm:$0xff] }
 0x4f5   : > { %v6190_v45 = vld [vmem:[#allocation4 + $0xa9] sm:$0xff]  ;;  %6607 = vrot.lane.b32.xlu2 %v7354_v10, %s8817_s11  ;;  %v6286_v44 = vpack.c.bf16 %v6254_v51, %v6254_v51  ;;  %v6191_v28 = vld [vmem:[#allocation4 + $0xb1] sm:$0xff]  ;;  %v5573_v20 = vadd.f32 %v10574_v18, %v5484_v53  ;;  %v10686_v53 = vpop.permute.xlu2 %6599  ;;  %v5400_v0 = vadd.f32 %v10691_v27, %v10157_v7 }
 0x4f6   : > { %v6222_v62 = vpack.c.bf16 %v6190_v45, %v6190_v45  ;;  %v6223_v25 = vpack.c.bf16 %v6191_v28, %v6191_v28  ;;  %v7327_v39 = vunpack.c.l.b16 %v6350_v55  ;;  %v10670_v38 = vpop.f32.mrf.mxu0 }
 0x4f7   : > { %v7215_v63 = vunpack.c.l.b16 %v6286_v44  ;;  %v5745_v42 = vpop.f32.mrf.mxu2  ;;  %v5662_v31 = vadd.f32 %v10548_v14, %v5573_v20 }
 0x4f8   : > { %v7104_v59 = vunpack.c.l.b16 %v6222_v62  ;;  %v7105_v10 = vunpack.c.l.b16 %v6223_v25  ;;  %v5746_v56 = vadd.f32 %v5745_v42, %v5657_v3  ;;  %v7355_v6 = vpack.c.b16 %v7327_v39, %v7326_v36 }
 0x4f9   : > { %v7243_v1 = vpack.c.b16 %v7215_v63, %v7214_v26  ;;  %v10657_v19 = vpop.f32.mrf.mxu1  ;;  %v4995_v3 = vunpack.c.l.b16 %v3907_v37  ;;  %v5487_v62 = vadd.f32 %v10585_v57, %v5398_v12 }
 0x4fa   : > { %v10640_v2 = vpack.c.b16 %v7105_v10, %v7104_v59  ;;  %v5809_v34 = vmax.f32 %v5746_v56, 0.0 }
 0x4fb   : > { %7262 = vrot.lane.b32.xlu0 %v7243_v1, %s8816_s23  ;;  %v6319_v5 = vld [vmem:[#allocation4 + $0xc8] sm:$0xff]  ;;  %v5576_v57 = vadd.f32 %v10603_v60, %v5487_v62  ;;  %v5489_v60 = vadd.f32 %v10612_v41, %v5400_v0  ;;  %v5403_v41 = vadd.f32 %v10691_v27, %v10164_v52 }
 0x4fc   : > { %7374 = vrot.lane.b32.xlu1 %v7355_v6, %s8818_s18  ;;  %5841 = vst.msk [vmem:[#allocation4 + $0xd0] sm:$0xff] %vm419_vm4, %v5809_v34  ;;  %8574 = vmatmul.msk.bf16.gmra.mxu2 %vm334_vm3, %v5011_v40  ;;  %v6255_v43 = vld [vmem:[#allocation4 + $0xc7] sm:$0xff]  ;;  %v6351_v11 = vpack.c.bf16 %v6319_v5, %v6319_v5  ;;  %v5012_v40 = vpack.c.b16 %v4996_v48, %v4995_v3  ;;  %v10681_v33 = vpop.f32.mrf.mxu3 }
 0x4fd   : > { %7152 = vrot.lane.b32.xlu2 %v10640_v2, %s8817_s11  ;;  %v6287_v45 = vpack.c.bf16 %v6255_v43, %v6255_v43  ;;  %v5578_v37 = vadd.f32 %v10624_v30, %v5489_v60 }
 0x4fe   : > { %v7328_v39 = vunpack.c.l.b16 %v6351_v11 }
 0x4ff   : > { %v5748_v61 = vpop.f32.mrf.mxu2  ;;  %v7216_v63 = vunpack.c.l.b16 %v6287_v45  ;;  %v5667_v52 = vadd.f32 %v10589_v13, %v5578_v37 }
 0x500   : > { %v5749_v29 = vadd.f32 %v5748_v61, %v5660_v16  ;;  %v5665_v16 = vadd.f32 %v10566_v9, %v5576_v57  ;;  %v10703_v61 = vpop.f32.mrf.mxu0 }
 0x501   : > { %v10679_v59 = vpop.f32.mrf.mxu1 }
 0x502   : > { %v5810_v51 = vmax.f32 %v5749_v29, 0.0 }
 0x503   : > { %8648 = vmatmul.msk.bf16.vlgmr.msrb.gmra.mxu1 %vm419_vm4, %v10525_v22  ;;  %6719 = vrot.lane.b32.xlu0 %v10605_v17, %s8816_s23  ;;  %v6320_v55 = vld [vmem:[#allocation4 + $0xd0] sm:$0xff] }
 0x504   : > { %6831 = vrot.lane.b32.xlu1 %v7243_v1, %s8818_s18  ;;  %v6256_v44 = vld [vmem:[#allocation4 + $0xcf] sm:$0xff]  ;;  %5842 = vst.msk [vmem:[#allocation4 + $0xe8] sm:$0xff] %vm419_vm4, %v5810_v51  ;;  %v6352_v22 = vpack.c.bf16 %v6320_v55, %v6320_v55  ;;  %v10712_v9 = vpop.f32.mrf.mxu3 }
 0x505   : > { %v6192_v28 = vld [vmem:[#allocation4 + $0xc9] sm:$0xff]  ;;  %6609 = vrot.lane.b32.xlu2 %v7355_v6, %s8817_s11  ;;  %v6288_v18 = vpack.c.bf16 %v6256_v44, %v6256_v44  ;;  %v6193_v47 = vld [vmem:[#allocation4 + $0xd1] sm:$0xff] }
 0x506   : > { %v6224_v25 = vpack.c.bf16 %v6192_v28, %v6192_v28  ;;  %v6225_v36 = vpack.c.bf16 %v6193_v47, %v6193_v47  ;;  %v7329_v26 = vunpack.c.l.b16 %v6352_v22  ;;  %v5492_v22 = vadd.f32 %v10638_v8, %v5403_v41 }
 0x507   : > { %v7217_v42 = vunpack.c.l.b16 %v6288_v18  ;;  %v5750_v10 = vpop.f32.mrf.mxu2 }
 0x508   : > { %v7106_v56 = vunpack.c.l.b16 %v6224_v25  ;;  %v7107_v6 = vunpack.c.l.b16 %v6225_v36  ;;  %v5751_v1 = vadd.f32 %v5750_v10, %v5662_v31  ;;  %v7356_v23 = vpack.c.b16 %v7329_v26, %v7328_v39  ;;  %v10723_v39 = vpop.f32.mrf.mxu0  ;;  %v5862_v10 = vld [vmem:[#allocation4 + $0x7] sm:$0xff] }
 0x509   : > { %v7244_v34 = vpack.c.b16 %v7217_v42, %v7216_v63  ;;  %v10706_v46 = vpop.f32.mrf.mxu1  ;;  %v5581_v13 = vadd.f32 %v10643_v15, %v5492_v22 }
 0x50a   : > { %v10683_v14 = vpack.c.b16 %v7107_v6, %v7106_v56  ;;  %v5811_v54 = vmax.f32 %v5751_v1, 0.0  ;;  %v5863_v56 = vld [vmem:[#allocation4 + $0xf] sm:$0xff]  ;;  %v5405_v1 = vadd.f32 %v10691_v27, %v10174_v32 }
 0x50b   : > { %7264 = vrot.lane.b32.xlu0 %v7244_v34, %s8816_s23  ;;  %v6321_v43 = vld [vmem:[#allocation4 + $0xe8] sm:$0xff]  ;;  %v5670_v32 = vadd.f32 %v10608_v50, %v5581_v13  ;;  %v11374_v13 = vld [vmem:[#allocation5_spill] sm:$0xff] }
 0x50c   : > { %7376 = vrot.lane.b32.xlu1 %v7356_v23, %s8818_s18  ;;  %5843 = vst.msk [vmem:[#allocation4 + $0xf0] sm:$0xff] %vm419_vm4, %v5811_v54  ;;  %8575 = vmatmul.msk.bf16.gmra.mxu2 %vm334_vm3, %v5012_v40  ;;  %v6257_v7 = vld [vmem:[#allocation4 + $0xe7] sm:$0xff]  ;;  %v6353_v51 = vpack.c.bf16 %v6321_v43, %v6321_v43  ;;  %v5895_v40 = vpack.c.bf16 %v5863_v56, %v5863_v56  ;;  %v10740_v54 = vpop.f32.mrf.mxu3 }
 0x50d   : > { %7154 = vrot.lane.b32.xlu2 %v10683_v14, %s8817_s11  ;;  %v6289_v11 = vpack.c.bf16 %v6257_v7, %v6257_v7  ;;  %v5494_v15 = vadd.f32 %v10660_v24, %v5405_v1 }
 0x50e   : > { %v7330_v3 = vunpack.c.l.b16 %v6353_v51  ;;  %v6472_v43 = vunpack.c.l.b16 %v5895_v40 }
 0x50f   : > { %v5753_v5 = vpop.f32.mrf.mxu2  ;;  %v7218_v49 = vunpack.c.l.b16 %v6289_v11  ;;  %v5408_v11 = vadd.f32 %v10691_v27, %v10178_v21 }
 0x510   : > { %v5754_v29 = vadd.f32 %v5753_v5, %v5665_v16  ;;  %v10744_v37 = vpop.f32.mrf.mxu0 }
 0x511   : > { %v5497_v21 = vadd.f32 %v10681_v33, %v5408_v11 }
 0x512   : > { %v5812_v20 = vmax.f32 %v5754_v29, 0.0  ;;  %v5583_v29 = vadd.f32 %v10670_v38, %v5494_v15 }
 0x513   : > { %8649 = vmatmul.msk.bf16.gmra.mxu1 %vm419_vm4, %v10563_v58  ;;  %6721 = vrot.lane.b32.xlu0 %v10640_v2, %s8816_s23  ;;  %v6322_v45 = vld [vmem:[#allocation4 + $0xf0] sm:$0xff] }
 0x514   : > { %6833 = vrot.lane.b32.xlu1 %v7244_v34, %s8818_s18  ;;  %v6258_v30 = vld [vmem:[#allocation4 + $0xef] sm:$0xff]  ;;  %5844 = vst.msk [vmem:[#allocation4 + $0x108] sm:$0xff] %vm419_vm4, %v5812_v20  ;;  %v10719_v58 = vpop.permute.xlu2 %7144  ;;  %v6354_v55 = vpack.c.bf16 %v6322_v45, %v6322_v45  ;;  %v5894_v34 = vpack.c.bf16 %v5862_v10, %v5862_v10  ;;  %v5586_v10 = vadd.f32 %v10703_v61, %v5497_v21 }
 0x515   : > { %v6194_v12 = vld [vmem:[#allocation4 + $0xe9] sm:$0xff]  ;;  %6611 = vrot.lane.b32.xlu2 %v7356_v23, %s8817_s11  ;;  %v6290_v44 = vpack.c.bf16 %v6258_v30, %v6258_v30  ;;  %v6195_v28 = vld [vmem:[#allocation4 + $0xf1] sm:$0xff]  ;;  %v10730_v23 = vpop.f32.mrf.mxu1 }
 0x516   : > { %v6226_v18 = vpack.c.bf16 %v6194_v12, %v6194_v12  ;;  %v6227_v47 = vpack.c.bf16 %v6195_v28, %v6195_v28  ;;  %v7331_v48 = vunpack.c.l.b16 %v6354_v55  ;;  %v6471_v5 = vunpack.c.l.b16 %v5894_v34 }
 0x517   : > { %v7219_v31 = vunpack.c.l.b16 %v6290_v44  ;;  %v5755_v62 = vpop.f32.mrf.mxu2  ;;  %v5672_v55 = vadd.f32 %v10629_v4, %v5583_v29  ;;  %v5675_v15 = vadd.f32 %v10657_v19, %v5586_v10  ;;  %v11375_v19 = vld [vmem:[#allocation6_spill] sm:$0xff] }
 0x518   : > { %v7108_v25 = vunpack.c.l.b16 %v6226_v18  ;;  %v7109_v36 = vunpack.c.l.b16 %v6227_v47  ;;  %v5756_v26 = vadd.f32 %v5755_v62, %v5667_v52  ;;  %v7357_v63 = vpack.c.b16 %v7331_v48, %v7330_v3 }
 0x519   : > { %v7245_v42 = vpack.c.b16 %v7219_v31, %v7218_v49  ;;  %v6503_v38 = vpack.c.b16 %v6472_v43, %v6471_v5  ;;  %v10761_v49 = vpop.f32.mrf.mxu3 }
 0x51a   : > { %v10725_v6 = vpack.c.b16 %v7109_v36, %v7108_v25  ;;  %v5813_v8 = vmax.f32 %v5756_v26, 0.0 }
 0x51b   : > { %7266 = vrot.lane.b32.xlu0 %v7245_v42, %s8816_s23  ;;  %v6323_v60 = vld [vmem:[#allocation4 + $0x108] sm:$0xff]  ;;  %v6857_v4 = vsel %vm419_vm4, %v6503_v38, %v10686_v53  ;;  %v10773_v53 = vpop.f32.mrf.mxu0 }
 0x51c   : > { %7378 = vrot.lane.b32.xlu1 %v7357_v63, %s8818_s18  ;;  %5845 = vst.msk [vmem:[#allocation4 + $0x110] sm:$0xff] %vm419_vm4, %v5813_v8  ;;  %v10737_v57 = vpop.permute.xlu2 %6601  ;;  %v6259_v16 = vld [vmem:[#allocation4 + $0x107] sm:$0xff]  ;;  %v6355_v51 = vpack.c.bf16 %v6323_v60, %v6323_v60  ;;  %v5410_v8 = vadd.f32 %v10691_v27, %v11374_v13 }
 0x51d   : > { %7156 = vrot.lane.b32.xlu2 %v10725_v6, %s8817_s11  ;;  %v6291_v24 = vpack.c.bf16 %v6259_v16, %v6259_v16  ;;  %v10757_v44 = vpop.f32.mrf.mxu1 }
 0x51e   : > { %v7332_v18 = vunpack.c.l.b16 %v6355_v51  ;;  %v5499_v61 = vadd.f32 %v10712_v9, %v5410_v8 }
 0x51f   : > { %v5758_v0 = vpop.f32.mrf.mxu2  ;;  %v7220_v3 = vunpack.c.l.b16 %v6291_v24  ;;  %v5413_v24 = vadd.f32 %v10691_v27, %v11375_v19  ;;  %v6120_v19 = vld [vmem:[#allocation4 + $0x48] sm:$0xff] }
 0x520   : > { %v5759_v7 = vadd.f32 %v5758_v0, %v5670_v32 }
 0x521   : > { %v10786_v29 = vpop.f32.mrf.mxu3 }
 0x522   : > { %v5814_v20 = vmax.f32 %v5759_v7, 0.0  ;;  %v5588_v7 = vadd.f32 %v10723_v39, %v5499_v61  ;;  %v7402_v61 = vsel %vm419_vm4, %v10501_v35, %v10719_v58 }
 0x523   : > { %8650 = vmatmul.msk.bf16.gmra.mxu1 %vm419_vm4, %v10605_v17  ;;  %6723 = vrot.lane.b32.xlu0 %v10683_v14, %s8816_s23  ;;  %v6324_v50 = vld [vmem:[#allocation4 + $0x110] sm:$0xff]  ;;  %v10801_v21 = vpop.f32.mrf.mxu0 }
 0x524   : > { %6835 = vrot.lane.b32.xlu1 %v7245_v42, %s8818_s18  ;;  %v6260_v41 = vld [vmem:[#allocation4 + $0x10f] sm:$0xff]  ;;  %5846 = vst.msk [vmem:[#allocation4 + $0x128] sm:$0xff] %vm419_vm4, %v5814_v20  ;;  %v6356_v30 = vpack.c.bf16 %v6324_v50, %v6324_v50  ;;  %v5677_v38 = vadd.f32 %v10679_v59, %v5588_v7 }
 0x525   : > { %v6196_v45 = vld [vmem:[#allocation4 + $0x109] sm:$0xff]  ;;  %6613 = vrot.lane.b32.xlu2 %v7357_v63, %s8817_s11  ;;  %v6292_v17 = vpack.c.bf16 %v6260_v41, %v6260_v41  ;;  %v6197_v12 = vld [vmem:[#allocation4 + $0x111] sm:$0xff]  ;;  %v6712_v63 = vpop.permute.xlu0 %6711  ;;  %v10783_v0 = vpop.f32.mrf.mxu1 }
 0x526   : > { %v10759_v28 = vpop.permute.xlu2 %7146  ;;  %v6228_v52 = vpack.c.bf16 %v6196_v45, %v6196_v45  ;;  %v6229_v22 = vpack.c.bf16 %v6197_v12, %v6197_v12  ;;  %v7333_v47 = vunpack.c.l.b16 %v6356_v30  ;;  %v6904_v1 = vsel %vm334_vm3, %v6857_v4, %v6712_v63  ;;  %v11376_v59 = vld [vmem:[#allocation7_spill] sm:$0xff] }
 0x527   : > { %v7221_v48 = vunpack.c.l.b16 %v6292_v17  ;;  %v5760_v31 = vpop.f32.mrf.mxu2  ;;  %v5502_v30 = vadd.f32 %v10740_v54, %v5413_v24  ;;  %v5415_v54 = vadd.f32 %v10691_v27, %v11376_v59 }
 0x528   : > { %v7110_v62 = vunpack.c.l.b16 %v6228_v52  ;;  %v7111_v25 = vunpack.c.l.b16 %v6229_v22  ;;  %v5761_v36 = vadd.f32 %v5760_v31, %v5672_v55  ;;  %v7358_v33 = vpack.c.b16 %v7333_v47, %v7332_v18 }
 0x529   : > { %v7246_v26 = vpack.c.b16 %v7221_v48, %v7220_v3  ;;  %v5865_v3 = vld [vmem:[#allocation4 + $0x2f] sm:$0xff]  ;;  %v5591_v10 = vadd.f32 %v10744_v37, %v5502_v30  ;;  %v5504_v8 = vadd.f32 %v10761_v49, %v5415_v54  ;;  %v6152_v30 = vpack.c.bf16 %v6120_v19, %v6120_v19 }
 0x52a   : > { %v10765_v42 = vpack.c.b16 %v7111_v25, %v7110_v62  ;;  %v5815_v56 = vmax.f32 %v5761_v36, 0.0 }
 0x52b   : > { %7268 = vrot.lane.b32.xlu0 %v7246_v26, %s8816_s23  ;;  %v6325_v16 = vld [vmem:[#allocation4 + $0x128] sm:$0xff]  ;;  %v5593_v35 = vadd.f32 %v10773_v53, %v5504_v8 }
 0x52c   : > { %7380 = vrot.lane.b32.xlu1 %v7358_v33, %s8818_s18  ;;  %5847 = vst.msk [vmem:[#allocation4 + $0x130] sm:$0xff] %vm419_vm4, %v5815_v56  ;;  %v6261_v5 = vld [vmem:[#allocation4 + $0x127] sm:$0xff]  ;;  %v6357_v9 = vpack.c.bf16 %v6325_v16, %v6325_v16  ;;  %v5897_v56 = vpack.c.bf16 %v5865_v3, %v5865_v3 }
 0x52d   : > { %7158 = vrot.lane.b32.xlu2 %v10765_v42, %s8817_s11  ;;  %v6824_v34 = vpop.permute.xlu1 %6823  ;;  %v6293_v51 = vpack.c.bf16 %v6261_v5, %v6261_v5  ;;  %v5682_v53 = vadd.f32 %v10730_v23, %v5593_v35 }
 0x52e   : > { %v10779_v40 = vpop.permute.xlu2 %6603  ;;  %v6937_v32 = vsel %vm6935_vm5, %v6904_v1, %v6824_v34  ;;  %v7334_v52 = vunpack.c.l.b16 %v6357_v9  ;;  %v10811_v1 = vpop.f32.mrf.mxu3  ;;  %v6474_v16 = vunpack.c.l.b16 %v5897_v56 }
 0x52f   : > { %7812 = vmatmul.bf16.vlgmr.msrb.gmra.mxu3 %v6937_v32  ;;  %v5763_v60 = vpop.f32.mrf.mxu2  ;;  %v7222_v18 = vunpack.c.l.b16 %v6293_v51  ;;  %v6121_v32 = vld [vmem:[#allocation4 + $0x50] sm:$0xff]  ;;  %v10827_v9 = vpop.f32.mrf.mxu0 }
 0x530   : > { %v5764_v43 = vadd.f32 %v5763_v60, %v5675_v15  ;;  %v5680_v60 = vadd.f32 %v10706_v46, %v5591_v10  ;;  %v6153_v24 = vpack.c.bf16 %v6121_v32, %v6121_v32 }
 0x532   : > { %v5816_v20 = vmax.f32 %v5764_v43, 0.0 }
 0x533   : > { %8651 = vmatmul.msk.bf16.gmra.mxu1 %vm419_vm4, %v10640_v2  ;;  %6725 = vrot.lane.b32.xlu0 %v10725_v6, %s8816_s23  ;;  %v6326_v11 = vld [vmem:[#allocation4 + $0x130] sm:$0xff] }
 0x534   : > { %6837 = vrot.lane.b32.xlu1 %v7246_v26, %s8818_s18  ;;  %v6262_v50 = vld [vmem:[#allocation4 + $0x12f] sm:$0xff]  ;;  %5848 = vst.msk [vmem:[#allocation4 + $0x148] sm:$0xff] %vm419_vm4, %v5816_v20  ;;  %v6358_v39 = vpack.c.bf16 %v6326_v11, %v6326_v11  ;;  %v10805_v26 = vpop.f32.mrf.mxu1 }
 0x535   : > { %v6198_v41 = vld [vmem:[#allocation4 + $0x129] sm:$0xff]  ;;  %6615 = vrot.lane.b32.xlu2 %v7358_v33, %s8817_s11  ;;  %v6294_v45 = vpack.c.bf16 %v6262_v50, %v6262_v50  ;;  %v6199_v2 = vld [vmem:[#allocation4 + $0x131] sm:$0xff] }
 0x536   : > { %v10799_v17 = vpop.permute.xlu2 %7148  ;;  %v6230_v12 = vpack.c.bf16 %v6198_v41, %v6198_v41  ;;  %v6231_v55 = vpack.c.bf16 %v6199_v2, %v6199_v2  ;;  %v7335_v22 = vunpack.c.l.b16 %v6358_v39  ;;  %v5864_v33 = vld [vmem:[#allocation4 + $0x27] sm:$0xff]  ;;  %v11377_v50 = vld [vmem:[#allocation8_spill] sm:$0xff]  ;;  %v10845_v59 = vpop.f32.mrf.mxu3 }
 0x537   : > { %v7223_v47 = vunpack.c.l.b16 %v6294_v45  ;;  %v5765_v48 = vpop.f32.mrf.mxu2  ;;  %v5896_v34 = vpack.c.bf16 %v5864_v33, %v5864_v33  ;;  %v5418_v46 = vadd.f32 %v10691_v27, %v11377_v50  ;;  %v10855_v35 = vpop.f32.mrf.mxu0 }
 0x538   : > { %v7112_v31 = vunpack.c.l.b16 %v6230_v12  ;;  %v7113_v62 = vunpack.c.l.b16 %v6231_v55  ;;  %v5766_v25 = vadd.f32 %v5765_v48, %v5677_v38  ;;  %v7359_v4 = vpack.c.b16 %v7335_v22, %v7334_v52 }
 0x539   : > { %v7247_v36 = vpack.c.b16 %v7223_v47, %v7222_v18  ;;  %v6473_v51 = vunpack.c.l.b16 %v5896_v34  ;;  %v5507_v38 = vadd.f32 %v10786_v29, %v5418_v46  ;;  %v7018_v34 = vunpack.c.l.b16 %v6152_v30 }
 0x53a   : > { %v10807_v63 = vpack.c.b16 %v7113_v62, %v7112_v31  ;;  %v5817_v13 = vmax.f32 %v5766_v25, 0.0 }
 0x53b   : > { %7270 = vrot.lane.b32.xlu0 %v7247_v36, %s8816_s23  ;;  %v6327_v7 = vld [vmem:[#allocation4 + $0x148] sm:$0xff]  ;;  %v6504_v39 = vpack.c.b16 %v6474_v16, %v6473_v51 }
 0x53c   : > { %7382 = vrot.lane.b32.xlu1 %v7359_v4, %s8818_s18  ;;  %5849 = vst.msk [vmem:[#allocation4 + $0x150] sm:$0xff] %vm419_vm4, %v5817_v13  ;;  %v7257_v37 = vpop.permute.xlu0 %7256  ;;  %v6263_v20 = vld [vmem:[#allocation4 + $0x147] sm:$0xff]  ;;  %v6359_v41 = vpack.c.bf16 %v6327_v7, %v6327_v7  ;;  %v10835_v12 = vpop.f32.mrf.mxu1  ;;  %v5596_v7 = vadd.f32 %v10801_v21, %v5507_v38 }
 0x53d   : > { %7160 = vrot.lane.b32.xlu2 %v10807_v63, %s8817_s11  ;;  %v7369_v15 = vpop.permute.xlu1 %7368  ;;  %v7449_v49 = vsel %vm334_vm3, %v7402_v61, %v7257_v37  ;;  %v6295_v2 = vpack.c.bf16 %v6263_v20, %v6263_v20  ;;  %v6860_v18 = vsel %vm419_vm4, %v6504_v39, %v10737_v57  ;;  %v5866_v16 = vld [vmem:[#allocation4 + $0x47] sm:$0xff] }
 0x53e   : > { %v7481_v5 = vsel %vm6935_vm5, %v7449_v49, %v7369_v15  ;;  %v7336_v62 = vunpack.c.l.b16 %v6359_v41  ;;  %v11378_v49 = vld [vmem:[#allocation9_spill] sm:$0xff]  ;;  %v5685_v41 = vadd.f32 %v10757_v44, %v5596_v7 }
 0x53f   : > { %v10824_v43 = vpop.permute.xlu2 %6605  ;;  %v5768_v58 = vpop.f32.mrf.mxu2  ;;  %7901 = vmatmul.bf16.vlgmr.msrb.gmra.mxu0 %v7481_v5  ;;  %v7224_v10 = vunpack.c.l.b16 %v6295_v2 }
 0x540   : > { %v5769_v11 = vadd.f32 %v5768_v58, %v5680_v60  ;;  %v5420_v60 = vadd.f32 %v10691_v27, %v11378_v49 }
 0x542   : > { %v5818_v45 = vmax.f32 %v5769_v11, 0.0  ;;  %v5509_v19 = vadd.f32 %v10811_v1, %v5420_v60  ;;  %v5898_v11 = vpack.c.bf16 %v5866_v16, %v5866_v16 }
 0x543   : > { %8652 = vmatmul.msk.bf16.gmra.mxu1 %vm419_vm4, %v10683_v14  ;;  %6727 = vrot.lane.b32.xlu0 %v10765_v42, %s8816_s23  ;;  %v6328_v55 = vld [vmem:[#allocation4 + $0x150] sm:$0xff]  ;;  %v7019_v14 = vunpack.c.l.b16 %v6153_v24 }
 0x544   : > { %6839 = vrot.lane.b32.xlu1 %v7247_v36, %s8818_s18  ;;  %v6264_v52 = vld [vmem:[#allocation4 + $0x14f] sm:$0xff]  ;;  %5850 = vst.msk [vmem:[#allocation4 + $0x168] sm:$0xff] %vm419_vm4, %v5818_v45  ;;  %v6714_v29 = vpop.permute.xlu0 %6713  ;;  %v6360_v47 = vpack.c.bf16 %v6328_v55, %v6328_v55  ;;  %v10867_v39 = vpop.f32.mrf.mxu1  ;;  %v5598_v38 = vadd.f32 %v10827_v9, %v5509_v19  ;;  %v6475_v55 = vunpack.c.l.b16 %v5898_v11 }
 0x545   : > { %v6200_v22 = vld [vmem:[#allocation4 + $0x149] sm:$0xff]  ;;  %6617 = vrot.lane.b32.xlu2 %v7359_v4, %s8817_s11  ;;  %v6826_v23 = vpop.permute.xlu1 %6825  ;;  %v6296_v3 = vpack.c.bf16 %v6264_v52, %v6264_v52  ;;  %v6201_v48 = vld [vmem:[#allocation4 + $0x151] sm:$0xff]  ;;  %v6906_v31 = vsel %vm334_vm3, %v6860_v18, %v6714_v29  ;;  %v7049_v58 = vpack.c.b16 %v7019_v14, %v7018_v34  ;;  %v10873_v52 = vpop.f32.mrf.mxu3 }
 0x546   : > { %v6232_v25 = vpack.c.bf16 %v6200_v22, %v6200_v22  ;;  %v6233_v36 = vpack.c.bf16 %v6201_v48, %v6201_v48  ;;  %v6940_v57 = vsel %vm6935_vm5, %v6906_v31, %v6826_v23  ;;  %v7337_v33 = vunpack.c.l.b16 %v6360_v47  ;;  %v5867_v4 = vld [vmem:[#allocation4 + $0x4f] sm:$0xff] }
 0x547   : > { %v10847_v54 = vpop.permute.xlu2 %7150  ;;  %v7225_v56 = vunpack.c.l.b16 %v6296_v3  ;;  %v5770_v13 = vpop.f32.mrf.mxu2  ;;  %7817 = vmatmul.bf16.gmra.mxu3 %v6940_v57  ;;  %v5899_v20 = vpack.c.bf16 %v5867_v4, %v5867_v4  ;;  %v7405_v24 = vsel %vm419_vm4, %v7049_v58, %v10759_v28  ;;  %v6123_v22 = vld [vmem:[#allocation4 + $0x70] sm:$0xff]  ;;  %v6122_v18 = vld [vmem:[#allocation4 + $0x68] sm:$0xff]  ;;  %v5687_v9 = vadd.f32 %v10783_v0, %v5598_v38 }
 0x548   : > { %v7114_v8 = vunpack.c.l.b16 %v6232_v25  ;;  %v7115_v61 = vunpack.c.l.b16 %v6233_v36  ;;  %v5771_v37 = vadd.f32 %v5770_v13, %v5682_v53  ;;  %v7360_v15 = vpack.c.b16 %v7337_v33, %v7336_v62  ;;  %v11379_v29 = vld [vmem:[#allocation10_spill] sm:$0xff]  ;;  %v10883_v33 = vpop.f32.mrf.mxu0 }
 0x549   : > { %v7248_v32 = vpack.c.b16 %v7225_v56, %v7224_v10  ;;  %v6476_v1 = vunpack.c.l.b16 %v5899_v20  ;;  %v5423_v47 = vadd.f32 %v10691_v27, %v11379_v29  ;;  %v6155_v31 = vpack.c.bf16 %v6123_v22, %v6123_v22 }
 0x54a   : > { %v10852_v5 = vpack.c.b16 %v7115_v61, %v7114_v8  ;;  %v5819_v51 = vmax.f32 %v5771_v37, 0.0  ;;  %v6154_v62 = vpack.c.bf16 %v6122_v18, %v6122_v18 }
 0x54b   : > { %7272 = vrot.lane.b32.xlu0 %v7248_v32, %s8816_s23  ;;  %v6329_v28 = vld [vmem:[#allocation4 + $0x168] sm:$0xff]  ;;  %v6505_v3 = vpack.c.b16 %v6476_v1, %v6475_v55  ;;  %v7021_v58 = vunpack.c.l.b16 %v6155_v31 }
 0x54c   : > { %7384 = vrot.lane.b32.xlu1 %v7360_v15, %s8818_s18  ;;  %5851 = vst.msk [vmem:[#allocation4 + $0x170] sm:$0xff] %vm419_vm4, %v5819_v51  ;;  %v6265_v53 = vld [vmem:[#allocation4 + $0x167] sm:$0xff]  ;;  %v6361_v44 = vpack.c.bf16 %v6329_v28, %v6329_v28 }
 0x54d   : > { %7162 = vrot.lane.b32.xlu2 %v10852_v5, %s8817_s11  ;;  %v7371_v21 = vpop.permute.xlu1 %7370  ;;  %v7259_v50 = vpop.permute.xlu0 %7258  ;;  %v6297_v23 = vpack.c.bf16 %v6265_v53, %v6265_v53  ;;  %v6863_v4 = vsel %vm419_vm4, %v6505_v3, %v10779_v40  ;;  %v5869_v40 = vld [vmem:[#allocation4 + $0x6f] sm:$0xff] }
 0x54e   : > { %v7451_v46 = vsel %vm334_vm3, %v7405_v24, %v7259_v50  ;;  %v7338_v61 = vunpack.c.l.b16 %v6361_v44  ;;  %v10894_v24 = vpop.f32.mrf.mxu1  ;;  %v10898_v1 = vpop.f32.mrf.mxu3  ;;  %v5901_v38 = vpack.c.bf16 %v5869_v40, %v5869_v40 }
 0x54f   : > { %v10869_v45 = vpop.permute.xlu2 %6607  ;;  %v7484_v2 = vsel %vm6935_vm5, %v7451_v46, %v7371_v21  ;;  %v5773_v30 = vpop.f32.mrf.mxu2  ;;  %v7226_v34 = vunpack.c.l.b16 %v6297_v23  ;;  %v7020_v46 = vunpack.c.l.b16 %v6154_v62 }
 0x550   : > { %7906 = vmatmul.bf16.gmra.mxu0 %v7484_v2  ;;  %v5774_v14 = vadd.f32 %v5773_v30, %v5685_v41  ;;  %v5868_v2 = vld [vmem:[#allocation4 + $0x67] sm:$0xff]  ;;  %v11380_v30 = vld [vmem:[#allocation11_spill] sm:$0xff]  ;;  %v5605_v31 = vpop.f32.mrf.mxu0  ;;  %v6478_v62 = vunpack.c.l.b16 %v5901_v38 }
 0x551   : > { %v7050_v53 = vpack.c.b16 %v7021_v58, %v7020_v46  ;;  %v5425_v55 = vadd.f32 %v10691_v27, %v11380_v30  ;;  %v5900_v18 = vpack.c.bf16 %v5868_v2, %v5868_v2 }
 0x552   : > { %v5820_v48 = vmax.f32 %v5774_v14, 0.0  ;;  %v6125_v14 = vld [vmem:[#allocation4 + $0x90] sm:$0xff] }
 0x553   : > { %8653 = vmatmul.msk.bf16.gmra.mxu1 %vm419_vm4, %v10725_v6  ;;  %6729 = vrot.lane.b32.xlu0 %v10807_v63, %s8816_s23  ;;  %v6330_v25 = vld [vmem:[#allocation4 + $0x170] sm:$0xff]  ;;  %v7408_v22 = vsel %vm419_vm4, %v7050_v53, %v10799_v17  ;;  %v6157_v17 = vpack.c.bf16 %v6125_v14, %v6125_v14 }
 0x554   : > { %6841 = vrot.lane.b32.xlu1 %v7248_v32, %s8818_s18  ;;  %v6266_v36 = vld [vmem:[#allocation4 + $0x16f] sm:$0xff]  ;;  %5852 = vst.msk [vmem:[#allocation4 + $0x188] sm:$0xff] %vm419_vm4, %v5820_v48  ;;  %v6362_v10 = vpack.c.bf16 %v6330_v25, %v6330_v25 }
 0x555   : > { %v6202_v57 = vld [vmem:[#allocation4 + $0x169] sm:$0xff]  ;;  %6619 = vrot.lane.b32.xlu2 %v7360_v15, %s8817_s11  ;;  %v6298_v6 = vpack.c.bf16 %v6266_v36, %v6266_v36  ;;  %v6203_v56 = vld [vmem:[#allocation4 + $0x171] sm:$0xff]  ;;  %v6716_v13 = vpop.permute.xlu0 %6715  ;;  %v5512_v15 = vadd.f32 %v10845_v59, %v5423_v47 }
 0x556   : > { %v6234_v0 = vpack.c.bf16 %v6202_v57, %v6202_v57  ;;  %v6828_v8 = vpop.permute.xlu1 %6827  ;;  %v6235_v37 = vpack.c.bf16 %v6203_v56, %v6203_v56  ;;  %v6908_v32 = vsel %vm334_vm3, %v6863_v4, %v6716_v13  ;;  %v7339_v60 = vunpack.c.l.b16 %v6362_v10  ;;  %v6124_v36 = vld [vmem:[#allocation4 + $0x88] sm:$0xff]  ;;  %v11381_v13 = vld [vmem:[#allocation12_spill] sm:$0xff] }
 0x557   : > { %v10890_v49 = vpop.permute.xlu2 %7152  ;;  %v7227_v16 = vunpack.c.l.b16 %v6298_v6  ;;  %v5775_v20 = vpop.f32.mrf.mxu2  ;;  %v6943_v51 = vsel %vm6935_vm5, %v6908_v32, %v6828_v8  ;;  %v5601_v59 = vadd.f32 %v10855_v35, %v5512_v15  ;;  %v6477_v6 = vunpack.c.l.b16 %v5900_v18 }
 0x558   : > { %v7116_v7 = vunpack.c.l.b16 %v6234_v0  ;;  %v7117_v19 = vunpack.c.l.b16 %v6235_v37  ;;  %v5776_v11 = vadd.f32 %v5775_v20, %v5687_v9  ;;  %7822 = vmatmul.bf16.gmra.mxu3 %v6943_v51  ;;  %v7361_v21 = vpack.c.b16 %v7339_v60, %v7338_v61 }
 0x559   : > { %v7249_v50 = vpack.c.b16 %v7227_v16, %v7226_v34  ;;  %v5690_v48 = vadd.f32 %v10805_v26, %v5601_v59  ;;  %v5514_v9 = vadd.f32 %v10873_v52, %v5425_v55  ;;  %v5428_v8 = vadd.f32 %v10691_v27, %v11381_v13  ;;  %v5518_v16 = vpop.f32.mrf.mxu3  ;;  %v5871_v55 = vld [vmem:[#allocation4 + $0x8f] sm:$0xff] }
 0x55a   : > { %v10896_v41 = vpack.c.b16 %v7117_v19, %v7116_v7  ;;  %v5821_v28 = vmax.f32 %v5776_v11, 0.0  ;;  %v6506_v52 = vpack.c.b16 %v6478_v62, %v6477_v6  ;;  %v6156_v61 = vpack.c.bf16 %v6124_v36, %v6124_v36  ;;  %v6127_v6 = vld [vmem:[#allocation4 + $0xb0] sm:$0xff] }
 0x55b   : > { %7274 = vrot.lane.b32.xlu0 %v7249_v50, %s8816_s23  ;;  %v6331_v47 = vld [vmem:[#allocation4 + $0x188] sm:$0xff]  ;;  %v5603_v26 = vadd.f32 %v10883_v33, %v5514_v9  ;;  %v7023_v7 = vunpack.c.l.b16 %v6157_v17  ;;  %v5517_v38 = vadd.f32 %v10898_v1, %v5428_v8  ;;  %v5903_v1 = vpack.c.bf16 %v5871_v55, %v5871_v55 }
 0x55c   : > { %7386 = vrot.lane.b32.xlu1 %v7361_v21, %s8818_s18  ;;  %5853 = vst.msk [vmem:[#allocation4 + $0x190] sm:$0xff] %vm419_vm4, %v5821_v28  ;;  %v6267_v3 = vld [vmem:[#allocation4 + $0x187] sm:$0xff]  ;;  %v6363_v0 = vpack.c.bf16 %v6331_v47, %v6331_v47  ;;  %v6866_v33 = vsel %vm419_vm4, %v6506_v52, %v10824_v43 }
 0x55d   : > { %7164 = vrot.lane.b32.xlu2 %v10896_v41, %s8817_s11  ;;  %v7261_v35 = vpop.permute.xlu0 %7260  ;;  %v6299_v4 = vpack.c.bf16 %v6267_v3, %v6267_v3  ;;  %v5692_v53 = vadd.f32 %v10835_v12, %v5603_v26  ;;  %v5607_v3 = vpop.f32.mrf.mxu0  ;;  %v5606_v12 = vadd.f32 %v5605_v31, %v5517_v38  ;;  %v6480_v52 = vunpack.c.l.b16 %v5903_v1 }
 0x55e   : > { %v7373_v44 = vpop.permute.xlu1 %7372  ;;  %v7453_v23 = vsel %vm334_vm3, %v7408_v22, %v7261_v35  ;;  %v7340_v40 = vunpack.c.l.b16 %v6363_v0 }
 0x55f   : > { %v10911_v29 = vpop.permute.xlu2 %6609  ;;  %v7487_v25 = vsel %vm6935_vm5, %v7453_v23, %v7373_v44  ;;  %v5778_v10 = vpop.f32.mrf.mxu2  ;;  %v7228_v11 = vunpack.c.l.b16 %v6299_v4  ;;  %v7022_v44 = vunpack.c.l.b16 %v6156_v61  ;;  %v5695_v8 = vadd.f32 %v10867_v39, %v5606_v12 }
 0x560   : > { %v10916_v57 = vpop.f32.mrf.mxu1  ;;  %7911 = vmatmul.bf16.gmra.mxu0 %v7487_v25  ;;  %v5779_v56 = vadd.f32 %v5778_v10, %v5690_v48  ;;  %v5870_v48 = vld [vmem:[#allocation4 + $0x87] sm:$0xff] }
 0x561   : > { %v7051_v9 = vpack.c.b16 %v7023_v7, %v7022_v44  ;;  %v11382_v25 = vld [vmem:[#allocation13_spill] sm:$0xff]  ;;  %v5902_v10 = vpack.c.bf16 %v5870_v48, %v5870_v48  ;;  %v5521_v26 = vpop.f32.mrf.mxu3 }
 0x562   : > { %v5822_v34 = vmax.f32 %v5779_v56, 0.0  ;;  %v5430_v36 = vadd.f32 %v10691_v27, %v11382_v25 }
 0x563   : > { %8654 = vmatmul.msk.bf16.gmra.mxu1 %vm419_vm4, %v10765_v42  ;;  %6731 = vrot.lane.b32.xlu0 %v10852_v5, %s8816_s23  ;;  %v6332_v37 = vld [vmem:[#allocation4 + $0x190] sm:$0xff]  ;;  %v7411_v17 = vsel %vm419_vm4, %v7051_v9, %v10847_v54  ;;  %v6479_v7 = vunpack.c.l.b16 %v5902_v10 }
 0x564   : > { %6843 = vrot.lane.b32.xlu1 %v7249_v50, %s8818_s18  ;;  %v6268_v32 = vld [vmem:[#allocation4 + $0x18f] sm:$0xff]  ;;  %v6364_v15 = vpack.c.bf16 %v6332_v37, %v6332_v37  ;;  %5854 = vst.msk [vmem:[#allocation4 + $0x1a8] sm:$0xff] %vm419_vm4, %v5822_v34  ;;  %v5519_v0 = vadd.f32 %v5518_v16, %v5430_v36  ;;  %v6159_v37 = vpack.c.bf16 %v6127_v6, %v6127_v6 }
 0x565   : > { %v6204_v60 = vld [vmem:[#allocation4 + $0x189] sm:$0xff]  ;;  %6621 = vrot.lane.b32.xlu2 %v7361_v21, %s8817_s11  ;;  %v6300_v58 = vpack.c.bf16 %v6268_v32, %v6268_v32  ;;  %v6205_v42 = vld [vmem:[#allocation4 + $0x191] sm:$0xff]  ;;  %v6718_v19 = vpop.permute.xlu0 %6717  ;;  %v6507_v39 = vpack.c.b16 %v6480_v52, %v6479_v7 }
 0x566   : > { %v6236_v20 = vpack.c.bf16 %v6204_v60, %v6204_v60  ;;  %v6830_v51 = vpop.permute.xlu1 %6829  ;;  %v6237_v50 = vpack.c.bf16 %v6205_v42, %v6205_v42  ;;  %v6910_v46 = vsel %vm334_vm3, %v6866_v33, %v6718_v19  ;;  %v7341_v28 = vunpack.c.l.b16 %v6364_v15  ;;  %v6126_v15 = vld [vmem:[#allocation4 + $0xa8] sm:$0xff] }
 0x567   : > { %v10931_v2 = vpop.permute.xlu2 %7154  ;;  %v7229_v21 = vunpack.c.l.b16 %v6300_v58  ;;  %v6946_v43 = vsel %vm6935_vm5, %v6910_v46, %v6830_v51  ;;  %v5780_v18 = vpop.f32.mrf.mxu2  ;;  %v5608_v58 = vadd.f32 %v5607_v3, %v5519_v0  ;;  %v11383_v51 = vld [vmem:[#allocation14_spill] sm:$0xff] }
 0x568   : > { %v7118_v59 = vunpack.c.l.b16 %v6236_v20  ;;  %v7119_v30 = vunpack.c.l.b16 %v6237_v50  ;;  %v10936_v22 = vpop.f32.mrf.mxu1  ;;  %7827 = vmatmul.bf16.gmra.mxu3 %v6946_v43  ;;  %v10938_v14 = vpack.c.b16 %v7341_v28, %v7340_v40  ;;  %v5781_v23 = vadd.f32 %v5780_v18, %v5692_v53  ;;  %v5610_v40 = vpop.f32.mrf.mxu0  ;;  %v5872_v0 = vld [vmem:[#allocation4 + $0xa7] sm:$0xff] }
 0x569   : > { %v7250_v35 = vpack.c.b16 %v7229_v21, %v7228_v11  ;;  %v5433_v19 = vadd.f32 %v10691_v27, %v11383_v51  ;;  %v6158_v11 = vpack.c.bf16 %v6126_v15, %v6126_v15  ;;  %v7025_v50 = vunpack.c.l.b16 %v6159_v37 }
 0x56a   : > { %v10940_v47 = vpack.c.b16 %v7119_v30, %v7118_v59  ;;  %v5823_v62 = vmax.f32 %v5781_v23, 0.0  ;;  %v6869_v21 = vsel %vm419_vm4, %v6507_v39, %v10869_v45  ;;  %v5697_v18 = vadd.f32 %v10894_v24, %v5608_v58 }
 0x56b   : > { %7276 = vrot.lane.b32.xlu0 %v7250_v35, %s8816_s23  ;;  %v6333_v34 = vld [vmem:[#allocation4 + $0x1a8] sm:$0xff]  ;;  %v7024_v1 = vunpack.c.l.b16 %v6158_v11  ;;  %v5522_v10 = vadd.f32 %v5521_v26, %v5433_v19  ;;  %v5904_v37 = vpack.c.bf16 %v5872_v0, %v5872_v0 }
 0x56c   : > { %7388 = vrot.lane.b32.xlu1 %v10938_v14, %s8818_s18  ;;  %5855 = vst.msk [vmem:[#allocation4 + $0x1b0] sm:$0xff] %vm419_vm4, %v5823_v62  ;;  %v6269_v60 = vld [vmem:[#allocation4 + $0x1a7] sm:$0xff]  ;;  %v6365_v42 = vpack.c.bf16 %v6333_v34, %v6333_v34  ;;  %v5873_v62 = vld [vmem:[#allocation4 + $0xaf] sm:$0xff] }
 0x56d   : > { %7166 = vrot.lane.b32.xlu2 %v10940_v47, %s8817_s11  ;;  %v7263_v56 = vpop.permute.xlu0 %7262  ;;  %v6301_v33 = vpack.c.bf16 %v6269_v60, %v6269_v60  ;;  %v7052_v52 = vpack.c.b16 %v7025_v50, %v7024_v1  ;;  %v6129_v60 = vld [vmem:[#allocation4 + $0xd0] sm:$0xff] }
 0x56e   : > { %v7375_v31 = vpop.permute.xlu1 %7374  ;;  %v7455_v4 = vsel %vm334_vm3, %v7411_v17, %v7263_v56  ;;  %v7342_v23 = vunpack.c.l.b16 %v6365_v42  ;;  %v5523_v56 = vpop.f32.mrf.mxu3  ;;  %v6161_v11 = vpack.c.bf16 %v6129_v60, %v6129_v60 }
 0x56f   : > { %v10953_v13 = vpop.permute.xlu2 %6611  ;;  %v7490_v61 = vsel %vm6935_vm5, %v7455_v4, %v7375_v31  ;;  %v5783_v32 = vpop.f32.mrf.mxu2  ;;  %v7230_v45 = vunpack.c.l.b16 %v6301_v33  ;;  %v7414_v26 = vsel %vm419_vm4, %v7052_v52, %v10890_v49 }
 0x570   : > { %v10957_v54 = vpop.f32.mrf.mxu1  ;;  %7916 = vmatmul.bf16.gmra.mxu0 %v7490_v61  ;;  %v5784_v16 = vadd.f32 %v5783_v32, %v5695_v8  ;;  %v5905_v61 = vpack.c.bf16 %v5873_v62, %v5873_v62  ;;  %v5611_v32 = vadd.f32 %v5610_v40, %v5522_v10  ;;  %v5612_v39 = vpop.f32.mrf.mxu0 }
 0x572   : > { %v5824_v20 = vmax.f32 %v5784_v16, 0.0  ;;  %v11384_v16 = vld [vmem:[#allocation15_spill] sm:$0xff]  ;;  %v5700_v33 = vadd.f32 %v10916_v57, %v5611_v32 }
 0x573   : > { %8655 = vmatmul.msk.bf16.gmra.mxu1 %vm419_vm4, %v10807_v63  ;;  %6733 = vrot.lane.b32.xlu0 %v10896_v41, %s8816_s23  ;;  %v6334_v46 = vld [vmem:[#allocation4 + $0x1b0] sm:$0xff]  ;;  %v5435_v58 = vadd.f32 %v10691_v27, %v11384_v16 }
 0x574   : > { %6845 = vrot.lane.b32.xlu1 %v7250_v35, %s8818_s18  ;;  %v6270_v63 = vld [vmem:[#allocation4 + $0x1af] sm:$0xff]  ;;  %5856 = vst.msk [vmem:[#allocation4 + $0x1c8] sm:$0xff] %vm419_vm4, %v5824_v20  ;;  %v6366_v38 = vpack.c.bf16 %v6334_v46, %v6334_v46  ;;  %v6482_v20 = vunpack.c.l.b16 %v5905_v61  ;;  %v8805_v61 = vld [vmem:[%s11338_s6] ss:$0 sm:$0xff] }
 0x575   : > { %6623 = vrot.lane.b32.xlu2 %v10938_v14, %s8817_s11  ;;  %v6206_v28 = vld [vmem:[#allocation4 + $0x1a9] sm:$0xff]  ;;  %v6720_v53 = vpop.permute.xlu0 %6719  ;;  %v6302_v43 = vpack.c.bf16 %v6270_v63, %v6270_v63  ;;  %v6207_v30 = vld [vmem:[#allocation4 + $0x1b1] sm:$0xff]  ;;  %v5524_v49 = vadd.f32 %v5523_v56, %v5435_v58  ;;  %v6481_v63 = vunpack.c.l.b16 %v5904_v37 }
 0x576   : > { %v6832_v59 = vpop.permute.xlu1 %6831  ;;  %v6238_v55 = vpack.c.bf16 %v6206_v28, %v6206_v28  ;;  %v6912_v35 = vsel %vm334_vm3, %v6869_v21, %v6720_v53  ;;  %v6239_v3 = vpack.c.bf16 %v6207_v30, %v6207_v30  ;;  %v7343_v12 = vunpack.c.l.b16 %v6366_v38  ;;  %v6128_v28 = vld [vmem:[#allocation4 + $0xc8] sm:$0xff]  ;;  %v5526_v38 = vpop.f32.mrf.mxu3 }
 0x577   : > { %v10973_v44 = vpop.permute.xlu2 %7156  ;;  %v6949_v48 = vsel %vm6935_vm5, %v6912_v35, %v6832_v59  ;;  %v7231_v9 = vunpack.c.l.b16 %v6302_v43  ;;  %v5785_v25 = vpop.f32.mrf.mxu2  ;;  %v6508_v59 = vpack.c.b16 %v6482_v20, %v6481_v63  ;;  %v6160_v43 = vpack.c.bf16 %v6128_v28, %v6128_v28  ;;  %v5875_v37 = vld [vmem:[#allocation4 + $0xcf] sm:$0xff] }
 0x578   : > { %7832 = vmatmul.bf16.gmra.mxu3 %v6949_v48  ;;  %v7120_v36 = vunpack.c.l.b16 %v6238_v55  ;;  %v7121_v17 = vunpack.c.l.b16 %v6239_v3  ;;  %v5786_v6 = vadd.f32 %v5785_v25, %v5697_v18  ;;  %v10976_v24 = vpack.c.b16 %v7343_v12, %v7342_v23  ;;  %v10980_v4 = vpop.f32.mrf.mxu1  ;;  %v6131_v63 = vld [vmem:[#allocation4 + $0xf0] sm:$0xff] }
 0x579   : > { %v10978_v31 = vpack.c.b16 %v7231_v9, %v7230_v45  ;;  %v7027_v30 = vunpack.c.l.b16 %v6161_v11  ;;  %v5613_v55 = vadd.f32 %v5612_v39, %v5524_v49  ;;  %v6872_v3 = vsel %vm419_vm4, %v6508_v59, %v10911_v29 }
 0x57a   : > { %v10982_v8 = vpack.c.b16 %v7121_v17, %v7120_v36  ;;  %v5825_v34 = vmax.f32 %v5786_v6, 0.0  ;;  %v5615_v6 = vpop.f32.mrf.mxu0 }
 0x57b   : > { %7278 = vrot.lane.b32.xlu0 %v10978_v31, %s8816_s23  ;;  %v6335_v19 = vld [vmem:[#allocation4 + $0x1c8] sm:$0xff]  ;;  %v5702_v25 = vadd.f32 %v10936_v22, %v5613_v55  ;;  %v11386_v55 = vld [vmem:[#allocation17_spill] sm:$0xff] }
 0x57c   : > { %7390 = vrot.lane.b32.xlu1 %v10976_v24, %s8818_s18  ;;  %5857 = vst.msk [vmem:[#allocation4 + $0x1d0] sm:$0xff] %vm419_vm4, %v5825_v34  ;;  %v6271_v46 = vld [vmem:[#allocation4 + $0x1c7] sm:$0xff]  ;;  %v6367_v27 = vpack.c.bf16 %v6335_v19, %v6335_v19  ;;  %v11385_v34 = vld [vmem:[#allocation16_spill] sm:$0xff]  ;;  %v5907_v19 = vpack.c.bf16 %v5875_v37, %v5875_v37 }
 0x57d   : > { %7168 = vrot.lane.b32.xlu2 %v10982_v8, %s8817_s11  ;;  %v7265_v15 = vpop.permute.xlu0 %7264  ;;  %v6303_v57 = vpack.c.bf16 %v6271_v46, %v6271_v46 }
 0x57e   : > { %v7377_v7 = vpop.permute.xlu1 %7376  ;;  %v7457_v42 = vsel %vm334_vm3, %v7414_v26, %v7265_v15  ;;  %v7344_v17 = vunpack.c.l.b16 %v6367_v27  ;;  %v5438_v26 = vadd.f32 %v8805_v61, %v11385_v34 }
 0x57f   : > { %v7493_v51 = vsel %vm6935_vm5, %v7457_v42, %v7377_v7  ;;  %v10998_v40 = vpop.permute.xlu2 %6613  ;;  %v5788_v50 = vpop.f32.mrf.mxu2  ;;  %v7232_v52 = vunpack.c.l.b16 %v6303_v57  ;;  %v7026_v7 = vunpack.c.l.b16 %v6160_v43  ;;  %v5874_v42 = vld [vmem:[#allocation4 + $0xc7] sm:$0xff]  ;;  %v6484_v57 = vunpack.c.l.b16 %v5907_v19 }
 0x580   : > { %7921 = vmatmul.bf16.gmra.mxu0 %v7493_v51  ;;  %v5789_v21 = vadd.f32 %v5788_v50, %v5700_v33  ;;  %v11006_v18 = vpop.f32.mrf.mxu1  ;;  %v5527_v33 = vadd.f32 %v5526_v38, %v5438_v26  ;;  %v5906_v46 = vpack.c.bf16 %v5874_v42, %v5874_v42 }
 0x581   : > { %v7053_v51 = vpack.c.b16 %v7027_v30, %v7026_v7 }
 0x582   : > { %v5826_v53 = vmax.f32 %v5789_v21, 0.0  ;;  %v5616_v11 = vadd.f32 %v5615_v6, %v5527_v33 }
 0x583   : > { %8656 = vmatmul.msk.bf16.gmra.mxu1 %vm419_vm4, %v10852_v5  ;;  %6735 = vrot.lane.b32.xlu0 %v10940_v47, %s8816_s23  ;;  %v6336_v5 = vld [vmem:[#allocation4 + $0x1d0] sm:$0xff]  ;;  %v7417_v50 = vsel %vm419_vm4, %v7053_v51, %v10931_v2  ;;  %v6163_v2 = vpack.c.bf16 %v6131_v63, %v6131_v63 }
 0x584   : > { %6847 = vrot.lane.b32.xlu1 %v10978_v31, %s8818_s18  ;;  %v6272_v35 = vld [vmem:[#allocation4 + $0x1cf] sm:$0xff]  ;;  %5858 = vst.msk [vmem:[#allocation4 + $0x1e8] sm:$0xff] %vm419_vm4, %v5826_v53  ;;  %v6368_v45 = vpack.c.bf16 %v6336_v5, %v6336_v5  ;;  %v5528_v53 = vpop.f32.mrf.mxu3  ;;  %v5705_v38 = vadd.f32 %v10957_v54, %v5616_v11  ;;  %v5440_v5 = vadd.f32 %v8805_v61, %v11386_v55 }
 0x585   : > { %6625 = vrot.lane.b32.xlu2 %v10976_v24, %s8817_s11  ;;  %v6208_v23 = vld [vmem:[#allocation4 + $0x1c9] sm:$0xff]  ;;  %v6722_v12 = vpop.permute.xlu0 %6721  ;;  %v6304_v9 = vpack.c.bf16 %v6272_v35, %v6272_v35  ;;  %v6209_v1 = vld [vmem:[#allocation4 + $0x1d1] sm:$0xff] }
 0x586   : > { %v6834_v48 = vpop.permute.xlu1 %6833  ;;  %v6240_v62 = vpack.c.bf16 %v6208_v23, %v6208_v23  ;;  %v6914_v36 = vsel %vm334_vm3, %v6872_v3, %v6722_v12  ;;  %v6241_v10 = vpack.c.bf16 %v6209_v1, %v6209_v1  ;;  %v7345_v0 = vunpack.c.l.b16 %v6368_v45  ;;  %v5617_v3 = vpop.f32.mrf.mxu0  ;;  %v6130_v12 = vld [vmem:[#allocation4 + $0xe8] sm:$0xff] }
 0x587   : > { %v6952_v56 = vsel %vm6935_vm5, %v6914_v36, %v6834_v48  ;;  %v7233_v29 = vunpack.c.l.b16 %v6304_v9  ;;  %v5790_v32 = vpop.f32.mrf.mxu2  ;;  %v11024_v39 = vpop.permute.xlu2 %7158  ;;  %v6483_v48 = vunpack.c.l.b16 %v5906_v46  ;;  %v5529_v9 = vadd.f32 %v5528_v53, %v5440_v5 }
 0x588   : > { %7837 = vmatmul.bf16.gmra.mxu3 %v6952_v56  ;;  %v7122_v22 = vunpack.c.l.b16 %v6240_v62  ;;  %v7123_v60 = vunpack.c.l.b16 %v6241_v10  ;;  %v5791_v15 = vadd.f32 %v5790_v32, %v5702_v25  ;;  %v11020_v16 = vpack.c.b16 %v7345_v0, %v7344_v17  ;;  %v11037_v27 = vpop.f32.mrf.mxu1 }
 0x589   : > { %v11022_v58 = vpack.c.b16 %v7233_v29, %v7232_v52  ;;  %v6509_v62 = vpack.c.b16 %v6484_v57, %v6483_v48  ;;  %v5618_v36 = vadd.f32 %v5617_v3, %v5529_v9  ;;  %v6162_v17 = vpack.c.bf16 %v6130_v12, %v6130_v12  ;;  %v6133_v48 = vld [vmem:[#allocation4 + $0x110] sm:$0xff] }
 0x58a   : > { %v11026_v20 = vpack.c.b16 %v7123_v60, %v7122_v22  ;;  %v5827_v49 = vmax.f32 %v5791_v15, 0.0  ;;  %v7029_v10 = vunpack.c.l.b16 %v6163_v2 }
 0x58b   : > { %7280 = vrot.lane.b32.xlu0 %v11022_v58, %s8816_s23  ;;  %v6337_v30 = vld [vmem:[#allocation4 + $0x1e8] sm:$0xff]  ;;  %v6875_v52 = vsel %vm419_vm4, %v6509_v62, %v10953_v13  ;;  %v5707_v22 = vadd.f32 %v10980_v4, %v5618_v36  ;;  %v7028_v63 = vunpack.c.l.b16 %v6162_v17 }
 0x58c   : > { %7392 = vrot.lane.b32.xlu1 %v11020_v16, %s8818_s18  ;;  %5859 = vst.msk [vmem:[#allocation4 + $0x1f0] sm:$0xff] %vm419_vm4, %v5827_v49  ;;  %v6273_v23 = vld [vmem:[#allocation4 + $0x1e7] sm:$0xff]  ;;  %v6369_v1 = vpack.c.bf16 %v6337_v30, %v6337_v30  ;;  %v5877_v13 = vld [vmem:[#allocation4 + $0xef] sm:$0xff] }
 0x58d   : > { %7170 = vrot.lane.b32.xlu2 %v11026_v20, %s8817_s11  ;;  %v7267_v21 = vpop.permute.xlu0 %7266  ;;  %v6305_v25 = vpack.c.bf16 %v6273_v23, %v6273_v23  ;;  %v7054_v57 = vpack.c.b16 %v7029_v10, %v7028_v63  ;;  %v6132_v62 = vld [vmem:[#allocation4 + $0x108] sm:$0xff] }
 0x58e   : > { %v7379_v28 = vpop.permute.xlu1 %7378  ;;  %v7459_v59 = vsel %vm334_vm3, %v7417_v50, %v7267_v21  ;;  %v7346_v7 = vunpack.c.l.b16 %v6369_v1  ;;  %v6164_v10 = vpack.c.bf16 %v6132_v62, %v6132_v62  ;;  %v6135_v62 = vld [vmem:[#allocation4 + $0x130] sm:$0xff] }
 0x58f   : > { %v7496_v43 = vsel %vm6935_vm5, %v7459_v59, %v7379_v28  ;;  %v5793_v35 = vpop.f32.mrf.mxu2  ;;  %v11049_v6 = vpop.permute.xlu2 %6615  ;;  %v7234_v51 = vunpack.c.l.b16 %v6305_v25  ;;  %v5876_v59 = vld [vmem:[#allocation4 + $0xe7] sm:$0xff]  ;;  %v7420_v30 = vsel %vm419_vm4, %v7054_v57, %v10973_v44 }
 0x590   : > { %7926 = vmatmul.bf16.gmra.mxu0 %v7496_v43  ;;  %v5794_v45 = vadd.f32 %v5793_v35, %v5705_v38  ;;  %v11059_v49 = vpop.f32.mrf.mxu1  ;;  %v5909_v38 = vpack.c.bf16 %v5877_v13, %v5877_v13  ;;  %v5908_v55 = vpack.c.bf16 %v5876_v59, %v5876_v59 }
 0x592   : > { %v5828_v54 = vmax.f32 %v5794_v45, 0.0  ;;  %v6486_v3 = vunpack.c.l.b16 %v5909_v38  ;;  %v6485_v1 = vunpack.c.l.b16 %v5908_v55 }
 0x593   : > { %8657 = vmatmul.msk.bf16.gmra.mxu1 %vm419_vm4, %v10896_v41  ;;  %6737 = vrot.lane.b32.xlu0 %v10982_v8, %s8816_s23  ;;  %v6338_v56 = vld [vmem:[#allocation4 + $0x1f0] sm:$0xff] }
 0x594   : > { %6849 = vrot.lane.b32.xlu1 %v11022_v58, %s8818_s18  ;;  %v6274_v41 = vld [vmem:[#allocation4 + $0x1ef] sm:$0xff]  ;;  %5860 = vst.msk [vmem:[#allocation4 + $0x208] sm:$0xff] %vm419_vm4, %v5828_v54  ;;  %v6370_v34 = vpack.c.bf16 %v6338_v56, %v6338_v56  ;;  %v6165_v54 = vpack.c.bf16 %v6133_v48, %v6133_v48  ;;  %v6510_v36 = vpack.c.b16 %v6486_v3, %v6485_v1 }
 0x595   : > { %6627 = vrot.lane.b32.xlu2 %v11020_v16, %s8817_s11  ;;  %v6210_v0 = vld [vmem:[#allocation4 + $0x1e9] sm:$0xff]  ;;  %v6724_v61 = vpop.permute.xlu0 %6723  ;;  %v6306_v26 = vpack.c.bf16 %v6274_v41, %v6274_v41  ;;  %v6211_v37 = vld [vmem:[#allocation4 + $0x1f1] sm:$0xff] }
 0x596   : > { %v6836_v29 = vpop.permute.xlu1 %6835  ;;  %v6242_v32 = vpack.c.bf16 %v6210_v0, %v6210_v0  ;;  %v6916_v60 = vsel %vm334_vm3, %v6875_v52, %v6724_v61  ;;  %v6243_v15 = vpack.c.bf16 %v6211_v37, %v6211_v37  ;;  %v7347_v33 = vunpack.c.l.b16 %v6370_v34 }
 0x597   : > { %v6955_v42 = vsel %vm6935_vm5, %v6916_v60, %v6836_v29  ;;  %v7235_v19 = vunpack.c.l.b16 %v6306_v26  ;;  %v5795_v11 = vpop.f32.mrf.mxu2  ;;  %v11076_v35 = vpop.permute.xlu2 %7160  ;;  %v6878_v52 = vsel %vm419_vm4, %v6510_v36, %v10998_v40 }
 0x598   : > { %7842 = vmatmul.bf16.gmra.mxu3 %v6955_v42  ;;  %v7124_v50 = vunpack.c.l.b16 %v6242_v32  ;;  %v7125_v46 = vunpack.c.l.b16 %v6243_v15  ;;  %v5796_v28 = vadd.f32 %v5795_v11, %v5707_v22  ;;  %v11061_v21 = vpack.c.b16 %v7347_v33, %v7346_v7  ;;  %v11080_v44 = vpop.f32.mrf.mxu1  ;;  %v5879_v15 = vld [vmem:[#allocation4 + $0x10f] sm:$0xff] }
 0x599   : > { %v11063_v4 = vpack.c.b16 %v7235_v19, %v7234_v51  ;;  %v7031_v32 = vunpack.c.l.b16 %v6165_v54  ;;  %v5911_v59 = vpack.c.bf16 %v5879_v15, %v5879_v15  ;;  %v11126_v15 = vld [vmem:[%s11340_s8] ss:$0 sm:$0xff] }
 0x59a   : > { %v11065_v53 = vpack.c.b16 %v7125_v46, %v7124_v50  ;;  %v5829_v43 = vmax.f32 %v5796_v28, 0.0  ;;  %v7030_v50 = vunpack.c.l.b16 %v6164_v10  ;;  %v5878_v46 = vld [vmem:[#allocation4 + $0x107] sm:$0xff] }
 0x59b   : > { %7282 = vrot.lane.b32.xlu0 %v11063_v4, %s8816_s23  ;;  %v6339_v45 = vld [vmem:[#allocation4 + $0x208] sm:$0xff] }
 0x59c   : > { %7394 = vrot.lane.b32.xlu1 %v11061_v21, %s8818_s18  ;;  %5861 = vst.msk [vmem:[#allocation4 + $0x210] sm:$0xff] %vm419_vm4, %v5829_v43  ;;  %v6275_v9 = vld [vmem:[#allocation4 + $0x207] sm:$0xff]  ;;  %v6371_v25 = vpack.c.bf16 %v6339_v45, %v6339_v45  ;;  %v7055_v38 = vpack.c.b16 %v7031_v32, %v7030_v50  ;;  %v6488_v45 = vunpack.c.l.b16 %v5911_v59 }
 0x59d   : > { %7172 = vrot.lane.b32.xlu2 %v11065_v53, %s8817_s11  ;;  %v7269_v2 = vpop.permute.xlu0 %7268  ;;  %v6307_v17 = vpack.c.bf16 %v6275_v9, %v6275_v9  ;;  %v6277_v43 = vld [vmem:[#allocation4 + $0x227] sm:$0xff] }
 0x59e   : > { %v7381_v5 = vpop.permute.xlu1 %7380  ;;  %v7461_v23 = vsel %vm334_vm3, %v7420_v30, %v7269_v2  ;;  %v7348_v60 = vunpack.c.l.b16 %v6371_v25  ;;  %v5910_v30 = vpack.c.bf16 %v5878_v46, %v5878_v46  ;;  %v6341_v2 = vld [vmem:[#allocation4 + $0x228] sm:$0xff]  ;;  %v7423_v3 = vsel %vm419_vm4, %v7055_v38, %v11024_v39 }
 0x59f   : > { %v7499_v12 = vsel %vm6935_vm5, %v7461_v23, %v7381_v5  ;;  %v7236_v51 = vunpack.c.l.b16 %v6307_v17  ;;  %v11094_v13 = vpop.permute.xlu2 %6617  ;;  %v6278_v5 = vld [vmem:[#allocation4 + $0x22f] sm:$0xff]  ;;  %v6309_v1 = vpack.c.bf16 %v6277_v43, %v6277_v43  ;;  %v6373_v36 = vpack.c.bf16 %v6341_v2, %v6341_v2 }
 0x5a0   : > { %7931 = vmatmul.bf16.gmra.mxu0 %v7499_v12  ;;  %v11103_v55 = vpop.f32.mrf.mxu1  ;;  %v6342_v23 = vld [vmem:[#allocation4 + $0x230] sm:$0xff]  ;;  %v6310_v25 = vpack.c.bf16 %v6278_v5, %v6278_v5  ;;  %v6487_v10 = vunpack.c.l.b16 %v5910_v30 }
 0x5a1   : > { %v6374_v17 = vpack.c.bf16 %v6342_v23, %v6342_v23  ;;  %v7238_v39 = vunpack.c.l.b16 %v6309_v1 }
 0x5a3   : > { %8658 = vmatmul.msk.bf16.gmra.mxu1 %vm419_vm4, %v10940_v47  ;;  %6739 = vrot.lane.b32.xlu0 %v11026_v20, %s8816_s23  ;;  %v6340_v56 = vld [vmem:[#allocation4 + $0x210] sm:$0xff] }
 0x5a4   : > { %6851 = vrot.lane.b32.xlu1 %v11063_v4, %s8818_s18  ;;  %v6276_v41 = vld [vmem:[#allocation4 + $0x20f] sm:$0xff]  ;;  %v6372_v61 = vpack.c.bf16 %v6340_v56, %v6340_v56  ;;  %v6511_v56 = vpack.c.b16 %v6488_v45, %v6487_v10 }
 0x5a5   : > { %6629 = vrot.lane.b32.xlu2 %v11061_v21, %s8817_s11  ;;  %v6212_v0 = vld [vmem:[#allocation4 + $0x209] sm:$0xff]  ;;  %v6726_v29 = vpop.permute.xlu0 %6725  ;;  %v6308_v34 = vpack.c.bf16 %v6276_v41, %v6276_v41  ;;  %v6213_v26 = vld [vmem:[#allocation4 + $0x211] sm:$0xff] }
 0x5a6   : > { %v6838_v47 = vpop.permute.xlu1 %6837  ;;  %v6244_v37 = vpack.c.bf16 %v6212_v0, %v6212_v0  ;;  %v6918_v22 = vsel %vm334_vm3, %v6878_v52, %v6726_v29  ;;  %v6245_v7 = vpack.c.bf16 %v6213_v26, %v6213_v26  ;;  %v7349_v33 = vunpack.c.l.b16 %v6372_v61  ;;  %v6134_v41 = vld [vmem:[#allocation4 + $0x128] sm:$0xff]  ;;  %v6137_v45 = vld [vmem:[#allocation4 + $0x150] sm:$0xff] }
 0x5a7   : > { %v6958_v42 = vsel %vm6935_vm5, %v6918_v22, %v6838_v47  ;;  %v7237_v19 = vunpack.c.l.b16 %v6308_v34  ;;  %v6167_v0 = vpack.c.bf16 %v6135_v62, %v6135_v62  ;;  %v11111_v52 = vpop.permute.xlu2 %7162  ;;  %v7239_v47 = vunpack.c.l.b16 %v6310_v25  ;;  %v6136_v62 = vld [vmem:[#allocation4 + $0x148] sm:$0xff] }
 0x5a8   : > { %7847 = vmatmul.bf16.gmra.mxu3 %v6958_v42  ;;  %v7126_v40 = vunpack.c.l.b16 %v6244_v37  ;;  %v7127_v11 = vunpack.c.l.b16 %v6245_v7  ;;  %v11096_v63 = vpack.c.b16 %v7349_v33, %v7348_v60  ;;  %v7350_v29 = vunpack.c.l.b16 %v6373_v36  ;;  %v11120_v22 = vpop.f32.mrf.mxu1 }
 0x5a9   : > { %v7254_v28 = vpack.c.b16 %v7237_v19, %v7236_v51  ;;  %v7351_v61 = vunpack.c.l.b16 %v6374_v17  ;;  %v6881_v34 = vsel %vm419_vm4, %v6511_v56, %v11049_v6  ;;  %v6166_v26 = vpack.c.bf16 %v6134_v41, %v6134_v41  ;;  %v5881_v6 = vld [vmem:[#allocation4 + $0x12f] sm:$0xff] }
 0x5aa   : > { %v11098_v57 = vpack.c.b16 %v7127_v11, %v7126_v40  ;;  %v7033_v7 = vunpack.c.l.b16 %v6167_v0  ;;  %v7255_v33 = vpack.c.b16 %v7239_v47, %v7238_v39  ;;  %v5880_v40 = vld [vmem:[#allocation4 + $0x127] sm:$0xff]  ;;  %v5913_v50 = vpack.c.bf16 %v5881_v6, %v5881_v6 }
 0x5ab   : > { %7284 = vrot.lane.b32.xlu0 %v7254_v28, %s8816_s23  ;;  %v7367_v51 = vpack.c.b16 %v7351_v61, %v7350_v29  ;;  %v7032_v19 = vunpack.c.l.b16 %v6166_v26  ;;  %v5912_v43 = vpack.c.bf16 %v5880_v40, %v5880_v40  ;;  %v6169_v25 = vpack.c.bf16 %v6137_v45, %v6137_v45 }
 0x5ac   : > { %7396 = vrot.lane.b32.xlu1 %v11096_v63, %s8818_s18  ;;  %v6168_v10 = vpack.c.bf16 %v6136_v62, %v6136_v62 }
 0x5ad   : > { %7174 = vrot.lane.b32.xlu2 %v11098_v57, %s8817_s11  ;;  %v7271_v12 = vpop.permute.xlu0 %7270  ;;  %v7056_v11 = vpack.c.b16 %v7033_v7, %v7032_v19  ;;  %v6489_v1 = vunpack.c.l.b16 %v5912_v43  ;;  %v7035_v29 = vunpack.c.l.b16 %v6169_v25  ;;  %v6139_v43 = vld [vmem:[#allocation4 + $0x170] sm:$0xff] }
 0x5ae   : > { %v7383_v48 = vpop.permute.xlu1 %7382  ;;  %v7463_v9 = vsel %vm334_vm3, %v7423_v3, %v7271_v12  ;;  %v6490_v3 = vunpack.c.l.b16 %v5913_v50  ;;  %v7034_v26 = vunpack.c.l.b16 %v6168_v10  ;;  %v5884_v10 = vld [vmem:[#allocation4 + $0x167] sm:$0xff] }
 0x5af   : > { %v7502_v54 = vsel %vm6935_vm5, %v7463_v9, %v7383_v48  ;;  %v7426_v38 = vsel %vm419_vm4, %v7056_v11, %v11076_v35 }
 0x5b0   : > { %7936 = vmatmul.bf16.gmra.mxu0 %v7502_v54  ;;  %v11145_v35 = vpop.f32.mrf.mxu1  ;;  %v6512_v54 = vpack.c.b16 %v6490_v3, %v6489_v1 }
 0x5b2   : > { %v7813_v60 = vpop.f32.mrf.mxu3  ;;  %v6884_v17 = vsel %vm419_vm4, %v6512_v54, %v11094_v13 }
 0x5b3   : > { %8659 = vmatmul.msk.bf16.gmra.mxu1 %vm419_vm4, %v10982_v8  ;;  %6741 = vrot.lane.b32.xlu0 %v11065_v53, %s8816_s23  ;;  %v7814_v46 = vadd.f32 %v11126_v15, %v7813_v60  ;;  %v7057_v60 = vpack.c.b16 %v7035_v29, %v7034_v26 }
 0x5b4   : > { %6853 = vrot.lane.b32.xlu1 %v7254_v28, %s8818_s18  ;;  %v11133_v28 = vpop.permute.xlu2 %6619 }
 0x5b5   : > { %v6728_v32 = vpop.permute.xlu0 %6727 }
 0x5b6   : > { %v6840_v37 = vpop.permute.xlu1 %6839  ;;  %v6920_v8 = vsel %vm334_vm3, %v6881_v34, %v6728_v32  ;;  %v5883_v34 = vld [vmem:[#allocation4 + $0x14f] sm:$0xff] }
 0x5b7   : > { %v6961_v42 = vsel %vm6935_vm5, %v6920_v8, %v6840_v37  ;;  %v5882_v37 = vld [vmem:[#allocation4 + $0x147] sm:$0xff]  ;;  %v5915_v8 = vpack.c.bf16 %v5883_v34, %v5883_v34 }
 0x5b8   : > { %7852 = vmatmul.bf16.gmra.mxu3 %v6961_v42  ;;  %v11159_v32 = vpop.f32.mrf.mxu1 }
 0x5b9   : > { %v6492_v11 = vunpack.c.l.b16 %v5915_v8 }
 0x5ba   : > { %v7815_v9 = vpop.f32.mrf.mxu3 }
 0x5bb   : > { %7286 = vrot.lane.b32.xlu0 %v7255_v33, %s8816_s23  ;;  %v7816_v36 = vadd.f32 %v11126_v15, %v7815_v9  ;;  %v5914_v33 = vpack.c.bf16 %v5882_v37, %v5882_v37 }
 0x5bc   : > { %7398 = vrot.lane.b32.xlu1 %v7367_v51, %s8818_s18  ;;  %v7902_v59 = vpop.f32.mrf.mxu0  ;;  %v7165_v39 = vpop.permute.xlu2 %7164 }
 0x5bd   : > { %v7903_v30 = vadd.f32 %v7902_v59, %v7814_v46  ;;  %v7273_v2 = vpop.permute.xlu0 %7272 }
 0x5be   : > { %v7385_v5 = vpop.permute.xlu1 %7384  ;;  %v7465_v23 = vsel %vm334_vm3, %v7426_v38, %v7273_v2  ;;  %v6491_v38 = vunpack.c.l.b16 %v5914_v33 }
 0x5bf   : > { %v7992_v48 = vadd.f32 %v11006_v18, %v7903_v30  ;;  %v7505_v12 = vsel %vm6935_vm5, %v7465_v23, %v7385_v5  ;;  %v6138_v5 = vld [vmem:[#allocation4 + $0x168] sm:$0xff]  ;;  %v6171_v23 = vpack.c.bf16 %v6139_v43, %v6139_v43 }
 0x5c0   : > { %7941 = vmatmul.bf16.gmra.mxu0 %v7505_v12  ;;  %v11172_v3 = vpop.f32.mrf.mxu1  ;;  %v6170_v1 = vpack.c.bf16 %v6138_v5, %v6138_v5  ;;  %v5886_v43 = vld [vmem:[#allocation4 + $0x187] sm:$0xff] }
 0x5c1   : > { %8072 = vst.msk [vmem:[%s11140_s24] sm:$0xff] %vm8071_vm6, %v7992_v48  ;;  %v7037_v25 = vunpack.c.l.b16 %v6171_v23 }
 0x5c3   : > { %8660 = vmatmul.msk.bf16.gmra.mxu1 %vm419_vm4, %v11026_v20 }
 0x5c4   : > { %v7904_v18 = vpop.f32.mrf.mxu0  ;;  %v6622_v59 = vpop.permute.xlu2 %6621 }
 0x5c5   : > { %v7905_v56 = vadd.f32 %v7904_v18, %v7816_v36  ;;  %v6730_v0 = vpop.permute.xlu0 %6729  ;;  %v5885_v36 = vld [vmem:[#allocation4 + $0x16f] sm:$0xff]  ;;  %v7036_v18 = vunpack.c.l.b16 %v6170_v1 }
 0x5c6   : > { %v6842_v41 = vpop.permute.xlu1 %6841  ;;  %v6922_v47 = vsel %vm334_vm3, %v6884_v17, %v6730_v0 }
 0x5c7   : > { %v7994_v61 = vadd.f32 %v11037_v27, %v7905_v56  ;;  %v6964_v20 = vsel %vm6935_vm5, %v6922_v47, %v6842_v41  ;;  %v7429_v27 = vsel %vm419_vm4, %v7057_v60, %v11111_v52  ;;  %v6513_v52 = vpack.c.b16 %v6492_v11, %v6491_v38  ;;  %v5887_v38 = vld [vmem:[#allocation4 + $0x18f] sm:$0xff] }
 0x5c8   : > { %7857 = vmatmul.bf16.gmra.mxu3 %v6964_v20  ;;  %v5917_v41 = vpack.c.bf16 %v5885_v36, %v5885_v36  ;;  %v11183_v20 = vpop.f32.mrf.mxu1 }
 0x5c9   : > { %8073 = vst.msk [vmem:[%s11140_s24 + $0x8] sm:$0xff] %vm8071_vm6, %v7994_v61  ;;  %v6887_v48 = vsel %vm419_vm4, %v6513_v52, %v11133_v28  ;;  %v7058_v28 = vpack.c.b16 %v7037_v25, %v7036_v18  ;;  %v5916_v61 = vpack.c.bf16 %v5884_v10, %v5884_v10  ;;  %v5919_v52 = vpack.c.bf16 %v5887_v38, %v5887_v38 }
 0x5ca   : > { %v7818_v13 = vpop.f32.mrf.mxu3 }
 0x5cb   : > { %v7819_v7 = vadd.f32 %v11126_v15, %v7818_v13  ;;  %v6494_v13 = vunpack.c.l.b16 %v5917_v41 }
 0x5cc   : > { %v7167_v17 = vpop.permute.xlu2 %7166 }
 0x5cd   : > { %v7907_v42 = vpop.f32.mrf.mxu0  ;;  %v7275_v19 = vpop.permute.xlu0 %7274  ;;  %v7435_v23 = vsel %vm419_vm4, %v10938_v14, %v7167_v17 }
 0x5ce   : > { %v7908_v51 = vadd.f32 %v7907_v42, %v7819_v7  ;;  %v7387_v6 = vpop.permute.xlu1 %7386  ;;  %v7467_v40 = vsel %vm334_vm3, %v7429_v27, %v7275_v19  ;;  %v6493_v7 = vunpack.c.l.b16 %v5916_v61 }
 0x5cf   : > { %v7508_v46 = vsel %vm6935_vm5, %v7467_v40, %v7387_v6 }
 0x5d0   : > { %v7997_v50 = vadd.f32 %v11059_v49, %v7908_v51  ;;  %7946 = vmatmul.bf16.gmra.mxu0 %v7508_v46  ;;  %v6514_v42 = vpack.c.b16 %v6494_v13, %v6493_v7 }
 0x5d2   : > { %8074 = vst.msk [vmem:[%s11140_s24 + $0x10] sm:$0xff] %vm8071_vm6, %v7997_v50  ;;  %v7820_v30 = vpop.f32.mrf.mxu3  ;;  %v6890_v19 = vsel %vm419_vm4, %v6514_v42, %v6622_v59  ;;  %v11195_v50 = vpop.f32.mrf.mxu1 }
 0x5d3   : > { %8661 = vmatmul.msk.bf16.gmra.mxu1 %vm419_vm4, %v11065_v53  ;;  %v7821_v2 = vadd.f32 %v11126_v15, %v7820_v30 }
 0x5d4   : > { %v6624_v27 = vpop.permute.xlu2 %6623 }
 0x5d5   : > { %v7909_v49 = vpop.f32.mrf.mxu0  ;;  %v6732_v9 = vpop.permute.xlu0 %6731 }
 0x5d6   : > { %v7910_v12 = vadd.f32 %v7909_v49, %v7821_v2  ;;  %v6844_v45 = vpop.permute.xlu1 %6843  ;;  %v6924_v62 = vsel %vm334_vm3, %v6887_v48, %v6732_v9  ;;  %v5918_v49 = vpack.c.bf16 %v5886_v43, %v5886_v43  ;;  %v6496_v9 = vunpack.c.l.b16 %v5919_v52 }
 0x5d7   : > { %v6967_v54 = vsel %vm6935_vm5, %v6924_v62, %v6844_v45 }
 0x5d8   : > { %v7999_v53 = vadd.f32 %v11080_v44, %v7910_v12  ;;  %7862 = vmatmul.bf16.gmra.mxu3 %v6967_v54  ;;  %v7432_v44 = vsel %vm419_vm4, %v7058_v28, %v7165_v39 }
 0x5da   : > { %8075 = vst.msk [vmem:[%s11140_s24 + $0x18] sm:$0xff] %vm8071_vm6, %v7999_v53  ;;  %v6495_v53 = vunpack.c.l.b16 %v5918_v49  ;;  %v11207_v54 = vpop.f32.mrf.mxu1 }
 0x5db   : > { %v7823_v56 = vpop.f32.mrf.mxu3 }
 0x5dc   : > { %v7824_v0 = vadd.f32 %v11126_v15, %v7823_v56  ;;  %v7169_v48 = vpop.permute.xlu2 %7168  ;;  %v6515_v14 = vpack.c.b16 %v6496_v9, %v6495_v53 }
 0x5dd   : > { %v7912_v47 = vpop.f32.mrf.mxu0  ;;  %v7277_v26 = vpop.permute.xlu0 %7276 }
 0x5de   : > { %v7389_v29 = vpop.permute.xlu1 %7388  ;;  %v7913_v34 = vadd.f32 %v7912_v47, %v7824_v0  ;;  %v7469_v37 = vsel %vm334_vm3, %v7432_v44, %v7277_v26  ;;  %v6893_v10 = vsel %vm419_vm4, %v6515_v14, %v6624_v27 }
 0x5df   : > { %v7511_v8 = vsel %vm6935_vm5, %v7469_v37, %v7389_v29  ;;  %v7438_v37 = vsel %vm419_vm4, %v10976_v24, %v7169_v48 }
 0x5e0   : > { %v8002_v60 = vadd.f32 %v11103_v55, %v7913_v34  ;;  %7951 = vmatmul.bf16.gmra.mxu0 %v7511_v8 }
 0x5e2   : > { %8076 = vst.msk [vmem:[%s11140_s24 + $0x20] sm:$0xff] %vm8071_vm6, %v8002_v60  ;;  %v11218_v44 = vpop.f32.mrf.mxu1 }
 0x5e3   : > { %8662 = vmatmul.msk.bf16.gmra.mxu1 %vm419_vm4, %v11098_v57  ;;  %v7825_v39 = vpop.f32.mrf.mxu3 }
 0x5e4   : > { %v7826_v33 = vadd.f32 %v11126_v15, %v7825_v39  ;;  %v6626_v41 = vpop.permute.xlu2 %6625 }
 0x5e5   : > { %v7914_v51 = vpop.f32.mrf.mxu0  ;;  %v6734_v40 = vpop.permute.xlu0 %6733  ;;  %v6896_v24 = vsel %vm419_vm4, %v10978_v31, %v6626_v41 }
 0x5e6   : > { %v6846_v6 = vpop.permute.xlu1 %6845  ;;  %v7915_v55 = vadd.f32 %v7914_v51, %v7826_v33  ;;  %v6926_v11 = vsel %vm334_vm3, %v6890_v19, %v6734_v40 }
 0x5e7   : > { %v6970_v57 = vsel %vm6935_vm5, %v6926_v11, %v6846_v6 }
 0x5e8   : > { %v8004_v46 = vadd.f32 %v11120_v22, %v7915_v55  ;;  %7867 = vmatmul.bf16.gmra.mxu3 %v6970_v57  ;;  %v6406_v57 = vld [vmem:[#allocation4 + $0x231] sm:$0xff] }
 0x5ea   : > { %8077 = vst.msk [vmem:[%s11140_s24 + $0x28] sm:$0xff] %vm8071_vm6, %v8004_v46  ;;  %v11231_v6 = vpop.f32.mrf.mxu1  ;;  %v6405_v46 = vld [vmem:[#allocation4 + $0x229] sm:$0xff] }
 0x5eb   : > { %v7828_v30 = vpop.f32.mrf.mxu3  ;;  %v6437_v43 = vpack.c.bf16 %v6405_v46, %v6405_v46 }
 0x5ec   : > { %v7829_v59 = vadd.f32 %v11126_v15, %v7828_v30  ;;  %v7171_v39 = vpop.permute.xlu2 %7170  ;;  %v6438_v30 = vpack.c.bf16 %v6406_v57, %v6406_v57 }
 0x5ed   : > { %v7917_v2 = vpop.f32.mrf.mxu0  ;;  %v7279_v22 = vpop.permute.xlu0 %7278 }
 0x5ee   : > { %v7391_v5 = vpop.permute.xlu1 %7390  ;;  %v7918_v12 = vadd.f32 %v7917_v2, %v7829_v59  ;;  %v7471_v45 = vsel %vm334_vm3, %v7435_v23, %v7279_v22  ;;  %v7590_v2 = vunpack.c.l.b16 %v6437_v43  ;;  %v7591_v23 = vunpack.c.l.b16 %v6438_v30 }
 0x5ef   : > { %v7514_v62 = vsel %vm6935_vm5, %v7471_v45, %v7391_v5 }
 0x5f0   : > { %v8007_v1 = vadd.f32 %v11145_v35, %v7918_v12  ;;  %7956 = vmatmul.bf16.gmra.mxu0 %v7514_v62  ;;  %v7607_v12 = vpack.c.b16 %v7591_v23, %v7590_v2 }
 0x5f2   : > { %8078 = vst.msk [vmem:[%s11140_s24 + $0x30] sm:$0xff] %vm8071_vm6, %v8007_v1  ;;  %v8026_v45 = vpop.f32.mrf.mxu1 }
 0x5f3   : > { %v7830_v25 = vpop.f32.mrf.mxu3  ;;  %8663 = vmatmul.msk.bf16.gmra.mxu1 %vm419_vm4, %v7607_v12 }
 0x5f4   : > { %v7831_v36 = vadd.f32 %v11126_v15, %v7830_v25  ;;  %v6628_v52 = vpop.permute.xlu2 %6627 }
 0x5f5   : > { %v7919_v17 = vpop.f32.mrf.mxu0  ;;  %v6736_v56 = vpop.permute.xlu0 %6735  ;;  %v6899_v14 = vsel %vm419_vm4, %v11022_v58, %v6628_v52 }
 0x5f6   : > { %v6848_v18 = vpop.permute.xlu1 %6847  ;;  %v7920_v28 = vadd.f32 %v7919_v17, %v7831_v36  ;;  %v6928_v35 = vsel %vm334_vm3, %v6893_v10, %v6736_v56 }
 0x5f7   : > { %v6973_v47 = vsel %vm6935_vm5, %v6928_v35, %v6848_v18 }
 0x5f8   : > { %v8009_v0 = vadd.f32 %v11159_v32, %v7920_v28  ;;  %7872 = vmatmul.bf16.gmra.mxu3 %v6973_v47 }
 0x5fa   : > { %8079 = vst.msk [vmem:[%s11140_s24 + $0x38] sm:$0xff] %vm8071_vm6, %v8009_v0  ;;  %v8028_v28 = vpop.f32.mrf.mxu1 }
 0x5fb   : > { %v7833_v29 = vpop.f32.mrf.mxu3 }
 0x5fc   : > { %v7834_v61 = vadd.f32 %v11126_v15, %v7833_v29  ;;  %v7173_v17 = vpop.permute.xlu2 %7172 }
 0x5fd   : > { %v7922_v26 = vpop.f32.mrf.mxu0  ;;  %v7281_v13 = vpop.permute.xlu0 %7280  ;;  %v7444_v58 = vsel %vm419_vm4, %v11061_v21, %v7173_v17 }
 0x5fe   : > { %v7393_v34 = vpop.permute.xlu1 %7392  ;;  %v7923_v60 = vadd.f32 %v7922_v26, %v7834_v61  ;;  %v7473_v32 = vsel %vm334_vm3, %v7438_v37, %v7281_v13 }
 0x5ff   : > { %v7517_v7 = vsel %vm6935_vm5, %v7473_v32, %v7393_v34 }
 0x600   : > { %v8012_v8 = vadd.f32 %v11172_v3, %v7923_v60  ;;  %7961 = vmatmul.bf16.gmra.mxu0 %v7517_v7 }
 0x602   : > { %8080 = vst.msk [vmem:[%s11140_s24 + $0x40] sm:$0xff] %vm8071_vm6, %v8012_v8  ;;  %v8031_v60 = vpop.f32.mrf.mxu1 }
 0x603   : > { %v7835_v42 = vpop.f32.mrf.mxu3 }
 0x604   : > { %v7836_v27 = vadd.f32 %v11126_v15, %v7835_v42  ;;  %v6630_v37 = vpop.permute.xlu2 %6629 }
 0x605   : > { %v7924_v51 = vpop.f32.mrf.mxu0  ;;  %v6738_v19 = vpop.permute.xlu0 %6737  ;;  %v6902_v21 = vsel %vm419_vm4, %v11063_v4, %v6630_v37 }
 0x606   : > { %v6850_v33 = vpop.permute.xlu1 %6849  ;;  %v7925_v55 = vadd.f32 %v7924_v51, %v7836_v27  ;;  %v6930_v3 = vsel %vm334_vm3, %v6896_v24, %v6738_v19 }
 0x607   : > { %v6976_v11 = vsel %vm6935_vm5, %v6930_v3, %v6850_v33 }
 0x608   : > { %v8014_v40 = vadd.f32 %v11183_v20, %v7925_v55  ;;  %7877 = vmatmul.bf16.gmra.mxu3 %v6976_v11  ;;  %v7441_v20 = vsel %vm419_vm4, %v11020_v16, %v7171_v39 }
 0x60a   : > { %8081 = vst.msk [vmem:[%s11140_s24 + $0x48] sm:$0xff] %vm8071_vm6, %v8014_v40  ;;  %v8033_v40 = vpop.f32.mrf.mxu1 }
 0x60b   : > { %v7838_v38 = vpop.f32.mrf.mxu3 }
 0x60c   : > { %v7839_v31 = vadd.f32 %v11126_v15, %v7838_v38  ;;  %v7175_v51 = vpop.permute.xlu2 %7174 }
 0x60d   : > { %v7927_v5 = vpop.f32.mrf.mxu0  ;;  %v7283_v49 = vpop.permute.xlu0 %7282  ;;  %v7447_v4 = vsel %vm419_vm4, %v11096_v63, %v7175_v51 }
 0x60e   : > { %v7395_v59 = vpop.permute.xlu1 %7394  ;;  %v7928_v48 = vadd.f32 %v7927_v5, %v7839_v31  ;;  %v7475_v22 = vsel %vm334_vm3, %v7441_v20, %v7283_v49 }
 0x60f   : > { %v7520_v1 = vsel %vm6935_vm5, %v7475_v22, %v7395_v59 }
 0x610   : > { %v8017_v9 = vadd.f32 %v11195_v50, %v7928_v48  ;;  %7966 = vmatmul.bf16.gmra.mxu0 %v7520_v1 }
 0x612   : > { %8082 = vst.msk [vmem:[%s11140_s24 + $0x50] sm:$0xff] %vm8071_vm6, %v8017_v9  ;;  %v8036_v59 = vpop.f32.mrf.mxu1 }
 0x613   : > { %v7840_v62 = vpop.f32.mrf.mxu3 }
 0x614   : > { %v7841_v53 = vadd.f32 %v11126_v15, %v7840_v62 }
 0x615   : > { %v7929_v25 = vpop.f32.mrf.mxu0  ;;  %v6740_v36 = vpop.permute.xlu0 %6739 }
 0x616   : > { %v6852_v16 = vpop.permute.xlu1 %6851  ;;  %v7930_v18 = vadd.f32 %v7929_v25, %v7841_v53  ;;  %v6932_v50 = vsel %vm334_vm3, %v6899_v14, %v6740_v36 }
 0x617   : > { %v6979_v56 = vsel %vm6935_vm5, %v6932_v50, %v6852_v16 }
 0x618   : > { %v8019_v10 = vadd.f32 %v11207_v54, %v7930_v18  ;;  %7882 = vmatmul.bf16.gmra.mxu3 %v6979_v56 }
 0x61a   : > { %8083 = vst.msk [vmem:[%s11140_s24 + $0x58] sm:$0xff] %vm8071_vm6, %v8019_v10  ;;  %v8038_v48 = vpop.f32.mrf.mxu1 }
 0x61b   : > { %v7843_v35 = vpop.f32.mrf.mxu3 }
 0x61c   : > { %v7844_v41 = vadd.f32 %v11126_v15, %v7843_v35 }
 0x61d   : > { %v7932_v47 = vpop.f32.mrf.mxu0  ;;  %v7285_v29 = vpop.permute.xlu0 %7284 }
 0x61e   : > { %v7397_v0 = vpop.permute.xlu1 %7396  ;;  %v7933_v61 = vadd.f32 %v7932_v47, %v7844_v41  ;;  %v7477_v34 = vsel %vm334_vm3, %v7444_v58, %v7285_v29 }
 0x61f   : > { %v7523_v26 = vsel %vm6935_vm5, %v7477_v34, %v7397_v0 }
 0x620   : > { %v8022_v54 = vadd.f32 %v11218_v44, %v7933_v61  ;;  %7971 = vmatmul.bf16.gmra.mxu0 %v7523_v26 }
 0x622   : > { %8084 = vst.msk [vmem:[%s11140_s24 + $0x60] sm:$0xff] %vm8071_vm6, %v8022_v54  ;;  %v8041_v53 = vpop.f32.mrf.mxu1 }
 0x623   : > { %v7845_v13 = vpop.f32.mrf.mxu3 }
 0x624   : > { %v7846_v32 = vadd.f32 %v11126_v15, %v7845_v13 }
 0x625   : > { %v7934_v7 = vpop.f32.mrf.mxu0  ;;  %v6742_v39 = vpop.permute.xlu0 %6741 }
 0x626   : > { %v6854_v8 = vpop.permute.xlu1 %6853  ;;  %v7935_v42 = vadd.f32 %v7934_v7, %v7846_v32  ;;  %v6934_v44 = vsel %vm334_vm3, %v6902_v21, %v6742_v39 }
 0x627   : > { %v6982_v33 = vsel %vm6935_vm5, %v6934_v44, %v6854_v8 }
 0x628   : > { %v8024_v27 = vadd.f32 %v11231_v6, %v7935_v42  ;;  %7887 = vmatmul.bf16.gmra.mxu3 %v6982_v33 }
 0x62a   : > { %8085 = vst.msk [vmem:[%s11140_s24 + $0x68] sm:$0xff] %vm8071_vm6, %v8024_v27  ;;  %v8043_v10 = vpop.f32.mrf.mxu1 }
 0x62b   : > { %v7848_v24 = vpop.f32.mrf.mxu3 }
 0x62c   : > { %v7849_v19 = vadd.f32 %v11126_v15, %v7848_v24 }
 0x62d   : > { %v7937_v55 = vpop.f32.mrf.mxu0  ;;  %v7287_v11 = vpop.permute.xlu0 %7286 }
 0x62e   : > { %v7399_v3 = vpop.permute.xlu1 %7398  ;;  %v7938_v46 = vadd.f32 %v7937_v55, %v7849_v19  ;;  %v7479_v6 = vsel %vm334_vm3, %v7447_v4, %v7287_v11 }
 0x62f   : > { %v7526_v38 = vsel %vm6935_vm5, %v7479_v6, %v7399_v3 }
 0x630   : > { %v8027_v57 = vadd.f32 %v8026_v45, %v7938_v46  ;;  %7976 = vmatmul.bf16.gmra.mxu0 %v7526_v38 }
 0x632   : > { %8086 = vst.msk [vmem:[%s11140_s24 + $0x70] sm:$0xff] %vm8071_vm6, %v8027_v57  ;;  %v8046_v58 = vpop.f32.mrf.mxu1 }
 0x633   : > { %v7850_v43 = vpop.f32.mrf.mxu3 }
 0x634   : > { %v7851_v30 = vadd.f32 %v11126_v15, %v7850_v43 }
 0x635   : > { %v7939_v52 = vpop.f32.mrf.mxu0 }
 0x636   : > { %v7940_v31 = vadd.f32 %v7939_v52, %v7851_v30 }
 0x638   : > { %v8029_v63 = vadd.f32 %v8028_v28, %v7940_v31 }
 0x63a   : > { %8087 = vst.msk [vmem:[%s11140_s24 + $0x78] sm:$0xff] %vm8071_vm6, %v8029_v63  ;;  %v8048_v13 = vpop.f32.mrf.mxu1 }
 0x63b   : > { %v7853_v5 = vpop.f32.mrf.mxu3 }
 0x63c   : > { %v7854_v2 = vadd.f32 %v11126_v15, %v7853_v5 }
 0x63d   : > { %v7942_v23 = vpop.f32.mrf.mxu0 }
 0x63e   : > { %v7943_v20 = vadd.f32 %v7942_v23, %v7854_v2 }
 0x640   : > { %v8032_v49 = vadd.f32 %v8031_v60, %v7943_v20 }
 0x642   : > { %8088 = vst.msk [vmem:[%s11140_s24 + $0x80] sm:$0xff] %vm8071_vm6, %v8032_v49  ;;  %v8051_v39 = vpop.f32.mrf.mxu1 }
 0x643   : > { %v7855_v22 = vpop.f32.mrf.mxu3 }
 0x644   : > { %v7856_v12 = vadd.f32 %v11126_v15, %v7855_v22 }
 0x645   : > { %v7944_v45 = vpop.f32.mrf.mxu0 }
 0x646   : > { %v7945_v9 = vadd.f32 %v7944_v45, %v7856_v12 }
 0x648   : > { %v8034_v1 = vadd.f32 %v8033_v40, %v7945_v9 }
 0x64a   : > { %8089 = vst.msk [vmem:[%s11140_s24 + $0x88] sm:$0xff] %vm8071_vm6, %v8034_v1  ;;  %v8053_v55 = vpop.f32.mrf.mxu1 }
 0x64b   : > { %v7858_v62 = vpop.f32.mrf.mxu3 }
 0x64c   : > { %v7859_v16 = vadd.f32 %v11126_v15, %v7858_v62 }
 0x64d   : > { %v7947_v25 = vpop.f32.mrf.mxu0 }
 0x64e   : > { %v7948_v14 = vadd.f32 %v7947_v25, %v7859_v16 }
 0x650   : > { %v8037_v36 = vadd.f32 %v8036_v59, %v7948_v14 }
 0x652   : > { %8090 = vst.msk [vmem:[%s11140_s24 + $0x90] sm:$0xff] %vm8071_vm6, %v8037_v36  ;;  %v8056_v38 = vpop.f32.mrf.mxu1 }
 0x653   : > { %v7860_v18 = vpop.f32.mrf.mxu3 }
 0x654   : > { %v7861_v17 = vadd.f32 %v11126_v15, %v7860_v18 }
 0x655   : > { %v7949_v50 = vpop.f32.mrf.mxu0 }
 0x656   : > { %v7950_v56 = vadd.f32 %v7949_v50, %v7861_v17 }
 0x658   : > { %v8039_v28 = vadd.f32 %v8038_v48, %v7950_v56 }
 0x65a   : > { %8091 = vst.msk [vmem:[%s11140_s24 + $0x98] sm:$0xff] %vm8071_vm6, %v8039_v28  ;;  %v8058_v5 = vpop.f32.mrf.mxu1 }
 0x65b   : > { %v7863_v35 = vpop.f32.mrf.mxu3 }
 0x65c   : > { %v7864_v41 = vadd.f32 %v11126_v15, %v7863_v35 }
 0x65d   : > { %v7952_v0 = vpop.f32.mrf.mxu0 }
 0x65e   : > { %v7953_v47 = vadd.f32 %v7952_v0, %v7864_v41 }
 0x660   : > { %v8042_v29 = vadd.f32 %v8041_v53, %v7953_v47 }
 0x662   : > { %8092 = vst.msk [vmem:[%s11140_s24 + $0xa0] sm:$0xff] %vm8071_vm6, %v8042_v29  ;;  %v8061_v22 = vpop.f32.mrf.mxu1 }
 0x663   : > { %v7865_v61 = vpop.f32.mrf.mxu3 }
 0x664   : > { %v7866_v34 = vadd.f32 %v11126_v15, %v7865_v61 }
 0x665   : > { %v7954_v54 = vpop.f32.mrf.mxu0 }
 0x666   : > { %v7955_v26 = vadd.f32 %v7954_v54, %v7866_v34 }
 0x668   : > { %v8044_v37 = vadd.f32 %v8043_v10, %v7955_v26 }
 0x66a   : > { %8093 = vst.msk [vmem:[%s11140_s24 + $0xa8] sm:$0xff] %vm8071_vm6, %v8044_v37  ;;  %v8063_v25 = vpop.f32.mrf.mxu1 }
 0x66b   : > { %v7868_v60 = vpop.f32.mrf.mxu3 }
 0x66c   : > { %v7869_v32 = vadd.f32 %v11126_v15, %v7868_v60 }
 0x66d   : > { %v7957_v8 = vpop.f32.mrf.mxu0 }
 0x66e   : > { %v7958_v7 = vadd.f32 %v7957_v8, %v7869_v32 }
 0x670   : > { %v8047_v21 = vadd.f32 %v8046_v58, %v7958_v7 }
 0x672   : > { %8094 = vst.msk [vmem:[%s11140_s24 + $0xb0] sm:$0xff] %vm8071_vm6, %v8047_v21  ;;  %v8066_v10 = vpop.f32.mrf.mxu1 }
 0x673   : > { %v7870_v42 = vpop.f32.mrf.mxu3 }
 0x674   : > { %v7871_v44 = vadd.f32 %v11126_v15, %v7870_v42 }
 0x675   : > { %v7959_v27 = vpop.f32.mrf.mxu0 }
 0x676   : > { %v7960_v33 = vadd.f32 %v7959_v27, %v7871_v44 }
 0x678   : > { %v8049_v51 = vadd.f32 %v8048_v13, %v7960_v33 }
 0x67a   : > { %8095 = vst.msk [vmem:[%s11140_s24 + $0xb8] sm:$0xff] %vm8071_vm6, %v8049_v51  ;;  %v8068_v29 = vpop.f32.mrf.mxu1 }
 0x67b   : > { %v7873_v24 = vpop.f32.mrf.mxu3 }
 0x67c   : > { %v7874_v19 = vadd.f32 %v11126_v15, %v7873_v24 }
 0x67d   : > { %v7962_v3 = vpop.f32.mrf.mxu0 }
 0x67e   : > { %v7963_v4 = vadd.f32 %v7962_v3, %v7874_v19 }
 0x680   : > { %v8052_v40 = vadd.f32 %v8051_v39, %v7963_v4 }
 0x682   : > { %8096 = vst.msk [vmem:[%s11140_s24 + $0xc0] sm:$0xff] %vm8071_vm6, %v8052_v40 }
 0x683   : > { %v7875_v11 = vpop.f32.mrf.mxu3 }
 0x684   : > { %v7876_v46 = vadd.f32 %v11126_v15, %v7875_v11 }
 0x685   : > { %v7964_v6 = vpop.f32.mrf.mxu0 }
 0x686   : > { %v7965_v57 = vadd.f32 %v7964_v6, %v7876_v46 }
 0x688   : > { %v8054_v43 = vadd.f32 %v8053_v55, %v7965_v57 }
 0x68a   : > { %8097 = vst.msk [vmem:[%s11140_s24 + $0xc8] sm:$0xff] %vm8071_vm6, %v8054_v43 }
 0x68b   : > { %v7878_v30 = vpop.f32.mrf.mxu3 }
 0x68c   : > { %v7879_v52 = vadd.f32 %v11126_v15, %v7878_v30 }
 0x68d   : > { %v7967_v31 = vpop.f32.mrf.mxu0 }
 0x68e   : > { %v7968_v59 = vadd.f32 %v7967_v31, %v7879_v52 }
 0x690   : > { %v8057_v63 = vadd.f32 %v8056_v38, %v7968_v59 }
 0x692   : > { %8098 = vst.msk [vmem:[%s11140_s24 + $0xd0] sm:$0xff] %vm8071_vm6, %v8057_v63 }
 0x693   : > { %v7880_v2 = vpop.f32.mrf.mxu3 }
 0x694   : > { %v7881_v23 = vadd.f32 %v11126_v15, %v7880_v2 }
 0x695   : > { %v7969_v20 = vpop.f32.mrf.mxu0 }
 0x696   : > { %v7970_v49 = vadd.f32 %v7969_v20, %v7881_v23 }
 0x698   : > { %v8059_v48 = vadd.f32 %v8058_v5, %v7970_v49 }
 0x69a   : > { %8099 = vst.msk [vmem:[%s11140_s24 + $0xd8] sm:$0xff] %vm8071_vm6, %v8059_v48 }
 0x69b   : > { %v7883_v12 = vpop.f32.mrf.mxu3 }
 0x69c   : > { %v7884_v45 = vadd.f32 %v11126_v15, %v7883_v12 }
 0x69d   : > { %v7972_v9 = vpop.f32.mrf.mxu0 }
 0x69e   : > { %v7973_v1 = vadd.f32 %v7972_v9, %v7884_v45 }
 0x6a0   : > { %v8062_v62 = vadd.f32 %v8061_v22, %v7973_v1 }
 0x6a2   : > { %8100 = vst.msk [vmem:[%s11140_s24 + $0xe0] sm:$0xff] %vm8071_vm6, %v8062_v62 }
 0x6a3   : > { %v7885_v53 = vpop.f32.mrf.mxu3 }
 0x6a4   : > { %v7886_v16 = vadd.f32 %v11126_v15, %v7885_v53 }
 0x6a5   : > { %v7974_v14 = vpop.f32.mrf.mxu0 }
 0x6a6   : > { %v7975_v36 = vadd.f32 %v7974_v14, %v7886_v16 }
 0x6a8   : > { %v8064_v18 = vadd.f32 %v8063_v25, %v7975_v36 }
 0x6aa   : > { %8101 = vst.msk [vmem:[%s11140_s24 + $0xe8] sm:$0xff] %vm8071_vm6, %v8064_v18 }
 0x6ab   : > { %v7888_v17 = vpop.f32.mrf.mxu3 }
 0x6ac   : > { %v7889_v50 = vadd.f32 %v11126_v15, %v7888_v17 }
 0x6ad   : > { %v7977_v56 = vpop.f32.mrf.mxu0 }
 0x6ae   : > { %v7978_v28 = vadd.f32 %v7977_v56, %v7889_v50 }
 0x6b0   : > { %v8067_v35 = vadd.f32 %v8066_v10, %v7978_v28 }
 0x6b2   : > { %8102 = vst.msk [vmem:[%s11140_s24 + $0xf0] sm:$0xff] %vm8071_vm6, %v8067_v35 }
 0x6b3   : > { %v7890_v41 = vpop.f32.mrf.mxu3 }
 0x6b4   : > { %v7891_v0 = vadd.f32 %v11126_v15, %v7890_v41 }
 0x6b5   : > { %v7979_v47 = vpop.f32.mrf.mxu0 }
 0x6b6   : > { %v7980_v58 = vadd.f32 %v7979_v47, %v7891_v0 }
 0x6b8   : > { %v8069_v61 = vadd.f32 %v8068_v29, %v7980_v58 }
 0x6ba   : > { %8103 = vst.msk [vmem:[%s11140_s24 + $0xf8] sm:$0xff] %vm8071_vm6, %v8069_v61 }
 0x6bb PF: > { %s19_s30 = sadd.s32 1, %s8812_s30  }
 0x6bc   : > { %p16_p4 = scmp.ge.s32.totalorder %s19_s30, 4  }
 0x6be   :  { %18 = sbr.rel (!%p16_p4) target bundleno = 1 (0x1), region = 95 }

</bundles_post_ra>
